<compile_context>
chip_gen: v7x
topology: tpu7x:2x2x1
jax: 0.10.0
libtpu: 0.0.40
codegen_flags: <defaults>
</compile_context>

<pallas_src>
import math

import jax
import jax.numpy as jnp
from jax.experimental import pallas as pl
from jax.experimental.pallas import tpu as pltpu


def _round_up(a, b):
    return ((a + b - 1) // b) * b


# --------------------------------------------------------------------------
# Pallas kernels: matmul + (BN-folded) bias + PReLU, 1 or 2 stages, +residual
#   p_ref rows: 0 = folded bias, 1 = PReLU alpha (padded lanes: bias=0, alpha=1)
# --------------------------------------------------------------------------
def _k1(x_ref, w_ref, p_ref, o_ref):
    y = jnp.dot(x_ref[...], w_ref[...], preferred_element_type=jnp.float32)
    y = y + p_ref[0:1, :]
    o_ref[...] = jnp.where(y >= 0.0, y, p_ref[1:2, :] * y)


def _k1_res(x_ref, w_ref, p_ref, r_ref, o_ref):
    y = jnp.dot(x_ref[...], w_ref[...], preferred_element_type=jnp.float32)
    y = y + p_ref[0:1, :]
    o_ref[...] = jnp.where(y >= 0.0, y, p_ref[1:2, :] * y) + r_ref[...]


def _k2(x_ref, w1_ref, p1_ref, w2_ref, p2_ref, o_ref):
    h = jnp.dot(x_ref[...], w1_ref[...], preferred_element_type=jnp.float32)
    h = h + p1_ref[0:1, :]
    h = jnp.where(h >= 0.0, h, p1_ref[1:2, :] * h)
    y = jnp.dot(h.astype(jnp.bfloat16), w2_ref[...],
                preferred_element_type=jnp.float32)
    y = y + p2_ref[0:1, :]
    o_ref[...] = jnp.where(y >= 0.0, y, p2_ref[1:2, :] * y)


def _k2_res(x_ref, w1_ref, p1_ref, w2_ref, p2_ref, r_ref, o_ref):
    h = jnp.dot(x_ref[...], w1_ref[...], preferred_element_type=jnp.float32)
    h = h + p1_ref[0:1, :]
    h = jnp.where(h >= 0.0, h, p1_ref[1:2, :] * h)
    y = jnp.dot(h.astype(jnp.bfloat16), w2_ref[...],
                preferred_element_type=jnp.float32)
    y = y + p2_ref[0:1, :]
    o_ref[...] = jnp.where(y >= 0.0, y, p2_ref[1:2, :] * y) + r_ref[...]


_KERNELS = {(1, False): _k1, (1, True): _k1_res,
            (2, False): _k2, (2, True): _k2_res}


def fused_pallas(x, stages, res=None):
    """x: (M, K) f32/bf16.  stages: list (len 1 or 2) of {'w': (K, Np) bf16,
    'p': (8, Np) f32}.  res: optional (M, Ncols<=Nlast) f32 residual.
    Returns (M, Nlast) f32 (padded output columns included; caller slices)."""
    M, K = x.shape
    Nlast = stages[-1]['w'].shape[1]

    # Right-size M: single block for small M; 2-way parallel grid for big M
    # (keeps both v7x TensorCores busy; negligible overhead on v5e/v6e).
    if M > 256:
        tm = _round_up(-(-M // 2), 16)
    else:
        tm = _round_up(max(M, 8), 16)
    Mp = _round_up(M, tm)
    gm = Mp // tm

    x_p = jnp.pad(x.astype(jnp.bfloat16), ((0, Mp - M), (0, 0)))
    operands = [x_p]
    in_specs = [pl.BlockSpec((tm, K), lambda i: (i, 0))]
    for st in stages:
        operands += [st['w'], st['p']]
        in_specs += [pl.BlockSpec(st['w'].shape, lambda i: (0, 0)),
                     pl.BlockSpec(st['p'].shape, lambda i: (0, 0))]
    has_res = res is not None
    if has_res:
        r_p = jnp.pad(res.astype(jnp.float32),
                      ((0, Mp - M), (0, Nlast - res.shape[1])))
        operands.append(r_p)
        in_specs.append(pl.BlockSpec((tm, Nlast), lambda i: (i, 0)))

    out = pl.pallas_call(
        _KERNELS[(len(stages), has_res)],
        out_shape=jax.ShapeDtypeStruct((Mp, Nlast), jnp.float32),
        grid_spec=pltpu.PrefetchScalarGridSpec(
            num_scalar_prefetch=0,
            grid=(gm,),
            in_specs=in_specs,
            out_specs=pl.BlockSpec((tm, Nlast), lambda i: (i, 0)),
        ),
        compiler_params=pltpu.CompilerParams(
            dimension_semantics=("parallel",)),
    )(*operands)
    return out[:M]


# --------------------------------------------------------------------------
# im2col + layer wrappers (pure XLA glue around the fused kernel)
# --------------------------------------------------------------------------
def im2col(x, kh, kw, stride, pad):
    """x: (N,H,W,C) NHWC -> (N*Ho*Wo, kh*kw*C), row features ordered (i,j,c)."""
    if pad > 0:
        x = jnp.pad(x, ((0, 0), (pad, pad), (pad, pad), (0, 0)))
    n, h, w, c = x.shape
    ho = (h - kh) // stride + 1
    wo = (w - kw) // stride + 1
    patches = []
    for i in range(kh):
        for j in range(kw):
            patches.append(
                x[:, i:i + (ho - 1) * stride + 1:stride,
                     j:j + (wo - 1) * stride + 1:stride, :])
    cols = jnp.concatenate(patches, axis=-1)
    return cols.reshape(n * ho * wo, kh * kw * c), (n, ho, wo)


def conv_block(stages, x, k, stride=1, pad=0, cout=None, residual=False):
    x_bf = x.astype(jnp.bfloat16)          # glue (im2col) runs in bf16
    if k == 1 and stride == 1 and pad == 0:
        n, ho, wo, cin = x.shape
        cols = x_bf.reshape(n * ho * wo, cin)
    else:
        cols, (n, ho, wo) = im2col(x_bf, k, k, stride, pad)
    # residual stays f32 to preserve the trunk accumulation precision
    res = x.astype(jnp.float32).reshape(n * ho * wo, x.shape[-1]) \
        if residual else None
    out = fused_pallas(cols, stages, res=res)
    return out[:, :cout].reshape(n, ho, wo, cout)


def convT2_block(stages, x, cout):
    """ConvTranspose2d(kernel=2, stride=2): each input pixel emits a 2x2 block.
    Optionally fused with a following 1x1 (block-diagonal second stage)."""
    n, h, w, cin = x.shape
    out = fused_pallas(x.reshape(n * h * w, cin), stages)   # (M, >=4*cout)
    out = out[:, :4 * cout].reshape(n, h, w, 2, 2, cout)
    out = jnp.transpose(out, (0, 1, 3, 2, 4, 5)).reshape(n, 2 * h, 2 * w, cout)
    return out


# --------------------------------------------------------------------------
# Parameter construction: draw torch-init weights, fold BN, pre-transpose,
# pre-flip convT kernels, pad channels to 128, pack (bias, alpha) per stage.
# --------------------------------------------------------------------------
def make_params(channel_n, key):
    keys = iter(jax.random.split(key, 64))
    EPS = 1e-5

    def draw_conv(cout, cin, k):
        fan_in = cin * k * k
        bound = 1.0 / math.sqrt(fan_in)
        w = jax.random.uniform(next(keys), (cout, cin, k, k), jnp.float32,
                               -bound, bound)
        b = jax.random.uniform(next(keys), (cout,), jnp.float32, -bound, bound)
        return w, b

    def draw_convT(cin, cout, k):
        fan_in = cout * k * k
        bound = 1.0 / math.sqrt(fan_in)
        w = jax.random.uniform(next(keys), (cin, cout, k, k), jnp.float32,
                               -bound, bound)
        b = jax.random.uniform(next(keys), (cout,), jnp.float32, -bound, bound)
        return w, b

    def bn_fold(c):
        gamma = jnp.ones((c,), jnp.float32)
        beta = jnp.zeros((c,), jnp.float32)
        rm = jnp.zeros((c,), jnp.float32)
        rv = jnp.ones((c,), jnp.float32)
        scale = gamma / jnp.sqrt(rv + EPS)
        shift = beta - rm * scale
        return scale, shift

    def no_bn(c):
        return jnp.ones((c,), jnp.float32), jnp.zeros((c,), jnp.float32)

    def prelu(c):
        # TODO(synk): per-channel alpha; torch nn.PReLU(c) init is 0.25 per
        # channel — identical values at init.
        return jnp.full((c,), 0.25, jnp.float32)

    def no_act(c):
        return jnp.ones((c,), jnp.float32)   # PReLU with alpha=1 == identity

    def conv_mat(w_oihw):          # (O,I,kh,kw) -> (kh*kw*I, O), (i,j,c) rows
        o, i, kh, kw = w_oihw.shape
        return jnp.transpose(w_oihw, (2, 3, 1, 0)).reshape(kh * kw * i, o)

    def convT_mat_1x1(w):          # (I,O,1,1) -> (I,O)
        return w[:, :, 0, 0]

    def convT_mat_2x2(w):          # (I,O,2,2) -> (I, 4*O), columns (di,dj,o)
        return jnp.transpose(w, (0, 2, 3, 1)).reshape(w.shape[0],
                                                      4 * w.shape[1])

    def convT_mat_kxk(w):          # (I,O,k,k) -> conv-equiv (k*k*I, O)
        w_eff = jnp.transpose(w, (1, 0, 2, 3))[:, :, ::-1, ::-1]
        return conv_mat(w_eff)

    def block_diag(w_small, reps):  # (K,N) -> (reps*K, reps*N) block-diagonal
        K, N = w_small.shape
        out = jnp.zeros((reps * K, reps * N), w_small.dtype)
        for r in range(reps):
            out = out.at[r * K:(r + 1) * K, r * N:(r + 1) * N].set(w_small)
        return out

    def pack_stage(w_mat, bias, scale, shift, alpha, kpad=None):
        """Fold BN into (w, b), pad K/N, pack (bias, alpha) into one operand."""
        K, N = w_mat.shape
        Kp = K if kpad is None else kpad
        Np = _round_up(N, 128)
        wf = w_mat * scale[None, :]
        bf = bias * scale + shift
        w_p = jnp.zeros((Kp, Np), jnp.float32).at[:K, :N].set(wf)
        w_p = w_p.astype(jnp.bfloat16)
        pv = jnp.zeros((8, Np), jnp.float32)
        pv = pv.at[0, :N].set(bf)
        pv = pv.at[1, :].set(1.0)
        pv = pv.at[1, :N].set(alpha)
        return dict(w=w_p, p=pv)

    P = {}

    # b1: Conv5x5(channel_n->32)+BN+PReLU  ->  Conv1x1(32->32)+BN+PReLU
    w, b = draw_conv(32, channel_n, 5)
    s1 = pack_stage(conv_mat(w), b, *bn_fold(32), prelu(32))
    w, b = draw_conv(32, 32, 1)
    s2 = pack_stage(conv_mat(w), b, *bn_fold(32), prelu(32),
                    kpad=s1['w'].shape[1])
    P['b1'] = [s1, s2]

    # b2: Conv2x2 s2 (32->64)+BN+PReLU -> Conv1x1 (64->64)+BN+PReLU
    w, b = draw_conv(64, 32, 2)
    s1 = pack_stage(conv_mat(w), b, *bn_fold(64), prelu(64))
    w, b = draw_conv(64, 64, 1)
    s2 = pack_stage(conv_mat(w), b, *bn_fold(64), prelu(64),
                    kpad=s1['w'].shape[1])
    P['b2'] = [s1, s2]

    # b3: Conv2x2 s2 (64->256)+BN+PReLU -> Conv1x1 (256->256)+BN+PReLU
    w, b = draw_conv(256, 64, 2)
    s1 = pack_stage(conv_mat(w), b, *bn_fold(256), prelu(256))
    w, b = draw_conv(256, 256, 1)
    s2 = pack_stage(conv_mat(w), b, *bn_fold(256), prelu(256),
                    kpad=s1['w'].shape[1])
    P['b3'] = [s1, s2]

    # b4 / b6: Conv3x3 pad1 (bias only) -> Conv1x1+BN+PReLU   (+ residual)
    for name in ('b4', 'b6'):
        w, b = draw_conv(256, 256, 3)
        s1 = pack_stage(conv_mat(w), b, *no_bn(256), no_act(256))
        w, b = draw_conv(256, 256, 1)
        s2 = pack_stage(conv_mat(w), b, *bn_fold(256), prelu(256),
                        kpad=s1['w'].shape[1])
        P[name] = [s1, s2]

    # b5 / b7: Conv3x3 pad1 +BN+PReLU   (+ residual)
    for name in ('b5', 'b7'):
        w, b = draw_conv(256, 256, 3)
        P[name] = [pack_stage(conv_mat(w), b, *bn_fold(256), prelu(256))]

    # b8: ConvTranspose2d 2x2 s2 (256->128)+BN+PReLU
    w, b = draw_convT(256, 128, 2)
    sc, sh = bn_fold(128)
    P['b8'] = [pack_stage(convT_mat_2x2(w), jnp.tile(b, 4), jnp.tile(sc, 4),
                          jnp.tile(sh, 4), jnp.tile(prelu(128), 4))]

    # b9: ConvTranspose2d 2x2 s2 (128->64)+BN+PReLU  fused with
    # b9_1: ConvTranspose2d 1x1 (64->64)+BN+PReLU via a block-diagonal
    #       second-stage weight over the 4 emitted positions (di,dj).
    w, b = draw_convT(128, 64, 2)
    sc, sh = bn_fold(64)
    s1 = pack_stage(convT_mat_2x2(w), jnp.tile(b, 4), jnp.tile(sc, 4),
                    jnp.tile(sh, 4), jnp.tile(prelu(64), 4))
    w, b = draw_convT(64, 64, 1)
    sc, sh = bn_fold(64)
    s2 = pack_stage(block_diag(convT_mat_1x1(w), 4),
                    jnp.tile(b, 4), jnp.tile(sc, 4), jnp.tile(sh, 4),
                    jnp.tile(prelu(64), 4), kpad=s1['w'].shape[1])
    P['b9'] = [s1, s2]

    # b10: ConvT 5x5 (64->32)+BN+PReLU (== conv5x5 pad4, flipped) -> ConvT1x1
    w, b = draw_convT(64, 32, 5)
    s1 = pack_stage(convT_mat_kxk(w), b, *bn_fold(32), prelu(32))
    w, b = draw_convT(32, 32, 1)
    s2 = pack_stage(convT_mat_1x1(w), b, *bn_fold(32), prelu(32),
                    kpad=s1['w'].shape[1])
    P['b10'] = [s1, s2]

    # b11: Conv3x3 pad1 (32->12)+BN+PReLU -> Conv1x1 (12->3)+BN+PReLU
    w, b = draw_conv(12, 32, 3)
    s1 = pack_stage(conv_mat(w), b, *bn_fold(12), prelu(12))
    w, b = draw_conv(3, 12, 1)
    s2 = pack_stage(conv_mat(w), b, *bn_fold(3), prelu(3),
                    kpad=s1['w'].shape[1])
    P['b11'] = [s1, s2]

    return P


# --------------------------------------------------------------------------
# Forward pass (matches ConvNet_2.forward)
# --------------------------------------------------------------------------
def forward(params, x_nchw, noise_key):
    x = jnp.transpose(x_nchw, (0, 2, 3, 1)).astype(jnp.float32)   # -> NHWC
    n, h, w, c = x.shape

    # add_noise: N(0, 0.005) on channel 0 only, relu(noise + 0.01) - 0.01
    noise = jax.random.normal(noise_key, (n, h, w, 1), jnp.float32) * 0.005
    noise = jax.nn.relu(noise + 0.01) - 0.01
    x = x + jnp.concatenate(
        [noise, jnp.zeros((n, h, w, c - 1), jnp.float32)], axis=-1)

    x = conv_block(params['b1'], x, k=5, cout=32)                 # l1 + l1_1
    x = conv_block(params['b2'], x, k=2, stride=2, cout=64)       # l2 + l2_1
    x = conv_block(params['b3'], x, k=2, stride=2, cout=256)      # l3 + l3_1
    x = conv_block(params['b4'], x, k=3, pad=1, cout=256, residual=True)
    x = conv_block(params['b5'], x, k=3, pad=1, cout=256, residual=True)
    x = conv_block(params['b6'], x, k=3, pad=1, cout=256, residual=True)
    x = conv_block(params['b7'], x, k=3, pad=1, cout=256, residual=True)
    x = convT2_block(params['b8'], x, cout=128)                   # up 2x
    x = convT2_block(params['b9'], x, cout=64)                    # up 2x + l9_1
    x = conv_block(params['b10'], x, k=5, pad=4, cout=32)         # l10 + l10_1
    x = conv_block(params['b11'], x, k=3, pad=1, cout=3)          # l11 + l12
    return jnp.transpose(x, (0, 3, 1, 2))                         # -> NCHW


if __name__ == "__main__":
    channel_n = 4
    key = jax.random.PRNGKey(0)
    pkey, xkey, nkey = jax.random.split(key, 3)

    params = make_params(channel_n, pkey)
    # input NCHW, spatial 16:  16 -(5x5)-> 12 -(s2)-> 6 -(s2)-> 3 -> ... -> 16
    x = jax.random.normal(xkey, (2, channel_n, 16, 16), jnp.float32)

    fwd = jax.jit(forward)
    out = fwd(params, x, nkey)
    out = jax.block_until_ready(out)
    assert out.shape == (2, 3, 16, 16), out.shape
    assert jnp.all(jnp.isfinite(out))
    print("KERNEL_OK")
</pallas_src>

<mosaic_0001>
module attributes {stable_mosaic.version = 11 : i64} {
  func.func @_k2(%arg0: i32, %arg1: memref<144x100xbf16, #tpu.memory_space<vmem>>, %arg2: memref<100x128xbf16, #tpu.memory_space<vmem>>, %arg3: memref<8x128xf32, #tpu.memory_space<vmem>>, %arg4: memref<128x128xbf16, #tpu.memory_space<vmem>>, %arg5: memref<8x128xf32, #tpu.memory_space<vmem>>, %arg6: memref<144x128xf32, #tpu.memory_space<vmem>>) attributes {dimension_semantics = [#tpu.dimension_semantics<parallel>], iteration_bounds = array<i64: 2>, scalar_prefetch = 0 : i64, scratch_operands = 0 : i64, tpu.core_type = #tpu.core_type<tc>, window_params = [{transform_indices = @transform_0, window_bounds = array<i64: 144, 100>}, {pipeline_mode = #tpu.pipeline_mode<synchronous>, transform_indices = @transform_1, window_bounds = array<i64: 100, 128>}, {pipeline_mode = #tpu.pipeline_mode<synchronous>, transform_indices = @transform_2, window_bounds = array<i64: 8, 128>}, {pipeline_mode = #tpu.pipeline_mode<synchronous>, transform_indices = @transform_3, window_bounds = array<i64: 128, 128>}, {pipeline_mode = #tpu.pipeline_mode<synchronous>, transform_indices = @transform_4, window_bounds = array<i64: 8, 128>}, {transform_indices = @transform_5, window_bounds = array<i64: 144, 128>}]} {
    %c0 = arith.constant 0 : index
    %c0_0 = arith.constant 0 : index
    %0 = vector.load %arg1[%c0, %c0_0] : memref<144x100xbf16, #tpu.memory_space<vmem>>, vector<144x100xbf16>
    %c0_1 = arith.constant 0 : index
    %c0_2 = arith.constant 0 : index
    %1 = vector.load %arg2[%c0_1, %c0_2] : memref<100x128xbf16, #tpu.memory_space<vmem>>, vector<100x128xbf16>
    %cst = arith.constant dense<0.000000e+00> : vector<144x128xf32>
    %2 = tpu.matmul %0, %1, %cst {dimension_numbers = #tpu.dot_dimension_numbers<[1], [0], [0], [1], [0, 0, 1, 1], [], []>} : vector<144x100xbf16>, vector<100x128xbf16>, vector<144x128xf32> -> vector<144x128xf32>
    %c0_3 = arith.constant 0 : index
    %c0_4 = arith.constant 0 : index
    %3 = vector.load %arg3[%c0_3, %c0_4] : memref<8x128xf32, #tpu.memory_space<vmem>>, vector<1x128xf32>
    %4 = vector.broadcast %3 : vector<1x128xf32> to vector<144x128xf32>
    %5 = arith.addf %2, %4 : vector<144x128xf32>
    %cst_5 = arith.constant 0.000000e+00 : f32
    %6 = vector.broadcast %cst_5 : f32 to vector<144x128xf32>
    %7 = arith.cmpf oge, %5, %6 : vector<144x128xf32>
    %c1 = arith.constant 1 : index
    %c0_6 = arith.constant 0 : index
    %8 = vector.load %arg3[%c1, %c0_6] : memref<8x128xf32, #tpu.memory_space<vmem>>, vector<1x128xf32>
    %9 = vector.broadcast %8 : vector<1x128xf32> to vector<144x128xf32>
    %10 = arith.mulf %9, %5 : vector<144x128xf32>
    %11 = arith.select %7, %5, %10 : vector<144x128xi1>, vector<144x128xf32>
    %12 = arith.truncf %11 : vector<144x128xf32> to vector<144x128xbf16>
    %c0_7 = arith.constant 0 : index
    %c0_8 = arith.constant 0 : index
    %13 = vector.load %arg4[%c0_7, %c0_8] : memref<128x128xbf16, #tpu.memory_space<vmem>>, vector<128x128xbf16>
    %cst_9 = arith.constant dense<0.000000e+00> : vector<144x128xf32>
    %14 = tpu.matmul %12, %13, %cst_9 {dimension_numbers = #tpu.dot_dimension_numbers<[1], [0], [0], [1], [0, 0, 1, 1], [], []>} : vector<144x128xbf16>, vector<128x128xbf16>, vector<144x128xf32> -> vector<144x128xf32>
    %c0_10 = arith.constant 0 : index
    %c0_11 = arith.constant 0 : index
    %15 = vector.load %arg5[%c0_10, %c0_11] : memref<8x128xf32, #tpu.memory_space<vmem>>, vector<1x128xf32>
    %16 = vector.broadcast %15 : vector<1x128xf32> to vector<144x128xf32>
    %17 = arith.addf %14, %16 : vector<144x128xf32>
    %cst_12 = arith.constant 0.000000e+00 : f32
    %18 = vector.broadcast %cst_12 : f32 to vector<144x128xf32>
    %19 = arith.cmpf oge, %17, %18 : vector<144x128xf32>
    %c1_13 = arith.constant 1 : index
    %c0_14 = arith.constant 0 : index
    %20 = vector.load %arg5[%c1_13, %c0_14] : memref<8x128xf32, #tpu.memory_space<vmem>>, vector<1x128xf32>
    %21 = vector.broadcast %20 : vector<1x128xf32> to vector<144x128xf32>
    %22 = arith.mulf %21, %17 : vector<144x128xf32>
    %23 = arith.select %19, %17, %22 : vector<144x128xi1>, vector<144x128xf32>
    %c0_15 = arith.constant 0 : index
    %c0_16 = arith.constant 0 : index
    %24 = vector.load %arg6[%c0_15, %c0_16] : memref<144x128xf32, #tpu.memory_space<vmem>>, vector<144x128xf32>
    tpu.vector_store %arg6[%c0_15, %c0_16], %23 {strides = array<i32>} : memref<144x128xf32, #tpu.memory_space<vmem>>, vector<144x128xf32>,
    return
  }
  func.func @transform_0(%arg0: i32) -> (i32, i32) {
    %c0_i32 = arith.constant 0 : i32
    %c0_i32_0 = arith.constant 0 : i32
    return %arg0, %c0_i32 : i32, i32
  }
  func.func @transform_1(%arg0: i32) -> (i32, i32) {
    %c0_i32 = arith.constant 0 : i32
    %c0_i32_0 = arith.constant 0 : i32
    %c0_i32_1 = arith.constant 0 : i32
    return %c0_i32, %c0_i32_0 : i32, i32
  }
  func.func @transform_2(%arg0: i32) -> (i32, i32) {
    %c0_i32 = arith.constant 0 : i32
    %c0_i32_0 = arith.constant 0 : i32
    %c0_i32_1 = arith.constant 0 : i32
    return %c0_i32, %c0_i32_0 : i32, i32
  }
  func.func @transform_3(%arg0: i32) -> (i32, i32) {
    %c0_i32 = arith.constant 0 : i32
    %c0_i32_0 = arith.constant 0 : i32
    %c0_i32_1 = arith.constant 0 : i32
    return %c0_i32, %c0_i32_0 : i32, i32
  }
  func.func @transform_4(%arg0: i32) -> (i32, i32) {
    %c0_i32 = arith.constant 0 : i32
    %c0_i32_0 = arith.constant 0 : i32
    %c0_i32_1 = arith.constant 0 : i32
    return %c0_i32, %c0_i32_0 : i32, i32
  }
  func.func @transform_5(%arg0: i32) -> (i32, i32) {
    %c0_i32 = arith.constant 0 : i32
    %c0_i32_0 = arith.constant 0 : i32
    return %arg0, %c0_i32 : i32, i32
  }
}

module attributes {stable_mosaic.version = 11 : i64} {
  func.func @_k2(%arg0: i32, %arg1: memref<80x128xbf16, #tpu.memory_space<vmem>>, %arg2: memref<128x128xbf16, #tpu.memory_space<vmem>>, %arg3: memref<8x128xf32, #tpu.memory_space<vmem>>, %arg4: memref<128x128xbf16, #tpu.memory_space<vmem>>, %arg5: memref<8x128xf32, #tpu.memory_space<vmem>>, %arg6: memref<80x128xf32, #tpu.memory_space<vmem>>) attributes {dimension_semantics = [#tpu.dimension_semantics<parallel>], iteration_bounds = array<i64: 1>, scalar_prefetch = 0 : i64, scratch_operands = 0 : i64, tpu.core_type = #tpu.core_type<tc>, window_params = [{transform_indices = @transform_0, window_bounds = array<i64: 80, 128>}, {pipeline_mode = #tpu.pipeline_mode<synchronous>, transform_indices = @transform_1, window_bounds = array<i64: 128, 128>}, {pipeline_mode = #tpu.pipeline_mode<synchronous>, transform_indices = @transform_2, window_bounds = array<i64: 8, 128>}, {pipeline_mode = #tpu.pipeline_mode<synchronous>, transform_indices = @transform_3, window_bounds = array<i64: 128, 128>}, {pipeline_mode = #tpu.pipeline_mode<synchronous>, transform_indices = @transform_4, window_bounds = array<i64: 8, 128>}, {transform_indices = @transform_5, window_bounds = array<i64: 80, 128>}]} {
    %c0 = arith.constant 0 : index
    %c0_0 = arith.constant 0 : index
    %0 = vector.load %arg1[%c0, %c0_0] : memref<80x128xbf16, #tpu.memory_space<vmem>>, vector<80x128xbf16>
    %c0_1 = arith.constant 0 : index
    %c0_2 = arith.constant 0 : index
    %1 = vector.load %arg2[%c0_1, %c0_2] : memref<128x128xbf16, #tpu.memory_space<vmem>>, vector<128x128xbf16>
    %cst = arith.constant dense<0.000000e+00> : vector<80x128xf32>
    %2 = tpu.matmul %0, %1, %cst {dimension_numbers = #tpu.dot_dimension_numbers<[1], [0], [0], [1], [0, 0, 1, 1], [], []>} : vector<80x128xbf16>, vector<128x128xbf16>, vector<80x128xf32> -> vector<80x128xf32>
    %c0_3 = arith.constant 0 : index
    %c0_4 = arith.constant 0 : index
    %3 = vector.load %arg3[%c0_3, %c0_4] : memref<8x128xf32, #tpu.memory_space<vmem>>, vector<1x128xf32>
    %4 = vector.broadcast %3 : vector<1x128xf32> to vector<80x128xf32>
    %5 = arith.addf %2, %4 : vector<80x128xf32>
    %cst_5 = arith.constant 0.000000e+00 : f32
    %6 = vector.broadcast %cst_5 : f32 to vector<80x128xf32>
    %7 = arith.cmpf oge, %5, %6 : vector<80x128xf32>
    %c1 = arith.constant 1 : index
    %c0_6 = arith.constant 0 : index
    %8 = vector.load %arg3[%c1, %c0_6] : memref<8x128xf32, #tpu.memory_space<vmem>>, vector<1x128xf32>
    %9 = vector.broadcast %8 : vector<1x128xf32> to vector<80x128xf32>
    %10 = arith.mulf %9, %5 : vector<80x128xf32>
    %11 = arith.select %7, %5, %10 : vector<80x128xi1>, vector<80x128xf32>
    %12 = arith.truncf %11 : vector<80x128xf32> to vector<80x128xbf16>
    %c0_7 = arith.constant 0 : index
    %c0_8 = arith.constant 0 : index
    %13 = vector.load %arg4[%c0_7, %c0_8] : memref<128x128xbf16, #tpu.memory_space<vmem>>, vector<128x128xbf16>
    %cst_9 = arith.constant dense<0.000000e+00> : vector<80x128xf32>
    %14 = tpu.matmul %12, %13, %cst_9 {dimension_numbers = #tpu.dot_dimension_numbers<[1], [0], [0], [1], [0, 0, 1, 1], [], []>} : vector<80x128xbf16>, vector<128x128xbf16>, vector<80x128xf32> -> vector<80x128xf32>
    %c0_10 = arith.constant 0 : index
    %c0_11 = arith.constant 0 : index
    %15 = vector.load %arg5[%c0_10, %c0_11] : memref<8x128xf32, #tpu.memory_space<vmem>>, vector<1x128xf32>
    %16 = vector.broadcast %15 : vector<1x128xf32> to vector<80x128xf32>
    %17 = arith.addf %14, %16 : vector<80x128xf32>
    %cst_12 = arith.constant 0.000000e+00 : f32
    %18 = vector.broadcast %cst_12 : f32 to vector<80x128xf32>
    %19 = arith.cmpf oge, %17, %18 : vector<80x128xf32>
    %c1_13 = arith.constant 1 : index
    %c0_14 = arith.constant 0 : index
    %20 = vector.load %arg5[%c1_13, %c0_14] : memref<8x128xf32, #tpu.memory_space<vmem>>, vector<1x128xf32>
    %21 = vector.broadcast %20 : vector<1x128xf32> to vector<80x128xf32>
    %22 = arith.mulf %21, %17 : vector<80x128xf32>
    %23 = arith.select %19, %17, %22 : vector<80x128xi1>, vector<80x128xf32>
    %c0_15 = arith.constant 0 : index
    %c0_16 = arith.constant 0 : index
    %24 = vector.load %arg6[%c0_15, %c0_16] : memref<80x128xf32, #tpu.memory_space<vmem>>, vector<80x128xf32>
    tpu.vector_store %arg6[%c0_15, %c0_16], %23 {strides = array<i32>} : memref<80x128xf32, #tpu.memory_space<vmem>>, vector<80x128xf32>,
    return
  }
  func.func @transform_0(%arg0: i32) -> (i32, i32) {
    %c0_i32 = arith.constant 0 : i32
    %c0_i32_0 = arith.constant 0 : i32
    return %arg0, %c0_i32 : i32, i32
  }
  func.func @transform_1(%arg0: i32) -> (i32, i32) {
    %c0_i32 = arith.constant 0 : i32
    %c0_i32_0 = arith.constant 0 : i32
    %c0_i32_1 = arith.constant 0 : i32
    return %c0_i32, %c0_i32_0 : i32, i32
  }
  func.func @transform_2(%arg0: i32) -> (i32, i32) {
    %c0_i32 = arith.constant 0 : i32
    %c0_i32_0 = arith.constant 0 : i32
    %c0_i32_1 = arith.constant 0 : i32
    return %c0_i32, %c0_i32_0 : i32, i32
  }
  func.func @transform_3(%arg0: i32) -> (i32, i32) {
    %c0_i32 = arith.constant 0 : i32
    %c0_i32_0 = arith.constant 0 : i32
    %c0_i32_1 = arith.constant 0 : i32
    return %c0_i32, %c0_i32_0 : i32, i32
  }
  func.func @transform_4(%arg0: i32) -> (i32, i32) {
    %c0_i32 = arith.constant 0 : i32
    %c0_i32_0 = arith.constant 0 : i32
    %c0_i32_1 = arith.constant 0 : i32
    return %c0_i32, %c0_i32_0 : i32, i32
  }
  func.func @transform_5(%arg0: i32) -> (i32, i32) {
    %c0_i32 = arith.constant 0 : i32
    %c0_i32_0 = arith.constant 0 : i32
    return %arg0, %c0_i32 : i32, i32
  }
}

module attributes {stable_mosaic.version = 11 : i64} {
  func.func @_k2(%arg0: i32, %arg1: memref<32x256xbf16, #tpu.memory_space<vmem>>, %arg2: memref<256x256xbf16, #tpu.memory_space<vmem>>, %arg3: memref<8x256xf32, #tpu.memory_space<vmem>>, %arg4: memref<256x256xbf16, #tpu.memory_space<vmem>>, %arg5: memref<8x256xf32, #tpu.memory_space<vmem>>, %arg6: memref<32x256xf32, #tpu.memory_space<vmem>>) attributes {dimension_semantics = [#tpu.dimension_semantics<parallel>], iteration_bounds = array<i64: 1>, scalar_prefetch = 0 : i64, scratch_operands = 0 : i64, tpu.core_type = #tpu.core_type<tc>, window_params = [{transform_indices = @transform_0, window_bounds = array<i64: 32, 256>}, {pipeline_mode = #tpu.pipeline_mode<synchronous>, transform_indices = @transform_1, window_bounds = array<i64: 256, 256>}, {pipeline_mode = #tpu.pipeline_mode<synchronous>, transform_indices = @transform_2, window_bounds = array<i64: 8, 256>}, {pipeline_mode = #tpu.pipeline_mode<synchronous>, transform_indices = @transform_3, window_bounds = array<i64: 256, 256>}, {pipeline_mode = #tpu.pipeline_mode<synchronous>, transform_indices = @transform_4, window_bounds = array<i64: 8, 256>}, {transform_indices = @transform_5, window_bounds = array<i64: 32, 256>}]} {
    %c0 = arith.constant 0 : index
    %c0_0 = arith.constant 0 : index
    %0 = vector.load %arg1[%c0, %c0_0] : memref<32x256xbf16, #tpu.memory_space<vmem>>, vector<32x256xbf16>
    %c0_1 = arith.constant 0 : index
    %c0_2 = arith.constant 0 : index
    %1 = vector.load %arg2[%c0_1, %c0_2] : memref<256x256xbf16, #tpu.memory_space<vmem>>, vector<256x256xbf16>
    %cst = arith.constant dense<0.000000e+00> : vector<32x256xf32>
    %2 = tpu.matmul %0, %1, %cst {dimension_numbers = #tpu.dot_dimension_numbers<[1], [0], [0], [1], [0, 0, 1, 1], [], []>} : vector<32x256xbf16>, vector<256x256xbf16>, vector<32x256xf32> -> vector<32x256xf32>
    %c0_3 = arith.constant 0 : index
    %c0_4 = arith.constant 0 : index
    %3 = vector.load %arg3[%c0_3, %c0_4] : memref<8x256xf32, #tpu.memory_space<vmem>>, vector<1x256xf32>
    %4 = vector.broadcast %3 : vector<1x256xf32> to vector<32x256xf32>
    %5 = arith.addf %2, %4 : vector<32x256xf32>
    %cst_5 = arith.constant 0.000000e+00 : f32
    %6 = vector.broadcast %cst_5 : f32 to vector<32x256xf32>
    %7 = arith.cmpf oge, %5, %6 : vector<32x256xf32>
    %c1 = arith.constant 1 : index
    %c0_6 = arith.constant 0 : index
    %8 = vector.load %arg3[%c1, %c0_6] : memref<8x256xf32, #tpu.memory_space<vmem>>, vector<1x256xf32>
    %9 = vector.broadcast %8 : vector<1x256xf32> to vector<32x256xf32>
    %10 = arith.mulf %9, %5 : vector<32x256xf32>
    %11 = arith.select %7, %5, %10 : vector<32x256xi1>, vector<32x256xf32>
    %12 = arith.truncf %11 : vector<32x256xf32> to vector<32x256xbf16>
    %c0_7 = arith.constant 0 : index
    %c0_8 = arith.constant 0 : index
    %13 = vector.load %arg4[%c0_7, %c0_8] : memref<256x256xbf16, #tpu.memory_space<vmem>>, vector<256x256xbf16>
    %cst_9 = arith.constant dense<0.000000e+00> : vector<32x256xf32>
    %14 = tpu.matmul %12, %13, %cst_9 {dimension_numbers = #tpu.dot_dimension_numbers<[1], [0], [0], [1], [0, 0, 1, 1], [], []>} : vector<32x256xbf16>, vector<256x256xbf16>, vector<32x256xf32> -> vector<32x256xf32>
    %c0_10 = arith.constant 0 : index
    %c0_11 = arith.constant 0 : index
    %15 = vector.load %arg5[%c0_10, %c0_11] : memref<8x256xf32, #tpu.memory_space<vmem>>, vector<1x256xf32>
    %16 = vector.broadcast %15 : vector<1x256xf32> to vector<32x256xf32>
    %17 = arith.addf %14, %16 : vector<32x256xf32>
    %cst_12 = arith.constant 0.000000e+00 : f32
    %18 = vector.broadcast %cst_12 : f32 to vector<32x256xf32>
    %19 = arith.cmpf oge, %17, %18 : vector<32x256xf32>
    %c1_13 = arith.constant 1 : index
    %c0_14 = arith.constant 0 : index
    %20 = vector.load %arg5[%c1_13, %c0_14] : memref<8x256xf32, #tpu.memory_space<vmem>>, vector<1x256xf32>
    %21 = vector.broadcast %20 : vector<1x256xf32> to vector<32x256xf32>
    %22 = arith.mulf %21, %17 : vector<32x256xf32>
    %23 = arith.select %19, %17, %22 : vector<32x256xi1>, vector<32x256xf32>
    %c0_15 = arith.constant 0 : index
    %c0_16 = arith.constant 0 : index
    %24 = vector.load %arg6[%c0_15, %c0_16] : memref<32x256xf32, #tpu.memory_space<vmem>>, vector<32x256xf32>
    tpu.vector_store %arg6[%c0_15, %c0_16], %23 {strides = array<i32>} : memref<32x256xf32, #tpu.memory_space<vmem>>, vector<32x256xf32>,
    return
  }
  func.func @transform_0(%arg0: i32) -> (i32, i32) {
    %c0_i32 = arith.constant 0 : i32
    %c0_i32_0 = arith.constant 0 : i32
    return %arg0, %c0_i32 : i32, i32
  }
  func.func @transform_1(%arg0: i32) -> (i32, i32) {
    %c0_i32 = arith.constant 0 : i32
    %c0_i32_0 = arith.constant 0 : i32
    %c0_i32_1 = arith.constant 0 : i32
    return %c0_i32, %c0_i32_0 : i32, i32
  }
  func.func @transform_2(%arg0: i32) -> (i32, i32) {
    %c0_i32 = arith.constant 0 : i32
    %c0_i32_0 = arith.constant 0 : i32
    %c0_i32_1 = arith.constant 0 : i32
    return %c0_i32, %c0_i32_0 : i32, i32
  }
  func.func @transform_3(%arg0: i32) -> (i32, i32) {
    %c0_i32 = arith.constant 0 : i32
    %c0_i32_0 = arith.constant 0 : i32
    %c0_i32_1 = arith.constant 0 : i32
    return %c0_i32, %c0_i32_0 : i32, i32
  }
  func.func @transform_4(%arg0: i32) -> (i32, i32) {
    %c0_i32 = arith.constant 0 : i32
    %c0_i32_0 = arith.constant 0 : i32
    %c0_i32_1 = arith.constant 0 : i32
    return %c0_i32, %c0_i32_0 : i32, i32
  }
  func.func @transform_5(%arg0: i32) -> (i32, i32) {
    %c0_i32 = arith.constant 0 : i32
    %c0_i32_0 = arith.constant 0 : i32
    return %arg0, %c0_i32 : i32, i32
  }
}

module attributes {stable_mosaic.version = 11 : i64} {
  func.func @_k2_res(%arg0: i32, %arg1: memref<32x2304xbf16, #tpu.memory_space<vmem>>, %arg2: memref<2304x256xbf16, #tpu.memory_space<vmem>>, %arg3: memref<8x256xf32, #tpu.memory_space<vmem>>, %arg4: memref<256x256xbf16, #tpu.memory_space<vmem>>, %arg5: memref<8x256xf32, #tpu.memory_space<vmem>>, %arg6: memref<32x256xf32, #tpu.memory_space<vmem>>, %arg7: memref<32x256xf32, #tpu.memory_space<vmem>>) attributes {dimension_semantics = [#tpu.dimension_semantics<parallel>], iteration_bounds = array<i64: 1>, scalar_prefetch = 0 : i64, scratch_operands = 0 : i64, tpu.core_type = #tpu.core_type<tc>, window_params = [{transform_indices = @transform_0, window_bounds = array<i64: 32, 2304>}, {pipeline_mode = #tpu.pipeline_mode<synchronous>, transform_indices = @transform_1, window_bounds = array<i64: 2304, 256>}, {pipeline_mode = #tpu.pipeline_mode<synchronous>, transform_indices = @transform_2, window_bounds = array<i64: 8, 256>}, {pipeline_mode = #tpu.pipeline_mode<synchronous>, transform_indices = @transform_3, window_bounds = array<i64: 256, 256>}, {pipeline_mode = #tpu.pipeline_mode<synchronous>, transform_indices = @transform_4, window_bounds = array<i64: 8, 256>}, {transform_indices = @transform_5, window_bounds = array<i64: 32, 256>}, {transform_indices = @transform_6, window_bounds = array<i64: 32, 256>}]} {
    %c0 = arith.constant 0 : index
    %c0_0 = arith.constant 0 : index
    %0 = vector.load %arg1[%c0, %c0_0] : memref<32x2304xbf16, #tpu.memory_space<vmem>>, vector<32x2304xbf16>
    %c0_1 = arith.constant 0 : index
    %c0_2 = arith.constant 0 : index
    %1 = vector.load %arg2[%c0_1, %c0_2] : memref<2304x256xbf16, #tpu.memory_space<vmem>>, vector<2304x256xbf16>
    %cst = arith.constant dense<0.000000e+00> : vector<32x256xf32>
    %2 = tpu.matmul %0, %1, %cst {dimension_numbers = #tpu.dot_dimension_numbers<[1], [0], [0], [1], [0, 0, 1, 1], [], []>} : vector<32x2304xbf16>, vector<2304x256xbf16>, vector<32x256xf32> -> vector<32x256xf32>
    %c0_3 = arith.constant 0 : index
    %c0_4 = arith.constant 0 : index
    %3 = vector.load %arg3[%c0_3, %c0_4] : memref<8x256xf32, #tpu.memory_space<vmem>>, vector<1x256xf32>
    %4 = vector.broadcast %3 : vector<1x256xf32> to vector<32x256xf32>
    %5 = arith.addf %2, %4 : vector<32x256xf32>
    %cst_5 = arith.constant 0.000000e+00 : f32
    %6 = vector.broadcast %cst_5 : f32 to vector<32x256xf32>
    %7 = arith.cmpf oge, %5, %6 : vector<32x256xf32>
    %c1 = arith.constant 1 : index
    %c0_6 = arith.constant 0 : index
    %8 = vector.load %arg3[%c1, %c0_6] : memref<8x256xf32, #tpu.memory_space<vmem>>, vector<1x256xf32>
    %9 = vector.broadcast %8 : vector<1x256xf32> to vector<32x256xf32>
    %10 = arith.mulf %9, %5 : vector<32x256xf32>
    %11 = arith.select %7, %5, %10 : vector<32x256xi1>, vector<32x256xf32>
    %12 = arith.truncf %11 : vector<32x256xf32> to vector<32x256xbf16>
    %c0_7 = arith.constant 0 : index
    %c0_8 = arith.constant 0 : index
    %13 = vector.load %arg4[%c0_7, %c0_8] : memref<256x256xbf16, #tpu.memory_space<vmem>>, vector<256x256xbf16>
    %cst_9 = arith.constant dense<0.000000e+00> : vector<32x256xf32>
    %14 = tpu.matmul %12, %13, %cst_9 {dimension_numbers = #tpu.dot_dimension_numbers<[1], [0], [0], [1], [0, 0, 1, 1], [], []>} : vector<32x256xbf16>, vector<256x256xbf16>, vector<32x256xf32> -> vector<32x256xf32>
    %c0_10 = arith.constant 0 : index
    %c0_11 = arith.constant 0 : index
    %15 = vector.load %arg5[%c0_10, %c0_11] : memref<8x256xf32, #tpu.memory_space<vmem>>, vector<1x256xf32>
    %16 = vector.broadcast %15 : vector<1x256xf32> to vector<32x256xf32>
    %17 = arith.addf %14, %16 : vector<32x256xf32>
    %cst_12 = arith.constant 0.000000e+00 : f32
    %18 = vector.broadcast %cst_12 : f32 to vector<32x256xf32>
    %19 = arith.cmpf oge, %17, %18 : vector<32x256xf32>
    %c1_13 = arith.constant 1 : index
    %c0_14 = arith.constant 0 : index
    %20 = vector.load %arg5[%c1_13, %c0_14] : memref<8x256xf32, #tpu.memory_space<vmem>>, vector<1x256xf32>
    %21 = vector.broadcast %20 : vector<1x256xf32> to vector<32x256xf32>
    %22 = arith.mulf %21, %17 : vector<32x256xf32>
    %23 = arith.select %19, %17, %22 : vector<32x256xi1>, vector<32x256xf32>
    %c0_15 = arith.constant 0 : index
    %c0_16 = arith.constant 0 : index
    %24 = vector.load %arg6[%c0_15, %c0_16] : memref<32x256xf32, #tpu.memory_space<vmem>>, vector<32x256xf32>
    %25 = arith.addf %23, %24 : vector<32x256xf32>
    %c0_17 = arith.constant 0 : index
    %c0_18 = arith.constant 0 : index
    %26 = vector.load %arg7[%c0_17, %c0_18] : memref<32x256xf32, #tpu.memory_space<vmem>>, vector<32x256xf32>
    tpu.vector_store %arg7[%c0_17, %c0_18], %25 {strides = array<i32>} : memref<32x256xf32, #tpu.memory_space<vmem>>, vector<32x256xf32>,
    return
  }
  func.func @transform_0(%arg0: i32) -> (i32, i32) {
    %c0_i32 = arith.constant 0 : i32
    %c0_i32_0 = arith.constant 0 : i32
    return %arg0, %c0_i32 : i32, i32
  }
  func.func @transform_1(%arg0: i32) -> (i32, i32) {
    %c0_i32 = arith.constant 0 : i32
    %c0_i32_0 = arith.constant 0 : i32
    %c0_i32_1 = arith.constant 0 : i32
    return %c0_i32, %c0_i32_0 : i32, i32
  }
  func.func @transform_2(%arg0: i32) -> (i32, i32) {
    %c0_i32 = arith.constant 0 : i32
    %c0_i32_0 = arith.constant 0 : i32
    %c0_i32_1 = arith.constant 0 : i32
    return %c0_i32, %c0_i32_0 : i32, i32
  }
  func.func @transform_3(%arg0: i32) -> (i32, i32) {
    %c0_i32 = arith.constant 0 : i32
    %c0_i32_0 = arith.constant 0 : i32
    %c0_i32_1 = arith.constant 0 : i32
    return %c0_i32, %c0_i32_0 : i32, i32
  }
  func.func @transform_4(%arg0: i32) -> (i32, i32) {
    %c0_i32 = arith.constant 0 : i32
    %c0_i32_0 = arith.constant 0 : i32
    %c0_i32_1 = arith.constant 0 : i32
    return %c0_i32, %c0_i32_0 : i32, i32
  }
  func.func @transform_5(%arg0: i32) -> (i32, i32) {
    %c0_i32 = arith.constant 0 : i32
    %c0_i32_0 = arith.constant 0 : i32
    return %arg0, %c0_i32 : i32, i32
  }
  func.func @transform_6(%arg0: i32) -> (i32, i32) {
    %c0_i32 = arith.constant 0 : i32
    %c0_i32_0 = arith.constant 0 : i32
    return %arg0, %c0_i32 : i32, i32
  }
}

module attributes {stable_mosaic.version = 11 : i64} {
  func.func @_k1_res(%arg0: i32, %arg1: memref<32x2304xbf16, #tpu.memory_space<vmem>>, %arg2: memref<2304x256xbf16, #tpu.memory_space<vmem>>, %arg3: memref<8x256xf32, #tpu.memory_space<vmem>>, %arg4: memref<32x256xf32, #tpu.memory_space<vmem>>, %arg5: memref<32x256xf32, #tpu.memory_space<vmem>>) attributes {dimension_semantics = [#tpu.dimension_semantics<parallel>], iteration_bounds = array<i64: 1>, scalar_prefetch = 0 : i64, scratch_operands = 0 : i64, tpu.core_type = #tpu.core_type<tc>, window_params = [{transform_indices = @transform_0, window_bounds = array<i64: 32, 2304>}, {pipeline_mode = #tpu.pipeline_mode<synchronous>, transform_indices = @transform_1, window_bounds = array<i64: 2304, 256>}, {pipeline_mode = #tpu.pipeline_mode<synchronous>, transform_indices = @transform_2, window_bounds = array<i64: 8, 256>}, {transform_indices = @transform_3, window_bounds = array<i64: 32, 256>}, {transform_indices = @transform_4, window_bounds = array<i64: 32, 256>}]} {
    %c0 = arith.constant 0 : index
    %c0_0 = arith.constant 0 : index
    %0 = vector.load %arg1[%c0, %c0_0] : memref<32x2304xbf16, #tpu.memory_space<vmem>>, vector<32x2304xbf16>
    %c0_1 = arith.constant 0 : index
    %c0_2 = arith.constant 0 : index
    %1 = vector.load %arg2[%c0_1, %c0_2] : memref<2304x256xbf16, #tpu.memory_space<vmem>>, vector<2304x256xbf16>
    %cst = arith.constant dense<0.000000e+00> : vector<32x256xf32>
    %2 = tpu.matmul %0, %1, %cst {dimension_numbers = #tpu.dot_dimension_numbers<[1], [0], [0], [1], [0, 0, 1, 1], [], []>} : vector<32x2304xbf16>, vector<2304x256xbf16>, vector<32x256xf32> -> vector<32x256xf32>
    %c0_3 = arith.constant 0 : index
    %c0_4 = arith.constant 0 : index
    %3 = vector.load %arg3[%c0_3, %c0_4] : memref<8x256xf32, #tpu.memory_space<vmem>>, vector<1x256xf32>
    %4 = vector.broadcast %3 : vector<1x256xf32> to vector<32x256xf32>
    %5 = arith.addf %2, %4 : vector<32x256xf32>
    %cst_5 = arith.constant 0.000000e+00 : f32
    %6 = vector.broadcast %cst_5 : f32 to vector<32x256xf32>
    %7 = arith.cmpf oge, %5, %6 : vector<32x256xf32>
    %c1 = arith.constant 1 : index
    %c0_6 = arith.constant 0 : index
    %8 = vector.load %arg3[%c1, %c0_6] : memref<8x256xf32, #tpu.memory_space<vmem>>, vector<1x256xf32>
    %9 = vector.broadcast %8 : vector<1x256xf32> to vector<32x256xf32>
    %10 = arith.mulf %9, %5 : vector<32x256xf32>
    %11 = arith.select %7, %5, %10 : vector<32x256xi1>, vector<32x256xf32>
    %c0_7 = arith.constant 0 : index
    %c0_8 = arith.constant 0 : index
    %12 = vector.load %arg4[%c0_7, %c0_8] : memref<32x256xf32, #tpu.memory_space<vmem>>, vector<32x256xf32>
    %13 = arith.addf %11, %12 : vector<32x256xf32>
    %c0_9 = arith.constant 0 : index
    %c0_10 = arith.constant 0 : index
    %14 = vector.load %arg5[%c0_9, %c0_10] : memref<32x256xf32, #tpu.memory_space<vmem>>, vector<32x256xf32>
    tpu.vector_store %arg5[%c0_9, %c0_10], %13 {strides = array<i32>} : memref<32x256xf32, #tpu.memory_space<vmem>>, vector<32x256xf32>,
    return
  }
  func.func @transform_0(%arg0: i32) -> (i32, i32) {
    %c0_i32 = arith.constant 0 : i32
    %c0_i32_0 = arith.constant 0 : i32
    return %arg0, %c0_i32 : i32, i32
  }
  func.func @transform_1(%arg0: i32) -> (i32, i32) {
    %c0_i32 = arith.constant 0 : i32
    %c0_i32_0 = arith.constant 0 : i32
    %c0_i32_1 = arith.constant 0 : i32
    return %c0_i32, %c0_i32_0 : i32, i32
  }
  func.func @transform_2(%arg0: i32) -> (i32, i32) {
    %c0_i32 = arith.constant 0 : i32
    %c0_i32_0 = arith.constant 0 : i32
    %c0_i32_1 = arith.constant 0 : i32
    return %c0_i32, %c0_i32_0 : i32, i32
  }
  func.func @transform_3(%arg0: i32) -> (i32, i32) {
    %c0_i32 = arith.constant 0 : i32
    %c0_i32_0 = arith.constant 0 : i32
    return %arg0, %c0_i32 : i32, i32
  }
  func.func @transform_4(%arg0: i32) -> (i32, i32) {
    %c0_i32 = arith.constant 0 : i32
    %c0_i32_0 = arith.constant 0 : i32
    return %arg0, %c0_i32 : i32, i32
  }
}

module attributes {stable_mosaic.version = 11 : i64} {
  func.func @_k1(%arg0: i32, %arg1: memref<32x256xbf16, #tpu.memory_space<vmem>>, %arg2: memref<256x512xbf16, #tpu.memory_space<vmem>>, %arg3: memref<8x512xf32, #tpu.memory_space<vmem>>, %arg4: memref<32x512xf32, #tpu.memory_space<vmem>>) attributes {dimension_semantics = [#tpu.dimension_semantics<parallel>], iteration_bounds = array<i64: 1>, scalar_prefetch = 0 : i64, scratch_operands = 0 : i64, tpu.core_type = #tpu.core_type<tc>, window_params = [{transform_indices = @transform_0, window_bounds = array<i64: 32, 256>}, {pipeline_mode = #tpu.pipeline_mode<synchronous>, transform_indices = @transform_1, window_bounds = array<i64: 256, 512>}, {pipeline_mode = #tpu.pipeline_mode<synchronous>, transform_indices = @transform_2, window_bounds = array<i64: 8, 512>}, {transform_indices = @transform_3, window_bounds = array<i64: 32, 512>}]} {
    %c0 = arith.constant 0 : index
    %c0_0 = arith.constant 0 : index
    %0 = vector.load %arg1[%c0, %c0_0] : memref<32x256xbf16, #tpu.memory_space<vmem>>, vector<32x256xbf16>
    %c0_1 = arith.constant 0 : index
    %c0_2 = arith.constant 0 : index
    %1 = vector.load %arg2[%c0_1, %c0_2] : memref<256x512xbf16, #tpu.memory_space<vmem>>, vector<256x512xbf16>
    %cst = arith.constant dense<0.000000e+00> : vector<32x512xf32>
    %2 = tpu.matmul %0, %1, %cst {dimension_numbers = #tpu.dot_dimension_numbers<[1], [0], [0], [1], [0, 0, 1, 1], [], []>} : vector<32x256xbf16>, vector<256x512xbf16>, vector<32x512xf32> -> vector<32x512xf32>
    %c0_3 = arith.constant 0 : index
    %c0_4 = arith.constant 0 : index
    %3 = vector.load %arg3[%c0_3, %c0_4] : memref<8x512xf32, #tpu.memory_space<vmem>>, vector<1x512xf32>
    %4 = vector.broadcast %3 : vector<1x512xf32> to vector<32x512xf32>
    %5 = arith.addf %2, %4 : vector<32x512xf32>
    %cst_5 = arith.constant 0.000000e+00 : f32
    %6 = vector.broadcast %cst_5 : f32 to vector<32x512xf32>
    %7 = arith.cmpf oge, %5, %6 : vector<32x512xf32>
    %c1 = arith.constant 1 : index
    %c0_6 = arith.constant 0 : index
    %8 = vector.load %arg3[%c1, %c0_6] : memref<8x512xf32, #tpu.memory_space<vmem>>, vector<1x512xf32>
    %9 = vector.broadcast %8 : vector<1x512xf32> to vector<32x512xf32>
    %10 = arith.mulf %9, %5 : vector<32x512xf32>
    %11 = arith.select %7, %5, %10 : vector<32x512xi1>, vector<32x512xf32>
    %c0_7 = arith.constant 0 : index
    %c0_8 = arith.constant 0 : index
    %12 = vector.load %arg4[%c0_7, %c0_8] : memref<32x512xf32, #tpu.memory_space<vmem>>, vector<32x512xf32>
    tpu.vector_store %arg4[%c0_7, %c0_8], %11 {strides = array<i32>} : memref<32x512xf32, #tpu.memory_space<vmem>>, vector<32x512xf32>,
    return
  }
  func.func @transform_0(%arg0: i32) -> (i32, i32) {
    %c0_i32 = arith.constant 0 : i32
    %c0_i32_0 = arith.constant 0 : i32
    return %arg0, %c0_i32 : i32, i32
  }
  func.func @transform_1(%arg0: i32) -> (i32, i32) {
    %c0_i32 = arith.constant 0 : i32
    %c0_i32_0 = arith.constant 0 : i32
    %c0_i32_1 = arith.constant 0 : i32
    return %c0_i32, %c0_i32_0 : i32, i32
  }
  func.func @transform_2(%arg0: i32) -> (i32, i32) {
    %c0_i32 = arith.constant 0 : i32
    %c0_i32_0 = arith.constant 0 : i32
    %c0_i32_1 = arith.constant 0 : i32
    return %c0_i32, %c0_i32_0 : i32, i32
  }
  func.func @transform_3(%arg0: i32) -> (i32, i32) {
    %c0_i32 = arith.constant 0 : i32
    %c0_i32_0 = arith.constant 0 : i32
    return %arg0, %c0_i32 : i32, i32
  }
}

module attributes {stable_mosaic.version = 11 : i64} {
  func.func @_k2(%arg0: i32, %arg1: memref<80x128xbf16, #tpu.memory_space<vmem>>, %arg2: memref<128x256xbf16, #tpu.memory_space<vmem>>, %arg3: memref<8x256xf32, #tpu.memory_space<vmem>>, %arg4: memref<256x256xbf16, #tpu.memory_space<vmem>>, %arg5: memref<8x256xf32, #tpu.memory_space<vmem>>, %arg6: memref<80x256xf32, #tpu.memory_space<vmem>>) attributes {dimension_semantics = [#tpu.dimension_semantics<parallel>], iteration_bounds = array<i64: 1>, scalar_prefetch = 0 : i64, scratch_operands = 0 : i64, tpu.core_type = #tpu.core_type<tc>, window_params = [{transform_indices = @transform_0, window_bounds = array<i64: 80, 128>}, {pipeline_mode = #tpu.pipeline_mode<synchronous>, transform_indices = @transform_1, window_bounds = array<i64: 128, 256>}, {pipeline_mode = #tpu.pipeline_mode<synchronous>, transform_indices = @transform_2, window_bounds = array<i64: 8, 256>}, {pipeline_mode = #tpu.pipeline_mode<synchronous>, transform_indices = @transform_3, window_bounds = array<i64: 256, 256>}, {pipeline_mode = #tpu.pipeline_mode<synchronous>, transform_indices = @transform_4, window_bounds = array<i64: 8, 256>}, {transform_indices = @transform_5, window_bounds = array<i64: 80, 256>}]} {
    %c0 = arith.constant 0 : index
    %c0_0 = arith.constant 0 : index
    %0 = vector.load %arg1[%c0, %c0_0] : memref<80x128xbf16, #tpu.memory_space<vmem>>, vector<80x128xbf16>
    %c0_1 = arith.constant 0 : index
    %c0_2 = arith.constant 0 : index
    %1 = vector.load %arg2[%c0_1, %c0_2] : memref<128x256xbf16, #tpu.memory_space<vmem>>, vector<128x256xbf16>
    %cst = arith.constant dense<0.000000e+00> : vector<80x256xf32>
    %2 = tpu.matmul %0, %1, %cst {dimension_numbers = #tpu.dot_dimension_numbers<[1], [0], [0], [1], [0, 0, 1, 1], [], []>} : vector<80x128xbf16>, vector<128x256xbf16>, vector<80x256xf32> -> vector<80x256xf32>
    %c0_3 = arith.constant 0 : index
    %c0_4 = arith.constant 0 : index
    %3 = vector.load %arg3[%c0_3, %c0_4] : memref<8x256xf32, #tpu.memory_space<vmem>>, vector<1x256xf32>
    %4 = vector.broadcast %3 : vector<1x256xf32> to vector<80x256xf32>
    %5 = arith.addf %2, %4 : vector<80x256xf32>
    %cst_5 = arith.constant 0.000000e+00 : f32
    %6 = vector.broadcast %cst_5 : f32 to vector<80x256xf32>
    %7 = arith.cmpf oge, %5, %6 : vector<80x256xf32>
    %c1 = arith.constant 1 : index
    %c0_6 = arith.constant 0 : index
    %8 = vector.load %arg3[%c1, %c0_6] : memref<8x256xf32, #tpu.memory_space<vmem>>, vector<1x256xf32>
    %9 = vector.broadcast %8 : vector<1x256xf32> to vector<80x256xf32>
    %10 = arith.mulf %9, %5 : vector<80x256xf32>
    %11 = arith.select %7, %5, %10 : vector<80x256xi1>, vector<80x256xf32>
    %12 = arith.truncf %11 : vector<80x256xf32> to vector<80x256xbf16>
    %c0_7 = arith.constant 0 : index
    %c0_8 = arith.constant 0 : index
    %13 = vector.load %arg4[%c0_7, %c0_8] : memref<256x256xbf16, #tpu.memory_space<vmem>>, vector<256x256xbf16>
    %cst_9 = arith.constant dense<0.000000e+00> : vector<80x256xf32>
    %14 = tpu.matmul %12, %13, %cst_9 {dimension_numbers = #tpu.dot_dimension_numbers<[1], [0], [0], [1], [0, 0, 1, 1], [], []>} : vector<80x256xbf16>, vector<256x256xbf16>, vector<80x256xf32> -> vector<80x256xf32>
    %c0_10 = arith.constant 0 : index
    %c0_11 = arith.constant 0 : index
    %15 = vector.load %arg5[%c0_10, %c0_11] : memref<8x256xf32, #tpu.memory_space<vmem>>, vector<1x256xf32>
    %16 = vector.broadcast %15 : vector<1x256xf32> to vector<80x256xf32>
    %17 = arith.addf %14, %16 : vector<80x256xf32>
    %cst_12 = arith.constant 0.000000e+00 : f32
    %18 = vector.broadcast %cst_12 : f32 to vector<80x256xf32>
    %19 = arith.cmpf oge, %17, %18 : vector<80x256xf32>
    %c1_13 = arith.constant 1 : index
    %c0_14 = arith.constant 0 : index
    %20 = vector.load %arg5[%c1_13, %c0_14] : memref<8x256xf32, #tpu.memory_space<vmem>>, vector<1x256xf32>
    %21 = vector.broadcast %20 : vector<1x256xf32> to vector<80x256xf32>
    %22 = arith.mulf %21, %17 : vector<80x256xf32>
    %23 = arith.select %19, %17, %22 : vector<80x256xi1>, vector<80x256xf32>
    %c0_15 = arith.constant 0 : index
    %c0_16 = arith.constant 0 : index
    %24 = vector.load %arg6[%c0_15, %c0_16] : memref<80x256xf32, #tpu.memory_space<vmem>>, vector<80x256xf32>
    tpu.vector_store %arg6[%c0_15, %c0_16], %23 {strides = array<i32>} : memref<80x256xf32, #tpu.memory_space<vmem>>, vector<80x256xf32>,
    return
  }
  func.func @transform_0(%arg0: i32) -> (i32, i32) {
    %c0_i32 = arith.constant 0 : i32
    %c0_i32_0 = arith.constant 0 : i32
    return %arg0, %c0_i32 : i32, i32
  }
  func.func @transform_1(%arg0: i32) -> (i32, i32) {
    %c0_i32 = arith.constant 0 : i32
    %c0_i32_0 = arith.constant 0 : i32
    %c0_i32_1 = arith.constant 0 : i32
    return %c0_i32, %c0_i32_0 : i32, i32
  }
  func.func @transform_2(%arg0: i32) -> (i32, i32) {
    %c0_i32 = arith.constant 0 : i32
    %c0_i32_0 = arith.constant 0 : i32
    %c0_i32_1 = arith.constant 0 : i32
    return %c0_i32, %c0_i32_0 : i32, i32
  }
  func.func @transform_3(%arg0: i32) -> (i32, i32) {
    %c0_i32 = arith.constant 0 : i32
    %c0_i32_0 = arith.constant 0 : i32
    %c0_i32_1 = arith.constant 0 : i32
    return %c0_i32, %c0_i32_0 : i32, i32
  }
  func.func @transform_4(%arg0: i32) -> (i32, i32) {
    %c0_i32 = arith.constant 0 : i32
    %c0_i32_0 = arith.constant 0 : i32
    %c0_i32_1 = arith.constant 0 : i32
    return %c0_i32, %c0_i32_0 : i32, i32
  }
  func.func @transform_5(%arg0: i32) -> (i32, i32) {
    %c0_i32 = arith.constant 0 : i32
    %c0_i32_0 = arith.constant 0 : i32
    return %arg0, %c0_i32 : i32, i32
  }
}

module attributes {stable_mosaic.version = 11 : i64} {
  func.func @_k2(%arg0: i32, %arg1: memref<256x1600xbf16, #tpu.memory_space<vmem>>, %arg2: memref<1600x128xbf16, #tpu.memory_space<vmem>>, %arg3: memref<8x128xf32, #tpu.memory_space<vmem>>, %arg4: memref<128x128xbf16, #tpu.memory_space<vmem>>, %arg5: memref<8x128xf32, #tpu.memory_space<vmem>>, %arg6: memref<256x128xf32, #tpu.memory_space<vmem>>) attributes {dimension_semantics = [#tpu.dimension_semantics<parallel>], iteration_bounds = array<i64: 2>, scalar_prefetch = 0 : i64, scratch_operands = 0 : i64, tpu.core_type = #tpu.core_type<tc>, window_params = [{transform_indices = @transform_0, window_bounds = array<i64: 256, 1600>}, {pipeline_mode = #tpu.pipeline_mode<synchronous>, transform_indices = @transform_1, window_bounds = array<i64: 1600, 128>}, {pipeline_mode = #tpu.pipeline_mode<synchronous>, transform_indices = @transform_2, window_bounds = array<i64: 8, 128>}, {pipeline_mode = #tpu.pipeline_mode<synchronous>, transform_indices = @transform_3, window_bounds = array<i64: 128, 128>}, {pipeline_mode = #tpu.pipeline_mode<synchronous>, transform_indices = @transform_4, window_bounds = array<i64: 8, 128>}, {transform_indices = @transform_5, window_bounds = array<i64: 256, 128>}]} {
    %c0 = arith.constant 0 : index
    %c0_0 = arith.constant 0 : index
    %0 = vector.load %arg1[%c0, %c0_0] : memref<256x1600xbf16, #tpu.memory_space<vmem>>, vector<256x1600xbf16>
    %c0_1 = arith.constant 0 : index
    %c0_2 = arith.constant 0 : index
    %1 = vector.load %arg2[%c0_1, %c0_2] : memref<1600x128xbf16, #tpu.memory_space<vmem>>, vector<1600x128xbf16>
    %cst = arith.constant dense<0.000000e+00> : vector<256x128xf32>
    %2 = tpu.matmul %0, %1, %cst {dimension_numbers = #tpu.dot_dimension_numbers<[1], [0], [0], [1], [0, 0, 1, 1], [], []>} : vector<256x1600xbf16>, vector<1600x128xbf16>, vector<256x128xf32> -> vector<256x128xf32>
    %c0_3 = arith.constant 0 : index
    %c0_4 = arith.constant 0 : index
    %3 = vector.load %arg3[%c0_3, %c0_4] : memref<8x128xf32, #tpu.memory_space<vmem>>, vector<1x128xf32>
    %4 = vector.broadcast %3 : vector<1x128xf32> to vector<256x128xf32>
    %5 = arith.addf %2, %4 : vector<256x128xf32>
    %cst_5 = arith.constant 0.000000e+00 : f32
    %6 = vector.broadcast %cst_5 : f32 to vector<256x128xf32>
    %7 = arith.cmpf oge, %5, %6 : vector<256x128xf32>
    %c1 = arith.constant 1 : index
    %c0_6 = arith.constant 0 : index
    %8 = vector.load %arg3[%c1, %c0_6] : memref<8x128xf32, #tpu.memory_space<vmem>>, vector<1x128xf32>
    %9 = vector.broadcast %8 : vector<1x128xf32> to vector<256x128xf32>
    %10 = arith.mulf %9, %5 : vector<256x128xf32>
    %11 = arith.select %7, %5, %10 : vector<256x128xi1>, vector<256x128xf32>
    %12 = arith.truncf %11 : vector<256x128xf32> to vector<256x128xbf16>
    %c0_7 = arith.constant 0 : index
    %c0_8 = arith.constant 0 : index
    %13 = vector.load %arg4[%c0_7, %c0_8] : memref<128x128xbf16, #tpu.memory_space<vmem>>, vector<128x128xbf16>
    %cst_9 = arith.constant dense<0.000000e+00> : vector<256x128xf32>
    %14 = tpu.matmul %12, %13, %cst_9 {dimension_numbers = #tpu.dot_dimension_numbers<[1], [0], [0], [1], [0, 0, 1, 1], [], []>} : vector<256x128xbf16>, vector<128x128xbf16>, vector<256x128xf32> -> vector<256x128xf32>
    %c0_10 = arith.constant 0 : index
    %c0_11 = arith.constant 0 : index
    %15 = vector.load %arg5[%c0_10, %c0_11] : memref<8x128xf32, #tpu.memory_space<vmem>>, vector<1x128xf32>
    %16 = vector.broadcast %15 : vector<1x128xf32> to vector<256x128xf32>
    %17 = arith.addf %14, %16 : vector<256x128xf32>
    %cst_12 = arith.constant 0.000000e+00 : f32
    %18 = vector.broadcast %cst_12 : f32 to vector<256x128xf32>
    %19 = arith.cmpf oge, %17, %18 : vector<256x128xf32>
    %c1_13 = arith.constant 1 : index
    %c0_14 = arith.constant 0 : index
    %20 = vector.load %arg5[%c1_13, %c0_14] : memref<8x128xf32, #tpu.memory_space<vmem>>, vector<1x128xf32>
    %21 = vector.broadcast %20 : vector<1x128xf32> to vector<256x128xf32>
    %22 = arith.mulf %21, %17 : vector<256x128xf32>
    %23 = arith.select %19, %17, %22 : vector<256x128xi1>, vector<256x128xf32>
    %c0_15 = arith.constant 0 : index
    %c0_16 = arith.constant 0 : index
    %24 = vector.load %arg6[%c0_15, %c0_16] : memref<256x128xf32, #tpu.memory_space<vmem>>, vector<256x128xf32>
    tpu.vector_store %arg6[%c0_15, %c0_16], %23 {strides = array<i32>} : memref<256x128xf32, #tpu.memory_space<vmem>>, vector<256x128xf32>,
    return
  }
  func.func @transform_0(%arg0: i32) -> (i32, i32) {
    %c0_i32 = arith.constant 0 : i32
    %c0_i32_0 = arith.constant 0 : i32
    return %arg0, %c0_i32 : i32, i32
  }
  func.func @transform_1(%arg0: i32) -> (i32, i32) {
    %c0_i32 = arith.constant 0 : i32
    %c0_i32_0 = arith.constant 0 : i32
    %c0_i32_1 = arith.constant 0 : i32
    return %c0_i32, %c0_i32_0 : i32, i32
  }
  func.func @transform_2(%arg0: i32) -> (i32, i32) {
    %c0_i32 = arith.constant 0 : i32
    %c0_i32_0 = arith.constant 0 : i32
    %c0_i32_1 = arith.constant 0 : i32
    return %c0_i32, %c0_i32_0 : i32, i32
  }
  func.func @transform_3(%arg0: i32) -> (i32, i32) {
    %c0_i32 = arith.constant 0 : i32
    %c0_i32_0 = arith.constant 0 : i32
    %c0_i32_1 = arith.constant 0 : i32
    return %c0_i32, %c0_i32_0 : i32, i32
  }
  func.func @transform_4(%arg0: i32) -> (i32, i32) {
    %c0_i32 = arith.constant 0 : i32
    %c0_i32_0 = arith.constant 0 : i32
    %c0_i32_1 = arith.constant 0 : i32
    return %c0_i32, %c0_i32_0 : i32, i32
  }
  func.func @transform_5(%arg0: i32) -> (i32, i32) {
    %c0_i32 = arith.constant 0 : i32
    %c0_i32_0 = arith.constant 0 : i32
    return %arg0, %c0_i32 : i32, i32
  }
}

module attributes {stable_mosaic.version = 11 : i64} {
  func.func @_k2(%arg0: i32, %arg1: memref<256x288xbf16, #tpu.memory_space<vmem>>, %arg2: memref<288x128xbf16, #tpu.memory_space<vmem>>, %arg3: memref<8x128xf32, #tpu.memory_space<vmem>>, %arg4: memref<128x128xbf16, #tpu.memory_space<vmem>>, %arg5: memref<8x128xf32, #tpu.memory_space<vmem>>, %arg6: memref<256x128xf32, #tpu.memory_space<vmem>>) attributes {dimension_semantics = [#tpu.dimension_semantics<parallel>], iteration_bounds = array<i64: 2>, scalar_prefetch = 0 : i64, scratch_operands = 0 : i64, tpu.core_type = #tpu.core_type<tc>, window_params = [{transform_indices = @transform_0, window_bounds = array<i64: 256, 288>}, {pipeline_mode = #tpu.pipeline_mode<synchronous>, transform_indices = @transform_1, window_bounds = array<i64: 288, 128>}, {pipeline_mode = #tpu.pipeline_mode<synchronous>, transform_indices = @transform_2, window_bounds = array<i64: 8, 128>}, {pipeline_mode = #tpu.pipeline_mode<synchronous>, transform_indices = @transform_3, window_bounds = array<i64: 128, 128>}, {pipeline_mode = #tpu.pipeline_mode<synchronous>, transform_indices = @transform_4, window_bounds = array<i64: 8, 128>}, {transform_indices = @transform_5, window_bounds = array<i64: 256, 128>}]} {
    %c0 = arith.constant 0 : index
    %c0_0 = arith.constant 0 : index
    %0 = vector.load %arg1[%c0, %c0_0] : memref<256x288xbf16, #tpu.memory_space<vmem>>, vector<256x288xbf16>
    %c0_1 = arith.constant 0 : index
    %c0_2 = arith.constant 0 : index
    %1 = vector.load %arg2[%c0_1, %c0_2] : memref<288x128xbf16, #tpu.memory_space<vmem>>, vector<288x128xbf16>
    %cst = arith.constant dense<0.000000e+00> : vector<256x128xf32>
    %2 = tpu.matmul %0, %1, %cst {dimension_numbers = #tpu.dot_dimension_numbers<[1], [0], [0], [1], [0, 0, 1, 1], [], []>} : vector<256x288xbf16>, vector<288x128xbf16>, vector<256x128xf32> -> vector<256x128xf32>
    %c0_3 = arith.constant 0 : index
    %c0_4 = arith.constant 0 : index
    %3 = vector.load %arg3[%c0_3, %c0_4] : memref<8x128xf32, #tpu.memory_space<vmem>>, vector<1x128xf32>
    %4 = vector.broadcast %3 : vector<1x128xf32> to vector<256x128xf32>
    %5 = arith.addf %2, %4 : vector<256x128xf32>
    %cst_5 = arith.constant 0.000000e+00 : f32
    %6 = vector.broadcast %cst_5 : f32 to vector<256x128xf32>
    %7 = arith.cmpf oge, %5, %6 : vector<256x128xf32>
    %c1 = arith.constant 1 : index
    %c0_6 = arith.constant 0 : index
    %8 = vector.load %arg3[%c1, %c0_6] : memref<8x128xf32, #tpu.memory_space<vmem>>, vector<1x128xf32>
    %9 = vector.broadcast %8 : vector<1x128xf32> to vector<256x128xf32>
    %10 = arith.mulf %9, %5 : vector<256x128xf32>
    %11 = arith.select %7, %5, %10 : vector<256x128xi1>, vector<256x128xf32>
    %12 = arith.truncf %11 : vector<256x128xf32> to vector<256x128xbf16>
    %c0_7 = arith.constant 0 : index
    %c0_8 = arith.constant 0 : index
    %13 = vector.load %arg4[%c0_7, %c0_8] : memref<128x128xbf16, #tpu.memory_space<vmem>>, vector<128x128xbf16>
    %cst_9 = arith.constant dense<0.000000e+00> : vector<256x128xf32>
    %14 = tpu.matmul %12, %13, %cst_9 {dimension_numbers = #tpu.dot_dimension_numbers<[1], [0], [0], [1], [0, 0, 1, 1], [], []>} : vector<256x128xbf16>, vector<128x128xbf16>, vector<256x128xf32> -> vector<256x128xf32>
    %c0_10 = arith.constant 0 : index
    %c0_11 = arith.constant 0 : index
    %15 = vector.load %arg5[%c0_10, %c0_11] : memref<8x128xf32, #tpu.memory_space<vmem>>, vector<1x128xf32>
    %16 = vector.broadcast %15 : vector<1x128xf32> to vector<256x128xf32>
    %17 = arith.addf %14, %16 : vector<256x128xf32>
    %cst_12 = arith.constant 0.000000e+00 : f32
    %18 = vector.broadcast %cst_12 : f32 to vector<256x128xf32>
    %19 = arith.cmpf oge, %17, %18 : vector<256x128xf32>
    %c1_13 = arith.constant 1 : index
    %c0_14 = arith.constant 0 : index
    %20 = vector.load %arg5[%c1_13, %c0_14] : memref<8x128xf32, #tpu.memory_space<vmem>>, vector<1x128xf32>
    %21 = vector.broadcast %20 : vector<1x128xf32> to vector<256x128xf32>
    %22 = arith.mulf %21, %17 : vector<256x128xf32>
    %23 = arith.select %19, %17, %22 : vector<256x128xi1>, vector<256x128xf32>
    %c0_15 = arith.constant 0 : index
    %c0_16 = arith.constant 0 : index
    %24 = vector.load %arg6[%c0_15, %c0_16] : memref<256x128xf32, #tpu.memory_space<vmem>>, vector<256x128xf32>
    tpu.vector_store %arg6[%c0_15, %c0_16], %23 {strides = array<i32>} : memref<256x128xf32, #tpu.memory_space<vmem>>, vector<256x128xf32>,
    return
  }
  func.func @transform_0(%arg0: i32) -> (i32, i32) {
    %c0_i32 = arith.constant 0 : i32
    %c0_i32_0 = arith.constant 0 : i32
    return %arg0, %c0_i32 : i32, i32
  }
  func.func @transform_1(%arg0: i32) -> (i32, i32) {
    %c0_i32 = arith.constant 0 : i32
    %c0_i32_0 = arith.constant 0 : i32
    %c0_i32_1 = arith.constant 0 : i32
    return %c0_i32, %c0_i32_0 : i32, i32
  }
  func.func @transform_2(%arg0: i32) -> (i32, i32) {
    %c0_i32 = arith.constant 0 : i32
    %c0_i32_0 = arith.constant 0 : i32
    %c0_i32_1 = arith.constant 0 : i32
    return %c0_i32, %c0_i32_0 : i32, i32
  }
  func.func @transform_3(%arg0: i32) -> (i32, i32) {
    %c0_i32 = arith.constant 0 : i32
    %c0_i32_0 = arith.constant 0 : i32
    %c0_i32_1 = arith.constant 0 : i32
    return %c0_i32, %c0_i32_0 : i32, i32
  }
  func.func @transform_4(%arg0: i32) -> (i32, i32) {
    %c0_i32 = arith.constant 0 : i32
    %c0_i32_0 = arith.constant 0 : i32
    %c0_i32_1 = arith.constant 0 : i32
    return %c0_i32, %c0_i32_0 : i32, i32
  }
  func.func @transform_5(%arg0: i32) -> (i32, i32) {
    %c0_i32 = arith.constant 0 : i32
    %c0_i32_0 = arith.constant 0 : i32
    return %arg0, %c0_i32 : i32, i32
  }
}

</mosaic_0001>

<bundles_post_ra>
// kernel: forward.11
= control target key start
LH: loop header
LB: loop body
LE: loop exit
PB: predicated region body
PF: predicated region fallthrough
CT: control target
= control target key end

     0   :  { %s1116_s18 = smov 0   ;;  %s1365_s0 = inlined_call_operand.vmem [shape: bf16[288,100], index: 0, kind: input, shape index: {}]   ;;  %s1366_s1 = inlined_call_operand.vmem [shape: bf16[100,128], index: 1, kind: input, shape index: {}]   ;;  %s1367_s2 = inlined_call_operand.vmem [shape: f32[8,128], index: 2, kind: input, shape index: {}]   ;;  %s1368_s3 = inlined_call_operand.vmem [shape: bf16[128,128], index: 3, kind: input, shape index: {}]   ;;  %s1369_s4 = inlined_call_operand.vmem [shape: f32[8,128], index: 4, kind: input, shape index: {}]   ;;  %s1370_s5 = inlined_call_operand.vmem [shape: f32[288,128], index: 5, kind: output, shape index: {}]  }
   0x1 LB: > { %s861_s19 = sadd.s32 4294967295, %s1082_s18   ;;  %p865_p0 = scmp.ge.s32.totalorder %s1082_s18, 1  ;;  %s1082_s18 = sphi %s1116_s18, %s15_s18  }
   0x2   : > { %p188_p1 = scmp.lt.s32.totalorder %s1082_s18, 3 }
   0x4   : > { %p189_p2 = pnand %p865_p0, %p188_p1 }
   0x5   : > { %v1052_v0 = vld [vmem:[%s1366_s1] sm:$0xff] (!%p189_p2)   ;;  %v1084_v1 = vmov (!%p189_p2), 0.0   ;;  %v1053_v2 = vld [vmem:[%s1366_s1 + $0x8] sm:$0xff] (!%p189_p2)   ;;  %vm1085_vm0 = vmmov (!%p189_p2), 0   ;;  %s216_s24 = smul.u32 (!%p189_p2), 18, %s861_s19  ;;  %v1054_v3 = vld [vmem:[%s1366_s1 + $0x10] sm:$0xff] (!%p189_p2)  }
   0x6   : > { %192 = sbr.rel (%p189_p2) target bundleno = 539 (0x21b), region = 40  ;;  %940 = vmatprep.subr.bf16.mxu0 (!%p189_p2), %v1084_v1  ;;  %990 = vmatprep.subr.bf16.mxu1 (!%p189_p2), %v1084_v1  ;;  %v1068_v4 = vld [vmem:[%s1368_s3] sm:$0xff] (!%p189_p2)   ;;  %v1069_v5 = vld [vmem:[%s1368_s3 + $0x8] sm:$0xff] (!%p189_p2)   ;;  %v1055_v6 = vld [vmem:[%s1366_s1 + $0x18] sm:$0xff] (!%p189_p2)   ;;  %vm377_vm1 = vcmask (!%p189_p2), 1041408   ;;  %vm349_vm2 = vcmask (!%p189_p2), 818176  }
   0x7   : > { %941 = vmatpush3.bf16.msra.mxu0 (!%p189_p2), %v1052_v0  ;;  %954 = vmatprep.mubr.msk.bf16.mxu0 (!%p189_p2), %vm1085_vm0, %v1084_v1  ;;  %p217_p3 = scmp.lt.s32.totalorder (!%p189_p2), %s216_s24, 35  ;;  %v1070_v7 = vld [vmem:[%s1368_s3 + $0x10] sm:$0xff] (!%p189_p2)   ;;  %v1056_v8 = vld [vmem:[%s1366_s1 + $0x20] sm:$0xff] (!%p189_p2)   ;;  %v1071_v9 = vld [vmem:[%s1368_s3 + $0x18] sm:$0xff] (!%p189_p2)  }
   0x8   : > { %942 = vmatprep.subr.bf16.mxu0 (!%p189_p2), %v1084_v1  ;;  %1006 = vmatprep.mubr.msk.bf16.mxu1 (!%p189_p2), %vm1085_vm0, %v1084_v1  ;;  %v1058_v10 = vld [vmem:[%s1366_s1 + $0x30] ss:$0 sps:$4 sm:$0x33] (!%p189_p2)   ;;  %v1057_v11 = vld [vmem:[%s1366_s1 + $0x28] sm:$0xff] (!%p189_p2)   ;;  %v1072_v12 = vld [vmem:[%s1368_s3 + $0x20] sm:$0xff] (!%p189_p2)  }
   0x9   : > { %991 = vmatpush3.bf16.msra.mxu1 (!%p189_p2), %v1068_v4  ;;  %v379_v13 = vsel (!%p189_p2), %vm377_vm1, %v1058_v10, 0  ;;  %v1073_v14 = vld [vmem:[%s1368_s3 + $0x28] sm:$0xff] (!%p189_p2)   ;;  %v1074_v24 = vld [vmem:[%s1368_s3 + $0x30] sm:$0xff] (!%p189_p2)   ;;  %v1075_v25 = vld [vmem:[%s1368_s3 + $0x38] sm:$0xff] (!%p189_p2)  }
   0xa   : > { %992 = vmatprep.subr.bf16.mxu1 (!%p189_p2), %v1084_v1  ;;  %v1233_v26 = vld [vmem:[%s1367_s2] ss:$0 sm:$0xff] (!%p189_p2)  ;;  %v1238_v28 = vld [vmem:[%s1367_s2 + $0x1] ss:$0 sm:$0xff] (!%p189_p2) }
   0xb   : > { %943 = vmatpush3.bf16.msra.mxu0 (!%p189_p2), %v1053_v2 }
   0xc   : > { %944 = vmatprep.subr.bf16.mxu0 (!%p189_p2), %v1084_v1 }
   0xd   : > { %s1372_s24 = smov (!%p217_p3, %s216_s24), 35  ;;  %993 = vmatpush3.bf16.msra.mxu1 %v1069_v5 }
   0xe   : > { %s866_s8 = sshll.u32 %s1372_s24, 2  ;;  %994 = vmatprep.subr.bf16.mxu1 %v1084_v1  ;;  %s867_s13 = sshll.u32 %s1372_s24, 3 }
   0xf   : > { %945 = vmatpush3.bf16.msra.mxu0 %v1054_v3  ;;  %s1157_s11 = scalar_lea.vmem %s1365_s0, %s866_s8  ;;  %s1307_s19 = scalar_lea.vmem %s1370_s5, %s867_s13 }
  0x10   : > { %946 = vmatprep.subr.bf16.mxu0 %v1084_v1  ;;  %v1059_v15 = vld [vmem:[%s1157_s11] sm:$0xff]   ;;  %v1060_v16 = vld [vmem:[%s1157_s11 + $0x8] sm:$0xff]   ;;  %v1061_v17 = vld [vmem:[%s1157_s11 + $0x10] sm:$0xff]  }
  0x11   : > { %995 = vmatpush3.bf16.msra.mxu1 %v1070_v7  ;;  %v1062_v18 = vld [vmem:[%s1157_s11 + $0x18] sm:$0xff]   ;;  %v1063_v19 = vld [vmem:[%s1157_s11 + $0x20] sm:$0xff]   ;;  %v1064_v20 = vld [vmem:[%s1157_s11 + $0x28] sm:$0xff]  }
  0x12   : > { %996 = vmatprep.subr.bf16.mxu1 %v1084_v1  ;;  %v1065_v21 = vld [vmem:[%s1157_s11 + $0x30] sm:$0xff]   ;;  %v1066_v22 = vld [vmem:[%s1157_s11 + $0x38] sm:$0xff]   ;;  %v1067_v23 = vld [vmem:[%s1157_s11 + $0x40] sm:$0xff]  }
  0x13   : > { %947 = vmatpush3.bf16.msra.mxu0 %v1055_v6 }
  0x14   : > { %948 = vmatprep.subr.bf16.mxu0 %v1084_v1 }
  0x15   : > { %997 = vmatpush3.bf16.msra.mxu1 %v1071_v9 }
  0x16   : > { %998 = vmatprep.subr.bf16.mxu1 %v1084_v1 }
  0x17   : > { %949 = vmatpush3.bf16.msra.mxu0 %v1056_v8 }
  0x18   : > { %950 = vmatprep.subr.bf16.mxu0 %v1084_v1 }
  0x19   : > { %999 = vmatpush3.bf16.msra.mxu1 %v1072_v12 }
  0x1a   : > { %1000 = vmatprep.subr.bf16.mxu1 %v1084_v1 }
  0x1b   : > { %951 = vmatpush3.bf16.msra.mxu0 %v1057_v11 }
  0x1c   : > { %952 = vmatprep.subr.bf16.mxu0 %v1084_v1 }
  0x1d   : > { %1001 = vmatpush3.bf16.msra.mxu1 %v1073_v14 }
  0x1e   : > { %1002 = vmatprep.subr.bf16.mxu1 %v1084_v1 }
  0x1f   : > { %953 = vmatpush3.bf16.msra.mxu0 %v379_v13 }
  0x21   : > { %1003 = vmatpush3.bf16.msra.mxu1 %v1074_v24 }
  0x22   : > { %955 = vmatmul.mubr.msk.bf16.vlgmr.msra.gmra.mrb[0].mxu0 %vm349_vm2, %v1059_v15  ;;  %1004 = vmatprep.subr.bf16.mxu1 %v1084_v1 }
  0x23   : > { %958 = vmatprep.mubr.msk.bf16.mxu0 %vm1085_vm0, %v1084_v1 }
  0x25   : > { %1005 = vmatpush3.bf16.msra.mxu1 %v1075_v25 }
  0x2a   : > { %959 = vmatmul.mubr.msk.bf16.gmra.mrb[4].mxu0 %vm349_vm2, %v1060_v16 }
  0x2b   : > { %962 = vmatprep.mubr.msk.bf16.mxu0 %vm1085_vm0, %v1084_v1 }
  0x32   : > { %963 = vmatmul.mubr.msk.bf16.gmra.mrb[8].mxu0 %vm349_vm2, %v1061_v17 }
  0x33   : > { %966 = vmatprep.mubr.msk.bf16.mxu0 %vm1085_vm0, %v1084_v1 }
  0x3a   : > { %967 = vmatmul.mubr.msk.bf16.gmra.mrb[12].mxu0 %vm349_vm2, %v1062_v18 }
  0x3b   : > { %970 = vmatprep.mubr.msk.bf16.mxu0 %vm1085_vm0, %v1084_v1 }
  0x42   : > { %971 = vmatmul.mubr.msk.bf16.gmra.mrb[16].mxu0 %vm349_vm2, %v1063_v19 }
  0x43   : > { %974 = vmatprep.mubr.msk.bf16.mxu0 %vm1085_vm0, %v1084_v1 }
  0x4a   : > { %975 = vmatmul.mubr.msk.bf16.gmra.mrb[20].mxu0 %vm349_vm2, %v1064_v20 }
  0x4b   : > { %978 = vmatprep.mubr.msk.bf16.mxu0 %vm1085_vm0, %v1084_v1 }
  0x52   : > { %979 = vmatmul.mubr.msk.bf16.gmra.mrb[24].mxu0 %vm349_vm2, %v1065_v21 }
  0x53   : > { %982 = vmatprep.mubr.msk.bf16.mxu0 %vm1085_vm0, %v1084_v1 }
  0x5a   : > { %983 = vmatmul.mubr.msk.bf16.gmra.mrb[28].mxu0 %vm349_vm2, %v1066_v22 }
  0x5b   : > { %986 = vmatprep.mubr.msk.bf16.mxu0 %vm1085_vm0, %v1084_v1 }
  0x62   : > { %987 = vmatmul.mubr.msk.bf16.gmra.mrb[32].mxu0 %vm349_vm2, %v1067_v23 }
  0xf5   : > { %v415_v27 = vpop.f32.mrb[0].mxu0 }
  0xf6   : > { %v416_v29 = vadd.f32 %v1233_v26, %v415_v27  ;;  %v956_v30 = vpop.f32.mrb[1].mxu0 }
  0xf7   : > { %v418_v31 = vpop.f32.mrb[2].mxu0 }
  0xf8   : > { %v509_v32 = vmul.f32 %v1238_v28, %v416_v29  ;;  %v419_v33 = vadd.f32 %v1233_v26, %v418_v31  ;;  %v957_v34 = vpop.f32.mrb[3].mxu0  ;;  %vm486_vm3 = vcmp.ge.f32.partialorder %v416_v29, 0.0 }
  0xfa   : > { %vm487_vm4 = vcmp.ge.f32.partialorder %v419_v33, 0.0  ;;  %v510_v35 = vmul.f32 %v1238_v28, %v419_v33  ;;  %v527_v36 = vsel %vm486_vm3, %v416_v29, %v509_v32 }
  0xfc   : > { %v528_v37 = vsel %vm487_vm4, %v419_v33, %v510_v35 }
  0xfd   : > { %v423_v38 = vpop.f32.mrb[4].mxu0  ;;  %v545_v39 = vpack.c.bf16 %v528_v37, %v527_v36 }
  0xfe   : > { %v424_v40 = vadd.f32 %v1233_v26, %v423_v38  ;;  %v960_v41 = vpop.f32.mrb[5].mxu0 }
  0xff   : > { %v426_v42 = vpop.f32.mrb[6].mxu0  ;;  %1007 = vmatmul.mubr.bf16.vlgmr.msra.gmra.mrb[0].mxu1 %v545_v39 }
 0x100   : > { %v511_v43 = vmul.f32 %v1238_v28, %v424_v40  ;;  %v427_v44 = vadd.f32 %v1233_v26, %v426_v42  ;;  %v961_v45 = vpop.f32.mrb[7].mxu0  ;;  %1010 = vmatprep.mubr.msk.bf16.mxu1 %vm1085_vm0, %v1084_v1  ;;  %vm488_vm5 = vcmp.ge.f32.partialorder %v424_v40, 0.0 }
 0x102   : > { %vm489_vm6 = vcmp.ge.f32.partialorder %v427_v44, 0.0  ;;  %v512_v46 = vmul.f32 %v1238_v28, %v427_v44  ;;  %v529_v47 = vsel %vm488_vm5, %v424_v40, %v511_v43 }
 0x104   : > { %v530_v48 = vsel %vm489_vm6, %v427_v44, %v512_v46 }
 0x105   : > { %v431_v49 = vpop.f32.mrb[8].mxu0  ;;  %v546_v50 = vpack.c.bf16 %v530_v48, %v529_v47 }
 0x106   : > { %v432_v51 = vadd.f32 %v1233_v26, %v431_v49  ;;  %v964_v52 = vpop.f32.mrb[9].mxu0 }
 0x107   : > { %v434_v53 = vpop.f32.mrb[10].mxu0  ;;  %1011 = vmatmul.mubr.bf16.gmra.mrb[4].mxu1 %v546_v50 }
 0x108   : > { %v513_v54 = vmul.f32 %v1238_v28, %v432_v51  ;;  %v435_v55 = vadd.f32 %v1233_v26, %v434_v53  ;;  %v965_v56 = vpop.f32.mrb[11].mxu0  ;;  %1014 = vmatprep.mubr.msk.bf16.mxu1 %vm1085_vm0, %v1084_v1  ;;  %vm490_vm7 = vcmp.ge.f32.partialorder %v432_v51, 0.0 }
 0x10a   : > { %vm491_vm8 = vcmp.ge.f32.partialorder %v435_v55, 0.0  ;;  %v514_v57 = vmul.f32 %v1238_v28, %v435_v55  ;;  %v531_v58 = vsel %vm490_vm7, %v432_v51, %v513_v54 }
 0x10c   : > { %v532_v59 = vsel %vm491_vm8, %v435_v55, %v514_v57 }
 0x10d   : > { %v439_v60 = vpop.f32.mrb[12].mxu0  ;;  %v547_v61 = vpack.c.bf16 %v532_v59, %v531_v58 }
 0x10e   : > { %v440_v62 = vadd.f32 %v1233_v26, %v439_v60  ;;  %v968_v63 = vpop.f32.mrb[13].mxu0 }
 0x10f   : > { %v442_v0 = vpop.f32.mrb[14].mxu0  ;;  %1015 = vmatmul.mubr.bf16.gmra.mrb[8].mxu1 %v547_v61 }
 0x110   : > { %v515_v2 = vmul.f32 %v1238_v28, %v440_v62  ;;  %v443_v3 = vadd.f32 %v1233_v26, %v442_v0  ;;  %v969_v4 = vpop.f32.mrb[15].mxu0  ;;  %1018 = vmatprep.mubr.msk.bf16.mxu1 %vm1085_vm0, %v1084_v1  ;;  %vm492_vm9 = vcmp.ge.f32.partialorder %v440_v62, 0.0 }
 0x112   : > { %vm493_vm10 = vcmp.ge.f32.partialorder %v443_v3, 0.0  ;;  %v516_v5 = vmul.f32 %v1238_v28, %v443_v3  ;;  %v533_v6 = vsel %vm492_vm9, %v440_v62, %v515_v2 }
 0x114   : > { %v534_v7 = vsel %vm493_vm10, %v443_v3, %v516_v5  ;;  %v1295_v3 = vld [vmem:[%s1369_s4] ss:$0 sm:$0xff] }
 0x115   : > { %v447_v8 = vpop.f32.mrb[16].mxu0  ;;  %v548_v9 = vpack.c.bf16 %v534_v7, %v533_v6 }
 0x116   : > { %v448_v10 = vadd.f32 %v1233_v26, %v447_v8  ;;  %v972_v11 = vpop.f32.mrb[17].mxu0 }
 0x117   : > { %v450_v12 = vpop.f32.mrb[18].mxu0  ;;  %1019 = vmatmul.mubr.bf16.gmra.mrb[12].mxu1 %v548_v9 }
 0x118   : > { %v517_v13 = vmul.f32 %v1238_v28, %v448_v10  ;;  %v451_v14 = vadd.f32 %v1233_v26, %v450_v12  ;;  %v973_v15 = vpop.f32.mrb[19].mxu0  ;;  %1022 = vmatprep.mubr.msk.bf16.mxu1 %vm1085_vm0, %v1084_v1  ;;  %vm494_vm11 = vcmp.ge.f32.partialorder %v448_v10, 0.0 }
 0x11a   : > { %vm495_vm12 = vcmp.ge.f32.partialorder %v451_v14, 0.0  ;;  %v518_v16 = vmul.f32 %v1238_v28, %v451_v14  ;;  %v535_v17 = vsel %vm494_vm11, %v448_v10, %v517_v13 }
 0x11c   : > { %v536_v18 = vsel %vm495_vm12, %v451_v14, %v518_v16 }
 0x11d   : > { %v455_v19 = vpop.f32.mrb[20].mxu0  ;;  %v549_v20 = vpack.c.bf16 %v536_v18, %v535_v17 }
 0x11e   : > { %v456_v21 = vadd.f32 %v1233_v26, %v455_v19  ;;  %v976_v22 = vpop.f32.mrb[21].mxu0 }
 0x11f   : > { %v458_v23 = vpop.f32.mrb[22].mxu0  ;;  %1023 = vmatmul.mubr.bf16.gmra.mrb[16].mxu1 %v549_v20 }
 0x120   : > { %v519_v24 = vmul.f32 %v1238_v28, %v456_v21  ;;  %v459_v25 = vadd.f32 %v1233_v26, %v458_v23  ;;  %v977_v27 = vpop.f32.mrb[23].mxu0  ;;  %1026 = vmatprep.mubr.msk.bf16.mxu1 %vm1085_vm0, %v1084_v1  ;;  %vm496_vm13 = vcmp.ge.f32.partialorder %v456_v21, 0.0 }
 0x122   : > { %vm497_vm14 = vcmp.ge.f32.partialorder %v459_v25, 0.0  ;;  %v520_v29 = vmul.f32 %v1238_v28, %v459_v25  ;;  %v537_v30 = vsel %vm496_vm13, %v456_v21, %v519_v24 }
 0x124   : > { %v538_v31 = vsel %vm497_vm14, %v459_v25, %v520_v29 }
 0x125   : > { %v463_v32 = vpop.f32.mrb[24].mxu0  ;;  %v550_v33 = vpack.c.bf16 %v538_v31, %v537_v30 }
 0x126   : > { %v464_v34 = vadd.f32 %v1233_v26, %v463_v32  ;;  %v980_v35 = vpop.f32.mrb[25].mxu0 }
 0x127   : > { %v466_v36 = vpop.f32.mrb[26].mxu0  ;;  %1027 = vmatmul.mubr.bf16.gmra.mrb[20].mxu1 %v550_v33 }
 0x128   : > { %v521_v37 = vmul.f32 %v1238_v28, %v464_v34  ;;  %v467_v38 = vadd.f32 %v1233_v26, %v466_v36  ;;  %v981_v39 = vpop.f32.mrb[27].mxu0  ;;  %1030 = vmatprep.mubr.msk.bf16.mxu1 %vm1085_vm0, %v1084_v1  ;;  %vm498_vm15 = vcmp.ge.f32.partialorder %v464_v34, 0.0 }
 0x12a   : > { %vm499_vm1 = vcmp.ge.f32.partialorder %v467_v38, 0.0  ;;  %v522_v40 = vmul.f32 %v1238_v28, %v467_v38  ;;  %v539_v41 = vsel %vm498_vm15, %v464_v34, %v521_v37 }
 0x12c   : > { %v540_v42 = vsel %vm499_vm1, %v467_v38, %v522_v40 }
 0x12d   : > { %v471_v43 = vpop.f32.mrb[28].mxu0  ;;  %v551_v44 = vpack.c.bf16 %v540_v42, %v539_v41 }
 0x12e   : > { %v472_v45 = vadd.f32 %v1233_v26, %v471_v43  ;;  %v984_v46 = vpop.f32.mrb[29].mxu0 }
 0x12f   : > { %v474_v47 = vpop.f32.mrb[30].mxu0  ;;  %1031 = vmatmul.mubr.bf16.gmra.mrb[24].mxu1 %v551_v44 }
 0x130   : > { %v523_v48 = vmul.f32 %v1238_v28, %v472_v45  ;;  %v475_v49 = vadd.f32 %v1233_v26, %v474_v47  ;;  %v985_v50 = vpop.f32.mrb[31].mxu0  ;;  %1034 = vmatprep.mubr.msk.bf16.mxu1 %vm1085_vm0, %v1084_v1  ;;  %vm500_vm2 = vcmp.ge.f32.partialorder %v472_v45, 0.0 }
 0x132   : > { %vm501_vm3 = vcmp.ge.f32.partialorder %v475_v49, 0.0  ;;  %v524_v51 = vmul.f32 %v1238_v28, %v475_v49  ;;  %v541_v52 = vsel %vm500_vm2, %v472_v45, %v523_v48 }
 0x134   : > { %v542_v53 = vsel %vm501_vm3, %v475_v49, %v524_v51 }
 0x135   : > { %v479_v54 = vpop.f32.mrb[32].mxu0  ;;  %v552_v55 = vpack.c.bf16 %v542_v53, %v541_v52 }
 0x136   : > { %v480_v56 = vadd.f32 %v1233_v26, %v479_v54  ;;  %v988_v57 = vpop.f32.mrb[33].mxu0 }
 0x137   : > { %v482_v58 = vpop.f32.mrb[34].mxu0  ;;  %1035 = vmatmul.mubr.bf16.gmra.mrb[28].mxu1 %v552_v55 }
 0x138   : > { %vm502_vm4 = vcmp.ge.f32.partialorder %v480_v56, 0.0  ;;  %v525_v59 = vmul.f32 %v1238_v28, %v480_v56  ;;  %v483_v60 = vadd.f32 %v1233_v26, %v482_v58  ;;  %v989_v61 = vpop.f32.mrb[35].mxu0  ;;  %1038 = vmatprep.mubr.msk.bf16.mxu1 %vm1085_vm0, %v1084_v1  ;;  %v1301_v26 = vld [vmem:[%s1369_s4 + $0x1] ss:$0 sm:$0xff] }
 0x13a   : > { %vm503_vm5 = vcmp.ge.f32.partialorder %v483_v60, 0.0  ;;  %v526_v62 = vmul.f32 %v1238_v28, %v483_v60  ;;  %v543_v63 = vsel %vm502_vm4, %v480_v56, %v525_v59 }
 0x13c   : > { %v544_v0 = vsel %vm503_vm5, %v483_v60, %v526_v62 }
 0x13d   : > { %v553_v2 = vpack.c.bf16 %v544_v0, %v543_v63 }
 0x13f   : > { %1039 = vmatmul.mubr.bf16.gmra.mrb[32].mxu1 %v553_v2 }
 0x1d2   : > { %v657_v4 = vpop.f32.mrb[0].mxu1 }
 0x1d3   : > { %v658_v1 = vadd.f32 %v1295_v3, %v657_v4  ;;  %v1008_v5 = vpop.f32.mrb[1].mxu1 }
 0x1d4   : > { %v660_v28 = vpop.f32.mrb[2].mxu1 }
 0x1d5   : > { %vm728_vm0 = vcmp.ge.f32.partialorder %v658_v1, 0.0  ;;  %v751_v6 = vmul.f32 %v1301_v26, %v658_v1  ;;  %v661_v7 = vadd.f32 %v1295_v3, %v660_v28  ;;  %v1009_v8 = vpop.f32.mrb[3].mxu1 }
 0x1d7   : > { %v769_v9 = vsel %vm728_vm0, %v658_v1, %v751_v6  ;;  %vm729_vm6 = vcmp.ge.f32.partialorder %v661_v7, 0.0  ;;  %v752_v10 = vmul.f32 %v1301_v26, %v661_v7 }
 0x1d8   : > { %787 = vst [vmem:[%s1307_s19] sm:$0xff] %v769_v9 }
 0x1d9   : > { %v770_v11 = vsel %vm729_vm6, %v661_v7, %v752_v10 }
 0x1da   : > { %788 = vst [vmem:[%s1307_s19 + $0x8] sm:$0xff] %v770_v11  ;;  %v665_v12 = vpop.f32.mrb[4].mxu1 }
 0x1db   : > { %v666_v13 = vadd.f32 %v1295_v3, %v665_v12  ;;  %v1012_v14 = vpop.f32.mrb[5].mxu1 }
 0x1dc   : > { %v668_v15 = vpop.f32.mrb[6].mxu1 }
 0x1dd   : > { %vm730_vm7 = vcmp.ge.f32.partialorder %v666_v13, 0.0  ;;  %v753_v16 = vmul.f32 %v1301_v26, %v666_v13  ;;  %v669_v17 = vadd.f32 %v1295_v3, %v668_v15  ;;  %v1013_v18 = vpop.f32.mrb[7].mxu1 }
 0x1df   : > { %v771_v19 = vsel %vm730_vm7, %v666_v13, %v753_v16  ;;  %vm731_vm8 = vcmp.ge.f32.partialorder %v669_v17, 0.0  ;;  %v754_v20 = vmul.f32 %v1301_v26, %v669_v17 }
 0x1e0   : > { %789 = vst [vmem:[%s1307_s19 + $0x10] sm:$0xff] %v771_v19 }
 0x1e1   : > { %v772_v21 = vsel %vm731_vm8, %v669_v17, %v754_v20 }
 0x1e2   : > { %790 = vst [vmem:[%s1307_s19 + $0x18] sm:$0xff] %v772_v21  ;;  %v673_v22 = vpop.f32.mrb[8].mxu1 }
 0x1e3   : > { %v674_v23 = vadd.f32 %v1295_v3, %v673_v22  ;;  %v1016_v24 = vpop.f32.mrb[9].mxu1 }
 0x1e4   : > { %v676_v25 = vpop.f32.mrb[10].mxu1 }
 0x1e5   : > { %vm732_vm9 = vcmp.ge.f32.partialorder %v674_v23, 0.0  ;;  %v755_v27 = vmul.f32 %v1301_v26, %v674_v23  ;;  %v677_v29 = vadd.f32 %v1295_v3, %v676_v25  ;;  %v1017_v30 = vpop.f32.mrb[11].mxu1 }
 0x1e7   : > { %v773_v31 = vsel %vm732_vm9, %v674_v23, %v755_v27  ;;  %vm733_vm10 = vcmp.ge.f32.partialorder %v677_v29, 0.0  ;;  %v756_v32 = vmul.f32 %v1301_v26, %v677_v29 }
 0x1e8   : > { %791 = vst [vmem:[%s1307_s19 + $0x20] sm:$0xff] %v773_v31 }
 0x1e9   : > { %v774_v33 = vsel %vm733_vm10, %v677_v29, %v756_v32 }
 0x1ea   : > { %792 = vst [vmem:[%s1307_s19 + $0x28] sm:$0xff] %v774_v33  ;;  %v681_v34 = vpop.f32.mrb[12].mxu1 }
 0x1eb   : > { %v682_v35 = vadd.f32 %v1295_v3, %v681_v34  ;;  %v1020_v36 = vpop.f32.mrb[13].mxu1 }
 0x1ec   : > { %v684_v37 = vpop.f32.mrb[14].mxu1 }
 0x1ed   : > { %vm734_vm11 = vcmp.ge.f32.partialorder %v682_v35, 0.0  ;;  %v757_v38 = vmul.f32 %v1301_v26, %v682_v35  ;;  %v685_v39 = vadd.f32 %v1295_v3, %v684_v37  ;;  %v1021_v40 = vpop.f32.mrb[15].mxu1 }
 0x1ef   : > { %v775_v41 = vsel %vm734_vm11, %v682_v35, %v757_v38  ;;  %vm735_vm12 = vcmp.ge.f32.partialorder %v685_v39, 0.0  ;;  %v758_v42 = vmul.f32 %v1301_v26, %v685_v39 }
 0x1f0   : > { %793 = vst [vmem:[%s1307_s19 + $0x30] sm:$0xff] %v775_v41 }
 0x1f1   : > { %v776_v43 = vsel %vm735_vm12, %v685_v39, %v758_v42 }
 0x1f2   : > { %794 = vst [vmem:[%s1307_s19 + $0x38] sm:$0xff] %v776_v43  ;;  %v689_v44 = vpop.f32.mrb[16].mxu1 }
 0x1f3   : > { %v690_v45 = vadd.f32 %v1295_v3, %v689_v44  ;;  %v1024_v46 = vpop.f32.mrb[17].mxu1 }
 0x1f4   : > { %v692_v47 = vpop.f32.mrb[18].mxu1 }
 0x1f5   : > { %vm736_vm13 = vcmp.ge.f32.partialorder %v690_v45, 0.0  ;;  %v759_v48 = vmul.f32 %v1301_v26, %v690_v45  ;;  %v693_v49 = vadd.f32 %v1295_v3, %v692_v47  ;;  %v1025_v50 = vpop.f32.mrb[19].mxu1 }
 0x1f7   : > { %v777_v51 = vsel %vm736_vm13, %v690_v45, %v759_v48  ;;  %vm737_vm14 = vcmp.ge.f32.partialorder %v693_v49, 0.0  ;;  %v760_v52 = vmul.f32 %v1301_v26, %v693_v49 }
 0x1f8   : > { %795 = vst [vmem:[%s1307_s19 + $0x40] sm:$0xff] %v777_v51 }
 0x1f9   : > { %v778_v53 = vsel %vm737_vm14, %v693_v49, %v760_v52 }
 0x1fa   : > { %796 = vst [vmem:[%s1307_s19 + $0x48] sm:$0xff] %v778_v53  ;;  %v697_v54 = vpop.f32.mrb[20].mxu1 }
 0x1fb   : > { %v698_v55 = vadd.f32 %v1295_v3, %v697_v54  ;;  %v1028_v56 = vpop.f32.mrb[21].mxu1 }
 0x1fc   : > { %v700_v57 = vpop.f32.mrb[22].mxu1 }
 0x1fd   : > { %vm738_vm15 = vcmp.ge.f32.partialorder %v698_v55, 0.0  ;;  %v761_v58 = vmul.f32 %v1301_v26, %v698_v55  ;;  %v701_v59 = vadd.f32 %v1295_v3, %v700_v57  ;;  %v1029_v60 = vpop.f32.mrb[23].mxu1 }
 0x1ff   : > { %v779_v61 = vsel %vm738_vm15, %v698_v55, %v761_v58  ;;  %vm739_vm1 = vcmp.ge.f32.partialorder %v701_v59, 0.0  ;;  %v762_v62 = vmul.f32 %v1301_v26, %v701_v59 }
 0x200   : > { %797 = vst [vmem:[%s1307_s19 + $0x50] sm:$0xff] %v779_v61 }
 0x201   : > { %v780_v63 = vsel %vm739_vm1, %v701_v59, %v762_v62 }
 0x202   : > { %798 = vst [vmem:[%s1307_s19 + $0x58] sm:$0xff] %v780_v63  ;;  %v705_v0 = vpop.f32.mrb[24].mxu1 }
 0x203   : > { %v706_v2 = vadd.f32 %v1295_v3, %v705_v0  ;;  %v1032_v4 = vpop.f32.mrb[25].mxu1 }
 0x204   : > { %v708_v1 = vpop.f32.mrb[26].mxu1 }
 0x205   : > { %vm740_vm2 = vcmp.ge.f32.partialorder %v706_v2, 0.0  ;;  %v763_v5 = vmul.f32 %v1301_v26, %v706_v2  ;;  %v709_v28 = vadd.f32 %v1295_v3, %v708_v1  ;;  %v1033_v6 = vpop.f32.mrb[27].mxu1 }
 0x207   : > { %v781_v7 = vsel %vm740_vm2, %v706_v2, %v763_v5  ;;  %vm741_vm3 = vcmp.ge.f32.partialorder %v709_v28, 0.0  ;;  %v764_v8 = vmul.f32 %v1301_v26, %v709_v28 }
 0x208   : > { %799 = vst [vmem:[%s1307_s19 + $0x60] sm:$0xff] %v781_v7 }
 0x209   : > { %v782_v9 = vsel %vm741_vm3, %v709_v28, %v764_v8 }
 0x20a   : > { %800 = vst [vmem:[%s1307_s19 + $0x68] sm:$0xff] %v782_v9  ;;  %v713_v10 = vpop.f32.mrb[28].mxu1 }
 0x20b   : > { %v714_v11 = vadd.f32 %v1295_v3, %v713_v10  ;;  %v1036_v12 = vpop.f32.mrb[29].mxu1 }
 0x20c   : > { %v716_v13 = vpop.f32.mrb[30].mxu1 }
 0x20d   : > { %vm742_vm4 = vcmp.ge.f32.partialorder %v714_v11, 0.0  ;;  %v765_v14 = vmul.f32 %v1301_v26, %v714_v11  ;;  %v717_v15 = vadd.f32 %v1295_v3, %v716_v13  ;;  %v1037_v16 = vpop.f32.mrb[31].mxu1 }
 0x20f   : > { %v783_v17 = vsel %vm742_vm4, %v714_v11, %v765_v14  ;;  %vm743_vm5 = vcmp.ge.f32.partialorder %v717_v15, 0.0  ;;  %v766_v18 = vmul.f32 %v1301_v26, %v717_v15 }
 0x210   : > { %801 = vst [vmem:[%s1307_s19 + $0x70] sm:$0xff] %v783_v17 }
 0x211   : > { %v784_v19 = vsel %vm743_vm5, %v717_v15, %v766_v18 }
 0x212   : > { %802 = vst [vmem:[%s1307_s19 + $0x78] sm:$0xff] %v784_v19  ;;  %v721_v20 = vpop.f32.mrb[32].mxu1 }
 0x213   : > { %v722_v21 = vadd.f32 %v1295_v3, %v721_v20  ;;  %v1040_v22 = vpop.f32.mrb[33].mxu1 }
 0x214   : > { %v724_v23 = vpop.f32.mrb[34].mxu1 }
 0x215   : > { %vm744_vm0 = vcmp.ge.f32.partialorder %v722_v21, 0.0  ;;  %v767_v24 = vmul.f32 %v1301_v26, %v722_v21  ;;  %v725_v25 = vadd.f32 %v1295_v3, %v724_v23  ;;  %v1041_v27 = vpop.f32.mrb[35].mxu1 }
 0x217   : > { %v785_v29 = vsel %vm744_vm0, %v722_v21, %v767_v24  ;;  %vm745_vm6 = vcmp.ge.f32.partialorder %v725_v25, 0.0  ;;  %v768_v30 = vmul.f32 %v1301_v26, %v725_v25 }
 0x218   : > { %803 = vst [vmem:[%s1307_s19 + $0x80] sm:$0xff] %v785_v29 }
 0x219   : > { %v786_v31 = vsel %vm745_vm6, %v725_v25, %v768_v30 }
 0x21a   : > { %804 = vst [vmem:[%s1307_s19 + $0x88] sm:$0xff] %v786_v31 }
 0x21b PF: > { %s15_s18 = sadd.s32 1, %s1082_s18  }
 0x21c   : > { %p12_p4 = scmp.ge.s32.totalorder %s15_s18, 4  }
 0x21e   :  { %14 = sbr.rel (!%p12_p4) target bundleno = 1 (0x1), region = 70 }

// kernel: forward.12
= control target key start
LH: loop header
LB: loop body
LE: loop exit
PB: predicated region body
PF: predicated region fallthrough
CT: control target
= control target key end

     0   :  { %v580_v0 = vmov 0.0   ;;  %vm581_vm0 = vmmov 0   ;;  %s801_s1 = inlined_call_operand.vmem [shape: bf16[128,128], index: 1, kind: input, shape index: {}]   ;;  %s802_s0 = inlined_call_operand.vmem [shape: bf16[80,128], index: 0, kind: input, shape index: {}]   ;;  %s803_s3 = inlined_call_operand.vmem [shape: bf16[128,128], index: 3, kind: input, shape index: {}]   ;;  %s804_s2 = inlined_call_operand.vmem [shape: f32[8,128], index: 2, kind: input, shape index: {}]   ;;  %s805_s4 = inlined_call_operand.vmem [shape: f32[8,128], index: 4, kind: input, shape index: {}]   ;;  %s806_s5 = inlined_call_operand.vmem [shape: f32[80,128], index: 5, kind: output, shape index: {}]  }
   0x1   :  { %485 = vmatprep.subr.bf16.mxu0 %v580_v0  ;;  %v559_v1 = vld [vmem:[%s801_s1] sm:$0xff]   ;;  %501 = vmatprep.mubr.msk.bf16.mxu0 %vm581_vm0, %v580_v0  ;;  %v560_v2 = vld [vmem:[%s801_s1 + $0x8] sm:$0xff]   ;;  %v561_v3 = vld [vmem:[%s801_s1 + $0x10] sm:$0xff]  }
   0x2   :  { %521 = vmatprep.subr.bf16.mxu1 %v580_v0  ;;  %537 = vmatprep.mubr.msk.bf16.mxu1 %vm581_vm0, %v580_v0  ;;  %v562_v4 = vld [vmem:[%s801_s1 + $0x18] sm:$0xff]   ;;  %v572_v5 = vld [vmem:[%s803_s3] sm:$0xff]   ;;  %v573_v7 = vld [vmem:[%s803_s3 + $0x8] sm:$0xff]  }
   0x3   :  { %486 = vmatpush3.bf16.msra.mxu0 %v559_v1  ;;  %v563_v6 = vld [vmem:[%s801_s1 + $0x20] sm:$0xff]   ;;  %522 = vmatpush3.bf16.msra.mxu1 %v572_v5  ;;  %v564_v8 = vld [vmem:[%s801_s1 + $0x28] sm:$0xff]   ;;  %v574_v9 = vld [vmem:[%s803_s3 + $0x10] sm:$0xff]  }
   0x4   :  { %487 = vmatprep.subr.bf16.mxu0 %v580_v0  ;;  %523 = vmatprep.subr.bf16.mxu1 %v580_v0  ;;  %v565_v10 = vld [vmem:[%s801_s1 + $0x30] sm:$0xff]   ;;  %v575_v11 = vld [vmem:[%s803_s3 + $0x18] sm:$0xff]   ;;  %v576_v13 = vld [vmem:[%s803_s3 + $0x20] sm:$0xff]  }
   0x5   :  { %v566_v12 = vld [vmem:[%s801_s1 + $0x38] sm:$0xff]   ;;  %v567_v14 = vld [vmem:[%s802_s0] sm:$0xff]   ;;  %v577_v15 = vld [vmem:[%s803_s3 + $0x28] sm:$0xff]  }
   0x6   :  { %v568_v16 = vld [vmem:[%s802_s0 + $0x8] sm:$0xff]   ;;  %v569_v17 = vld [vmem:[%s802_s0 + $0x10] sm:$0xff]   ;;  %v570_v18 = vld [vmem:[%s802_s0 + $0x18] sm:$0xff]  }
   0x7   :  { %488 = vmatpush3.bf16.msra.mxu0 %v560_v2  ;;  %524 = vmatpush3.bf16.msra.mxu1 %v573_v7  ;;  %v571_v19 = vld [vmem:[%s802_s0 + $0x20] sm:$0xff]   ;;  %v578_v20 = vld [vmem:[%s803_s3 + $0x30] sm:$0xff]   ;;  %v579_v21 = vld [vmem:[%s803_s3 + $0x38] sm:$0xff]  }
   0x8   :  { %489 = vmatprep.subr.bf16.mxu0 %v580_v0  ;;  %525 = vmatprep.subr.bf16.mxu1 %v580_v0  ;;  %v706_v22 = vld [vmem:[%s804_s2] ss:$0 sm:$0xff]  ;;  %v711_v24 = vld [vmem:[%s804_s2 + $0x1] ss:$0 sm:$0xff] }
   0xb   :  { %490 = vmatpush3.bf16.msra.mxu0 %v561_v3  ;;  %526 = vmatpush3.bf16.msra.mxu1 %v574_v9 }
   0xc   :  { %491 = vmatprep.subr.bf16.mxu0 %v580_v0  ;;  %527 = vmatprep.subr.bf16.mxu1 %v580_v0 }
   0xf   :  { %492 = vmatpush3.bf16.msra.mxu0 %v562_v4  ;;  %528 = vmatpush3.bf16.msra.mxu1 %v575_v11 }
  0x10   :  { %493 = vmatprep.subr.bf16.mxu0 %v580_v0  ;;  %529 = vmatprep.subr.bf16.mxu1 %v580_v0 }
  0x13   :  { %494 = vmatpush3.bf16.msra.mxu0 %v563_v6  ;;  %530 = vmatpush3.bf16.msra.mxu1 %v576_v13 }
  0x14   :  { %495 = vmatprep.subr.bf16.mxu0 %v580_v0  ;;  %531 = vmatprep.subr.bf16.mxu1 %v580_v0 }
  0x17   :  { %496 = vmatpush3.bf16.msra.mxu0 %v564_v8  ;;  %532 = vmatpush3.bf16.msra.mxu1 %v577_v15 }
  0x18   :  { %497 = vmatprep.subr.bf16.mxu0 %v580_v0  ;;  %533 = vmatprep.subr.bf16.mxu1 %v580_v0 }
  0x1b   :  { %498 = vmatpush3.bf16.msra.mxu0 %v565_v10  ;;  %534 = vmatpush3.bf16.msra.mxu1 %v578_v20 }
  0x1c   :  { %499 = vmatprep.subr.bf16.mxu0 %v580_v0  ;;  %535 = vmatprep.subr.bf16.mxu1 %v580_v0 }
  0x1f   :  { %500 = vmatpush3.bf16.msra.mxu0 %v566_v12  ;;  %536 = vmatpush3.bf16.msra.mxu1 %v579_v21 }
  0x22   :  { %502 = vmatmul.mubr.bf16.vlgmr.msra.gmra.mrb[0].mxu0 %v567_v14 }
  0x23   :  { %505 = vmatprep.mubr.msk.bf16.mxu0 %vm581_vm0, %v580_v0 }
  0x2a   :  { %506 = vmatmul.mubr.bf16.gmra.mrb[4].mxu0 %v568_v16  ;;  %v744_v16 = vld [vmem:[%s805_s4] ss:$0 sm:$0xff] }
  0x2b   :  { %509 = vmatprep.mubr.msk.bf16.mxu0 %vm581_vm0, %v580_v0 }
  0x32   :  { %510 = vmatmul.mubr.bf16.gmra.mrb[8].mxu0 %v569_v17 }
  0x33   :  { %513 = vmatprep.mubr.msk.bf16.mxu0 %vm581_vm0, %v580_v0 }
  0x3a   :  { %514 = vmatmul.mubr.bf16.gmra.mrb[12].mxu0 %v570_v18  ;;  %v749_v18 = vld [vmem:[%s805_s4 + $0x1] ss:$0 sm:$0xff] }
  0x3b   :  { %517 = vmatprep.mubr.msk.bf16.mxu0 %vm581_vm0, %v580_v0 }
  0x42   :  { %518 = vmatmul.mubr.bf16.gmra.mrb[16].mxu0 %v571_v19 }
  0xf5   :  { %v164_v23 = vpop.f32.mrb[0].mxu0 }
  0xf6   :  { %v165_v25 = vadd.f32 %v706_v22, %v164_v23  ;;  %v503_v26 = vpop.f32.mrb[1].mxu0 }
  0xf7   :  { %v167_v27 = vpop.f32.mrb[2].mxu0 }
  0xf8   :  { %v218_v28 = vmul.f32 %v711_v24, %v165_v25  ;;  %v168_v29 = vadd.f32 %v706_v22, %v167_v27  ;;  %v504_v30 = vpop.f32.mrb[3].mxu0  ;;  %vm203_vm1 = vcmp.ge.f32.partialorder %v165_v25, 0.0 }
  0xfa   :  { %vm204_vm2 = vcmp.ge.f32.partialorder %v168_v29, 0.0  ;;  %v219_v31 = vmul.f32 %v711_v24, %v168_v29  ;;  %v228_v32 = vsel %vm203_vm1, %v165_v25, %v218_v28 }
  0xfc   :  { %v229_v33 = vsel %vm204_vm2, %v168_v29, %v219_v31 }
  0xfd   :  { %v172_v34 = vpop.f32.mrb[4].mxu0  ;;  %v238_v35 = vpack.c.bf16 %v229_v33, %v228_v32 }
  0xfe   :  { %v173_v36 = vadd.f32 %v706_v22, %v172_v34  ;;  %v507_v37 = vpop.f32.mrb[5].mxu0 }
  0xff   :  { %v175_v38 = vpop.f32.mrb[6].mxu0  ;;  %538 = vmatmul.mubr.bf16.vlgmr.msra.gmra.mrb[0].mxu1 %v238_v35 }
 0x100   :  { %v220_v39 = vmul.f32 %v711_v24, %v173_v36  ;;  %v176_v40 = vadd.f32 %v706_v22, %v175_v38  ;;  %v508_v41 = vpop.f32.mrb[7].mxu0  ;;  %541 = vmatprep.mubr.msk.bf16.mxu1 %vm581_vm0, %v580_v0  ;;  %vm205_vm3 = vcmp.ge.f32.partialorder %v173_v36, 0.0 }
 0x102   :  { %vm206_vm4 = vcmp.ge.f32.partialorder %v176_v40, 0.0  ;;  %v221_v42 = vmul.f32 %v711_v24, %v176_v40  ;;  %v230_v43 = vsel %vm205_vm3, %v173_v36, %v220_v39 }
 0x104   :  { %v231_v44 = vsel %vm206_vm4, %v176_v40, %v221_v42 }
 0x105   :  { %v180_v45 = vpop.f32.mrb[8].mxu0  ;;  %v239_v46 = vpack.c.bf16 %v231_v44, %v230_v43 }
 0x106   :  { %v181_v47 = vadd.f32 %v706_v22, %v180_v45  ;;  %v511_v48 = vpop.f32.mrb[9].mxu0 }
 0x107   :  { %v183_v49 = vpop.f32.mrb[10].mxu0  ;;  %542 = vmatmul.mubr.bf16.gmra.mrb[4].mxu1 %v239_v46 }
 0x108   :  { %v222_v50 = vmul.f32 %v711_v24, %v181_v47  ;;  %v184_v51 = vadd.f32 %v706_v22, %v183_v49  ;;  %v512_v52 = vpop.f32.mrb[11].mxu0  ;;  %545 = vmatprep.mubr.msk.bf16.mxu1 %vm581_vm0, %v580_v0  ;;  %vm207_vm5 = vcmp.ge.f32.partialorder %v181_v47, 0.0 }
 0x10a   :  { %vm208_vm6 = vcmp.ge.f32.partialorder %v184_v51, 0.0  ;;  %v223_v53 = vmul.f32 %v711_v24, %v184_v51  ;;  %v232_v54 = vsel %vm207_vm5, %v181_v47, %v222_v50 }
 0x10c   :  { %v233_v55 = vsel %vm208_vm6, %v184_v51, %v223_v53 }
 0x10d   :  { %v188_v56 = vpop.f32.mrb[12].mxu0  ;;  %v240_v57 = vpack.c.bf16 %v233_v55, %v232_v54 }
 0x10e   :  { %v189_v58 = vadd.f32 %v706_v22, %v188_v56  ;;  %v515_v59 = vpop.f32.mrb[13].mxu0 }
 0x10f   :  { %v191_v60 = vpop.f32.mrb[14].mxu0  ;;  %546 = vmatmul.mubr.bf16.gmra.mrb[8].mxu1 %v240_v57 }
 0x110   :  { %v224_v61 = vmul.f32 %v711_v24, %v189_v58  ;;  %v192_v62 = vadd.f32 %v706_v22, %v191_v60  ;;  %v516_v63 = vpop.f32.mrb[15].mxu0  ;;  %549 = vmatprep.mubr.msk.bf16.mxu1 %vm581_vm0, %v580_v0  ;;  %vm209_vm7 = vcmp.ge.f32.partialorder %v189_v58, 0.0 }
 0x112   :  { %vm210_vm8 = vcmp.ge.f32.partialorder %v192_v62, 0.0  ;;  %v225_v1 = vmul.f32 %v711_v24, %v192_v62  ;;  %v234_v2 = vsel %vm209_vm7, %v189_v58, %v224_v61 }
 0x114   :  { %v235_v3 = vsel %vm210_vm8, %v192_v62, %v225_v1 }
 0x115   :  { %v196_v4 = vpop.f32.mrb[16].mxu0  ;;  %v241_v5 = vpack.c.bf16 %v235_v3, %v234_v2 }
 0x116   :  { %v197_v6 = vadd.f32 %v706_v22, %v196_v4  ;;  %v519_v7 = vpop.f32.mrb[17].mxu0 }
 0x117   :  { %v199_v8 = vpop.f32.mrb[18].mxu0  ;;  %550 = vmatmul.mubr.bf16.gmra.mrb[12].mxu1 %v241_v5 }
 0x118   :  { %v226_v9 = vmul.f32 %v711_v24, %v197_v6  ;;  %v200_v10 = vadd.f32 %v706_v22, %v199_v8  ;;  %v520_v11 = vpop.f32.mrb[19].mxu0  ;;  %553 = vmatprep.mubr.msk.bf16.mxu1 %vm581_vm0, %v580_v0  ;;  %vm211_vm9 = vcmp.ge.f32.partialorder %v197_v6, 0.0 }
 0x11a   :  { %vm212_vm10 = vcmp.ge.f32.partialorder %v200_v10, 0.0  ;;  %v227_v12 = vmul.f32 %v711_v24, %v200_v10  ;;  %v236_v13 = vsel %vm211_vm9, %v197_v6, %v226_v9 }
 0x11c   :  { %v237_v14 = vsel %vm212_vm10, %v200_v10, %v227_v12 }
 0x11d   :  { %v242_v15 = vpack.c.bf16 %v237_v14, %v236_v13 }
 0x11f   :  { %554 = vmatmul.mubr.bf16.gmra.mrb[16].mxu1 %v242_v15 }
 0x1d2   :  { %v346_v17 = vpop.f32.mrb[0].mxu1 }
 0x1d3   :  { %v347_v0 = vadd.f32 %v744_v16, %v346_v17  ;;  %v539_v19 = vpop.f32.mrb[1].mxu1 }
 0x1d4   :  { %v349_v20 = vpop.f32.mrb[2].mxu1 }
 0x1d5   :  { %vm385_vm11 = vcmp.ge.f32.partialorder %v347_v0, 0.0  ;;  %v400_v21 = vmul.f32 %v749_v18, %v347_v0  ;;  %v350_v22 = vadd.f32 %v744_v16, %v349_v20  ;;  %v540_v23 = vpop.f32.mrb[3].mxu1 }
 0x1d7   :  { %v410_v24 = vsel %vm385_vm11, %v347_v0, %v400_v21  ;;  %vm386_vm12 = vcmp.ge.f32.partialorder %v350_v22, 0.0  ;;  %v401_v25 = vmul.f32 %v749_v18, %v350_v22 }
 0x1d8   :  { %420 = vst [vmem:[%s806_s5] sm:$0xff] %v410_v24 }
 0x1d9   :  { %v411_v26 = vsel %vm386_vm12, %v350_v22, %v401_v25 }
 0x1da   :  { %421 = vst [vmem:[%s806_s5 + $0x8] sm:$0xff] %v411_v26  ;;  %v354_v27 = vpop.f32.mrb[4].mxu1 }
 0x1db   :  { %v355_v28 = vadd.f32 %v744_v16, %v354_v27  ;;  %v543_v29 = vpop.f32.mrb[5].mxu1 }
 0x1dc   :  { %v357_v30 = vpop.f32.mrb[6].mxu1 }
 0x1dd   :  { %vm387_vm13 = vcmp.ge.f32.partialorder %v355_v28, 0.0  ;;  %v402_v31 = vmul.f32 %v749_v18, %v355_v28  ;;  %v358_v32 = vadd.f32 %v744_v16, %v357_v30  ;;  %v544_v33 = vpop.f32.mrb[7].mxu1 }
 0x1df   :  { %v412_v34 = vsel %vm387_vm13, %v355_v28, %v402_v31  ;;  %vm388_vm14 = vcmp.ge.f32.partialorder %v358_v32, 0.0  ;;  %v403_v35 = vmul.f32 %v749_v18, %v358_v32 }
 0x1e0   :  { %422 = vst [vmem:[%s806_s5 + $0x10] sm:$0xff] %v412_v34 }
 0x1e1   :  { %v413_v36 = vsel %vm388_vm14, %v358_v32, %v403_v35 }
 0x1e2   :  { %423 = vst [vmem:[%s806_s5 + $0x18] sm:$0xff] %v413_v36  ;;  %v362_v37 = vpop.f32.mrb[8].mxu1 }
 0x1e3   :  { %v363_v38 = vadd.f32 %v744_v16, %v362_v37  ;;  %v547_v39 = vpop.f32.mrb[9].mxu1 }
 0x1e4   :  { %v365_v40 = vpop.f32.mrb[10].mxu1 }
 0x1e5   :  { %vm389_vm15 = vcmp.ge.f32.partialorder %v363_v38, 0.0  ;;  %v404_v41 = vmul.f32 %v749_v18, %v363_v38  ;;  %v366_v42 = vadd.f32 %v744_v16, %v365_v40  ;;  %v548_v43 = vpop.f32.mrb[11].mxu1 }
 0x1e7   :  { %v414_v44 = vsel %vm389_vm15, %v363_v38, %v404_v41  ;;  %vm390_vm0 = vcmp.ge.f32.partialorder %v366_v42, 0.0  ;;  %v405_v45 = vmul.f32 %v749_v18, %v366_v42 }
 0x1e8   :  { %424 = vst [vmem:[%s806_s5 + $0x20] sm:$0xff] %v414_v44 }
 0x1e9   :  { %v415_v46 = vsel %vm390_vm0, %v366_v42, %v405_v45 }
 0x1ea   :  { %425 = vst [vmem:[%s806_s5 + $0x28] sm:$0xff] %v415_v46  ;;  %v370_v47 = vpop.f32.mrb[12].mxu1 }
 0x1eb   :  { %v371_v48 = vadd.f32 %v744_v16, %v370_v47  ;;  %v551_v49 = vpop.f32.mrb[13].mxu1 }
 0x1ec   :  { %v373_v50 = vpop.f32.mrb[14].mxu1 }
 0x1ed   :  { %vm391_vm1 = vcmp.ge.f32.partialorder %v371_v48, 0.0  ;;  %v406_v51 = vmul.f32 %v749_v18, %v371_v48  ;;  %v374_v52 = vadd.f32 %v744_v16, %v373_v50  ;;  %v552_v53 = vpop.f32.mrb[15].mxu1 }
 0x1ef   :  { %v416_v54 = vsel %vm391_vm1, %v371_v48, %v406_v51  ;;  %vm392_vm2 = vcmp.ge.f32.partialorder %v374_v52, 0.0  ;;  %v407_v55 = vmul.f32 %v749_v18, %v374_v52 }
 0x1f0   :  { %426 = vst [vmem:[%s806_s5 + $0x30] sm:$0xff] %v416_v54 }
 0x1f1   :  { %v417_v56 = vsel %vm392_vm2, %v374_v52, %v407_v55 }
 0x1f2   :  { %427 = vst [vmem:[%s806_s5 + $0x38] sm:$0xff] %v417_v56  ;;  %v378_v57 = vpop.f32.mrb[16].mxu1 }
 0x1f3   :  { %v379_v58 = vadd.f32 %v744_v16, %v378_v57  ;;  %v555_v59 = vpop.f32.mrb[17].mxu1 }
 0x1f4   :  { %v381_v60 = vpop.f32.mrb[18].mxu1 }
 0x1f5   :  { %vm393_vm3 = vcmp.ge.f32.partialorder %v379_v58, 0.0  ;;  %v408_v61 = vmul.f32 %v749_v18, %v379_v58  ;;  %v382_v62 = vadd.f32 %v744_v16, %v381_v60  ;;  %v556_v63 = vpop.f32.mrb[19].mxu1 }
 0x1f7   :  { %v418_v1 = vsel %vm393_vm3, %v379_v58, %v408_v61  ;;  %vm394_vm4 = vcmp.ge.f32.partialorder %v382_v62, 0.0  ;;  %v409_v2 = vmul.f32 %v749_v18, %v382_v62 }
 0x1f8   :  { %428 = vst [vmem:[%s806_s5 + $0x40] sm:$0xff] %v418_v1 }
 0x1f9   :  { %v419_v3 = vsel %vm394_vm4, %v382_v62, %v409_v2 }
 0x1fa   :  { %429 = vst [vmem:[%s806_s5 + $0x48] sm:$0xff] %v419_v3 }

// kernel: forward.13
= control target key start
LH: loop header
LB: loop body
LE: loop exit
PB: predicated region body
PF: predicated region fallthrough
CT: control target
= control target key end

     0   :  { %s1090_s1 = inlined_call_operand.vmem [shape: bf16[256,256], index: 1, kind: input, shape index: {}]   ;;  %s1091_s0 = inlined_call_operand.vmem [shape: bf16[32,256], index: 0, kind: input, shape index: {}]   ;;  %s1092_s3 = inlined_call_operand.vmem [shape: bf16[256,256], index: 3, kind: input, shape index: {}]   ;;  %s1093_s2 = inlined_call_operand.vmem [shape: f32[8,256], index: 2, kind: input, shape index: {}]   ;;  %s1094_s4 = inlined_call_operand.vmem [shape: f32[8,256], index: 4, kind: input, shape index: {}]   ;;  %s1095_s5 = inlined_call_operand.vmem [shape: f32[32,256], index: 5, kind: output, shape index: {}]  }
   0x1   :  { %v718_v0 = vld [vmem:[%s1090_s1 + $0x4] ss:$8 sps:$4 sm:$0xff]   ;;  %v720_v1 = vld [vmem:[%s1090_s1] ss:$8 sps:$4 sm:$0xff]   ;;  %v721_v2 = vld [vmem:[%s1090_s1 + $0x14] ss:$8 sps:$4 sm:$0xff]  }
   0x2   :  { %248 = vmatprep.subr.bf16.mxu0 %v718_v0  ;;  %v723_v3 = vld [vmem:[%s1090_s1 + $0x10] ss:$8 sps:$4 sm:$0xff]   ;;  %v724_v4 = vld [vmem:[%s1090_s1 + $0x24] ss:$8 sps:$4 sm:$0xff]   ;;  %v726_v5 = vld [vmem:[%s1090_s1 + $0x20] ss:$8 sps:$4 sm:$0xff]  }
   0x3   :  { %249 = vmatpush1.bf16.msra.mxu0 %v720_v1  ;;  %v727_v6 = vld [vmem:[%s1090_s1 + $0x34] ss:$8 sps:$4 sm:$0xff]   ;;  %v729_v7 = vld [vmem:[%s1090_s1 + $0x30] ss:$8 sps:$4 sm:$0xff]   ;;  %v730_v8 = vld [vmem:[%s1090_s1 + $0x44] ss:$8 sps:$4 sm:$0xff]  }
   0x4   :  { %250 = vmatprep.subr.bf16.mxu0 %v721_v2  ;;  %v732_v9 = vld [vmem:[%s1090_s1 + $0x40] ss:$8 sps:$4 sm:$0xff]   ;;  %v733_v10 = vld [vmem:[%s1090_s1 + $0x54] ss:$8 sps:$4 sm:$0xff]   ;;  %v735_v11 = vld [vmem:[%s1090_s1 + $0x50] ss:$8 sps:$4 sm:$0xff]  }
   0x5   :  { %v736_v12 = vld [vmem:[%s1090_s1 + $0x64] ss:$8 sps:$4 sm:$0xff]   ;;  %v738_v14 = vld [vmem:[%s1090_s1 + $0x60] ss:$8 sps:$4 sm:$0xff]   ;;  %v739_v15 = vld [vmem:[%s1090_s1 + $0x74] ss:$8 sps:$4 sm:$0xff]  }
   0x6   :  { %v768_v13 = vld [vmem:[%s1091_s0 + $0x4] ss:$8 sps:$4 sm:$0xff]   ;;  %v774_v17 = vld [vmem:[%s1092_s3] ss:$8 sps:$4 sm:$0xff]   ;;  %v741_v18 = vld [vmem:[%s1090_s1 + $0x70] ss:$8 sps:$4 sm:$0xff]  }
   0x7   :  { %251 = vmatpush1.bf16.msra.mxu0 %v723_v3  ;;  %280 = vmatprep.mubr.bf16.mxu0 %v768_v13  ;;  %v772_v16 = vld [vmem:[%s1092_s3 + $0x4] ss:$8 sps:$4 sm:$0xff]   ;;  %v775_v19 = vld [vmem:[%s1092_s3 + $0x14] ss:$8 sps:$4 sm:$0xff]   ;;  %v777_v21 = vld [vmem:[%s1092_s3 + $0x10] ss:$8 sps:$4 sm:$0xff]  }
   0x8   :  { %252 = vmatprep.subr.bf16.mxu0 %v724_v4  ;;  %546 = vmatprep.subr.bf16.mxu1 %v772_v16  ;;  %v742_v20 = vld [vmem:[%s1090_s1 + $0x84] ss:$8 sps:$4 sm:$0xff]   ;;  %v744_v23 = vld [vmem:[%s1090_s1 + $0x80] ss:$8 sps:$4 sm:$0xff]   ;;  %v745_v24 = vld [vmem:[%s1090_s1 + $0x94] ss:$8 sps:$4 sm:$0xff]   ;;  %v58_v4 = vlaneseq }
   0x9   :  { %547 = vmatpush1.bf16.msra.mxu1 %v774_v17  ;;  %v778_v22 = vld [vmem:[%s1092_s3 + $0x24] ss:$8 sps:$4 sm:$0xff]   ;;  %v780_v25 = vld [vmem:[%s1092_s3 + $0x20] ss:$8 sps:$4 sm:$0xff]   ;;  %v781_v26 = vld [vmem:[%s1092_s3 + $0x34] ss:$8 sps:$4 sm:$0xff]  }
   0xa   :  { %548 = vmatprep.subr.bf16.mxu1 %v775_v19  ;;  %v747_v27 = vld [vmem:[%s1090_s1 + $0x90] ss:$8 sps:$4 sm:$0xff]   ;;  %v748_v28 = vld [vmem:[%s1090_s1 + $0xa4] ss:$8 sps:$4 sm:$0xff]   ;;  %v750_v31 = vld [vmem:[%s1090_s1 + $0xa0] ss:$8 sps:$4 sm:$0xff]  }
   0xb   :  { %253 = vmatpush1.bf16.msra.mxu0 %v726_v5  ;;  %v783_v29 = vld [vmem:[%s1092_s3 + $0x30] ss:$8 sps:$4 sm:$0xff]   ;;  %v784_v30 = vld [vmem:[%s1092_s3 + $0x44] ss:$8 sps:$4 sm:$0xff]   ;;  %v751_v32 = vld [vmem:[%s1090_s1 + $0xb4] ss:$8 sps:$4 sm:$0xff]  }
   0xc   :  { %254 = vmatprep.subr.bf16.mxu0 %v727_v6  ;;  %v786_v33 = vld [vmem:[%s1092_s3 + $0x40] ss:$8 sps:$4 sm:$0xff]   ;;  %v787_v34 = vld [vmem:[%s1092_s3 + $0x54] ss:$8 sps:$4 sm:$0xff]   ;;  %v753_v35 = vld [vmem:[%s1090_s1 + $0xb0] ss:$8 sps:$4 sm:$0xff]  }
   0xd   :  { %549 = vmatpush1.bf16.msra.mxu1 %v777_v21  ;;  %v789_v36 = vld [vmem:[%s1092_s3 + $0x50] ss:$8 sps:$4 sm:$0xff]   ;;  %v754_v37 = vld [vmem:[%s1090_s1 + $0xc4] ss:$8 sps:$4 sm:$0xff]   ;;  %v756_v39 = vld [vmem:[%s1090_s1 + $0xc0] ss:$8 sps:$4 sm:$0xff]  }
   0xe   :  { %550 = vmatprep.subr.bf16.mxu1 %v778_v22  ;;  %v790_v38 = vld [vmem:[%s1092_s3 + $0x64] ss:$8 sps:$4 sm:$0xff]   ;;  %v792_v40 = vld [vmem:[%s1092_s3 + $0x60] ss:$8 sps:$4 sm:$0xff]   ;;  %v757_v41 = vld [vmem:[%s1090_s1 + $0xd4] ss:$8 sps:$4 sm:$0xff]  }
   0xf   :  { %255 = vmatpush1.bf16.msra.mxu0 %v729_v7  ;;  %v793_v42 = vld [vmem:[%s1092_s3 + $0x74] ss:$8 sps:$4 sm:$0xff]   ;;  %v759_v43 = vld [vmem:[%s1090_s1 + $0xd0] ss:$8 sps:$4 sm:$0xff]   ;;  %v760_v45 = vld [vmem:[%s1090_s1 + $0xe4] ss:$8 sps:$4 sm:$0xff]  }
  0x10   :  { %256 = vmatprep.subr.bf16.mxu0 %v730_v8  ;;  %v795_v44 = vld [vmem:[%s1092_s3 + $0x70] ss:$8 sps:$4 sm:$0xff]   ;;  %v796_v46 = vld [vmem:[%s1092_s3 + $0x84] ss:$8 sps:$4 sm:$0xff]   ;;  %v762_v47 = vld [vmem:[%s1090_s1 + $0xe0] ss:$8 sps:$4 sm:$0xff]  }
  0x11   :  { %551 = vmatpush1.bf16.msra.mxu1 %v780_v25  ;;  %v798_v48 = vld [vmem:[%s1092_s3 + $0x80] ss:$8 sps:$4 sm:$0xff]   ;;  %v763_v49 = vld [vmem:[%s1090_s1 + $0xf4] ss:$8 sps:$4 sm:$0xff]   ;;  %v765_v51 = vld [vmem:[%s1090_s1 + $0xf0] ss:$8 sps:$4 sm:$0xff]  }
  0x12   :  { %552 = vmatprep.subr.bf16.mxu1 %v781_v26  ;;  %v799_v50 = vld [vmem:[%s1092_s3 + $0x94] ss:$8 sps:$4 sm:$0xff]   ;;  %v801_v52 = vld [vmem:[%s1092_s3 + $0x90] ss:$8 sps:$4 sm:$0xff]   ;;  %v802_v53 = vld [vmem:[%s1092_s3 + $0xa4] ss:$8 sps:$4 sm:$0xff]  }
  0x13   :  { %257 = vmatpush1.bf16.msra.mxu0 %v732_v9  ;;  %v766_v54 = vld [vmem:[%s1091_s0] ss:$8 sps:$4 sm:$0xff]   ;;  %v769_v55 = vld [vmem:[%s1091_s0 + $0x14] ss:$8 sps:$4 sm:$0xff]   ;;  %v807_v58 = vld [vmem:[%s1092_s3 + $0xb0] ss:$8 sps:$4 sm:$0xff]  }
  0x14   :  { %258 = vmatprep.subr.bf16.mxu0 %v733_v10  ;;  %v804_v56 = vld [vmem:[%s1092_s3 + $0xa0] ss:$8 sps:$4 sm:$0xff]   ;;  %v805_v57 = vld [vmem:[%s1092_s3 + $0xb4] ss:$8 sps:$4 sm:$0xff]   ;;  %v808_v59 = vld [vmem:[%s1092_s3 + $0xc4] ss:$8 sps:$4 sm:$0xff]  }
  0x15   :  { %553 = vmatpush1.bf16.msra.mxu1 %v783_v29  ;;  %v771_v60 = vld [vmem:[%s1091_s0 + $0x10] ss:$8 sps:$4 sm:$0xff]   ;;  %v810_v61 = vld [vmem:[%s1092_s3 + $0xc0] ss:$8 sps:$4 sm:$0xff]   ;;  %v811_v62 = vld [vmem:[%s1092_s3 + $0xd4] ss:$8 sps:$4 sm:$0xff]  }
  0x16   :  { %554 = vmatprep.subr.bf16.mxu1 %v784_v30  ;;  %v813_v63 = vld [vmem:[%s1092_s3 + $0xd0] ss:$8 sps:$4 sm:$0xff]   ;;  %v814_v0 = vld [vmem:[%s1092_s3 + $0xe4] ss:$8 sps:$4 sm:$0xff]   ;;  %v816_v1 = vld [vmem:[%s1092_s3 + $0xe0] ss:$8 sps:$4 sm:$0xff]  }
  0x17   :  { %259 = vmatpush1.bf16.msra.mxu0 %v735_v11  ;;  %v817_v2 = vld [vmem:[%s1092_s3 + $0xf4] ss:$8 sps:$4 sm:$0xff]   ;;  %v819_v3 = vld [vmem:[%s1092_s3 + $0xf0] ss:$8 sps:$4 sm:$0xff]   ;;  %v59_v5 = vshrl.u32 %v58_v4, 7 }
  0x18   :  { %260 = vmatprep.subr.bf16.mxu0 %v736_v12  ;;  %v56_v7 = vld [vmem:[%s1093_s2] ss:$8 sm:$0x3]  ;;  %v684_v9 = vld [vmem:[%s1093_s2 + $0x1] ss:$8 sm:$0x3] }
  0x19   :  { %555 = vmatpush1.bf16.msra.mxu1 %v786_v33  ;;  %v60_v6 = vsub.s32 0, %v59_v5  ;;  %v64_v8 = vsub.s32 1, %v59_v5 }
  0x1a   :  { %556 = vmatprep.subr.bf16.mxu1 %v787_v34 }
  0x1b   :  { %261 = vmatpush1.bf16.msra.mxu0 %v738_v14  ;;  %v61_v10 = vrot.slane %v56_v7, %v60_v6  ;;  %v65_v11 = vrot.slane %v56_v7, %v64_v8  ;;  %v315_v12 = vrot.slane %v684_v9, %v60_v6  ;;  %v319_v14 = vrot.slane %v684_v9, %v64_v8 }
  0x1c   :  { %262 = vmatprep.subr.bf16.mxu0 %v739_v15 }
  0x1d   :  { %557 = vmatpush1.bf16.msra.mxu1 %v789_v36 }
  0x1e   :  { %558 = vmatprep.subr.bf16.mxu1 %v790_v38 }
  0x1f   :  { %263 = vmatpush1.bf16.msra.mxu0 %v741_v18 }
  0x20   :  { %264 = vmatprep.subr.bf16.mxu0 %v742_v20 }
  0x21   :  { %559 = vmatpush1.bf16.msra.mxu1 %v792_v40 }
  0x22   :  { %560 = vmatprep.subr.bf16.mxu1 %v793_v42 }
  0x23   :  { %265 = vmatpush1.bf16.msra.mxu0 %v744_v23 }
  0x24   :  { %266 = vmatprep.subr.bf16.mxu0 %v745_v24 }
  0x25   :  { %561 = vmatpush1.bf16.msra.mxu1 %v795_v44 }
  0x26   :  { %562 = vmatprep.subr.bf16.mxu1 %v796_v46 }
  0x27   :  { %267 = vmatpush1.bf16.msra.mxu0 %v747_v27 }
  0x28   :  { %268 = vmatprep.subr.bf16.mxu0 %v748_v28 }
  0x29   :  { %563 = vmatpush1.bf16.msra.mxu1 %v798_v48 }
  0x2a   :  { %564 = vmatprep.subr.bf16.mxu1 %v799_v50  ;;  %v374_v50 = vld [vmem:[%s1094_s4] ss:$8 sm:$0x3] }
  0x2b   :  { %269 = vmatpush1.bf16.msra.mxu0 %v750_v31 }
  0x2c   :  { %270 = vmatprep.subr.bf16.mxu0 %v751_v32 }
  0x2d   :  { %565 = vmatpush1.bf16.msra.mxu1 %v801_v52  ;;  %v379_v52 = vrot.slane %v374_v50, %v60_v6 }
  0x2e   :  { %566 = vmatprep.subr.bf16.mxu1 %v802_v53  ;;  %v383_v53 = vrot.slane %v374_v50, %v64_v8 }
  0x2f   :  { %271 = vmatpush1.bf16.msra.mxu0 %v753_v35 }
  0x30   :  { %272 = vmatprep.subr.bf16.mxu0 %v754_v37 }
  0x31   :  { %567 = vmatpush1.bf16.msra.mxu1 %v804_v56 }
  0x32   :  { %568 = vmatprep.subr.bf16.mxu1 %v805_v57 }
  0x33   :  { %273 = vmatpush1.bf16.msra.mxu0 %v756_v39 }
  0x34   :  { %274 = vmatprep.subr.bf16.mxu0 %v757_v41 }
  0x35   :  { %569 = vmatpush1.bf16.msra.mxu1 %v807_v58 }
  0x36   :  { %570 = vmatprep.subr.bf16.mxu1 %v808_v59 }
  0x37   :  { %275 = vmatpush1.bf16.msra.mxu0 %v759_v43 }
  0x38   :  { %276 = vmatprep.subr.bf16.mxu0 %v760_v45 }
  0x39   :  { %571 = vmatpush1.bf16.msra.mxu1 %v810_v61 }
  0x3a   :  { %572 = vmatprep.subr.bf16.mxu1 %v811_v62 }
  0x3b   :  { %277 = vmatpush1.bf16.msra.mxu0 %v762_v47 }
  0x3c   :  { %278 = vmatprep.subr.bf16.mxu0 %v763_v49 }
  0x3d   :  { %573 = vmatpush1.bf16.msra.mxu1 %v813_v63 }
  0x3e   :  { %574 = vmatprep.subr.bf16.mxu1 %v814_v0 }
  0x3f   :  { %279 = vmatpush1.bf16.msra.mxu0 %v765_v51  ;;  %v717_v51 = vld [vmem:[%s1094_s4 + $0x1] ss:$8 sm:$0x3] }
  0x40   :  { %v617_v56 = vrot.slane %v717_v51, %v64_v8 }
  0x41   :  { %575 = vmatpush1.bf16.msra.mxu1 %v816_v1 }
  0x42   :  { %281 = vmatmul.mubr.bf16.vlgmr.msra.gmra.mrb[0].mxu0 %v766_v54  ;;  %576 = vmatprep.subr.bf16.mxu1 %v817_v2  ;;  %v613_v54 = vrot.slane %v717_v51, %v60_v6 }
  0x43   :  { %290 = vmatprep.mubr.bf16.mxu0 %v769_v55 }
  0x45   :  { %577 = vmatpush1.bf16.msra.mxu1 %v819_v3 }
  0x4a   :  { %291 = vmatmul.mubr.bf16.gmra.mrb[4].mxu0 %v771_v60 }
 0x115   :  { %v282_v13 = vpop.f32.mrb[0].mxu0 }
 0x116   :  { %v283_v15 = vadd.f32 %v282_v13, %v61_v10  ;;  %v284_v16 = vpop.f32.mrb[1].mxu0 }
 0x117   :  { %v285_v17 = vadd.f32 %v284_v16, %v65_v11  ;;  %v286_v18 = vpop.f32.mrb[2].mxu0 }
 0x118   :  { %v322_v19 = vmul.f32 %v315_v12, %v283_v15  ;;  %v287_v20 = vadd.f32 %v286_v18, %v61_v10  ;;  %v288_v21 = vpop.f32.mrb[3].mxu0  ;;  %vm301_vm0 = vcmp.ge.f32.partialorder %v283_v15, 0.0 }
 0x119   :  { %v323_v22 = vmul.f32 %v319_v14, %v285_v17  ;;  %v289_v23 = vadd.f32 %v288_v21, %v65_v11  ;;  %vm302_vm2 = vcmp.ge.f32.partialorder %v285_v17, 0.0 }
 0x11a   :  { %vm303_vm1 = vcmp.ge.f32.partialorder %v287_v20, 0.0  ;;  %v324_v24 = vmul.f32 %v315_v12, %v287_v20  ;;  %v330_v26 = vsel %vm301_vm0, %v283_v15, %v322_v19 }
 0x11b   :  { %v325_v25 = vmul.f32 %v319_v14, %v289_v23  ;;  %vm304_vm3 = vcmp.ge.f32.partialorder %v289_v23, 0.0  ;;  %v331_v29 = vsel %vm302_vm2, %v285_v17, %v323_v22 }
 0x11c   :  { %v332_v27 = vsel %vm303_vm1, %v287_v20, %v324_v24 }
 0x11d   :  { %v292_v28 = vpop.f32.mrb[4].mxu0  ;;  %v333_v30 = vsel %vm304_vm3, %v289_v23, %v325_v25  ;;  %v338_v31 = vpack.c.bf16 %v332_v27, %v330_v26 }
 0x11e   :  { %v293_v32 = vadd.f32 %v292_v28, %v61_v10  ;;  %v294_v33 = vpop.f32.mrb[5].mxu0  ;;  %v339_v34 = vpack.c.bf16 %v333_v30, %v331_v29 }
 0x11f   :  { %v295_v35 = vadd.f32 %v294_v33, %v65_v11  ;;  %v296_v36 = vpop.f32.mrb[6].mxu0 }
 0x120   :  { %v326_v37 = vmul.f32 %v315_v12, %v293_v32  ;;  %v297_v38 = vadd.f32 %v296_v36, %v61_v10  ;;  %v298_v39 = vpop.f32.mrb[7].mxu0  ;;  %578 = vmatprep.mubr.bf16.mxu1 %v339_v34  ;;  %vm305_vm4 = vcmp.ge.f32.partialorder %v293_v32, 0.0 }
 0x121   :  { %v327_v40 = vmul.f32 %v319_v14, %v295_v35  ;;  %v299_v41 = vadd.f32 %v298_v39, %v65_v11  ;;  %579 = vmatmul.mubr.bf16.vlgmr.msra.gmra.mrb[0].mxu1 %v338_v31  ;;  %vm306_vm5 = vcmp.ge.f32.partialorder %v295_v35, 0.0 }
 0x122   :  { %vm307_vm6 = vcmp.ge.f32.partialorder %v297_v38, 0.0  ;;  %v328_v42 = vmul.f32 %v315_v12, %v297_v38  ;;  %v334_v44 = vsel %vm305_vm4, %v293_v32, %v326_v37 }
 0x123   :  { %vm308_vm7 = vcmp.ge.f32.partialorder %v299_v41, 0.0  ;;  %v329_v43 = vmul.f32 %v319_v14, %v299_v41  ;;  %v335_v46 = vsel %vm306_vm5, %v295_v35, %v327_v40 }
 0x124   :  { %v336_v45 = vsel %vm307_vm6, %v297_v38, %v328_v42 }
 0x125   :  { %v337_v47 = vsel %vm308_vm7, %v299_v41, %v329_v43  ;;  %v340_v48 = vpack.c.bf16 %v336_v45, %v334_v44 }
 0x126   :  { %v341_v49 = vpack.c.bf16 %v337_v47, %v335_v46 }
 0x128   :  { %588 = vmatprep.mubr.bf16.mxu1 %v341_v49 }
 0x129   :  { %589 = vmatmul.mubr.bf16.gmra.mrb[4].mxu1 %v340_v48 }
 0x1f4   :  { %v580_v55 = vpop.f32.mrb[0].mxu1 }
 0x1f5   :  { %v581_v57 = vadd.f32 %v580_v55, %v379_v52  ;;  %v582_v58 = vpop.f32.mrb[1].mxu1 }
 0x1f6   :  { %v583_v59 = vadd.f32 %v582_v58, %v383_v53  ;;  %v584_v60 = vpop.f32.mrb[2].mxu1 }
 0x1f7   :  { %vm599_vm8 = vcmp.ge.f32.partialorder %v581_v57, 0.0  ;;  %v620_v61 = vmul.f32 %v613_v54, %v581_v57  ;;  %v585_v62 = vadd.f32 %v584_v60, %v379_v52  ;;  %v586_v63 = vpop.f32.mrb[3].mxu1 }
 0x1f8   :  { %vm600_vm9 = vcmp.ge.f32.partialorder %v583_v59, 0.0  ;;  %v621_v0 = vmul.f32 %v617_v56, %v583_v59  ;;  %v587_v1 = vadd.f32 %v586_v63, %v383_v53 }
 0x1f9   :  { %v628_v2 = vsel %vm599_vm8, %v581_v57, %v620_v61  ;;  %vm601_vm10 = vcmp.ge.f32.partialorder %v585_v62, 0.0  ;;  %v622_v3 = vmul.f32 %v613_v54, %v585_v62 }
 0x1fa   :  { %636 = vst [vmem:[%s1095_s5] sm:$0xff] %v628_v2  ;;  %v629_v4 = vsel %vm600_vm9, %v583_v59, %v621_v0  ;;  %vm602_vm11 = vcmp.ge.f32.partialorder %v587_v1, 0.0  ;;  %v623_v5 = vmul.f32 %v617_v56, %v587_v1 }
 0x1fb   :  { %637 = vst [vmem:[%s1095_s5 + $0x8] sm:$0xff] %v629_v4  ;;  %v630_v6 = vsel %vm601_vm10, %v585_v62, %v622_v3 }
 0x1fc   :  { %638 = vst [vmem:[%s1095_s5 + $0x10] sm:$0xff] %v630_v6  ;;  %v631_v7 = vsel %vm602_vm11, %v587_v1, %v623_v5  ;;  %v590_v8 = vpop.f32.mrb[4].mxu1 }
 0x1fd   :  { %639 = vst [vmem:[%s1095_s5 + $0x18] sm:$0xff] %v631_v7  ;;  %v591_v9 = vadd.f32 %v590_v8, %v379_v52  ;;  %v592_v10 = vpop.f32.mrb[5].mxu1 }
 0x1fe   :  { %v593_v11 = vadd.f32 %v592_v10, %v383_v53  ;;  %v594_v12 = vpop.f32.mrb[6].mxu1 }
 0x1ff   :  { %vm603_vm12 = vcmp.ge.f32.partialorder %v591_v9, 0.0  ;;  %v624_v13 = vmul.f32 %v613_v54, %v591_v9  ;;  %v595_v14 = vadd.f32 %v594_v12, %v379_v52  ;;  %v596_v15 = vpop.f32.mrb[7].mxu1 }
 0x200   :  { %vm604_vm13 = vcmp.ge.f32.partialorder %v593_v11, 0.0  ;;  %v625_v16 = vmul.f32 %v617_v56, %v593_v11  ;;  %v597_v17 = vadd.f32 %v596_v15, %v383_v53 }
 0x201   :  { %v632_v18 = vsel %vm603_vm12, %v591_v9, %v624_v13  ;;  %vm605_vm14 = vcmp.ge.f32.partialorder %v595_v14, 0.0  ;;  %v626_v19 = vmul.f32 %v613_v54, %v595_v14 }
 0x202   :  { %640 = vst [vmem:[%s1095_s5 + $0x20] sm:$0xff] %v632_v18  ;;  %v633_v20 = vsel %vm604_vm13, %v593_v11, %v625_v16  ;;  %vm606_vm15 = vcmp.ge.f32.partialorder %v597_v17, 0.0  ;;  %v627_v21 = vmul.f32 %v617_v56, %v597_v17 }
 0x203   :  { %641 = vst [vmem:[%s1095_s5 + $0x28] sm:$0xff] %v633_v20  ;;  %v634_v22 = vsel %vm605_vm14, %v595_v14, %v626_v19 }
 0x204   :  { %642 = vst [vmem:[%s1095_s5 + $0x30] sm:$0xff] %v634_v22  ;;  %v635_v23 = vsel %vm606_vm15, %v597_v17, %v627_v21 }
 0x205   :  { %643 = vst [vmem:[%s1095_s5 + $0x38] sm:$0xff] %v635_v23 }

// kernel: forward.18
= control target key start
LH: loop header
LB: loop body
LE: loop exit
PB: predicated region body
PF: predicated region fallthrough
CT: control target
= control target key end

     0   :  { %s1138_s1 = inlined_call_operand.vmem [shape: bf16[256,512], index: 1, kind: input, shape index: {}]   ;;  %s1139_s0 = inlined_call_operand.vmem [shape: bf16[32,256], index: 0, kind: input, shape index: {}]   ;;  %s1140_s2 = inlined_call_operand.vmem [shape: f32[8,512], index: 2, kind: input, shape index: {}]   ;;  %s1141_s3 = inlined_call_operand.vmem [shape: f32[32,512], index: 3, kind: output, shape index: {}]  }
   0x1   :  { %v710_v0 = vld [vmem:[%s1138_s1 + $0x4] ss:$16 sps:$4 sm:$0xff]   ;;  %v712_v1 = vld [vmem:[%s1138_s1 + $0xc] ss:$16 sps:$4 sm:$0xff]   ;;  %v714_v2 = vld [vmem:[%s1138_s1] ss:$16 sps:$4 sm:$0xff]  }
   0x2   :  { %444 = vmatprep.subr.bf16.mxu0 %v710_v0  ;;  %v715_v3 = vld [vmem:[%s1138_s1 + $0x8] ss:$16 sps:$4 sm:$0xff]   ;;  %497 = vmatprep.subr.bf16.mxu1 %v712_v1  ;;  %v716_v4 = vld [vmem:[%s1138_s1 + $0x24] ss:$16 sps:$4 sm:$0xff]   ;;  %v718_v5 = vld [vmem:[%s1138_s1 + $0x2c] ss:$16 sps:$4 sm:$0xff]  }
   0x3   :  { %445 = vmatpush1.bf16.msra.mxu0 %v714_v2  ;;  %498 = vmatpush1.bf16.msra.mxu1 %v715_v3  ;;  %v720_v6 = vld [vmem:[%s1138_s1 + $0x20] ss:$16 sps:$4 sm:$0xff]   ;;  %v721_v7 = vld [vmem:[%s1138_s1 + $0x28] ss:$16 sps:$4 sm:$0xff]   ;;  %v722_v8 = vld [vmem:[%s1138_s1 + $0x44] ss:$16 sps:$4 sm:$0xff]  }
   0x4   :  { %446 = vmatprep.subr.bf16.mxu0 %v716_v4  ;;  %499 = vmatprep.subr.bf16.mxu1 %v718_v5  ;;  %v724_v9 = vld [vmem:[%s1138_s1 + $0x4c] ss:$16 sps:$4 sm:$0xff]   ;;  %v726_v10 = vld [vmem:[%s1138_s1 + $0x40] ss:$16 sps:$4 sm:$0xff]   ;;  %v727_v11 = vld [vmem:[%s1138_s1 + $0x48] ss:$16 sps:$4 sm:$0xff]   ;;  %v84_v4 = vlaneseq }
   0x5   :  { %v728_v12 = vld [vmem:[%s1138_s1 + $0x64] ss:$16 sps:$4 sm:$0xff]   ;;  %v730_v13 = vld [vmem:[%s1138_s1 + $0x6c] ss:$16 sps:$4 sm:$0xff]   ;;  %v732_v14 = vld [vmem:[%s1138_s1 + $0x60] ss:$16 sps:$4 sm:$0xff]  }
   0x6   :  { %v733_v15 = vld [vmem:[%s1138_s1 + $0x68] ss:$16 sps:$4 sm:$0xff]   ;;  %v734_v16 = vld [vmem:[%s1138_s1 + $0x84] ss:$16 sps:$4 sm:$0xff]   ;;  %v736_v17 = vld [vmem:[%s1138_s1 + $0x8c] ss:$16 sps:$4 sm:$0xff]  }
   0x7   :  { %447 = vmatpush1.bf16.msra.mxu0 %v720_v6  ;;  %500 = vmatpush1.bf16.msra.mxu1 %v721_v7  ;;  %v738_v18 = vld [vmem:[%s1138_s1 + $0x80] ss:$16 sps:$4 sm:$0xff]   ;;  %v739_v19 = vld [vmem:[%s1138_s1 + $0x88] ss:$16 sps:$4 sm:$0xff]   ;;  %v740_v20 = vld [vmem:[%s1138_s1 + $0xa4] ss:$16 sps:$4 sm:$0xff]  }
   0x8   :  { %448 = vmatprep.subr.bf16.mxu0 %v722_v8  ;;  %501 = vmatprep.subr.bf16.mxu1 %v724_v9  ;;  %v742_v21 = vld [vmem:[%s1138_s1 + $0xac] ss:$16 sps:$4 sm:$0xff]   ;;  %v744_v22 = vld [vmem:[%s1138_s1 + $0xa0] ss:$16 sps:$4 sm:$0xff]   ;;  %v745_v23 = vld [vmem:[%s1138_s1 + $0xa8] ss:$16 sps:$4 sm:$0xff]  }
   0x9   :  { %v746_v24 = vld [vmem:[%s1138_s1 + $0xc4] ss:$16 sps:$4 sm:$0xff]   ;;  %v748_v25 = vld [vmem:[%s1138_s1 + $0xcc] ss:$16 sps:$4 sm:$0xff]   ;;  %v750_v26 = vld [vmem:[%s1138_s1 + $0xc0] ss:$16 sps:$4 sm:$0xff]  }
   0xa   :  { %v751_v27 = vld [vmem:[%s1138_s1 + $0xc8] ss:$16 sps:$4 sm:$0xff]   ;;  %v752_v28 = vld [vmem:[%s1138_s1 + $0xe4] ss:$16 sps:$4 sm:$0xff]   ;;  %v754_v29 = vld [vmem:[%s1138_s1 + $0xec] ss:$16 sps:$4 sm:$0xff]  }
   0xb   :  { %449 = vmatpush1.bf16.msra.mxu0 %v726_v10  ;;  %502 = vmatpush1.bf16.msra.mxu1 %v727_v11  ;;  %v756_v30 = vld [vmem:[%s1138_s1 + $0xe0] ss:$16 sps:$4 sm:$0xff]   ;;  %v757_v31 = vld [vmem:[%s1138_s1 + $0xe8] ss:$16 sps:$4 sm:$0xff]   ;;  %v758_v32 = vld [vmem:[%s1138_s1 + $0x104] ss:$16 sps:$4 sm:$0xff]  }
   0xc   :  { %450 = vmatprep.subr.bf16.mxu0 %v728_v12  ;;  %503 = vmatprep.subr.bf16.mxu1 %v730_v13  ;;  %v760_v33 = vld [vmem:[%s1138_s1 + $0x10c] ss:$16 sps:$4 sm:$0xff]   ;;  %v762_v34 = vld [vmem:[%s1138_s1 + $0x100] ss:$16 sps:$4 sm:$0xff]   ;;  %v763_v35 = vld [vmem:[%s1138_s1 + $0x108] ss:$16 sps:$4 sm:$0xff]  }
   0xd   :  { %v764_v36 = vld [vmem:[%s1138_s1 + $0x124] ss:$16 sps:$4 sm:$0xff]   ;;  %v766_v37 = vld [vmem:[%s1138_s1 + $0x12c] ss:$16 sps:$4 sm:$0xff]   ;;  %v768_v38 = vld [vmem:[%s1138_s1 + $0x120] ss:$16 sps:$4 sm:$0xff]  }
   0xe   :  { %v769_v39 = vld [vmem:[%s1138_s1 + $0x128] ss:$16 sps:$4 sm:$0xff]   ;;  %v770_v40 = vld [vmem:[%s1138_s1 + $0x144] ss:$16 sps:$4 sm:$0xff]   ;;  %v772_v41 = vld [vmem:[%s1138_s1 + $0x14c] ss:$16 sps:$4 sm:$0xff]  }
   0xf   :  { %451 = vmatpush1.bf16.msra.mxu0 %v732_v14  ;;  %504 = vmatpush1.bf16.msra.mxu1 %v733_v15  ;;  %v774_v42 = vld [vmem:[%s1138_s1 + $0x140] ss:$16 sps:$4 sm:$0xff]   ;;  %v775_v43 = vld [vmem:[%s1138_s1 + $0x148] ss:$16 sps:$4 sm:$0xff]   ;;  %v776_v44 = vld [vmem:[%s1138_s1 + $0x164] ss:$16 sps:$4 sm:$0xff]  }
  0x10   :  { %452 = vmatprep.subr.bf16.mxu0 %v734_v16  ;;  %505 = vmatprep.subr.bf16.mxu1 %v736_v17  ;;  %v778_v45 = vld [vmem:[%s1138_s1 + $0x16c] ss:$16 sps:$4 sm:$0xff]   ;;  %v780_v46 = vld [vmem:[%s1138_s1 + $0x160] ss:$16 sps:$4 sm:$0xff]   ;;  %v781_v48 = vld [vmem:[%s1138_s1 + $0x168] ss:$16 sps:$4 sm:$0xff]  }
  0x11   :  { %v808_v47 = vld [vmem:[%s1139_s0 + $0x4] ss:$8 sps:$4 sm:$0xff]   ;;  %v786_v51 = vld [vmem:[%s1138_s1 + $0x180] ss:$16 sps:$4 sm:$0xff]   ;;  %v787_v52 = vld [vmem:[%s1138_s1 + $0x188] ss:$16 sps:$4 sm:$0xff]  }
  0x12   :  { %v782_v49 = vld [vmem:[%s1138_s1 + $0x184] ss:$16 sps:$4 sm:$0xff]   ;;  %v784_v50 = vld [vmem:[%s1138_s1 + $0x18c] ss:$16 sps:$4 sm:$0xff]   ;;  %476 = vmatprep.mubr.bf16.mxu0 %v808_v47  ;;  %529 = vmatprep.mubr.bf16.mxu1 %v808_v47  ;;  %v792_v55 = vld [vmem:[%s1138_s1 + $0x1a0] ss:$16 sps:$4 sm:$0xff]  }
  0x13   :  { %453 = vmatpush1.bf16.msra.mxu0 %v738_v18  ;;  %506 = vmatpush1.bf16.msra.mxu1 %v739_v19  ;;  %v788_v53 = vld [vmem:[%s1138_s1 + $0x1a4] ss:$16 sps:$4 sm:$0xff]   ;;  %v790_v54 = vld [vmem:[%s1138_s1 + $0x1ac] ss:$16 sps:$4 sm:$0xff]   ;;  %v793_v56 = vld [vmem:[%s1138_s1 + $0x1a8] ss:$16 sps:$4 sm:$0xff]  }
  0x14   :  { %454 = vmatprep.subr.bf16.mxu0 %v740_v20  ;;  %507 = vmatprep.subr.bf16.mxu1 %v742_v21  ;;  %v794_v57 = vld [vmem:[%s1138_s1 + $0x1c4] ss:$16 sps:$4 sm:$0xff]   ;;  %v796_v58 = vld [vmem:[%s1138_s1 + $0x1cc] ss:$16 sps:$4 sm:$0xff]   ;;  %v798_v59 = vld [vmem:[%s1138_s1 + $0x1c0] ss:$16 sps:$4 sm:$0xff]  }
  0x15   :  { %v799_v60 = vld [vmem:[%s1138_s1 + $0x1c8] ss:$16 sps:$4 sm:$0xff]   ;;  %v800_v61 = vld [vmem:[%s1138_s1 + $0x1e4] ss:$16 sps:$4 sm:$0xff]   ;;  %v802_v62 = vld [vmem:[%s1138_s1 + $0x1ec] ss:$16 sps:$4 sm:$0xff]  }
  0x16   :  { %v804_v63 = vld [vmem:[%s1138_s1 + $0x1e0] ss:$16 sps:$4 sm:$0xff]   ;;  %v805_v0 = vld [vmem:[%s1138_s1 + $0x1e8] ss:$16 sps:$4 sm:$0xff]   ;;  %v809_v2 = vld [vmem:[%s1139_s0 + $0x14] ss:$8 sps:$4 sm:$0xff]  }
  0x17   :  { %455 = vmatpush1.bf16.msra.mxu0 %v744_v22  ;;  %508 = vmatpush1.bf16.msra.mxu1 %v745_v23  ;;  %v806_v1 = vld [vmem:[%s1139_s0] ss:$8 sps:$4 sm:$0xff]   ;;  %v811_v3 = vld [vmem:[%s1139_s0 + $0x10] ss:$8 sps:$4 sm:$0xff]   ;;  %v85_v5 = vshrl.u32 %v84_v4, 7 }
  0x18   :  { %456 = vmatprep.subr.bf16.mxu0 %v746_v24  ;;  %509 = vmatprep.subr.bf16.mxu1 %v748_v25  ;;  %v82_v8 = vld [vmem:[%s1140_s2] ss:$8 sm:$0xf]  ;;  %v709_v11 = vld [vmem:[%s1140_s2 + $0x1] ss:$8 sm:$0xf] }
  0x19   :  { %v86_v6 = vsub.s32 0, %v85_v5  ;;  %v94_v7 = vsub.s32 2, %v85_v5  ;;  %v90_v9 = vsub.s32 1, %v85_v5  ;;  %v98_v10 = vsub.s32 3, %v85_v5 }
  0x1b   :  { %457 = vmatpush1.bf16.msra.mxu0 %v750_v26  ;;  %510 = vmatpush1.bf16.msra.mxu1 %v751_v27  ;;  %v1042_v12 = vrot.slane %v82_v8, %v86_v6  ;;  %v1044_v13 = vrot.slane %v82_v8, %v94_v7  ;;  %v1046_v14 = vrot.slane %v82_v8, %v90_v9 }
  0x1c   :  { %458 = vmatprep.subr.bf16.mxu0 %v752_v28  ;;  %511 = vmatprep.subr.bf16.mxu1 %v754_v29  ;;  %v1048_v15 = vrot.slane %v82_v8, %v98_v10  ;;  %v1050_v16 = vrot.slane %v709_v11, %v86_v6  ;;  %v1052_v17 = vrot.slane %v709_v11, %v94_v7 }
  0x1d   :  { %v1054_v20 = vrot.slane %v709_v11, %v90_v9  ;;  %v1056_v21 = vrot.slane %v709_v11, %v98_v10 }
  0x1f   :  { %459 = vmatpush1.bf16.msra.mxu0 %v756_v30  ;;  %512 = vmatpush1.bf16.msra.mxu1 %v757_v31 }
  0x20   :  { %460 = vmatprep.subr.bf16.mxu0 %v758_v32  ;;  %513 = vmatprep.subr.bf16.mxu1 %v760_v33 }
  0x23   :  { %461 = vmatpush1.bf16.msra.mxu0 %v762_v34  ;;  %514 = vmatpush1.bf16.msra.mxu1 %v763_v35 }
  0x24   :  { %462 = vmatprep.subr.bf16.mxu0 %v764_v36  ;;  %515 = vmatprep.subr.bf16.mxu1 %v766_v37 }
  0x27   :  { %463 = vmatpush1.bf16.msra.mxu0 %v768_v38  ;;  %516 = vmatpush1.bf16.msra.mxu1 %v769_v39 }
  0x28   :  { %464 = vmatprep.subr.bf16.mxu0 %v770_v40  ;;  %517 = vmatprep.subr.bf16.mxu1 %v772_v41 }
  0x2b   :  { %465 = vmatpush1.bf16.msra.mxu0 %v774_v42  ;;  %518 = vmatpush1.bf16.msra.mxu1 %v775_v43 }
  0x2c   :  { %466 = vmatprep.subr.bf16.mxu0 %v776_v44  ;;  %519 = vmatprep.subr.bf16.mxu1 %v778_v45 }
  0x2f   :  { %467 = vmatpush1.bf16.msra.mxu0 %v780_v46  ;;  %520 = vmatpush1.bf16.msra.mxu1 %v781_v48 }
  0x30   :  { %468 = vmatprep.subr.bf16.mxu0 %v782_v49  ;;  %521 = vmatprep.subr.bf16.mxu1 %v784_v50 }
  0x33   :  { %469 = vmatpush1.bf16.msra.mxu0 %v786_v51  ;;  %522 = vmatpush1.bf16.msra.mxu1 %v787_v52 }
  0x34   :  { %470 = vmatprep.subr.bf16.mxu0 %v788_v53  ;;  %523 = vmatprep.subr.bf16.mxu1 %v790_v54 }
  0x37   :  { %471 = vmatpush1.bf16.msra.mxu0 %v792_v55  ;;  %524 = vmatpush1.bf16.msra.mxu1 %v793_v56 }
  0x38   :  { %472 = vmatprep.subr.bf16.mxu0 %v794_v57  ;;  %525 = vmatprep.subr.bf16.mxu1 %v796_v58 }
  0x3b   :  { %473 = vmatpush1.bf16.msra.mxu0 %v798_v59  ;;  %526 = vmatpush1.bf16.msra.mxu1 %v799_v60 }
  0x3c   :  { %474 = vmatprep.subr.bf16.mxu0 %v800_v61  ;;  %527 = vmatprep.subr.bf16.mxu1 %v802_v62 }
  0x3f   :  { %475 = vmatpush1.bf16.msra.mxu0 %v804_v63  ;;  %528 = vmatpush1.bf16.msra.mxu1 %v805_v0 }
  0x42   :  { %477 = vmatmul.mubr.bf16.vlgmr.msra.gmra.mrb[0].mxu0 %v806_v1  ;;  %530 = vmatmul.mubr.bf16.vlgmr.msra.gmra.mrb[0].mxu1 %v806_v1 }
  0x43   :  { %486 = vmatprep.mubr.bf16.mxu0 %v809_v2  ;;  %539 = vmatprep.mubr.bf16.mxu1 %v809_v2 }
  0x4a   :  { %487 = vmatmul.mubr.bf16.gmra.mrb[4].mxu0 %v811_v3  ;;  %540 = vmatmul.mubr.bf16.gmra.mrb[4].mxu1 %v811_v3 }
 0x115   :  { %v478_v18 = vpop.f32.mrb[0].mxu0  ;;  %v531_v19 = vpop.f32.mrb[0].mxu1 }
 0x116   :  { %v479_v22 = vadd.f32 %v478_v18, %v1042_v12  ;;  %v532_v23 = vadd.f32 %v531_v19, %v1044_v13  ;;  %v480_v24 = vpop.f32.mrb[1].mxu0  ;;  %v533_v25 = vpop.f32.mrb[1].mxu1 }
 0x117   :  { %v481_v26 = vadd.f32 %v480_v24, %v1046_v14  ;;  %v534_v27 = vadd.f32 %v533_v25, %v1048_v15  ;;  %v482_v28 = vpop.f32.mrb[2].mxu0  ;;  %v535_v29 = vpop.f32.mrb[2].mxu1 }
 0x118   :  { %vm550_vm0 = vcmp.ge.f32.partialorder %v479_v22, 0.0  ;;  %v589_v30 = vmul.f32 %v1050_v16, %v479_v22  ;;  %vm552_vm1 = vcmp.ge.f32.partialorder %v532_v23, 0.0  ;;  %v591_v31 = vmul.f32 %v1052_v17, %v532_v23  ;;  %v484_v32 = vpop.f32.mrb[3].mxu0  ;;  %v537_v33 = vpop.f32.mrb[3].mxu1 }
 0x119   :  { %vm551_vm2 = vcmp.ge.f32.partialorder %v481_v26, 0.0  ;;  %v590_v34 = vmul.f32 %v1054_v20, %v481_v26  ;;  %vm553_vm3 = vcmp.ge.f32.partialorder %v534_v27, 0.0  ;;  %v592_v35 = vmul.f32 %v1056_v21, %v534_v27 }
 0x11a   :  { %v605_v36 = vsel %vm550_vm0, %v479_v22, %v589_v30  ;;  %v607_v37 = vsel %vm552_vm1, %v532_v23, %v591_v31  ;;  %v483_v38 = vadd.f32 %v482_v28, %v1042_v12  ;;  %v536_v39 = vadd.f32 %v535_v29, %v1044_v13 }
 0x11b   :  { %621 = vst [vmem:[%s1141_s3] sm:$0xff] %v605_v36  ;;  %623 = vst [vmem:[%s1141_s3 + $0x10] sm:$0xff] %v607_v37  ;;  %v606_v40 = vsel %vm551_vm2, %v481_v26, %v590_v34  ;;  %v608_v41 = vsel %vm553_vm3, %v534_v27, %v592_v35  ;;  %v485_v42 = vadd.f32 %v484_v32, %v1046_v14 }
 0x11c   :  { %v538_v43 = vadd.f32 %v537_v33, %v1048_v15  ;;  %622 = vst [vmem:[%s1141_s3 + $0x8] sm:$0xff] %v606_v40  ;;  %624 = vst [vmem:[%s1141_s3 + $0x18] sm:$0xff] %v608_v41  ;;  %vm554_vm4 = vcmp.ge.f32.partialorder %v483_v38, 0.0  ;;  %v593_v44 = vmul.f32 %v1050_v16, %v483_v38  ;;  %vm556_vm5 = vcmp.ge.f32.partialorder %v536_v39, 0.0 }
 0x11d   :  { %v595_v45 = vmul.f32 %v1052_v17, %v536_v39  ;;  %vm555_vm6 = vcmp.ge.f32.partialorder %v485_v42, 0.0  ;;  %v594_v46 = vmul.f32 %v1054_v20, %v485_v42  ;;  %v488_v48 = vpop.f32.mrb[4].mxu0  ;;  %v541_v49 = vpop.f32.mrb[4].mxu1 }
 0x11e   :  { %vm557_vm7 = vcmp.ge.f32.partialorder %v538_v43, 0.0  ;;  %v596_v47 = vmul.f32 %v1056_v21, %v538_v43  ;;  %v609_v50 = vsel %vm554_vm4, %v483_v38, %v593_v44  ;;  %v489_v52 = vadd.f32 %v488_v48, %v1042_v12  ;;  %v490_v54 = vpop.f32.mrb[5].mxu0  ;;  %v543_v55 = vpop.f32.mrb[5].mxu1 }
 0x11f   :  { %v611_v51 = vsel %vm556_vm5, %v536_v39, %v595_v45  ;;  %v542_v53 = vadd.f32 %v541_v49, %v1044_v13  ;;  %625 = vst [vmem:[%s1141_s3 + $0x20] sm:$0xff] %v609_v50  ;;  %v610_v56 = vsel %vm555_vm6, %v485_v42, %v594_v46  ;;  %v491_v58 = vadd.f32 %v490_v54, %v1046_v14  ;;  %v492_v60 = vpop.f32.mrb[6].mxu0  ;;  %v545_v61 = vpop.f32.mrb[6].mxu1 }
 0x120   :  { %627 = vst [vmem:[%s1141_s3 + $0x30] sm:$0xff] %v611_v51  ;;  %v612_v57 = vsel %vm557_vm7, %v538_v43, %v596_v47  ;;  %v544_v59 = vadd.f32 %v543_v55, %v1048_v15  ;;  %626 = vst [vmem:[%s1141_s3 + $0x28] sm:$0xff] %v610_v56  ;;  %vm558_vm8 = vcmp.ge.f32.partialorder %v489_v52, 0.0  ;;  %v597_v62 = vmul.f32 %v1050_v16, %v489_v52  ;;  %v494_v0 = vpop.f32.mrb[7].mxu0  ;;  %v547_v1 = vpop.f32.mrb[7].mxu1 }
 0x121   :  { %628 = vst [vmem:[%s1141_s3 + $0x38] sm:$0xff] %v612_v57  ;;  %vm560_vm9 = vcmp.ge.f32.partialorder %v542_v53, 0.0  ;;  %v599_v63 = vmul.f32 %v1052_v17, %v542_v53  ;;  %vm559_vm10 = vcmp.ge.f32.partialorder %v491_v58, 0.0  ;;  %v598_v2 = vmul.f32 %v1054_v20, %v491_v58 }
 0x122   :  { %vm561_vm11 = vcmp.ge.f32.partialorder %v544_v59, 0.0  ;;  %v600_v3 = vmul.f32 %v1056_v21, %v544_v59  ;;  %v613_v4 = vsel %vm558_vm8, %v489_v52, %v597_v62  ;;  %v493_v6 = vadd.f32 %v492_v60, %v1042_v12 }
 0x123   :  { %v615_v5 = vsel %vm560_vm9, %v542_v53, %v599_v63  ;;  %v546_v7 = vadd.f32 %v545_v61, %v1044_v13  ;;  %629 = vst [vmem:[%s1141_s3 + $0x40] sm:$0xff] %v613_v4  ;;  %v614_v8 = vsel %vm559_vm10, %v491_v58, %v598_v2  ;;  %v495_v10 = vadd.f32 %v494_v0, %v1046_v14 }
 0x124   :  { %631 = vst [vmem:[%s1141_s3 + $0x50] sm:$0xff] %v615_v5  ;;  %v616_v9 = vsel %vm561_vm11, %v544_v59, %v600_v3  ;;  %v548_v11 = vadd.f32 %v547_v1, %v1048_v15  ;;  %630 = vst [vmem:[%s1141_s3 + $0x48] sm:$0xff] %v614_v8  ;;  %vm562_vm12 = vcmp.ge.f32.partialorder %v493_v6, 0.0  ;;  %v601_v12 = vmul.f32 %v1050_v16, %v493_v6 }
 0x125   :  { %632 = vst [vmem:[%s1141_s3 + $0x58] sm:$0xff] %v616_v9  ;;  %vm564_vm13 = vcmp.ge.f32.partialorder %v546_v7, 0.0  ;;  %v603_v13 = vmul.f32 %v1052_v17, %v546_v7  ;;  %vm563_vm14 = vcmp.ge.f32.partialorder %v495_v10, 0.0  ;;  %v602_v18 = vmul.f32 %v1054_v20, %v495_v10 }
 0x126   :  { %vm565_vm15 = vcmp.ge.f32.partialorder %v548_v11, 0.0  ;;  %v604_v14 = vmul.f32 %v1056_v21, %v548_v11  ;;  %v617_v15 = vsel %vm562_vm12, %v493_v6, %v601_v12 }
 0x127   :  { %v619_v19 = vsel %vm564_vm13, %v546_v7, %v603_v13  ;;  %633 = vst [vmem:[%s1141_s3 + $0x60] sm:$0xff] %v617_v15  ;;  %v618_v16 = vsel %vm563_vm14, %v495_v10, %v602_v18 }
 0x128   :  { %635 = vst [vmem:[%s1141_s3 + $0x70] sm:$0xff] %v619_v19  ;;  %v620_v22 = vsel %vm565_vm15, %v548_v11, %v604_v14  ;;  %634 = vst [vmem:[%s1141_s3 + $0x68] sm:$0xff] %v618_v16 }
 0x129   :  { %636 = vst [vmem:[%s1141_s3 + $0x78] sm:$0xff] %v620_v22 }

// kernel: forward.14
= control target key start
LH: loop header
LB: loop body
LE: loop exit
PB: predicated region body
PF: predicated region fallthrough
CT: control target
= control target key end

     0   :  { %s4958_s1 = inlined_call_operand.vmem [shape: bf16[2304,256], index: 1, kind: input, shape index: {}]   ;;  %s4959_s0 = inlined_call_operand.vmem [shape: bf16[32,2304], index: 0, kind: input, shape index: {}]   ;;  %s4960_s3 = inlined_call_operand.vmem [shape: bf16[256,256], index: 3, kind: input, shape index: {}]   ;;  %s4961_s2 = inlined_call_operand.vmem [shape: f32[8,256], index: 2, kind: input, shape index: {}]   ;;  %s4962_s4 = inlined_call_operand.vmem [shape: f32[8,256], index: 4, kind: input, shape index: {}]   ;;  %s4963_s5 = inlined_call_operand.vmem [shape: f32[32,256], index: 5, kind: input, shape index: {}]   ;;  %s4964_s6 = inlined_call_operand.vmem [shape: f32[32,256], index: 6, kind: output, shape index: {}]  }
   0x1   :  { %v3249_v0 = vld [vmem:[%s4958_s1 + $0x4] ss:$8 sps:$4 sm:$0xff]   ;;  %v3253_v2 = vld [vmem:[%s4958_s1] ss:$8 sps:$4 sm:$0xff]   ;;  %v3255_v4 = vld [vmem:[%s4958_s1 + $0x14] ss:$8 sps:$4 sm:$0xff]  }
   0x2   :  { %v3251_v1 = vld [vmem:[%s4958_s1 + $0x404] ss:$8 sps:$4 sm:$0xff]   ;;  %1979 = vmatprep.subr.bf16.mxu1 %v3249_v0  ;;  %v3254_v3 = vld [vmem:[%s4958_s1 + $0x400] ss:$8 sps:$4 sm:$0xff]   ;;  %v3257_v5 = vld [vmem:[%s4958_s1 + $0x414] ss:$8 sps:$4 sm:$0xff]  }
   0x3   :  { %2191 = vmatprep.subr.bf16.mxu0 %v3251_v1  ;;  %1980 = vmatpush1.bf16.msra.mxu1 %v3253_v2  ;;  %v3259_v6 = vld [vmem:[%s4958_s1 + $0x10] ss:$8 sps:$4 sm:$0xff]   ;;  %v3261_v8 = vld [vmem:[%s4958_s1 + $0x24] ss:$8 sps:$4 sm:$0xff]   ;;  %v3265_v10 = vld [vmem:[%s4958_s1 + $0x20] ss:$8 sps:$4 sm:$0xff]  }
   0x4   :  { %2192 = vmatpush1.bf16.msra.mxu0 %v3254_v3  ;;  %1981 = vmatprep.subr.bf16.mxu1 %v3255_v4  ;;  %v3260_v7 = vld [vmem:[%s4958_s1 + $0x410] ss:$8 sps:$4 sm:$0xff]   ;;  %v3263_v9 = vld [vmem:[%s4958_s1 + $0x424] ss:$8 sps:$4 sm:$0xff]   ;;  %v3266_v11 = vld [vmem:[%s4958_s1 + $0x420] ss:$8 sps:$4 sm:$0xff]  }
   0x5   :  { %2193 = vmatprep.subr.bf16.mxu0 %v3257_v5  ;;  %v3267_v12 = vld [vmem:[%s4958_s1 + $0x34] ss:$8 sps:$4 sm:$0xff]   ;;  %v3271_v14 = vld [vmem:[%s4958_s1 + $0x30] ss:$8 sps:$4 sm:$0xff]   ;;  %v3273_v16 = vld [vmem:[%s4958_s1 + $0x44] ss:$8 sps:$4 sm:$0xff]  }
   0x6   :  { %v3269_v13 = vld [vmem:[%s4958_s1 + $0x434] ss:$8 sps:$4 sm:$0xff]   ;;  %v3272_v15 = vld [vmem:[%s4958_s1 + $0x430] ss:$8 sps:$4 sm:$0xff]   ;;  %v3275_v17 = vld [vmem:[%s4958_s1 + $0x444] ss:$8 sps:$4 sm:$0xff]  }
   0x7   :  { %1982 = vmatpush1.bf16.msra.mxu1 %v3259_v6  ;;  %v3277_v18 = vld [vmem:[%s4958_s1 + $0x40] ss:$8 sps:$4 sm:$0xff]   ;;  %v3279_v20 = vld [vmem:[%s4958_s1 + $0x54] ss:$8 sps:$4 sm:$0xff]   ;;  %v3283_v22 = vld [vmem:[%s4958_s1 + $0x50] ss:$8 sps:$4 sm:$0xff]  }
   0x8   :  { %2194 = vmatpush1.bf16.msra.mxu0 %v3260_v7  ;;  %1983 = vmatprep.subr.bf16.mxu1 %v3261_v8  ;;  %v3278_v19 = vld [vmem:[%s4958_s1 + $0x440] ss:$8 sps:$4 sm:$0xff]   ;;  %v3281_v21 = vld [vmem:[%s4958_s1 + $0x454] ss:$8 sps:$4 sm:$0xff]   ;;  %v3284_v23 = vld [vmem:[%s4958_s1 + $0x450] ss:$8 sps:$4 sm:$0xff]  }
   0x9   :  { %2195 = vmatprep.subr.bf16.mxu0 %v3263_v9  ;;  %v3285_v24 = vld [vmem:[%s4958_s1 + $0x64] ss:$8 sps:$4 sm:$0xff]   ;;  %v3289_v26 = vld [vmem:[%s4958_s1 + $0x60] ss:$8 sps:$4 sm:$0xff]   ;;  %v3291_v28 = vld [vmem:[%s4958_s1 + $0x74] ss:$8 sps:$4 sm:$0xff]  }
   0xa   :  { %v3287_v25 = vld [vmem:[%s4958_s1 + $0x464] ss:$8 sps:$4 sm:$0xff]   ;;  %v3290_v27 = vld [vmem:[%s4958_s1 + $0x460] ss:$8 sps:$4 sm:$0xff]   ;;  %v3293_v29 = vld [vmem:[%s4958_s1 + $0x474] ss:$8 sps:$4 sm:$0xff]  }
   0xb   :  { %1984 = vmatpush1.bf16.msra.mxu1 %v3265_v10  ;;  %v3295_v30 = vld [vmem:[%s4958_s1 + $0x70] ss:$8 sps:$4 sm:$0xff]   ;;  %v3297_v32 = vld [vmem:[%s4958_s1 + $0x84] ss:$8 sps:$4 sm:$0xff]   ;;  %v3301_v34 = vld [vmem:[%s4958_s1 + $0x80] ss:$8 sps:$4 sm:$0xff]  }
   0xc   :  { %2196 = vmatpush1.bf16.msra.mxu0 %v3266_v11  ;;  %1985 = vmatprep.subr.bf16.mxu1 %v3267_v12  ;;  %v3296_v31 = vld [vmem:[%s4958_s1 + $0x470] ss:$8 sps:$4 sm:$0xff]   ;;  %v3299_v33 = vld [vmem:[%s4958_s1 + $0x484] ss:$8 sps:$4 sm:$0xff]   ;;  %v3302_v35 = vld [vmem:[%s4958_s1 + $0x480] ss:$8 sps:$4 sm:$0xff]  }
   0xd   :  { %2197 = vmatprep.subr.bf16.mxu0 %v3269_v13  ;;  %v3303_v36 = vld [vmem:[%s4958_s1 + $0x94] ss:$8 sps:$4 sm:$0xff]   ;;  %v3307_v38 = vld [vmem:[%s4958_s1 + $0x90] ss:$8 sps:$4 sm:$0xff]   ;;  %v3309_v40 = vld [vmem:[%s4958_s1 + $0xa4] ss:$8 sps:$4 sm:$0xff]  }
   0xe   :  { %v3305_v37 = vld [vmem:[%s4958_s1 + $0x494] ss:$8 sps:$4 sm:$0xff]   ;;  %v3308_v39 = vld [vmem:[%s4958_s1 + $0x490] ss:$8 sps:$4 sm:$0xff]   ;;  %v3311_v41 = vld [vmem:[%s4958_s1 + $0x4a4] ss:$8 sps:$4 sm:$0xff]  }
   0xf   :  { %1986 = vmatpush1.bf16.msra.mxu1 %v3271_v14  ;;  %v3313_v42 = vld [vmem:[%s4958_s1 + $0xa0] ss:$8 sps:$4 sm:$0xff]   ;;  %v3315_v44 = vld [vmem:[%s4958_s1 + $0xb4] ss:$8 sps:$4 sm:$0xff]   ;;  %v3319_v46 = vld [vmem:[%s4958_s1 + $0xb0] ss:$8 sps:$4 sm:$0xff]  }
  0x10   :  { %2198 = vmatpush1.bf16.msra.mxu0 %v3272_v15  ;;  %1987 = vmatprep.subr.bf16.mxu1 %v3273_v16  ;;  %v3314_v43 = vld [vmem:[%s4958_s1 + $0x4a0] ss:$8 sps:$4 sm:$0xff]   ;;  %v3317_v45 = vld [vmem:[%s4958_s1 + $0x4b4] ss:$8 sps:$4 sm:$0xff]   ;;  %v3320_v47 = vld [vmem:[%s4958_s1 + $0x4b0] ss:$8 sps:$4 sm:$0xff]  }
  0x11   :  { %2199 = vmatprep.subr.bf16.mxu0 %v3275_v17  ;;  %v3347_v48 = vld [vmem:[%s4959_s0 + $0x4] ss:$72 sps:$4 sm:$0xff]   ;;  %v3325_v52 = vld [vmem:[%s4958_s1 + $0xc0] ss:$8 sps:$4 sm:$0xff]   ;;  %v3327_v54 = vld [vmem:[%s4958_s1 + $0xd4] ss:$8 sps:$4 sm:$0xff]  }
  0x12   :  { %v3321_v49 = vld [vmem:[%s4958_s1 + $0xc4] ss:$8 sps:$4 sm:$0xff]   ;;  %2011 = vmatprep.mubr.bf16.mxu1 %v3347_v48  ;;  %v3326_v53 = vld [vmem:[%s4958_s1 + $0x4c0] ss:$8 sps:$4 sm:$0xff]   ;;  %v3329_v55 = vld [vmem:[%s4958_s1 + $0x4d4] ss:$8 sps:$4 sm:$0xff]  }
  0x13   :  { %1988 = vmatpush1.bf16.msra.mxu1 %v3277_v18  ;;  %v3323_v50 = vld [vmem:[%s4958_s1 + $0x4c4] ss:$8 sps:$4 sm:$0xff]   ;;  %v3331_v56 = vld [vmem:[%s4958_s1 + $0xd0] ss:$8 sps:$4 sm:$0xff]   ;;  %v3337_v60 = vld [vmem:[%s4958_s1 + $0xe0] ss:$8 sps:$4 sm:$0xff]  }
  0x14   :  { %2200 = vmatpush1.bf16.msra.mxu0 %v3278_v19  ;;  %1989 = vmatprep.subr.bf16.mxu1 %v3279_v20  ;;  %v3353_v51 = vld [vmem:[%s4959_s0 + $0x24] ss:$72 sps:$4 sm:$0xff]   ;;  %v3332_v57 = vld [vmem:[%s4958_s1 + $0x4d0] ss:$8 sps:$4 sm:$0xff]   ;;  %v3338_v61 = vld [vmem:[%s4958_s1 + $0x4e0] ss:$8 sps:$4 sm:$0xff]  }
  0x15   :  { %2201 = vmatprep.subr.bf16.mxu0 %v3281_v21  ;;  %2223 = vmatprep.mubr.bf16.mxu0 %v3353_v51  ;;  %v3333_v58 = vld [vmem:[%s4958_s1 + $0xe4] ss:$8 sps:$4 sm:$0xff]   ;;  %v3339_v62 = vld [vmem:[%s4958_s1 + $0xf4] ss:$8 sps:$4 sm:$0xff]   ;;  %v3343_v0 = vld [vmem:[%s4958_s1 + $0xf0] ss:$8 sps:$4 sm:$0xff]  }
  0x16   :  { %v3335_v59 = vld [vmem:[%s4958_s1 + $0x4e4] ss:$8 sps:$4 sm:$0xff]   ;;  %v3341_v63 = vld [vmem:[%s4958_s1 + $0x4f4] ss:$8 sps:$4 sm:$0xff]   ;;  %v3344_v1 = vld [vmem:[%s4958_s1 + $0x4f0] ss:$8 sps:$4 sm:$0xff]  }
  0x17   :  { %1990 = vmatpush1.bf16.msra.mxu1 %v3283_v22  ;;  %v3350_v2 = vld [vmem:[%s4958_s1 + $0x104] ss:$8 sps:$4 sm:$0xff]   ;;  %v3345_v4 = vld [vmem:[%s4959_s0] ss:$72 sps:$4 sm:$0xff]   ;;  %v3359_v8 = vld [vmem:[%s4958_s1 + $0x114] ss:$8 sps:$4 sm:$0xff]  }
  0x18   :  { %2202 = vmatpush1.bf16.msra.mxu0 %v3284_v23  ;;  %1991 = vmatprep.subr.bf16.mxu1 %v3285_v24  ;;  %v3356_v3 = vld [vmem:[%s4958_s1 + $0x504] ss:$8 sps:$4 sm:$0xff]   ;;  %v3348_v5 = vld [vmem:[%s4958_s1 + $0x100] ss:$8 sps:$4 sm:$0xff]   ;;  %v3362_v9 = vld [vmem:[%s4958_s1 + $0x514] ss:$8 sps:$4 sm:$0xff]  }
  0x19   :  { %2203 = vmatprep.subr.bf16.mxu0 %v3287_v25  ;;  %v3351_v6 = vld [vmem:[%s4959_s0 + $0x20] ss:$72 sps:$4 sm:$0xff]   ;;  %v3357_v10 = vld [vmem:[%s4958_s1 + $0x110] ss:$8 sps:$4 sm:$0xff]   ;;  %v3365_v12 = vld [vmem:[%s4958_s1 + $0x124] ss:$8 sps:$4 sm:$0xff]  }
  0x1a   :  { %v3354_v7 = vld [vmem:[%s4958_s1 + $0x500] ss:$8 sps:$4 sm:$0xff]   ;;  %v3360_v11 = vld [vmem:[%s4958_s1 + $0x510] ss:$8 sps:$4 sm:$0xff]   ;;  %v3368_v13 = vld [vmem:[%s4958_s1 + $0x524] ss:$8 sps:$4 sm:$0xff]  }
  0x1b   :  { %1992 = vmatpush1.bf16.msra.mxu1 %v3289_v26  ;;  %v3363_v14 = vld [vmem:[%s4958_s1 + $0x120] ss:$8 sps:$4 sm:$0xff]   ;;  %v3371_v16 = vld [vmem:[%s4958_s1 + $0x134] ss:$8 sps:$4 sm:$0xff]   ;;  %v3369_v18 = vld [vmem:[%s4958_s1 + $0x130] ss:$8 sps:$4 sm:$0xff]  }
  0x1c   :  { %2204 = vmatpush1.bf16.msra.mxu0 %v3290_v27  ;;  %1993 = vmatprep.subr.bf16.mxu1 %v3291_v28  ;;  %v3366_v15 = vld [vmem:[%s4958_s1 + $0x520] ss:$8 sps:$4 sm:$0xff]   ;;  %v3374_v17 = vld [vmem:[%s4958_s1 + $0x534] ss:$8 sps:$4 sm:$0xff]   ;;  %v3372_v19 = vld [vmem:[%s4958_s1 + $0x530] ss:$8 sps:$4 sm:$0xff]  }
  0x1d   :  { %2205 = vmatprep.subr.bf16.mxu0 %v3293_v29  ;;  %v3377_v20 = vld [vmem:[%s4958_s1 + $0x144] ss:$8 sps:$4 sm:$0xff]   ;;  %v3375_v22 = vld [vmem:[%s4958_s1 + $0x140] ss:$8 sps:$4 sm:$0xff]   ;;  %v3383_v24 = vld [vmem:[%s4958_s1 + $0x154] ss:$8 sps:$4 sm:$0xff]  }
  0x1e   :  { %v3380_v21 = vld [vmem:[%s4958_s1 + $0x544] ss:$8 sps:$4 sm:$0xff]   ;;  %v3378_v23 = vld [vmem:[%s4958_s1 + $0x540] ss:$8 sps:$4 sm:$0xff]   ;;  %v3386_v25 = vld [vmem:[%s4958_s1 + $0x554] ss:$8 sps:$4 sm:$0xff]  }
  0x1f   :  { %1994 = vmatpush1.bf16.msra.mxu1 %v3295_v30  ;;  %v3381_v26 = vld [vmem:[%s4958_s1 + $0x150] ss:$8 sps:$4 sm:$0xff]   ;;  %v3435_v28 = vld [vmem:[%s4959_s0 + $0x94] ss:$72 sps:$4 sm:$0xff]   ;;  %v3389_v29 = vld [vmem:[%s4958_s1 + $0x164] ss:$8 sps:$4 sm:$0xff]  }
  0x20   :  { %2206 = vmatpush1.bf16.msra.mxu0 %v3296_v31  ;;  %1995 = vmatprep.subr.bf16.mxu1 %v3297_v32  ;;  %v3384_v27 = vld [vmem:[%s4958_s1 + $0x550] ss:$8 sps:$4 sm:$0xff]   ;;  %v3392_v30 = vld [vmem:[%s4958_s1 + $0x564] ss:$8 sps:$4 sm:$0xff]   ;;  %v3440_v31 = vld [vmem:[%s4959_s0 + $0xb4] ss:$72 sps:$4 sm:$0xff]  }
  0x21   :  { %2207 = vmatprep.subr.bf16.mxu0 %v3299_v33  ;;  %v3387_v32 = vld [vmem:[%s4958_s1 + $0x160] ss:$8 sps:$4 sm:$0xff]   ;;  %v3405_v48 = vld [vmem:[%s4958_s1 + $0x190] ss:$8 sps:$4 sm:$0xff]   ;;  %v3416_v51 = vld [vmem:[%s4958_s1 + $0x5a4] ss:$8 sps:$4 sm:$0xff]  }
  0x22   :  { %v3390_v33 = vld [vmem:[%s4958_s1 + $0x560] ss:$8 sps:$4 sm:$0xff]  }
  0x23   :  { %1996 = vmatpush1.bf16.msra.mxu1 %v3301_v34  ;;  %v3445_v34 = vld [vmem:[%s4959_s0 + $0x90] ss:$72 sps:$4 sm:$0xff]  }
  0x24   :  { %2208 = vmatpush1.bf16.msra.mxu0 %v3302_v35  ;;  %1997 = vmatprep.subr.bf16.mxu1 %v3303_v36  ;;  %v3446_v35 = vld [vmem:[%s4959_s0 + $0xb0] ss:$72 sps:$4 sm:$0xff]   ;;  %v3395_v36 = vld [vmem:[%s4958_s1 + $0x174] ss:$8 sps:$4 sm:$0xff]  }
  0x25   :  { %2209 = vmatprep.subr.bf16.mxu0 %v3305_v37  ;;  %v3398_v37 = vld [vmem:[%s4958_s1 + $0x574] ss:$8 sps:$4 sm:$0xff]  }
  0x27   :  { %1998 = vmatpush1.bf16.msra.mxu1 %v3307_v38  ;;  %v3393_v38 = vld [vmem:[%s4958_s1 + $0x170] ss:$8 sps:$4 sm:$0xff]  }
  0x28   :  { %2210 = vmatpush1.bf16.msra.mxu0 %v3308_v39  ;;  %1999 = vmatprep.subr.bf16.mxu1 %v3309_v40  ;;  %v3396_v39 = vld [vmem:[%s4958_s1 + $0x570] ss:$8 sps:$4 sm:$0xff]   ;;  %v3455_v40 = vld [vmem:[%s4959_s0 + $0xc] ss:$72 sps:$4 sm:$0xff]  }
  0x29   :  { %2211 = vmatprep.subr.bf16.mxu0 %v3311_v41  ;;  %v3401_v41 = vld [vmem:[%s4958_s1 + $0x184] ss:$8 sps:$4 sm:$0xff]  }
  0x2b   :  { %2000 = vmatpush1.bf16.msra.mxu1 %v3313_v42  ;;  %v3404_v42 = vld [vmem:[%s4958_s1 + $0x584] ss:$8 sps:$4 sm:$0xff]  }
  0x2c   :  { %2212 = vmatpush1.bf16.msra.mxu0 %v3314_v43  ;;  %2001 = vmatprep.subr.bf16.mxu1 %v3315_v44  ;;  %v3461_v43 = vld [vmem:[%s4959_s0 + $0x2c] ss:$72 sps:$4 sm:$0xff]   ;;  %v3399_v44 = vld [vmem:[%s4958_s1 + $0x180] ss:$8 sps:$4 sm:$0xff]  }
  0x2d   :  { %2213 = vmatprep.subr.bf16.mxu0 %v3317_v45  ;;  %v3402_v45 = vld [vmem:[%s4958_s1 + $0x580] ss:$8 sps:$4 sm:$0xff]  }
  0x2f   :  { %2002 = vmatpush1.bf16.msra.mxu1 %v3319_v46  ;;  %v3407_v46 = vld [vmem:[%s4958_s1 + $0x194] ss:$8 sps:$4 sm:$0xff]  }
  0x30   :  { %2214 = vmatpush1.bf16.msra.mxu0 %v3320_v47  ;;  %2003 = vmatprep.subr.bf16.mxu1 %v3321_v49  ;;  %v3410_v47 = vld [vmem:[%s4958_s1 + $0x594] ss:$8 sps:$4 sm:$0xff]   ;;  %v3408_v49 = vld [vmem:[%s4958_s1 + $0x590] ss:$8 sps:$4 sm:$0xff]  }
  0x31   :  { %2215 = vmatprep.subr.bf16.mxu0 %v3323_v50  ;;  %v3413_v50 = vld [vmem:[%s4958_s1 + $0x1a4] ss:$8 sps:$4 sm:$0xff]  }
  0x33   :  { %2004 = vmatpush1.bf16.msra.mxu1 %v3325_v52  ;;  %v3411_v52 = vld [vmem:[%s4958_s1 + $0x1a0] ss:$8 sps:$4 sm:$0xff]  }
  0x34   :  { %2216 = vmatpush1.bf16.msra.mxu0 %v3326_v53  ;;  %2005 = vmatprep.subr.bf16.mxu1 %v3327_v54  ;;  %v3414_v53 = vld [vmem:[%s4958_s1 + $0x5a0] ss:$8 sps:$4 sm:$0xff]   ;;  %v3419_v54 = vld [vmem:[%s4958_s1 + $0x1b4] ss:$8 sps:$4 sm:$0xff]  }
  0x35   :  { %2217 = vmatprep.subr.bf16.mxu0 %v3329_v55  ;;  %v3422_v55 = vld [vmem:[%s4958_s1 + $0x5b4] ss:$8 sps:$4 sm:$0xff]  }
  0x37   :  { %2006 = vmatpush1.bf16.msra.mxu1 %v3331_v56  ;;  %v3417_v56 = vld [vmem:[%s4958_s1 + $0x1b0] ss:$8 sps:$4 sm:$0xff]  }
  0x38   :  { %2218 = vmatpush1.bf16.msra.mxu0 %v3332_v57  ;;  %2007 = vmatprep.subr.bf16.mxu1 %v3333_v58  ;;  %v3420_v57 = vld [vmem:[%s4958_s1 + $0x5b0] ss:$8 sps:$4 sm:$0xff]   ;;  %v3425_v58 = vld [vmem:[%s4958_s1 + $0x1c4] ss:$8 sps:$4 sm:$0xff]  }
  0x39   :  { %2219 = vmatprep.subr.bf16.mxu0 %v3335_v59  ;;  %v3428_v59 = vld [vmem:[%s4958_s1 + $0x5c4] ss:$8 sps:$4 sm:$0xff]  }
  0x3b   :  { %2008 = vmatpush1.bf16.msra.mxu1 %v3337_v60  ;;  %v3423_v60 = vld [vmem:[%s4958_s1 + $0x1c0] ss:$8 sps:$4 sm:$0xff]  }
  0x3c   :  { %2220 = vmatpush1.bf16.msra.mxu0 %v3338_v61  ;;  %2009 = vmatprep.subr.bf16.mxu1 %v3339_v62  ;;  %v3426_v61 = vld [vmem:[%s4958_s1 + $0x5c0] ss:$8 sps:$4 sm:$0xff]   ;;  %v3431_v62 = vld [vmem:[%s4958_s1 + $0x1d4] ss:$8 sps:$4 sm:$0xff]  }
  0x3d   :  { %2221 = vmatprep.subr.bf16.mxu0 %v3341_v63  ;;  %v3434_v63 = vld [vmem:[%s4958_s1 + $0x5d4] ss:$8 sps:$4 sm:$0xff]  }
  0x3f   :  { %2010 = vmatpush1.bf16.msra.mxu1 %v3343_v0  ;;  %v3429_v0 = vld [vmem:[%s4958_s1 + $0x1d0] ss:$8 sps:$4 sm:$0xff]  }
  0x40   :  { %2222 = vmatpush1.bf16.msra.mxu0 %v3344_v1  ;;  %2032 = vmatprep.subr.bf16.mxu1 %v3350_v2  ;;  %v3432_v1 = vld [vmem:[%s4958_s1 + $0x5d0] ss:$8 sps:$4 sm:$0xff]   ;;  %v3439_v2 = vld [vmem:[%s4958_s1 + $0x1e4] ss:$8 sps:$4 sm:$0xff]  }
  0x41   :  { %2244 = vmatprep.subr.bf16.mxu0 %v3356_v3  ;;  %v3444_v3 = vld [vmem:[%s4958_s1 + $0x5e4] ss:$8 sps:$4 sm:$0xff]  }
  0x42   :  { %2012 = vmatmul.mubr.bf16.vlgmr.msra.gmra.mrb[0].mxu1 %v3345_v4  ;;  %v3437_v4 = vld [vmem:[%s4958_s1 + $0x1e0] ss:$8 sps:$4 sm:$0xff]  }
  0x43   :  { %2224 = vmatmul.mubr.bf16.vlgmr.msra.gmra.mrb[0].mxu0 %v3351_v6  ;;  %2033 = vmatpush1.bf16.msra.mxu1 %v3348_v5  ;;  %v3442_v5 = vld [vmem:[%s4958_s1 + $0x5e0] ss:$8 sps:$4 sm:$0xff]   ;;  %v3449_v6 = vld [vmem:[%s4958_s1 + $0x1f4] ss:$8 sps:$4 sm:$0xff]  }
  0x44   :  { %2245 = vmatpush1.bf16.msra.mxu0 %v3354_v7  ;;  %2034 = vmatprep.subr.bf16.mxu1 %v3359_v8  ;;  %v3452_v7 = vld [vmem:[%s4958_s1 + $0x5f4] ss:$8 sps:$4 sm:$0xff]   ;;  %v3447_v8 = vld [vmem:[%s4958_s1 + $0x1f0] ss:$8 sps:$4 sm:$0xff]  }
  0x45   :  { %2246 = vmatprep.subr.bf16.mxu0 %v3362_v9  ;;  %2021 = vmatprep.mubr.bf16.mxu1 %v3435_v28  ;;  %v3450_v9 = vld [vmem:[%s4958_s1 + $0x5f0] ss:$8 sps:$4 sm:$0xff]   ;;  %v3479_v28 = vld [vmem:[%s4958_s1 + $0x234] ss:$8 sps:$4 sm:$0xff]  }
  0x46   :  { %2233 = vmatprep.mubr.bf16.mxu0 %v3440_v31  ;;  %v3480_v31 = vld [vmem:[%s4958_s1 + $0x630] ss:$8 sps:$4 sm:$0xff]  }
  0x47   :  { %2035 = vmatpush1.bf16.msra.mxu1 %v3357_v10  ;;  %v3458_v10 = vld [vmem:[%s4958_s1 + $0x204] ss:$8 sps:$4 sm:$0xff]  }
  0x48   :  { %2247 = vmatpush1.bf16.msra.mxu0 %v3360_v11  ;;  %2036 = vmatprep.subr.bf16.mxu1 %v3365_v12  ;;  %v3464_v11 = vld [vmem:[%s4958_s1 + $0x604] ss:$8 sps:$4 sm:$0xff]   ;;  %v3453_v12 = vld [vmem:[%s4959_s0 + $0x8] ss:$72 sps:$4 sm:$0xff]  }
  0x49   :  { %2248 = vmatprep.subr.bf16.mxu0 %v3368_v13  ;;  %v3456_v13 = vld [vmem:[%s4958_s1 + $0x200] ss:$8 sps:$4 sm:$0xff]  }
  0x4a   :  { %2022 = vmatmul.mubr.bf16.gmra.mrb[4].mxu1 %v3445_v34  ;;  %v3488_v34 = vld [vmem:[%s4958_s1 + $0x644] ss:$8 sps:$4 sm:$0xff]  }
  0x4b   :  { %2037 = vmatpush1.bf16.msra.mxu1 %v3363_v14  ;;  %2234 = vmatmul.mubr.bf16.gmra.mrb[4].mxu0 %v3446_v35  ;;  %v3459_v14 = vld [vmem:[%s4959_s0 + $0x28] ss:$72 sps:$4 sm:$0xff]   ;;  %v3569_v35 = vld [vmem:[%s4959_s0 + $0x34] ss:$72 sps:$4 sm:$0xff]  }
  0x4c   :  { %2249 = vmatpush1.bf16.msra.mxu0 %v3366_v15  ;;  %2038 = vmatprep.subr.bf16.mxu1 %v3371_v16  ;;  %v3462_v15 = vld [vmem:[%s4958_s1 + $0x600] ss:$8 sps:$4 sm:$0xff]   ;;  %v3467_v16 = vld [vmem:[%s4958_s1 + $0x214] ss:$8 sps:$4 sm:$0xff]  }
  0x4d   :  { %2250 = vmatprep.subr.bf16.mxu0 %v3374_v17  ;;  %2064 = vmatprep.mubr.bf16.mxu1 %v3455_v40  ;;  %v3470_v17 = vld [vmem:[%s4958_s1 + $0x614] ss:$8 sps:$4 sm:$0xff]   ;;  %v3489_v40 = vld [vmem:[%s4958_s1 + $0x250] ss:$8 sps:$4 sm:$0xff]  }
  0x4e   :  { %2276 = vmatprep.mubr.bf16.mxu0 %v3461_v43  ;;  %v3500_v43 = vld [vmem:[%s4958_s1 + $0x664] ss:$8 sps:$4 sm:$0xff]  }
  0x4f   :  { %2039 = vmatpush1.bf16.msra.mxu1 %v3369_v18  ;;  %v3465_v18 = vld [vmem:[%s4958_s1 + $0x210] ss:$8 sps:$4 sm:$0xff]  }
  0x50   :  { %2251 = vmatpush1.bf16.msra.mxu0 %v3372_v19  ;;  %2040 = vmatprep.subr.bf16.mxu1 %v3377_v20  ;;  %v3468_v19 = vld [vmem:[%s4958_s1 + $0x610] ss:$8 sps:$4 sm:$0xff]   ;;  %v3543_v20 = vld [vmem:[%s4959_s0 + $0x9c] ss:$72 sps:$4 sm:$0xff]  }
  0x51   :  { %2252 = vmatprep.subr.bf16.mxu0 %v3380_v21  ;;  %v3473_v21 = vld [vmem:[%s4958_s1 + $0x224] ss:$8 sps:$4 sm:$0xff]  }
  0x53   :  { %2041 = vmatpush1.bf16.msra.mxu1 %v3375_v22  ;;  %v3476_v22 = vld [vmem:[%s4958_s1 + $0x624] ss:$8 sps:$4 sm:$0xff]  }
  0x54   :  { %2253 = vmatpush1.bf16.msra.mxu0 %v3378_v23  ;;  %2042 = vmatprep.subr.bf16.mxu1 %v3383_v24  ;;  %v3548_v23 = vld [vmem:[%s4959_s0 + $0xbc] ss:$72 sps:$4 sm:$0xff]   ;;  %v3471_v24 = vld [vmem:[%s4958_s1 + $0x220] ss:$8 sps:$4 sm:$0xff]  }
  0x55   :  { %2254 = vmatprep.subr.bf16.mxu0 %v3386_v25  ;;  %v3474_v25 = vld [vmem:[%s4958_s1 + $0x620] ss:$8 sps:$4 sm:$0xff]  }
  0x57   :  { %2043 = vmatpush1.bf16.msra.mxu1 %v3381_v26  ;;  %v3553_v26 = vld [vmem:[%s4959_s0 + $0x98] ss:$72 sps:$4 sm:$0xff]  }
  0x58   :  { %2255 = vmatpush1.bf16.msra.mxu0 %v3384_v27  ;;  %2044 = vmatprep.subr.bf16.mxu1 %v3389_v29  ;;  %v3554_v27 = vld [vmem:[%s4959_s0 + $0xb8] ss:$72 sps:$4 sm:$0xff]   ;;  %v3482_v29 = vld [vmem:[%s4958_s1 + $0x634] ss:$8 sps:$4 sm:$0xff]  }
  0x59   :  { %2256 = vmatprep.subr.bf16.mxu0 %v3392_v30  ;;  %v3477_v30 = vld [vmem:[%s4958_s1 + $0x230] ss:$8 sps:$4 sm:$0xff]  }
  0x5b   :  { %2045 = vmatpush1.bf16.msra.mxu1 %v3387_v32  ;;  %v3563_v32 = vld [vmem:[%s4959_s0 + $0x14] ss:$72 sps:$4 sm:$0xff]  }
  0x5c   :  { %2257 = vmatpush1.bf16.msra.mxu0 %v3390_v33  ;;  %2046 = vmatprep.subr.bf16.mxu1 %v3395_v36  ;;  %v3485_v33 = vld [vmem:[%s4958_s1 + $0x244] ss:$8 sps:$4 sm:$0xff]   ;;  %v3483_v36 = vld [vmem:[%s4958_s1 + $0x240] ss:$8 sps:$4 sm:$0xff]  }
  0x5d   :  { %2258 = vmatprep.subr.bf16.mxu0 %v3398_v37  ;;  %v3486_v37 = vld [vmem:[%s4958_s1 + $0x640] ss:$8 sps:$4 sm:$0xff]  }
  0x5f   :  { %2047 = vmatpush1.bf16.msra.mxu1 %v3393_v38  ;;  %v3491_v38 = vld [vmem:[%s4958_s1 + $0x254] ss:$8 sps:$4 sm:$0xff]  }
  0x60   :  { %2259 = vmatpush1.bf16.msra.mxu0 %v3396_v39  ;;  %2048 = vmatprep.subr.bf16.mxu1 %v3401_v41  ;;  %v3494_v39 = vld [vmem:[%s4958_s1 + $0x654] ss:$8 sps:$4 sm:$0xff]   ;;  %v3492_v41 = vld [vmem:[%s4958_s1 + $0x650] ss:$8 sps:$4 sm:$0xff]  }
  0x61   :  { %2260 = vmatprep.subr.bf16.mxu0 %v3404_v42  ;;  %v3497_v42 = vld [vmem:[%s4958_s1 + $0x264] ss:$8 sps:$4 sm:$0xff]  }
  0x63   :  { %2049 = vmatpush1.bf16.msra.mxu1 %v3399_v44  ;;  %v3495_v44 = vld [vmem:[%s4958_s1 + $0x260] ss:$8 sps:$4 sm:$0xff]  }
  0x64   :  { %2261 = vmatpush1.bf16.msra.mxu0 %v3402_v45  ;;  %2050 = vmatprep.subr.bf16.mxu1 %v3407_v46  ;;  %v3498_v45 = vld [vmem:[%s4958_s1 + $0x660] ss:$8 sps:$4 sm:$0xff]   ;;  %v3503_v46 = vld [vmem:[%s4958_s1 + $0x274] ss:$8 sps:$4 sm:$0xff]  }
  0x65   :  { %2262 = vmatprep.subr.bf16.mxu0 %v3410_v47  ;;  %v3506_v47 = vld [vmem:[%s4958_s1 + $0x674] ss:$8 sps:$4 sm:$0xff]  }
  0x67   :  { %2051 = vmatpush1.bf16.msra.mxu1 %v3405_v48  ;;  %v3501_v48 = vld [vmem:[%s4958_s1 + $0x270] ss:$8 sps:$4 sm:$0xff]  }
  0x68   :  { %2263 = vmatpush1.bf16.msra.mxu0 %v3408_v49  ;;  %2052 = vmatprep.subr.bf16.mxu1 %v3413_v50  ;;  %v3504_v49 = vld [vmem:[%s4958_s1 + $0x670] ss:$8 sps:$4 sm:$0xff]   ;;  %v3509_v50 = vld [vmem:[%s4958_s1 + $0x284] ss:$8 sps:$4 sm:$0xff]  }
  0x69   :  { %2264 = vmatprep.subr.bf16.mxu0 %v3416_v51  ;;  %v3512_v51 = vld [vmem:[%s4958_s1 + $0x684] ss:$8 sps:$4 sm:$0xff]  }
  0x6b   :  { %2053 = vmatpush1.bf16.msra.mxu1 %v3411_v52  ;;  %v3507_v52 = vld [vmem:[%s4958_s1 + $0x280] ss:$8 sps:$4 sm:$0xff]  }
  0x6c   :  { %2265 = vmatpush1.bf16.msra.mxu0 %v3414_v53  ;;  %2054 = vmatprep.subr.bf16.mxu1 %v3419_v54  ;;  %v3510_v53 = vld [vmem:[%s4958_s1 + $0x680] ss:$8 sps:$4 sm:$0xff]   ;;  %v3515_v54 = vld [vmem:[%s4958_s1 + $0x294] ss:$8 sps:$4 sm:$0xff]  }
  0x6d   :  { %2266 = vmatprep.subr.bf16.mxu0 %v3422_v55  ;;  %v3518_v55 = vld [vmem:[%s4958_s1 + $0x694] ss:$8 sps:$4 sm:$0xff]  }
  0x6f   :  { %2055 = vmatpush1.bf16.msra.mxu1 %v3417_v56  ;;  %v3513_v56 = vld [vmem:[%s4958_s1 + $0x290] ss:$8 sps:$4 sm:$0xff]  }
  0x70   :  { %2267 = vmatpush1.bf16.msra.mxu0 %v3420_v57  ;;  %2056 = vmatprep.subr.bf16.mxu1 %v3425_v58  ;;  %v3516_v57 = vld [vmem:[%s4958_s1 + $0x690] ss:$8 sps:$4 sm:$0xff]   ;;  %v3521_v58 = vld [vmem:[%s4958_s1 + $0x2a4] ss:$8 sps:$4 sm:$0xff]  }
  0x71   :  { %2268 = vmatprep.subr.bf16.mxu0 %v3428_v59  ;;  %v3524_v59 = vld [vmem:[%s4958_s1 + $0x6a4] ss:$8 sps:$4 sm:$0xff]  }
  0x73   :  { %2057 = vmatpush1.bf16.msra.mxu1 %v3423_v60  ;;  %v3519_v60 = vld [vmem:[%s4958_s1 + $0x2a0] ss:$8 sps:$4 sm:$0xff]  }
  0x74   :  { %2269 = vmatpush1.bf16.msra.mxu0 %v3426_v61  ;;  %2058 = vmatprep.subr.bf16.mxu1 %v3431_v62  ;;  %v3522_v61 = vld [vmem:[%s4958_s1 + $0x6a0] ss:$8 sps:$4 sm:$0xff]   ;;  %v3527_v62 = vld [vmem:[%s4958_s1 + $0x2b4] ss:$8 sps:$4 sm:$0xff]  }
  0x75   :  { %2270 = vmatprep.subr.bf16.mxu0 %v3434_v63  ;;  %v3530_v63 = vld [vmem:[%s4958_s1 + $0x6b4] ss:$8 sps:$4 sm:$0xff]  }
  0x77   :  { %2059 = vmatpush1.bf16.msra.mxu1 %v3429_v0  ;;  %v3525_v0 = vld [vmem:[%s4958_s1 + $0x2b0] ss:$8 sps:$4 sm:$0xff]  }
  0x78   :  { %2271 = vmatpush1.bf16.msra.mxu0 %v3432_v1  ;;  %2060 = vmatprep.subr.bf16.mxu1 %v3439_v2  ;;  %v3528_v1 = vld [vmem:[%s4958_s1 + $0x6b0] ss:$8 sps:$4 sm:$0xff]   ;;  %v3533_v2 = vld [vmem:[%s4958_s1 + $0x2c4] ss:$8 sps:$4 sm:$0xff]  }
  0x79   :  { %2272 = vmatprep.subr.bf16.mxu0 %v3444_v3  ;;  %v3536_v3 = vld [vmem:[%s4958_s1 + $0x6c4] ss:$8 sps:$4 sm:$0xff]  }
  0x7b   :  { %2061 = vmatpush1.bf16.msra.mxu1 %v3437_v4  ;;  %v3531_v4 = vld [vmem:[%s4958_s1 + $0x2c0] ss:$8 sps:$4 sm:$0xff]  }
  0x7c   :  { %2273 = vmatpush1.bf16.msra.mxu0 %v3442_v5  ;;  %2062 = vmatprep.subr.bf16.mxu1 %v3449_v6  ;;  %v3534_v5 = vld [vmem:[%s4958_s1 + $0x6c0] ss:$8 sps:$4 sm:$0xff]   ;;  %v3539_v6 = vld [vmem:[%s4958_s1 + $0x2d4] ss:$8 sps:$4 sm:$0xff]  }
  0x7d   :  { %2274 = vmatprep.subr.bf16.mxu0 %v3452_v7  ;;  %v3542_v7 = vld [vmem:[%s4958_s1 + $0x6d4] ss:$8 sps:$4 sm:$0xff]  }
  0x7f   :  { %2063 = vmatpush1.bf16.msra.mxu1 %v3447_v8  ;;  %v3537_v8 = vld [vmem:[%s4958_s1 + $0x2d0] ss:$8 sps:$4 sm:$0xff]  }
  0x80   :  { %2275 = vmatpush1.bf16.msra.mxu0 %v3450_v9  ;;  %2085 = vmatprep.subr.bf16.mxu1 %v3458_v10  ;;  %v3540_v9 = vld [vmem:[%s4958_s1 + $0x6d0] ss:$8 sps:$4 sm:$0xff]   ;;  %v3547_v10 = vld [vmem:[%s4958_s1 + $0x2e4] ss:$8 sps:$4 sm:$0xff]  }
  0x81   :  { %2297 = vmatprep.subr.bf16.mxu0 %v3464_v11  ;;  %v3552_v11 = vld [vmem:[%s4958_s1 + $0x6e4] ss:$8 sps:$4 sm:$0xff]  }
  0x82   :  { %2065 = vmatmul.mubr.bf16.vlgmr.msra.gmra.mrb[0].mxu1 %v3453_v12  ;;  %v3545_v12 = vld [vmem:[%s4958_s1 + $0x2e0] ss:$8 sps:$4 sm:$0xff]  }
  0x83   :  { %2277 = vmatmul.mubr.bf16.vlgmr.msra.gmra.mrb[0].mxu0 %v3459_v14  ;;  %2086 = vmatpush1.bf16.msra.mxu1 %v3456_v13  ;;  %v3550_v13 = vld [vmem:[%s4958_s1 + $0x6e0] ss:$8 sps:$4 sm:$0xff]   ;;  %v3557_v14 = vld [vmem:[%s4958_s1 + $0x2f4] ss:$8 sps:$4 sm:$0xff]  }
  0x84   :  { %2298 = vmatpush1.bf16.msra.mxu0 %v3462_v15  ;;  %2087 = vmatprep.subr.bf16.mxu1 %v3467_v16  ;;  %v3560_v15 = vld [vmem:[%s4958_s1 + $0x6f4] ss:$8 sps:$4 sm:$0xff]   ;;  %v3555_v16 = vld [vmem:[%s4958_s1 + $0x2f0] ss:$8 sps:$4 sm:$0xff]  }
  0x85   :  { %2299 = vmatprep.subr.bf16.mxu0 %v3470_v17  ;;  %2074 = vmatprep.mubr.bf16.mxu1 %v3543_v20  ;;  %v3558_v17 = vld [vmem:[%s4958_s1 + $0x6f0] ss:$8 sps:$4 sm:$0xff]  }
  0x86   :  { %2286 = vmatprep.mubr.bf16.mxu0 %v3548_v23  ;;  %v3561_v20 = vld [vmem:[%s4959_s0 + $0x10] ss:$72 sps:$4 sm:$0xff]   ;;  %v3570_v23 = vld [vmem:[%s4958_s1 + $0x700] ss:$8 sps:$4 sm:$0xff]  }
  0x87   :  { %2088 = vmatpush1.bf16.msra.mxu1 %v3465_v18  ;;  %v3566_v18 = vld [vmem:[%s4958_s1 + $0x304] ss:$8 sps:$4 sm:$0xff]  }
  0x88   :  { %2300 = vmatpush1.bf16.msra.mxu0 %v3468_v19  ;;  %2089 = vmatprep.subr.bf16.mxu1 %v3473_v21  ;;  %v3572_v19 = vld [vmem:[%s4958_s1 + $0x704] ss:$8 sps:$4 sm:$0xff]   ;;  %v3564_v21 = vld [vmem:[%s4958_s1 + $0x300] ss:$8 sps:$4 sm:$0xff]  }
  0x89   :  { %2301 = vmatprep.subr.bf16.mxu0 %v3476_v22  ;;  %v3567_v22 = vld [vmem:[%s4959_s0 + $0x30] ss:$72 sps:$4 sm:$0xff]  }
  0x8a   :  { %2075 = vmatmul.mubr.bf16.gmra.mrb[4].mxu1 %v3553_v26  ;;  %v3651_v26 = vld [vmem:[%s4959_s0 + $0xa4] ss:$72 sps:$4 sm:$0xff]  }
  0x8b   :  { %2287 = vmatmul.mubr.bf16.gmra.mrb[4].mxu0 %v3554_v27  ;;  %2090 = vmatpush1.bf16.msra.mxu1 %v3471_v24  ;;  %v3575_v24 = vld [vmem:[%s4958_s1 + $0x314] ss:$8 sps:$4 sm:$0xff]   ;;  %v3657_v27 = vld [vmem:[%s4959_s0 + $0xc4] ss:$72 sps:$4 sm:$0xff]  }
  0x8c   :  { %2302 = vmatpush1.bf16.msra.mxu0 %v3474_v25  ;;  %2091 = vmatprep.subr.bf16.mxu1 %v3479_v28  ;;  %v3578_v25 = vld [vmem:[%s4958_s1 + $0x714] ss:$8 sps:$4 sm:$0xff]   ;;  %v3573_v28 = vld [vmem:[%s4958_s1 + $0x310] ss:$8 sps:$4 sm:$0xff]  }
  0x8d   :  { %2303 = vmatprep.subr.bf16.mxu0 %v3482_v29  ;;  %2117 = vmatprep.mubr.bf16.mxu1 %v3563_v32  ;;  %v3576_v29 = vld [vmem:[%s4958_s1 + $0x710] ss:$8 sps:$4 sm:$0xff]   ;;  %v3579_v32 = vld [vmem:[%s4958_s1 + $0x320] ss:$8 sps:$4 sm:$0xff]  }
  0x8e   :  { %2329 = vmatprep.mubr.bf16.mxu0 %v3569_v35  ;;  %v3662_v35 = vld [vmem:[%s4959_s0 + $0xc0] ss:$72 sps:$4 sm:$0xff]  }
  0x8f   :  { %2092 = vmatpush1.bf16.msra.mxu1 %v3477_v30  ;;  %v3581_v30 = vld [vmem:[%s4958_s1 + $0x324] ss:$8 sps:$4 sm:$0xff]  }
  0x90   :  { %2304 = vmatpush1.bf16.msra.mxu0 %v3480_v31  ;;  %2093 = vmatprep.subr.bf16.mxu1 %v3485_v33  ;;  %v3584_v31 = vld [vmem:[%s4958_s1 + $0x724] ss:$8 sps:$4 sm:$0xff]   ;;  %v3582_v33 = vld [vmem:[%s4958_s1 + $0x720] ss:$8 sps:$4 sm:$0xff]  }
  0x91   :  { %2305 = vmatprep.subr.bf16.mxu0 %v3488_v34  ;;  %v3653_v34 = vld [vmem:[%s4959_s0 + $0xa0] ss:$72 sps:$4 sm:$0xff]  }
  0x93   :  { %2094 = vmatpush1.bf16.msra.mxu1 %v3483_v36  ;;  %v3587_v36 = vld [vmem:[%s4958_s1 + $0x334] ss:$8 sps:$4 sm:$0xff]  }
  0x94   :  { %2306 = vmatpush1.bf16.msra.mxu0 %v3486_v37  ;;  %2095 = vmatprep.subr.bf16.mxu1 %v3491_v38  ;;  %v3590_v37 = vld [vmem:[%s4958_s1 + $0x734] ss:$8 sps:$4 sm:$0xff]  }
  0x95   :  { %2307 = vmatprep.subr.bf16.mxu0 %v3494_v39  ;;  %v3671_v38 = vld [vmem:[%s4959_s0 + $0x1c] ss:$72 sps:$4 sm:$0xff]  }
  0x96   :  { %v3674_v39 = vld [vmem:[%s4959_s0 + $0x3c] ss:$72 sps:$4 sm:$0xff]  }
  0x97   :  { %2096 = vmatpush1.bf16.msra.mxu1 %v3489_v40  ;;  %v3585_v40 = vld [vmem:[%s4958_s1 + $0x330] ss:$8 sps:$4 sm:$0xff]  }
  0x98   :  { %2308 = vmatpush1.bf16.msra.mxu0 %v3492_v41  ;;  %2097 = vmatprep.subr.bf16.mxu1 %v3497_v42  ;;  %v3588_v41 = vld [vmem:[%s4958_s1 + $0x730] ss:$8 sps:$4 sm:$0xff]   ;;  %v3593_v42 = vld [vmem:[%s4958_s1 + $0x344] ss:$8 sps:$4 sm:$0xff]  }
  0x99   :  { %2309 = vmatprep.subr.bf16.mxu0 %v3500_v43  ;;  %v3596_v43 = vld [vmem:[%s4958_s1 + $0x744] ss:$8 sps:$4 sm:$0xff]  }
  0x9b   :  { %2098 = vmatpush1.bf16.msra.mxu1 %v3495_v44  ;;  %v3591_v44 = vld [vmem:[%s4958_s1 + $0x340] ss:$8 sps:$4 sm:$0xff]  }
  0x9c   :  { %2310 = vmatpush1.bf16.msra.mxu0 %v3498_v45  ;;  %2099 = vmatprep.subr.bf16.mxu1 %v3503_v46  ;;  %v3594_v45 = vld [vmem:[%s4958_s1 + $0x740] ss:$8 sps:$4 sm:$0xff]   ;;  %v3599_v46 = vld [vmem:[%s4958_s1 + $0x354] ss:$8 sps:$4 sm:$0xff]  }
  0x9d   :  { %2311 = vmatprep.subr.bf16.mxu0 %v3506_v47  ;;  %v3602_v47 = vld [vmem:[%s4958_s1 + $0x754] ss:$8 sps:$4 sm:$0xff]  }
  0x9f   :  { %2100 = vmatpush1.bf16.msra.mxu1 %v3501_v48  ;;  %v3597_v48 = vld [vmem:[%s4958_s1 + $0x350] ss:$8 sps:$4 sm:$0xff]  }
  0xa0   :  { %2312 = vmatpush1.bf16.msra.mxu0 %v3504_v49  ;;  %2101 = vmatprep.subr.bf16.mxu1 %v3509_v50  ;;  %v3600_v49 = vld [vmem:[%s4958_s1 + $0x750] ss:$8 sps:$4 sm:$0xff]   ;;  %v3605_v50 = vld [vmem:[%s4958_s1 + $0x364] ss:$8 sps:$4 sm:$0xff]  }
  0xa1   :  { %2313 = vmatprep.subr.bf16.mxu0 %v3512_v51  ;;  %v3608_v51 = vld [vmem:[%s4958_s1 + $0x764] ss:$8 sps:$4 sm:$0xff]  }
  0xa3   :  { %2102 = vmatpush1.bf16.msra.mxu1 %v3507_v52  ;;  %v3603_v52 = vld [vmem:[%s4958_s1 + $0x360] ss:$8 sps:$4 sm:$0xff]  }
  0xa4   :  { %2314 = vmatpush1.bf16.msra.mxu0 %v3510_v53  ;;  %2103 = vmatprep.subr.bf16.mxu1 %v3515_v54  ;;  %v3606_v53 = vld [vmem:[%s4958_s1 + $0x760] ss:$8 sps:$4 sm:$0xff]   ;;  %v3611_v54 = vld [vmem:[%s4958_s1 + $0x374] ss:$8 sps:$4 sm:$0xff]  }
  0xa5   :  { %2315 = vmatprep.subr.bf16.mxu0 %v3518_v55  ;;  %v3614_v55 = vld [vmem:[%s4958_s1 + $0x774] ss:$8 sps:$4 sm:$0xff]  }
  0xa7   :  { %2104 = vmatpush1.bf16.msra.mxu1 %v3513_v56  ;;  %v3609_v56 = vld [vmem:[%s4958_s1 + $0x370] ss:$8 sps:$4 sm:$0xff]  }
  0xa8   :  { %2316 = vmatpush1.bf16.msra.mxu0 %v3516_v57  ;;  %2105 = vmatprep.subr.bf16.mxu1 %v3521_v58  ;;  %v3612_v57 = vld [vmem:[%s4958_s1 + $0x770] ss:$8 sps:$4 sm:$0xff]   ;;  %v3617_v58 = vld [vmem:[%s4958_s1 + $0x384] ss:$8 sps:$4 sm:$0xff]  }
  0xa9   :  { %2317 = vmatprep.subr.bf16.mxu0 %v3524_v59  ;;  %v3620_v59 = vld [vmem:[%s4958_s1 + $0x784] ss:$8 sps:$4 sm:$0xff]  }
  0xab   :  { %2106 = vmatpush1.bf16.msra.mxu1 %v3519_v60  ;;  %v3615_v60 = vld [vmem:[%s4958_s1 + $0x380] ss:$8 sps:$4 sm:$0xff]  }
  0xac   :  { %2318 = vmatpush1.bf16.msra.mxu0 %v3522_v61  ;;  %2107 = vmatprep.subr.bf16.mxu1 %v3527_v62  ;;  %v3618_v61 = vld [vmem:[%s4958_s1 + $0x780] ss:$8 sps:$4 sm:$0xff]   ;;  %v3623_v62 = vld [vmem:[%s4958_s1 + $0x394] ss:$8 sps:$4 sm:$0xff]  }
  0xad   :  { %2319 = vmatprep.subr.bf16.mxu0 %v3530_v63  ;;  %v3626_v63 = vld [vmem:[%s4958_s1 + $0x794] ss:$8 sps:$4 sm:$0xff]  }
  0xaf   :  { %2108 = vmatpush1.bf16.msra.mxu1 %v3525_v0  ;;  %v3621_v0 = vld [vmem:[%s4958_s1 + $0x390] ss:$8 sps:$4 sm:$0xff]  }
  0xb0   :  { %2320 = vmatpush1.bf16.msra.mxu0 %v3528_v1  ;;  %2109 = vmatprep.subr.bf16.mxu1 %v3533_v2  ;;  %v3624_v1 = vld [vmem:[%s4958_s1 + $0x790] ss:$8 sps:$4 sm:$0xff]   ;;  %v3629_v2 = vld [vmem:[%s4958_s1 + $0x3a4] ss:$8 sps:$4 sm:$0xff]  }
  0xb1   :  { %2321 = vmatprep.subr.bf16.mxu0 %v3536_v3  ;;  %v3632_v3 = vld [vmem:[%s4958_s1 + $0x7a4] ss:$8 sps:$4 sm:$0xff]  }
  0xb3   :  { %2110 = vmatpush1.bf16.msra.mxu1 %v3531_v4  ;;  %v3627_v4 = vld [vmem:[%s4958_s1 + $0x3a0] ss:$8 sps:$4 sm:$0xff]  }
  0xb4   :  { %2322 = vmatpush1.bf16.msra.mxu0 %v3534_v5  ;;  %2111 = vmatprep.subr.bf16.mxu1 %v3539_v6  ;;  %v3630_v5 = vld [vmem:[%s4958_s1 + $0x7a0] ss:$8 sps:$4 sm:$0xff]   ;;  %v3635_v6 = vld [vmem:[%s4958_s1 + $0x3b4] ss:$8 sps:$4 sm:$0xff]  }
  0xb5   :  { %2323 = vmatprep.subr.bf16.mxu0 %v3542_v7  ;;  %v3638_v7 = vld [vmem:[%s4958_s1 + $0x7b4] ss:$8 sps:$4 sm:$0xff]  }
  0xb7   :  { %2112 = vmatpush1.bf16.msra.mxu1 %v3537_v8  ;;  %v3633_v8 = vld [vmem:[%s4958_s1 + $0x3b0] ss:$8 sps:$4 sm:$0xff]  }
  0xb8   :  { %2324 = vmatpush1.bf16.msra.mxu0 %v3540_v9  ;;  %2113 = vmatprep.subr.bf16.mxu1 %v3547_v10  ;;  %v3636_v9 = vld [vmem:[%s4958_s1 + $0x7b0] ss:$8 sps:$4 sm:$0xff]   ;;  %v3641_v10 = vld [vmem:[%s4958_s1 + $0x3c4] ss:$8 sps:$4 sm:$0xff]  }
  0xb9   :  { %2325 = vmatprep.subr.bf16.mxu0 %v3552_v11  ;;  %v3644_v11 = vld [vmem:[%s4958_s1 + $0x7c4] ss:$8 sps:$4 sm:$0xff]  }
  0xbb   :  { %2114 = vmatpush1.bf16.msra.mxu1 %v3545_v12  ;;  %v3639_v12 = vld [vmem:[%s4958_s1 + $0x3c0] ss:$8 sps:$4 sm:$0xff]  }
  0xbc   :  { %2326 = vmatpush1.bf16.msra.mxu0 %v3550_v13  ;;  %2115 = vmatprep.subr.bf16.mxu1 %v3557_v14  ;;  %v3642_v13 = vld [vmem:[%s4958_s1 + $0x7c0] ss:$8 sps:$4 sm:$0xff]   ;;  %v3647_v14 = vld [vmem:[%s4958_s1 + $0x3d4] ss:$8 sps:$4 sm:$0xff]  }
  0xbd   :  { %2327 = vmatprep.subr.bf16.mxu0 %v3560_v15  ;;  %v3650_v15 = vld [vmem:[%s4958_s1 + $0x7d4] ss:$8 sps:$4 sm:$0xff]  }
  0xbf   :  { %2116 = vmatpush1.bf16.msra.mxu1 %v3555_v16  ;;  %v3645_v16 = vld [vmem:[%s4958_s1 + $0x3d0] ss:$8 sps:$4 sm:$0xff]  }
  0xc0   :  { %2328 = vmatpush1.bf16.msra.mxu0 %v3558_v17  ;;  %2138 = vmatprep.subr.bf16.mxu1 %v3566_v18  ;;  %v3648_v17 = vld [vmem:[%s4958_s1 + $0x7d0] ss:$8 sps:$4 sm:$0xff]   ;;  %v3656_v18 = vld [vmem:[%s4958_s1 + $0x3e4] ss:$8 sps:$4 sm:$0xff]  }
  0xc1   :  { %2350 = vmatprep.subr.bf16.mxu0 %v3572_v19  ;;  %v3661_v19 = vld [vmem:[%s4958_s1 + $0x7e4] ss:$8 sps:$4 sm:$0xff]  }
  0xc2   :  { %2118 = vmatmul.mubr.bf16.vlgmr.msra.gmra.mrb[0].mxu1 %v3561_v20  ;;  %v3654_v20 = vld [vmem:[%s4958_s1 + $0x3e0] ss:$8 sps:$4 sm:$0xff]  }
  0xc3   :  { %2330 = vmatmul.mubr.bf16.vlgmr.msra.gmra.mrb[0].mxu0 %v3567_v22  ;;  %2139 = vmatpush1.bf16.msra.mxu1 %v3564_v21  ;;  %v3659_v21 = vld [vmem:[%s4958_s1 + $0x7e0] ss:$8 sps:$4 sm:$0xff]   ;;  %v3665_v22 = vld [vmem:[%s4958_s1 + $0x3f4] ss:$8 sps:$4 sm:$0xff]  }
  0xc4   :  { %2351 = vmatpush1.bf16.msra.mxu0 %v3570_v23  ;;  %2140 = vmatprep.subr.bf16.mxu1 %v3575_v24  ;;  %v3668_v23 = vld [vmem:[%s4958_s1 + $0x7f4] ss:$8 sps:$4 sm:$0xff]   ;;  %v3663_v24 = vld [vmem:[%s4958_s1 + $0x3f0] ss:$8 sps:$4 sm:$0xff]  }
  0xc5   :  { %2352 = vmatprep.subr.bf16.mxu0 %v3578_v25  ;;  %2127 = vmatprep.mubr.bf16.mxu1 %v3651_v26  ;;  %v3666_v25 = vld [vmem:[%s4958_s1 + $0x7f0] ss:$8 sps:$4 sm:$0xff]   ;;  %v3677_v26 = vld [vmem:[%s4958_s1 + $0x804] ss:$8 sps:$4 sm:$0xff]  }
  0xc6   :  { %2339 = vmatprep.mubr.bf16.mxu0 %v3657_v27  ;;  %v3669_v27 = vld [vmem:[%s4959_s0 + $0x18] ss:$72 sps:$4 sm:$0xff]  }
  0xc7   :  { %2141 = vmatpush1.bf16.msra.mxu1 %v3573_v28  ;;  %v3672_v28 = vld [vmem:[%s4959_s0 + $0x38] ss:$72 sps:$4 sm:$0xff]  }
  0xc8   :  { %2353 = vmatpush1.bf16.msra.mxu0 %v3576_v29  ;;  %2142 = vmatprep.subr.bf16.mxu1 %v3581_v30  ;;  %v3675_v29 = vld [vmem:[%s4958_s1 + $0x800] ss:$8 sps:$4 sm:$0xff]   ;;  %v3681_v30 = vld [vmem:[%s4959_s0 + $0xac] ss:$72 sps:$4 sm:$0xff]  }
  0xc9   :  { %2354 = vmatprep.subr.bf16.mxu0 %v3584_v31  ;;  %v3680_v31 = vld [vmem:[%s4958_s1 + $0x814] ss:$8 sps:$4 sm:$0xff]  }
  0xca   :  { %2128 = vmatmul.mubr.bf16.gmra.mrb[4].mxu1 %v3653_v34  ;;  %v3686_v34 = vld [vmem:[%s4958_s1 + $0x824] ss:$8 sps:$4 sm:$0xff]  }
  0xcb   :  { %2340 = vmatmul.mubr.bf16.gmra.mrb[4].mxu0 %v3662_v35  ;;  %2143 = vmatpush1.bf16.msra.mxu1 %v3579_v32  ;;  %v3720_v32 = vld [vmem:[%s4959_s0 + $0xcc] ss:$72 sps:$4 sm:$0xff]   ;;  %v3683_v35 = vld [vmem:[%s4959_s0 + $0xa8] ss:$72 sps:$4 sm:$0xff]  }
  0xcc   :  { %2355 = vmatpush1.bf16.msra.mxu0 %v3582_v33  ;;  %2144 = vmatprep.subr.bf16.mxu1 %v3587_v36  ;;  %v3678_v33 = vld [vmem:[%s4958_s1 + $0x810] ss:$8 sps:$4 sm:$0xff]  }
  0xcd   :  { %2356 = vmatprep.subr.bf16.mxu0 %v3590_v37  ;;  %2170 = vmatprep.mubr.bf16.mxu1 %v3671_v38  ;;  %v3722_v36 = vld [vmem:[%s4959_s0 + $0xc8] ss:$72 sps:$4 sm:$0xff]   ;;  %v3731_v38 = vld [vmem:[%s4959_s0 + $0x44] ss:$72 sps:$4 sm:$0xff]  }
  0xce   :  { %2382 = vmatprep.mubr.bf16.mxu0 %v3674_v39  ;;  %v3684_v37 = vld [vmem:[%s4958_s1 + $0x820] ss:$8 sps:$4 sm:$0xff]   ;;  %v3689_v39 = vld [vmem:[%s4958_s1 + $0x834] ss:$8 sps:$4 sm:$0xff]  }
  0xcf   :  { %2145 = vmatpush1.bf16.msra.mxu1 %v3585_v40  ;;  %v3687_v40 = vld [vmem:[%s4958_s1 + $0x830] ss:$8 sps:$4 sm:$0xff]  }
  0xd0   :  { %2357 = vmatpush1.bf16.msra.mxu0 %v3588_v41  ;;  %2146 = vmatprep.subr.bf16.mxu1 %v3593_v42  ;;  %v3692_v41 = vld [vmem:[%s4958_s1 + $0x844] ss:$8 sps:$4 sm:$0xff]   ;;  %v3690_v42 = vld [vmem:[%s4958_s1 + $0x840] ss:$8 sps:$4 sm:$0xff]  }
  0xd1   :  { %2358 = vmatprep.subr.bf16.mxu0 %v3596_v43  ;;  %v3695_v43 = vld [vmem:[%s4958_s1 + $0x854] ss:$8 sps:$4 sm:$0xff]  }
  0xd3   :  { %2147 = vmatpush1.bf16.msra.mxu1 %v3591_v44  ;;  %v3693_v44 = vld [vmem:[%s4958_s1 + $0x850] ss:$8 sps:$4 sm:$0xff]  }
  0xd4   :  { %2359 = vmatpush1.bf16.msra.mxu0 %v3594_v45  ;;  %2148 = vmatprep.subr.bf16.mxu1 %v3599_v46  ;;  %v3698_v45 = vld [vmem:[%s4958_s1 + $0x864] ss:$8 sps:$4 sm:$0xff]   ;;  %v3696_v46 = vld [vmem:[%s4958_s1 + $0x860] ss:$8 sps:$4 sm:$0xff]  }
  0xd5   :  { %2360 = vmatprep.subr.bf16.mxu0 %v3602_v47  ;;  %v3701_v47 = vld [vmem:[%s4958_s1 + $0x874] ss:$8 sps:$4 sm:$0xff]  }
  0xd7   :  { %2149 = vmatpush1.bf16.msra.mxu1 %v3597_v48  ;;  %v3699_v48 = vld [vmem:[%s4958_s1 + $0x870] ss:$8 sps:$4 sm:$0xff]  }
  0xd8   :  { %2361 = vmatpush1.bf16.msra.mxu0 %v3600_v49  ;;  %2150 = vmatprep.subr.bf16.mxu1 %v3605_v50  ;;  %v3704_v49 = vld [vmem:[%s4958_s1 + $0x884] ss:$8 sps:$4 sm:$0xff]   ;;  %v3702_v50 = vld [vmem:[%s4958_s1 + $0x880] ss:$8 sps:$4 sm:$0xff]  }
  0xd9   :  { %2362 = vmatprep.subr.bf16.mxu0 %v3608_v51  ;;  %v3707_v51 = vld [vmem:[%s4958_s1 + $0x894] ss:$8 sps:$4 sm:$0xff]  }
  0xdb   :  { %2151 = vmatpush1.bf16.msra.mxu1 %v3603_v52  ;;  %v3705_v52 = vld [vmem:[%s4958_s1 + $0x890] ss:$8 sps:$4 sm:$0xff]  }
  0xdc   :  { %2363 = vmatpush1.bf16.msra.mxu0 %v3606_v53  ;;  %2152 = vmatprep.subr.bf16.mxu1 %v3611_v54  ;;  %v3710_v53 = vld [vmem:[%s4958_s1 + $0x8a4] ss:$8 sps:$4 sm:$0xff]   ;;  %v3708_v54 = vld [vmem:[%s4958_s1 + $0x8a0] ss:$8 sps:$4 sm:$0xff]  }
  0xdd   :  { %2364 = vmatprep.subr.bf16.mxu0 %v3614_v55  ;;  %v3713_v55 = vld [vmem:[%s4958_s1 + $0x8b4] ss:$8 sps:$4 sm:$0xff]  }
  0xdf   :  { %2153 = vmatpush1.bf16.msra.mxu1 %v3609_v56  ;;  %v3711_v56 = vld [vmem:[%s4958_s1 + $0x8b0] ss:$8 sps:$4 sm:$0xff]  }
  0xe0   :  { %2365 = vmatpush1.bf16.msra.mxu0 %v3612_v57  ;;  %2154 = vmatprep.subr.bf16.mxu1 %v3617_v58  ;;  %v3716_v57 = vld [vmem:[%s4958_s1 + $0x8c4] ss:$8 sps:$4 sm:$0xff]   ;;  %v3714_v58 = vld [vmem:[%s4958_s1 + $0x8c0] ss:$8 sps:$4 sm:$0xff]  }
  0xe1   :  { %2366 = vmatprep.subr.bf16.mxu0 %v3620_v59  ;;  %v3719_v59 = vld [vmem:[%s4958_s1 + $0x8d4] ss:$8 sps:$4 sm:$0xff]  }
  0xe3   :  { %2155 = vmatpush1.bf16.msra.mxu1 %v3615_v60  ;;  %v3717_v60 = vld [vmem:[%s4958_s1 + $0x8d0] ss:$8 sps:$4 sm:$0xff]  }
  0xe4   :  { %2367 = vmatpush1.bf16.msra.mxu0 %v3618_v61  ;;  %2156 = vmatprep.subr.bf16.mxu1 %v3623_v62  ;;  %v3725_v61 = vld [vmem:[%s4958_s1 + $0x8e4] ss:$8 sps:$4 sm:$0xff]   ;;  %v3723_v62 = vld [vmem:[%s4958_s1 + $0x8e0] ss:$8 sps:$4 sm:$0xff]  }
  0xe5   :  { %2368 = vmatprep.subr.bf16.mxu0 %v3626_v63  ;;  %v3728_v63 = vld [vmem:[%s4958_s1 + $0x8f4] ss:$8 sps:$4 sm:$0xff]  }
  0xe7   :  { %2157 = vmatpush1.bf16.msra.mxu1 %v3621_v0  ;;  %v3726_v0 = vld [vmem:[%s4958_s1 + $0x8f0] ss:$8 sps:$4 sm:$0xff]  }
  0xe8   :  { %2369 = vmatpush1.bf16.msra.mxu0 %v3624_v1  ;;  %2158 = vmatprep.subr.bf16.mxu1 %v3629_v2  ;;  %v3729_v1 = vld [vmem:[%s4959_s0 + $0x40] ss:$72 sps:$4 sm:$0xff]   ;;  %v3732_v2 = vld [vmem:[%s4959_s0 + $0xd4] ss:$72 sps:$4 sm:$0xff]  }
  0xe9   :  { %2370 = vmatprep.subr.bf16.mxu0 %v3632_v3  ;;  %v3734_v3 = vld [vmem:[%s4959_s0 + $0xd0] ss:$72 sps:$4 sm:$0xff]  }
  0xeb   :  { %2159 = vmatpush1.bf16.msra.mxu1 %v3627_v4  ;;  %v3737_v4 = vld [vmem:[%s4960_s3 + $0x4] ss:$8 sps:$4 sm:$0xff]  }
  0xec   :  { %2371 = vmatpush1.bf16.msra.mxu0 %v3630_v5  ;;  %2160 = vmatprep.subr.bf16.mxu1 %v3635_v6  ;;  %v3735_v5 = vld [vmem:[%s4960_s3] ss:$8 sps:$4 sm:$0xff]   ;;  %v3740_v6 = vld [vmem:[%s4960_s3 + $0x14] ss:$8 sps:$4 sm:$0xff]  }
  0xed   :  { %2372 = vmatprep.subr.bf16.mxu0 %v3638_v7  ;;  %v3738_v7 = vld [vmem:[%s4960_s3 + $0x10] ss:$8 sps:$4 sm:$0xff]  }
  0xef   :  { %2161 = vmatpush1.bf16.msra.mxu1 %v3633_v8  ;;  %v3743_v8 = vld [vmem:[%s4960_s3 + $0x24] ss:$8 sps:$4 sm:$0xff]  }
  0xf0   :  { %2373 = vmatpush1.bf16.msra.mxu0 %v3636_v9  ;;  %2162 = vmatprep.subr.bf16.mxu1 %v3641_v10  ;;  %v3741_v9 = vld [vmem:[%s4960_s3 + $0x20] ss:$8 sps:$4 sm:$0xff]   ;;  %v3746_v10 = vld [vmem:[%s4960_s3 + $0x34] ss:$8 sps:$4 sm:$0xff]  }
  0xf1   :  { %2374 = vmatprep.subr.bf16.mxu0 %v3644_v11  ;;  %v3744_v11 = vld [vmem:[%s4960_s3 + $0x30] ss:$8 sps:$4 sm:$0xff]  }
  0xf3   :  { %2163 = vmatpush1.bf16.msra.mxu1 %v3639_v12  ;;  %v3749_v12 = vld [vmem:[%s4960_s3 + $0x44] ss:$8 sps:$4 sm:$0xff]  }
  0xf4   :  { %2375 = vmatpush1.bf16.msra.mxu0 %v3642_v13  ;;  %2164 = vmatprep.subr.bf16.mxu1 %v3647_v14  ;;  %v3747_v13 = vld [vmem:[%s4960_s3 + $0x40] ss:$8 sps:$4 sm:$0xff]   ;;  %v3752_v14 = vld [vmem:[%s4960_s3 + $0x54] ss:$8 sps:$4 sm:$0xff]  }
  0xf5   :  { %2376 = vmatprep.subr.bf16.mxu0 %v3650_v15  ;;  %v3750_v15 = vld [vmem:[%s4960_s3 + $0x50] ss:$8 sps:$4 sm:$0xff]  }
  0xf7   :  { %2165 = vmatpush1.bf16.msra.mxu1 %v3645_v16  ;;  %v3755_v16 = vld [vmem:[%s4960_s3 + $0x64] ss:$8 sps:$4 sm:$0xff]  }
  0xf8   :  { %2377 = vmatpush1.bf16.msra.mxu0 %v3648_v17  ;;  %2166 = vmatprep.subr.bf16.mxu1 %v3656_v18  ;;  %v3753_v17 = vld [vmem:[%s4960_s3 + $0x60] ss:$8 sps:$4 sm:$0xff]   ;;  %v3758_v18 = vld [vmem:[%s4960_s3 + $0x74] ss:$8 sps:$4 sm:$0xff]  }
  0xf9   :  { %2378 = vmatprep.subr.bf16.mxu0 %v3661_v19  ;;  %v3756_v19 = vld [vmem:[%s4960_s3 + $0x70] ss:$8 sps:$4 sm:$0xff]  }
  0xfb   :  { %2167 = vmatpush1.bf16.msra.mxu1 %v3654_v20  ;;  %v3761_v20 = vld [vmem:[%s4960_s3 + $0x84] ss:$8 sps:$4 sm:$0xff]  }
  0xfc   :  { %2379 = vmatpush1.bf16.msra.mxu0 %v3659_v21  ;;  %2168 = vmatprep.subr.bf16.mxu1 %v3665_v22  ;;  %v3759_v21 = vld [vmem:[%s4960_s3 + $0x80] ss:$8 sps:$4 sm:$0xff]   ;;  %v3764_v22 = vld [vmem:[%s4960_s3 + $0x94] ss:$8 sps:$4 sm:$0xff]  }
  0xfd   :  { %2380 = vmatprep.subr.bf16.mxu0 %v3668_v23  ;;  %v3762_v23 = vld [vmem:[%s4960_s3 + $0x90] ss:$8 sps:$4 sm:$0xff]  }
  0xff   :  { %2169 = vmatpush1.bf16.msra.mxu1 %v3663_v24  ;;  %v3767_v24 = vld [vmem:[%s4960_s3 + $0xa4] ss:$8 sps:$4 sm:$0xff]  }
 0x100   :  { %2381 = vmatpush1.bf16.msra.mxu0 %v3666_v25  ;;  %2701 = vmatprep.subr.bf16.mxu1 %v3737_v4  ;;  %v3765_v25 = vld [vmem:[%s4960_s3 + $0xa0] ss:$8 sps:$4 sm:$0xff]  }
 0x101   :  { %2403 = vmatprep.subr.bf16.mxu0 %v3677_v26  ;;  %v3770_v26 = vld [vmem:[%s4960_s3 + $0xb4] ss:$8 sps:$4 sm:$0xff]  }
 0x102   :  { %2171 = vmatmul.mubr.bf16.vlgmr.msra.gmra.mrb[0].mxu1 %v3669_v27  ;;  %v3768_v27 = vld [vmem:[%s4960_s3 + $0xb0] ss:$8 sps:$4 sm:$0xff]  }
 0x103   :  { %2383 = vmatmul.mubr.bf16.vlgmr.msra.gmra.mrb[0].mxu0 %v3672_v28  ;;  %2180 = vmatprep.mubr.bf16.mxu1 %v3681_v30  ;;  %v3773_v28 = vld [vmem:[%s4960_s3 + $0xc4] ss:$8 sps:$4 sm:$0xff]   ;;  %v3776_v30 = vld [vmem:[%s4960_s3 + $0xd4] ss:$8 sps:$4 sm:$0xff]  }
 0x104   :  { %2404 = vmatpush1.bf16.msra.mxu0 %v3675_v29  ;;  %2392 = vmatprep.mubr.bf16.mxu0 %v3720_v32  ;;  %v3771_v29 = vld [vmem:[%s4960_s3 + $0xc0] ss:$8 sps:$4 sm:$0xff]   ;;  %v3779_v32 = vld [vmem:[%s4960_s3 + $0xe4] ss:$8 sps:$4 sm:$0xff]  }
 0x105   :  { %2405 = vmatprep.subr.bf16.mxu0 %v3680_v31  ;;  %2702 = vmatpush1.bf16.msra.mxu1 %v3735_v5  ;;  %v3774_v31 = vld [vmem:[%s4960_s3 + $0xd0] ss:$8 sps:$4 sm:$0xff]  }
 0x106   :  { %2703 = vmatprep.subr.bf16.mxu1 %v3740_v6 }
 0x108   :  { %2406 = vmatpush1.bf16.msra.mxu0 %v3678_v33  ;;  %v3777_v33 = vld [vmem:[%s4960_s3 + $0xe0] ss:$8 sps:$4 sm:$0xff]  }
 0x109   :  { %2407 = vmatprep.subr.bf16.mxu0 %v3686_v34  ;;  %2704 = vmatpush1.bf16.msra.mxu1 %v3738_v7  ;;  %v3782_v34 = vld [vmem:[%s4960_s3 + $0xf4] ss:$8 sps:$4 sm:$0xff]  }
 0x10a   :  { %2181 = vmatmul.mubr.bf16.gmra.mrb[4].mxu1 %v3683_v35  ;;  %2705 = vmatprep.subr.bf16.mxu1 %v3743_v8  ;;  %v3780_v35 = vld [vmem:[%s4960_s3 + $0xf0] ss:$8 sps:$4 sm:$0xff]  }
 0x10b   :  { %2393 = vmatmul.mubr.bf16.gmra.mrb[4].mxu0 %v3722_v36 }
 0x10c   :  { %2408 = vmatpush1.bf16.msra.mxu0 %v3684_v37  ;;  %2435 = vmatprep.mubr.bf16.mxu0 %v3731_v38 }
 0x10d   :  { %2409 = vmatprep.subr.bf16.mxu0 %v3689_v39  ;;  %2706 = vmatpush1.bf16.msra.mxu1 %v3741_v9 }
 0x10e   :  { %2707 = vmatprep.subr.bf16.mxu1 %v3746_v10 }
 0x110   :  { %2410 = vmatpush1.bf16.msra.mxu0 %v3687_v40 }
 0x111   :  { %2411 = vmatprep.subr.bf16.mxu0 %v3692_v41  ;;  %2708 = vmatpush1.bf16.msra.mxu1 %v3744_v11 }
 0x112   :  { %2709 = vmatprep.subr.bf16.mxu1 %v3749_v12 }
 0x114   :  { %2412 = vmatpush1.bf16.msra.mxu0 %v3690_v42 }
 0x115   :  { %2413 = vmatprep.subr.bf16.mxu0 %v3695_v43  ;;  %2710 = vmatpush1.bf16.msra.mxu1 %v3747_v13 }
 0x116   :  { %2711 = vmatprep.subr.bf16.mxu1 %v3752_v14 }
 0x118   :  { %2414 = vmatpush1.bf16.msra.mxu0 %v3693_v44  ;;  %v349_v44 = vlaneseq }
 0x119   :  { %2415 = vmatprep.subr.bf16.mxu0 %v3698_v45  ;;  %2712 = vmatpush1.bf16.msra.mxu1 %v3750_v15 }
 0x11a   :  { %2713 = vmatprep.subr.bf16.mxu1 %v3755_v16  ;;  %v350_v45 = vshrl.u32 %v349_v44, 7 }
 0x11c   :  { %2416 = vmatpush1.bf16.msra.mxu0 %v3696_v46  ;;  %v4886_v46 = vsub.s32 0, %v350_v45 }
 0x11d   :  { %2417 = vmatprep.subr.bf16.mxu0 %v3701_v47  ;;  %2714 = vmatpush1.bf16.msra.mxu1 %v3753_v17  ;;  %v347_v47 = vld [vmem:[%s4961_s2] ss:$8 sm:$0x3] }
 0x11e   :  { %2715 = vmatprep.subr.bf16.mxu1 %v3758_v18 }
 0x120   :  { %2418 = vmatpush1.bf16.msra.mxu0 %v3699_v48  ;;  %v4891_v48 = vsub.s32 1, %v350_v45 }
 0x121   :  { %2419 = vmatprep.subr.bf16.mxu0 %v3704_v49  ;;  %2716 = vmatpush1.bf16.msra.mxu1 %v3756_v19  ;;  %v352_v49 = vrot.slane %v347_v47, %v4886_v46 }
 0x122   :  { %2717 = vmatprep.subr.bf16.mxu1 %v3761_v20 }
 0x124   :  { %2420 = vmatpush1.bf16.msra.mxu0 %v3702_v50  ;;  %v3143_v50 = vld [vmem:[%s4961_s2 + $0x1] ss:$8 sm:$0x3] }
 0x125   :  { %2421 = vmatprep.subr.bf16.mxu0 %v3707_v51  ;;  %2718 = vmatpush1.bf16.msra.mxu1 %v3759_v21  ;;  %v356_v51 = vrot.slane %v347_v47, %v4891_v48  ;;  %v2791_v47 = vld [vmem:[%s4963_s5] sm:$0xff] }
 0x126   :  { %2719 = vmatprep.subr.bf16.mxu1 %v3764_v22 }
 0x128   :  { %2422 = vmatpush1.bf16.msra.mxu0 %v3705_v52 }
 0x129   :  { %2423 = vmatprep.subr.bf16.mxu0 %v3710_v53  ;;  %2720 = vmatpush1.bf16.msra.mxu1 %v3762_v23  ;;  %v2470_v53 = vrot.slane %v3143_v50, %v4886_v46 }
 0x12a   :  { %2721 = vmatprep.subr.bf16.mxu1 %v3767_v24 }
 0x12c   :  { %2424 = vmatpush1.bf16.msra.mxu0 %v3708_v54  ;;  %v2474_v54 = vrot.slane %v3143_v50, %v4891_v48 }
 0x12d   :  { %2425 = vmatprep.subr.bf16.mxu0 %v3713_v55  ;;  %2722 = vmatpush1.bf16.msra.mxu1 %v3765_v25 }
 0x12e   :  { %2723 = vmatprep.subr.bf16.mxu1 %v3770_v26 }
 0x130   :  { %2426 = vmatpush1.bf16.msra.mxu0 %v3711_v56 }
 0x131   :  { %2427 = vmatprep.subr.bf16.mxu0 %v3716_v57  ;;  %2724 = vmatpush1.bf16.msra.mxu1 %v3768_v27 }
 0x132   :  { %2725 = vmatprep.subr.bf16.mxu1 %v3773_v28 }
 0x134   :  { %2428 = vmatpush1.bf16.msra.mxu0 %v3714_v58 }
 0x135   :  { %2429 = vmatprep.subr.bf16.mxu0 %v3719_v59  ;;  %2726 = vmatpush1.bf16.msra.mxu1 %v3771_v29 }
 0x136   :  { %2727 = vmatprep.subr.bf16.mxu1 %v3776_v30 }
 0x138   :  { %2430 = vmatpush1.bf16.msra.mxu0 %v3717_v60 }
 0x139   :  { %2431 = vmatprep.subr.bf16.mxu0 %v3725_v61  ;;  %2728 = vmatpush1.bf16.msra.mxu1 %v3774_v31 }
 0x13a   :  { %2729 = vmatprep.subr.bf16.mxu1 %v3779_v32 }
 0x13c   :  { %2432 = vmatpush1.bf16.msra.mxu0 %v3723_v62 }
 0x13d   :  { %2433 = vmatprep.subr.bf16.mxu0 %v3728_v63  ;;  %2730 = vmatpush1.bf16.msra.mxu1 %v3777_v33 }
 0x13e   :  { %2731 = vmatprep.subr.bf16.mxu1 %v3782_v34  ;;  %v2529_v34 = vld [vmem:[%s4962_s4] ss:$8 sm:$0x3] }
 0x140   :  { %2434 = vmatpush1.bf16.msra.mxu0 %v3726_v0 }
 0x141   :  { %2732 = vmatpush1.bf16.msra.mxu1 %v3780_v35  ;;  %v3176_v35 = vld [vmem:[%s4962_s4 + $0x1] ss:$8 sm:$0x3] }
 0x143   :  { %2436 = vmatmul.mubr.bf16.vlgmr.msra.gmra.mrb[0].mxu0 %v3729_v1 }
 0x144   :  { %2445 = vmatprep.mubr.bf16.mxu0 %v3732_v2 }
 0x14b   :  { %2446 = vmatmul.mubr.bf16.gmra.mrb[4].mxu0 %v3734_v3 }
 0x1d5   :  { %v2172_v36 = vpop.f32.mrb[0].mxu1 }
 0x1d6   :  { %v2174_v37 = vpop.f32.mrb[1].mxu1  ;;  %v3177_v52 = vadd.f32 %v2172_v36, %v352_v49  ;;  %v2534_v36 = vrot.slane %v2529_v34, %v4886_v46 }
 0x1d7   :  { %v2176_v38 = vpop.f32.mrb[2].mxu1  ;;  %v3179_v55 = vadd.f32 %v2174_v37, %v356_v51  ;;  %v2538_v37 = vrot.slane %v2529_v34, %v4891_v48 }
 0x1d8   :  { %v2178_v39 = vpop.f32.mrb[3].mxu1  ;;  %v3181_v57 = vadd.f32 %v2176_v38, %v352_v49  ;;  %v2768_v38 = vrot.slane %v3176_v35, %v4886_v46  ;;  %v2792_v46 = vld [vmem:[%s4963_s5 + $0x8] sm:$0xff] }
 0x1d9   :  { %v3183_v60 = vadd.f32 %v2178_v39, %v356_v51 }
 0x1dd   :  { %v2182_v40 = vpop.f32.mrb[4].mxu1 }
 0x1de   :  { %v2184_v41 = vpop.f32.mrb[5].mxu1  ;;  %v3185_v6 = vadd.f32 %v2182_v40, %v352_v49  ;;  %v2772_v40 = vrot.slane %v3176_v35, %v4891_v48 }
 0x1df   :  { %v2186_v42 = vpop.f32.mrb[6].mxu1  ;;  %v3187_v9 = vadd.f32 %v2184_v41, %v356_v51 }
 0x1e0   :  { %v2188_v43 = vpop.f32.mrb[7].mxu1  ;;  %v3189_v14 = vadd.f32 %v2186_v42, %v352_v49 }
 0x1e1   :  { %v3191_v18 = vadd.f32 %v2188_v43, %v356_v51 }
 0x216   :  { %v2437_v56 = vpop.f32.mrb[0].mxu0 }
 0x217   :  { %v3178_v58 = vadd.f32 %v3177_v52, %v2437_v56  ;;  %v2439_v59 = vpop.f32.mrb[1].mxu0 }
 0x218   :  { %v3180_v61 = vadd.f32 %v3179_v55, %v2439_v59  ;;  %v2441_v62 = vpop.f32.mrb[2].mxu0 }
 0x219   :  { %v2477_v63 = vmul.f32 %v3178_v58, %v2470_v53  ;;  %v3182_v0 = vadd.f32 %v3181_v57, %v2441_v62  ;;  %v2443_v1 = vpop.f32.mrb[3].mxu0  ;;  %vm2456_vm0 = vcmp.ge.f32.partialorder %v3178_v58, 0.0 }
 0x21a   :  { %v2478_v2 = vmul.f32 %v3180_v61, %v2474_v54  ;;  %v3184_v3 = vadd.f32 %v3183_v60, %v2443_v1  ;;  %vm2457_vm1 = vcmp.ge.f32.partialorder %v3180_v61, 0.0 }
 0x21b   :  { %vm2458_vm2 = vcmp.ge.f32.partialorder %v3182_v0, 0.0  ;;  %v2479_v4 = vmul.f32 %v3182_v0, %v2470_v53  ;;  %v2485_v7 = vsel %vm2456_vm0, %v3178_v58, %v2477_v63  ;;  %v2794_v58 = vld [vmem:[%s4963_s5 + $0x18] sm:$0xff] }
 0x21c   :  { %vm2459_vm3 = vcmp.ge.f32.partialorder %v3184_v3, 0.0  ;;  %v2480_v5 = vmul.f32 %v3184_v3, %v2474_v54  ;;  %v2486_v12 = vsel %vm2457_vm1, %v3180_v61, %v2478_v2 }
 0x21d   :  { %v2487_v8 = vsel %vm2458_vm2, %v3182_v0, %v2479_v4 }
 0x21e   :  { %v2493_v10 = vpack.c.bf16 %v2487_v8, %v2485_v7  ;;  %v2447_v11 = vpop.f32.mrb[4].mxu0  ;;  %v2488_v13 = vsel %vm2459_vm3, %v3184_v3, %v2480_v5 }
 0x21f   :  { %v3186_v15 = vadd.f32 %v3185_v6, %v2447_v11  ;;  %v2449_v16 = vpop.f32.mrb[5].mxu0  ;;  %v2494_v17 = vpack.c.bf16 %v2488_v13, %v2486_v12  ;;  %v2795_v6 = vld [vmem:[%s4963_s5 + $0x20] sm:$0xff] }
 0x220   :  { %v3188_v19 = vadd.f32 %v3187_v9, %v2449_v16  ;;  %v2451_v20 = vpop.f32.mrb[6].mxu0 }
 0x221   :  { %v2481_v21 = vmul.f32 %v3186_v15, %v2470_v53  ;;  %v3190_v22 = vadd.f32 %v3189_v14, %v2451_v20  ;;  %v2453_v23 = vpop.f32.mrb[7].mxu0  ;;  %2733 = vmatprep.mubr.bf16.mxu1 %v2494_v17  ;;  %vm2460_vm4 = vcmp.ge.f32.partialorder %v3186_v15, 0.0  ;;  %v2797_v14 = vld [vmem:[%s4963_s5 + $0x30] sm:$0xff] }
 0x222   :  { %v2482_v24 = vmul.f32 %v3188_v19, %v2474_v54  ;;  %v3192_v25 = vadd.f32 %v3191_v18, %v2453_v23  ;;  %2734 = vmatmul.mubr.bf16.vlgmr.msra.gmra.mrb[8].mxu1 %v2493_v10  ;;  %vm2461_vm5 = vcmp.ge.f32.partialorder %v3188_v19, 0.0  ;;  %v2796_v10 = vld [vmem:[%s4963_s5 + $0x28] sm:$0xff]  ;;  %v2798_v18 = vld [vmem:[%s4963_s5 + $0x38] sm:$0xff] }
 0x223   :  { %vm2462_vm6 = vcmp.ge.f32.partialorder %v3190_v22, 0.0  ;;  %v2483_v26 = vmul.f32 %v3190_v22, %v2470_v53  ;;  %v2489_v28 = vsel %vm2460_vm4, %v3186_v15, %v2481_v21 }
 0x224   :  { %vm2463_vm7 = vcmp.ge.f32.partialorder %v3192_v25, 0.0  ;;  %v2484_v27 = vmul.f32 %v3192_v25, %v2474_v54  ;;  %v2490_v30 = vsel %vm2461_vm5, %v3188_v19, %v2482_v24  ;;  %v2793_v54 = vld [vmem:[%s4963_s5 + $0x10] sm:$0xff] }
 0x225   :  { %v2491_v29 = vsel %vm2462_vm6, %v3190_v22, %v2483_v26 }
 0x226   :  { %v2492_v31 = vsel %vm2463_vm7, %v3192_v25, %v2484_v27  ;;  %v2495_v32 = vpack.c.bf16 %v2491_v29, %v2489_v28 }
 0x227   :  { %v2496_v33 = vpack.c.bf16 %v2492_v31, %v2490_v30 }
 0x229   :  { %2743 = vmatprep.mubr.bf16.mxu1 %v2496_v33 }
 0x22a   :  { %2744 = vmatmul.mubr.bf16.gmra.mrb[12].mxu1 %v2495_v32 }
 0x2f5   :  { %v2735_v39 = vpop.f32.mrb[8].mxu1 }
 0x2f6   :  { %v2736_v41 = vadd.f32 %v2735_v39, %v2534_v36  ;;  %v2737_v42 = vpop.f32.mrb[9].mxu1 }
 0x2f7   :  { %v2738_v43 = vadd.f32 %v2737_v42, %v2538_v37  ;;  %v2739_v44 = vpop.f32.mrb[10].mxu1 }
 0x2f8   :  { %vm2754_vm8 = vcmp.ge.f32.partialorder %v2736_v41, 0.0  ;;  %v2775_v45 = vmul.f32 %v2768_v38, %v2736_v41  ;;  %v2740_v49 = vadd.f32 %v2739_v44, %v2534_v36  ;;  %v2741_v50 = vpop.f32.mrb[11].mxu1 }
 0x2f9   :  { %vm2755_vm9 = vcmp.ge.f32.partialorder %v2738_v43, 0.0  ;;  %v2776_v51 = vmul.f32 %v2772_v40, %v2738_v43  ;;  %v2742_v52 = vadd.f32 %v2741_v50, %v2538_v37 }
 0x2fa   :  { %v2783_v48 = vsel %vm2754_vm8, %v2736_v41, %v2775_v45  ;;  %vm2756_vm10 = vcmp.ge.f32.partialorder %v2740_v49, 0.0  ;;  %v2777_v53 = vmul.f32 %v2768_v38, %v2740_v49 }
 0x2fb   :  { %v2799_v55 = vadd.f32 %v2791_v47, %v2783_v48  ;;  %v2784_v56 = vsel %vm2755_vm9, %v2738_v43, %v2776_v51  ;;  %vm2757_vm11 = vcmp.ge.f32.partialorder %v2742_v52, 0.0  ;;  %v2778_v57 = vmul.f32 %v2772_v40, %v2742_v52 }
 0x2fc   :  { %v2800_v59 = vadd.f32 %v2792_v46, %v2784_v56  ;;  %v2785_v60 = vsel %vm2756_vm10, %v2740_v49, %v2777_v53 }
 0x2fd   :  { %2807 = vst [vmem:[%s4964_s6] sm:$0xff] %v2799_v55  ;;  %v2801_v61 = vadd.f32 %v2793_v54, %v2785_v60  ;;  %v2786_v62 = vsel %vm2757_vm11, %v2742_v52, %v2778_v57  ;;  %v2745_v63 = vpop.f32.mrb[12].mxu1 }
 0x2fe   :  { %2808 = vst [vmem:[%s4964_s6 + $0x8] sm:$0xff] %v2800_v59  ;;  %v2802_v0 = vadd.f32 %v2794_v58, %v2786_v62  ;;  %v2746_v1 = vadd.f32 %v2745_v63, %v2534_v36  ;;  %v2747_v2 = vpop.f32.mrb[13].mxu1 }
 0x2ff   :  { %2809 = vst [vmem:[%s4964_s6 + $0x10] sm:$0xff] %v2801_v61  ;;  %v2748_v3 = vadd.f32 %v2747_v2, %v2538_v37  ;;  %v2749_v4 = vpop.f32.mrb[14].mxu1 }
 0x300   :  { %2810 = vst [vmem:[%s4964_s6 + $0x18] sm:$0xff] %v2802_v0  ;;  %vm2758_vm12 = vcmp.ge.f32.partialorder %v2746_v1, 0.0  ;;  %v2779_v5 = vmul.f32 %v2768_v38, %v2746_v1  ;;  %v2750_v7 = vadd.f32 %v2749_v4, %v2534_v36  ;;  %v2751_v8 = vpop.f32.mrb[15].mxu1 }
 0x301   :  { %vm2759_vm13 = vcmp.ge.f32.partialorder %v2748_v3, 0.0  ;;  %v2780_v9 = vmul.f32 %v2772_v40, %v2748_v3  ;;  %v2752_v11 = vadd.f32 %v2751_v8, %v2538_v37 }
 0x302   :  { %v2787_v12 = vsel %vm2758_vm12, %v2746_v1, %v2779_v5  ;;  %vm2760_vm14 = vcmp.ge.f32.partialorder %v2750_v7, 0.0  ;;  %v2781_v13 = vmul.f32 %v2768_v38, %v2750_v7 }
 0x303   :  { %v2803_v15 = vadd.f32 %v2795_v6, %v2787_v12  ;;  %v2788_v16 = vsel %vm2759_vm13, %v2748_v3, %v2780_v9  ;;  %vm2761_vm15 = vcmp.ge.f32.partialorder %v2752_v11, 0.0  ;;  %v2782_v17 = vmul.f32 %v2772_v40, %v2752_v11 }
 0x304   :  { %v2804_v19 = vadd.f32 %v2796_v10, %v2788_v16  ;;  %v2789_v20 = vsel %vm2760_vm14, %v2750_v7, %v2781_v13 }
 0x305   :  { %2811 = vst [vmem:[%s4964_s6 + $0x20] sm:$0xff] %v2803_v15  ;;  %v2805_v21 = vadd.f32 %v2797_v14, %v2789_v20  ;;  %v2790_v22 = vsel %vm2761_vm15, %v2752_v11, %v2782_v17 }
 0x306   :  { %2812 = vst [vmem:[%s4964_s6 + $0x28] sm:$0xff] %v2804_v19  ;;  %v2806_v23 = vadd.f32 %v2798_v18, %v2790_v22 }
 0x307   :  { %2813 = vst [vmem:[%s4964_s6 + $0x30] sm:$0xff] %v2805_v21 }
 0x308   :  { %2814 = vst [vmem:[%s4964_s6 + $0x38] sm:$0xff] %v2806_v23 }

// kernel: forward.15
= control target key start
LH: loop header
LB: loop body
LE: loop exit
PB: predicated region body
PF: predicated region fallthrough
CT: control target
= control target key end

     0   :  { %s4481_s1 = inlined_call_operand.vmem [shape: bf16[2304,256], index: 1, kind: input, shape index: {}]   ;;  %s4482_s0 = inlined_call_operand.vmem [shape: bf16[32,2304], index: 0, kind: input, shape index: {}]   ;;  %s4483_s2 = inlined_call_operand.vmem [shape: f32[8,256], index: 2, kind: input, shape index: {}]   ;;  %s4484_s3 = inlined_call_operand.vmem [shape: f32[32,256], index: 3, kind: input, shape index: {}]   ;;  %s4485_s4 = inlined_call_operand.vmem [shape: f32[32,256], index: 4, kind: output, shape index: {}]  }
   0x1   :  { %v2944_v0 = vld [vmem:[%s4481_s1 + $0x4] ss:$8 sps:$4 sm:$0xff]   ;;  %v2948_v2 = vld [vmem:[%s4481_s1] ss:$8 sps:$4 sm:$0xff]   ;;  %v2950_v4 = vld [vmem:[%s4481_s1 + $0x14] ss:$8 sps:$4 sm:$0xff]  }
   0x2   :  { %v2946_v1 = vld [vmem:[%s4481_s1 + $0x404] ss:$8 sps:$4 sm:$0xff]   ;;  %1973 = vmatprep.subr.bf16.mxu1 %v2944_v0  ;;  %v2949_v3 = vld [vmem:[%s4481_s1 + $0x400] ss:$8 sps:$4 sm:$0xff]   ;;  %v2952_v5 = vld [vmem:[%s4481_s1 + $0x414] ss:$8 sps:$4 sm:$0xff]  }
   0x3   :  { %2185 = vmatprep.subr.bf16.mxu0 %v2946_v1  ;;  %1974 = vmatpush1.bf16.msra.mxu1 %v2948_v2  ;;  %v2954_v6 = vld [vmem:[%s4481_s1 + $0x10] ss:$8 sps:$4 sm:$0xff]   ;;  %v2956_v8 = vld [vmem:[%s4481_s1 + $0x24] ss:$8 sps:$4 sm:$0xff]   ;;  %v2960_v10 = vld [vmem:[%s4481_s1 + $0x20] ss:$8 sps:$4 sm:$0xff]  }
   0x4   :  { %2186 = vmatpush1.bf16.msra.mxu0 %v2949_v3  ;;  %1975 = vmatprep.subr.bf16.mxu1 %v2950_v4  ;;  %v2955_v7 = vld [vmem:[%s4481_s1 + $0x410] ss:$8 sps:$4 sm:$0xff]   ;;  %v2958_v9 = vld [vmem:[%s4481_s1 + $0x424] ss:$8 sps:$4 sm:$0xff]   ;;  %v2961_v11 = vld [vmem:[%s4481_s1 + $0x420] ss:$8 sps:$4 sm:$0xff]  }
   0x5   :  { %2187 = vmatprep.subr.bf16.mxu0 %v2952_v5  ;;  %v2962_v12 = vld [vmem:[%s4481_s1 + $0x34] ss:$8 sps:$4 sm:$0xff]   ;;  %v2966_v14 = vld [vmem:[%s4481_s1 + $0x30] ss:$8 sps:$4 sm:$0xff]   ;;  %v2968_v16 = vld [vmem:[%s4481_s1 + $0x44] ss:$8 sps:$4 sm:$0xff]  }
   0x6   :  { %v2964_v13 = vld [vmem:[%s4481_s1 + $0x434] ss:$8 sps:$4 sm:$0xff]   ;;  %v2967_v15 = vld [vmem:[%s4481_s1 + $0x430] ss:$8 sps:$4 sm:$0xff]   ;;  %v2970_v17 = vld [vmem:[%s4481_s1 + $0x444] ss:$8 sps:$4 sm:$0xff]  }
   0x7   :  { %1976 = vmatpush1.bf16.msra.mxu1 %v2954_v6  ;;  %v2972_v18 = vld [vmem:[%s4481_s1 + $0x40] ss:$8 sps:$4 sm:$0xff]   ;;  %v2974_v20 = vld [vmem:[%s4481_s1 + $0x54] ss:$8 sps:$4 sm:$0xff]   ;;  %v2978_v22 = vld [vmem:[%s4481_s1 + $0x50] ss:$8 sps:$4 sm:$0xff]  }
   0x8   :  { %2188 = vmatpush1.bf16.msra.mxu0 %v2955_v7  ;;  %1977 = vmatprep.subr.bf16.mxu1 %v2956_v8  ;;  %v2973_v19 = vld [vmem:[%s4481_s1 + $0x440] ss:$8 sps:$4 sm:$0xff]   ;;  %v2976_v21 = vld [vmem:[%s4481_s1 + $0x454] ss:$8 sps:$4 sm:$0xff]   ;;  %v2979_v23 = vld [vmem:[%s4481_s1 + $0x450] ss:$8 sps:$4 sm:$0xff]  }
   0x9   :  { %2189 = vmatprep.subr.bf16.mxu0 %v2958_v9  ;;  %v2980_v24 = vld [vmem:[%s4481_s1 + $0x64] ss:$8 sps:$4 sm:$0xff]   ;;  %v2984_v26 = vld [vmem:[%s4481_s1 + $0x60] ss:$8 sps:$4 sm:$0xff]   ;;  %v2986_v28 = vld [vmem:[%s4481_s1 + $0x74] ss:$8 sps:$4 sm:$0xff]  }
   0xa   :  { %v2982_v25 = vld [vmem:[%s4481_s1 + $0x464] ss:$8 sps:$4 sm:$0xff]   ;;  %v2985_v27 = vld [vmem:[%s4481_s1 + $0x460] ss:$8 sps:$4 sm:$0xff]   ;;  %v2988_v29 = vld [vmem:[%s4481_s1 + $0x474] ss:$8 sps:$4 sm:$0xff]  }
   0xb   :  { %1978 = vmatpush1.bf16.msra.mxu1 %v2960_v10  ;;  %v2990_v30 = vld [vmem:[%s4481_s1 + $0x70] ss:$8 sps:$4 sm:$0xff]   ;;  %v2992_v32 = vld [vmem:[%s4481_s1 + $0x84] ss:$8 sps:$4 sm:$0xff]   ;;  %v2996_v34 = vld [vmem:[%s4481_s1 + $0x80] ss:$8 sps:$4 sm:$0xff]  }
   0xc   :  { %2190 = vmatpush1.bf16.msra.mxu0 %v2961_v11  ;;  %1979 = vmatprep.subr.bf16.mxu1 %v2962_v12  ;;  %v2991_v31 = vld [vmem:[%s4481_s1 + $0x470] ss:$8 sps:$4 sm:$0xff]   ;;  %v2994_v33 = vld [vmem:[%s4481_s1 + $0x484] ss:$8 sps:$4 sm:$0xff]   ;;  %v2997_v35 = vld [vmem:[%s4481_s1 + $0x480] ss:$8 sps:$4 sm:$0xff]  }
   0xd   :  { %2191 = vmatprep.subr.bf16.mxu0 %v2964_v13  ;;  %v2998_v36 = vld [vmem:[%s4481_s1 + $0x94] ss:$8 sps:$4 sm:$0xff]   ;;  %v3002_v38 = vld [vmem:[%s4481_s1 + $0x90] ss:$8 sps:$4 sm:$0xff]   ;;  %v3004_v40 = vld [vmem:[%s4481_s1 + $0xa4] ss:$8 sps:$4 sm:$0xff]  }
   0xe   :  { %v3000_v37 = vld [vmem:[%s4481_s1 + $0x494] ss:$8 sps:$4 sm:$0xff]   ;;  %v3003_v39 = vld [vmem:[%s4481_s1 + $0x490] ss:$8 sps:$4 sm:$0xff]   ;;  %v3006_v41 = vld [vmem:[%s4481_s1 + $0x4a4] ss:$8 sps:$4 sm:$0xff]  }
   0xf   :  { %1980 = vmatpush1.bf16.msra.mxu1 %v2966_v14  ;;  %v3008_v42 = vld [vmem:[%s4481_s1 + $0xa0] ss:$8 sps:$4 sm:$0xff]   ;;  %v3010_v44 = vld [vmem:[%s4481_s1 + $0xb4] ss:$8 sps:$4 sm:$0xff]   ;;  %v3014_v46 = vld [vmem:[%s4481_s1 + $0xb0] ss:$8 sps:$4 sm:$0xff]  }
  0x10   :  { %2192 = vmatpush1.bf16.msra.mxu0 %v2967_v15  ;;  %1981 = vmatprep.subr.bf16.mxu1 %v2968_v16  ;;  %v3009_v43 = vld [vmem:[%s4481_s1 + $0x4a0] ss:$8 sps:$4 sm:$0xff]   ;;  %v3012_v45 = vld [vmem:[%s4481_s1 + $0x4b4] ss:$8 sps:$4 sm:$0xff]   ;;  %v3015_v47 = vld [vmem:[%s4481_s1 + $0x4b0] ss:$8 sps:$4 sm:$0xff]  }
  0x11   :  { %2193 = vmatprep.subr.bf16.mxu0 %v2970_v17  ;;  %v3042_v48 = vld [vmem:[%s4482_s0 + $0x4] ss:$72 sps:$4 sm:$0xff]   ;;  %v3020_v52 = vld [vmem:[%s4481_s1 + $0xc0] ss:$8 sps:$4 sm:$0xff]   ;;  %v3022_v54 = vld [vmem:[%s4481_s1 + $0xd4] ss:$8 sps:$4 sm:$0xff]  }
  0x12   :  { %v3016_v49 = vld [vmem:[%s4481_s1 + $0xc4] ss:$8 sps:$4 sm:$0xff]   ;;  %2005 = vmatprep.mubr.bf16.mxu1 %v3042_v48  ;;  %v3021_v53 = vld [vmem:[%s4481_s1 + $0x4c0] ss:$8 sps:$4 sm:$0xff]   ;;  %v3024_v55 = vld [vmem:[%s4481_s1 + $0x4d4] ss:$8 sps:$4 sm:$0xff]  }
  0x13   :  { %1982 = vmatpush1.bf16.msra.mxu1 %v2972_v18  ;;  %v3018_v50 = vld [vmem:[%s4481_s1 + $0x4c4] ss:$8 sps:$4 sm:$0xff]   ;;  %v3026_v56 = vld [vmem:[%s4481_s1 + $0xd0] ss:$8 sps:$4 sm:$0xff]   ;;  %v3032_v60 = vld [vmem:[%s4481_s1 + $0xe0] ss:$8 sps:$4 sm:$0xff]  }
  0x14   :  { %2194 = vmatpush1.bf16.msra.mxu0 %v2973_v19  ;;  %1983 = vmatprep.subr.bf16.mxu1 %v2974_v20  ;;  %v3048_v51 = vld [vmem:[%s4482_s0 + $0x24] ss:$72 sps:$4 sm:$0xff]   ;;  %v3027_v57 = vld [vmem:[%s4481_s1 + $0x4d0] ss:$8 sps:$4 sm:$0xff]   ;;  %v3033_v61 = vld [vmem:[%s4481_s1 + $0x4e0] ss:$8 sps:$4 sm:$0xff]  }
  0x15   :  { %2195 = vmatprep.subr.bf16.mxu0 %v2976_v21  ;;  %2217 = vmatprep.mubr.bf16.mxu0 %v3048_v51  ;;  %v3028_v58 = vld [vmem:[%s4481_s1 + $0xe4] ss:$8 sps:$4 sm:$0xff]   ;;  %v3034_v62 = vld [vmem:[%s4481_s1 + $0xf4] ss:$8 sps:$4 sm:$0xff]   ;;  %v3038_v0 = vld [vmem:[%s4481_s1 + $0xf0] ss:$8 sps:$4 sm:$0xff]  }
  0x16   :  { %v3030_v59 = vld [vmem:[%s4481_s1 + $0x4e4] ss:$8 sps:$4 sm:$0xff]   ;;  %v3036_v63 = vld [vmem:[%s4481_s1 + $0x4f4] ss:$8 sps:$4 sm:$0xff]   ;;  %v3039_v1 = vld [vmem:[%s4481_s1 + $0x4f0] ss:$8 sps:$4 sm:$0xff]  }
  0x17   :  { %1984 = vmatpush1.bf16.msra.mxu1 %v2978_v22  ;;  %v3045_v2 = vld [vmem:[%s4481_s1 + $0x104] ss:$8 sps:$4 sm:$0xff]   ;;  %v3040_v4 = vld [vmem:[%s4482_s0] ss:$72 sps:$4 sm:$0xff]   ;;  %v3054_v8 = vld [vmem:[%s4481_s1 + $0x114] ss:$8 sps:$4 sm:$0xff]  }
  0x18   :  { %2196 = vmatpush1.bf16.msra.mxu0 %v2979_v23  ;;  %1985 = vmatprep.subr.bf16.mxu1 %v2980_v24  ;;  %v3051_v3 = vld [vmem:[%s4481_s1 + $0x504] ss:$8 sps:$4 sm:$0xff]   ;;  %v3043_v5 = vld [vmem:[%s4481_s1 + $0x100] ss:$8 sps:$4 sm:$0xff]   ;;  %v3057_v9 = vld [vmem:[%s4481_s1 + $0x514] ss:$8 sps:$4 sm:$0xff]  }
  0x19   :  { %2197 = vmatprep.subr.bf16.mxu0 %v2982_v25  ;;  %v3046_v6 = vld [vmem:[%s4482_s0 + $0x20] ss:$72 sps:$4 sm:$0xff]   ;;  %v3052_v10 = vld [vmem:[%s4481_s1 + $0x110] ss:$8 sps:$4 sm:$0xff]   ;;  %v3060_v12 = vld [vmem:[%s4481_s1 + $0x124] ss:$8 sps:$4 sm:$0xff]  }
  0x1a   :  { %v3049_v7 = vld [vmem:[%s4481_s1 + $0x500] ss:$8 sps:$4 sm:$0xff]   ;;  %v3055_v11 = vld [vmem:[%s4481_s1 + $0x510] ss:$8 sps:$4 sm:$0xff]   ;;  %v3063_v13 = vld [vmem:[%s4481_s1 + $0x524] ss:$8 sps:$4 sm:$0xff]  }
  0x1b   :  { %1986 = vmatpush1.bf16.msra.mxu1 %v2984_v26  ;;  %v3058_v14 = vld [vmem:[%s4481_s1 + $0x120] ss:$8 sps:$4 sm:$0xff]   ;;  %v3066_v16 = vld [vmem:[%s4481_s1 + $0x134] ss:$8 sps:$4 sm:$0xff]   ;;  %v3064_v18 = vld [vmem:[%s4481_s1 + $0x130] ss:$8 sps:$4 sm:$0xff]  }
  0x1c   :  { %2198 = vmatpush1.bf16.msra.mxu0 %v2985_v27  ;;  %1987 = vmatprep.subr.bf16.mxu1 %v2986_v28  ;;  %v3061_v15 = vld [vmem:[%s4481_s1 + $0x520] ss:$8 sps:$4 sm:$0xff]   ;;  %v3069_v17 = vld [vmem:[%s4481_s1 + $0x534] ss:$8 sps:$4 sm:$0xff]   ;;  %v3067_v19 = vld [vmem:[%s4481_s1 + $0x530] ss:$8 sps:$4 sm:$0xff]  }
  0x1d   :  { %2199 = vmatprep.subr.bf16.mxu0 %v2988_v29  ;;  %v3072_v20 = vld [vmem:[%s4481_s1 + $0x144] ss:$8 sps:$4 sm:$0xff]   ;;  %v3070_v22 = vld [vmem:[%s4481_s1 + $0x140] ss:$8 sps:$4 sm:$0xff]   ;;  %v3078_v24 = vld [vmem:[%s4481_s1 + $0x154] ss:$8 sps:$4 sm:$0xff]  }
  0x1e   :  { %v3075_v21 = vld [vmem:[%s4481_s1 + $0x544] ss:$8 sps:$4 sm:$0xff]   ;;  %v3073_v23 = vld [vmem:[%s4481_s1 + $0x540] ss:$8 sps:$4 sm:$0xff]   ;;  %v3081_v25 = vld [vmem:[%s4481_s1 + $0x554] ss:$8 sps:$4 sm:$0xff]  }
  0x1f   :  { %1988 = vmatpush1.bf16.msra.mxu1 %v2990_v30  ;;  %v3076_v26 = vld [vmem:[%s4481_s1 + $0x150] ss:$8 sps:$4 sm:$0xff]   ;;  %v3130_v28 = vld [vmem:[%s4482_s0 + $0x94] ss:$72 sps:$4 sm:$0xff]   ;;  %v3084_v29 = vld [vmem:[%s4481_s1 + $0x164] ss:$8 sps:$4 sm:$0xff]  }
  0x20   :  { %2200 = vmatpush1.bf16.msra.mxu0 %v2991_v31  ;;  %1989 = vmatprep.subr.bf16.mxu1 %v2992_v32  ;;  %v3079_v27 = vld [vmem:[%s4481_s1 + $0x550] ss:$8 sps:$4 sm:$0xff]   ;;  %v3087_v30 = vld [vmem:[%s4481_s1 + $0x564] ss:$8 sps:$4 sm:$0xff]   ;;  %v3135_v31 = vld [vmem:[%s4482_s0 + $0xb4] ss:$72 sps:$4 sm:$0xff]  }
  0x21   :  { %2201 = vmatprep.subr.bf16.mxu0 %v2994_v33  ;;  %v3082_v32 = vld [vmem:[%s4481_s1 + $0x160] ss:$8 sps:$4 sm:$0xff]   ;;  %v3100_v48 = vld [vmem:[%s4481_s1 + $0x190] ss:$8 sps:$4 sm:$0xff]   ;;  %v3111_v51 = vld [vmem:[%s4481_s1 + $0x5a4] ss:$8 sps:$4 sm:$0xff]  }
  0x22   :  { %v3085_v33 = vld [vmem:[%s4481_s1 + $0x560] ss:$8 sps:$4 sm:$0xff]  }
  0x23   :  { %1990 = vmatpush1.bf16.msra.mxu1 %v2996_v34  ;;  %v3140_v34 = vld [vmem:[%s4482_s0 + $0x90] ss:$72 sps:$4 sm:$0xff]  }
  0x24   :  { %2202 = vmatpush1.bf16.msra.mxu0 %v2997_v35  ;;  %1991 = vmatprep.subr.bf16.mxu1 %v2998_v36  ;;  %v3141_v35 = vld [vmem:[%s4482_s0 + $0xb0] ss:$72 sps:$4 sm:$0xff]   ;;  %v3090_v36 = vld [vmem:[%s4481_s1 + $0x174] ss:$8 sps:$4 sm:$0xff]  }
  0x25   :  { %2203 = vmatprep.subr.bf16.mxu0 %v3000_v37  ;;  %v3093_v37 = vld [vmem:[%s4481_s1 + $0x574] ss:$8 sps:$4 sm:$0xff]  }
  0x27   :  { %1992 = vmatpush1.bf16.msra.mxu1 %v3002_v38  ;;  %v3088_v38 = vld [vmem:[%s4481_s1 + $0x170] ss:$8 sps:$4 sm:$0xff]  }
  0x28   :  { %2204 = vmatpush1.bf16.msra.mxu0 %v3003_v39  ;;  %1993 = vmatprep.subr.bf16.mxu1 %v3004_v40  ;;  %v3091_v39 = vld [vmem:[%s4481_s1 + $0x570] ss:$8 sps:$4 sm:$0xff]   ;;  %v3150_v40 = vld [vmem:[%s4482_s0 + $0xc] ss:$72 sps:$4 sm:$0xff]  }
  0x29   :  { %2205 = vmatprep.subr.bf16.mxu0 %v3006_v41  ;;  %v3096_v41 = vld [vmem:[%s4481_s1 + $0x184] ss:$8 sps:$4 sm:$0xff]  }
  0x2b   :  { %1994 = vmatpush1.bf16.msra.mxu1 %v3008_v42  ;;  %v3099_v42 = vld [vmem:[%s4481_s1 + $0x584] ss:$8 sps:$4 sm:$0xff]  }
  0x2c   :  { %2206 = vmatpush1.bf16.msra.mxu0 %v3009_v43  ;;  %1995 = vmatprep.subr.bf16.mxu1 %v3010_v44  ;;  %v3156_v43 = vld [vmem:[%s4482_s0 + $0x2c] ss:$72 sps:$4 sm:$0xff]   ;;  %v3094_v44 = vld [vmem:[%s4481_s1 + $0x180] ss:$8 sps:$4 sm:$0xff]  }
  0x2d   :  { %2207 = vmatprep.subr.bf16.mxu0 %v3012_v45  ;;  %v3097_v45 = vld [vmem:[%s4481_s1 + $0x580] ss:$8 sps:$4 sm:$0xff]  }
  0x2f   :  { %1996 = vmatpush1.bf16.msra.mxu1 %v3014_v46  ;;  %v3102_v46 = vld [vmem:[%s4481_s1 + $0x194] ss:$8 sps:$4 sm:$0xff]  }
  0x30   :  { %2208 = vmatpush1.bf16.msra.mxu0 %v3015_v47  ;;  %1997 = vmatprep.subr.bf16.mxu1 %v3016_v49  ;;  %v3105_v47 = vld [vmem:[%s4481_s1 + $0x594] ss:$8 sps:$4 sm:$0xff]   ;;  %v3103_v49 = vld [vmem:[%s4481_s1 + $0x590] ss:$8 sps:$4 sm:$0xff]  }
  0x31   :  { %2209 = vmatprep.subr.bf16.mxu0 %v3018_v50  ;;  %v3108_v50 = vld [vmem:[%s4481_s1 + $0x1a4] ss:$8 sps:$4 sm:$0xff]  }
  0x33   :  { %1998 = vmatpush1.bf16.msra.mxu1 %v3020_v52  ;;  %v3106_v52 = vld [vmem:[%s4481_s1 + $0x1a0] ss:$8 sps:$4 sm:$0xff]  }
  0x34   :  { %2210 = vmatpush1.bf16.msra.mxu0 %v3021_v53  ;;  %1999 = vmatprep.subr.bf16.mxu1 %v3022_v54  ;;  %v3109_v53 = vld [vmem:[%s4481_s1 + $0x5a0] ss:$8 sps:$4 sm:$0xff]   ;;  %v3114_v54 = vld [vmem:[%s4481_s1 + $0x1b4] ss:$8 sps:$4 sm:$0xff]  }
  0x35   :  { %2211 = vmatprep.subr.bf16.mxu0 %v3024_v55  ;;  %v3117_v55 = vld [vmem:[%s4481_s1 + $0x5b4] ss:$8 sps:$4 sm:$0xff]  }
  0x37   :  { %2000 = vmatpush1.bf16.msra.mxu1 %v3026_v56  ;;  %v3112_v56 = vld [vmem:[%s4481_s1 + $0x1b0] ss:$8 sps:$4 sm:$0xff]  }
  0x38   :  { %2212 = vmatpush1.bf16.msra.mxu0 %v3027_v57  ;;  %2001 = vmatprep.subr.bf16.mxu1 %v3028_v58  ;;  %v3115_v57 = vld [vmem:[%s4481_s1 + $0x5b0] ss:$8 sps:$4 sm:$0xff]   ;;  %v3120_v58 = vld [vmem:[%s4481_s1 + $0x1c4] ss:$8 sps:$4 sm:$0xff]  }
  0x39   :  { %2213 = vmatprep.subr.bf16.mxu0 %v3030_v59  ;;  %v3123_v59 = vld [vmem:[%s4481_s1 + $0x5c4] ss:$8 sps:$4 sm:$0xff]  }
  0x3b   :  { %2002 = vmatpush1.bf16.msra.mxu1 %v3032_v60  ;;  %v3118_v60 = vld [vmem:[%s4481_s1 + $0x1c0] ss:$8 sps:$4 sm:$0xff]  }
  0x3c   :  { %2214 = vmatpush1.bf16.msra.mxu0 %v3033_v61  ;;  %2003 = vmatprep.subr.bf16.mxu1 %v3034_v62  ;;  %v3121_v61 = vld [vmem:[%s4481_s1 + $0x5c0] ss:$8 sps:$4 sm:$0xff]   ;;  %v3126_v62 = vld [vmem:[%s4481_s1 + $0x1d4] ss:$8 sps:$4 sm:$0xff]  }
  0x3d   :  { %2215 = vmatprep.subr.bf16.mxu0 %v3036_v63  ;;  %v3129_v63 = vld [vmem:[%s4481_s1 + $0x5d4] ss:$8 sps:$4 sm:$0xff]  }
  0x3f   :  { %2004 = vmatpush1.bf16.msra.mxu1 %v3038_v0  ;;  %v3124_v0 = vld [vmem:[%s4481_s1 + $0x1d0] ss:$8 sps:$4 sm:$0xff]  }
  0x40   :  { %2216 = vmatpush1.bf16.msra.mxu0 %v3039_v1  ;;  %2026 = vmatprep.subr.bf16.mxu1 %v3045_v2  ;;  %v3127_v1 = vld [vmem:[%s4481_s1 + $0x5d0] ss:$8 sps:$4 sm:$0xff]   ;;  %v3134_v2 = vld [vmem:[%s4481_s1 + $0x1e4] ss:$8 sps:$4 sm:$0xff]  }
  0x41   :  { %2238 = vmatprep.subr.bf16.mxu0 %v3051_v3  ;;  %v3139_v3 = vld [vmem:[%s4481_s1 + $0x5e4] ss:$8 sps:$4 sm:$0xff]  }
  0x42   :  { %2006 = vmatmul.mubr.bf16.vlgmr.msra.gmra.mrb[0].mxu1 %v3040_v4  ;;  %v3132_v4 = vld [vmem:[%s4481_s1 + $0x1e0] ss:$8 sps:$4 sm:$0xff]  }
  0x43   :  { %2218 = vmatmul.mubr.bf16.vlgmr.msra.gmra.mrb[0].mxu0 %v3046_v6  ;;  %2027 = vmatpush1.bf16.msra.mxu1 %v3043_v5  ;;  %v3137_v5 = vld [vmem:[%s4481_s1 + $0x5e0] ss:$8 sps:$4 sm:$0xff]   ;;  %v3144_v6 = vld [vmem:[%s4481_s1 + $0x1f4] ss:$8 sps:$4 sm:$0xff]  }
  0x44   :  { %2239 = vmatpush1.bf16.msra.mxu0 %v3049_v7  ;;  %2028 = vmatprep.subr.bf16.mxu1 %v3054_v8  ;;  %v3147_v7 = vld [vmem:[%s4481_s1 + $0x5f4] ss:$8 sps:$4 sm:$0xff]   ;;  %v3142_v8 = vld [vmem:[%s4481_s1 + $0x1f0] ss:$8 sps:$4 sm:$0xff]  }
  0x45   :  { %2240 = vmatprep.subr.bf16.mxu0 %v3057_v9  ;;  %2015 = vmatprep.mubr.bf16.mxu1 %v3130_v28  ;;  %v3145_v9 = vld [vmem:[%s4481_s1 + $0x5f0] ss:$8 sps:$4 sm:$0xff]   ;;  %v3174_v28 = vld [vmem:[%s4481_s1 + $0x234] ss:$8 sps:$4 sm:$0xff]  }
  0x46   :  { %2227 = vmatprep.mubr.bf16.mxu0 %v3135_v31  ;;  %v3175_v31 = vld [vmem:[%s4481_s1 + $0x630] ss:$8 sps:$4 sm:$0xff]  }
  0x47   :  { %2029 = vmatpush1.bf16.msra.mxu1 %v3052_v10  ;;  %v3153_v10 = vld [vmem:[%s4481_s1 + $0x204] ss:$8 sps:$4 sm:$0xff]  }
  0x48   :  { %2241 = vmatpush1.bf16.msra.mxu0 %v3055_v11  ;;  %2030 = vmatprep.subr.bf16.mxu1 %v3060_v12  ;;  %v3159_v11 = vld [vmem:[%s4481_s1 + $0x604] ss:$8 sps:$4 sm:$0xff]   ;;  %v3148_v12 = vld [vmem:[%s4482_s0 + $0x8] ss:$72 sps:$4 sm:$0xff]  }
  0x49   :  { %2242 = vmatprep.subr.bf16.mxu0 %v3063_v13  ;;  %v3151_v13 = vld [vmem:[%s4481_s1 + $0x200] ss:$8 sps:$4 sm:$0xff]  }
  0x4a   :  { %2016 = vmatmul.mubr.bf16.gmra.mrb[4].mxu1 %v3140_v34  ;;  %v3183_v34 = vld [vmem:[%s4481_s1 + $0x644] ss:$8 sps:$4 sm:$0xff]  }
  0x4b   :  { %2031 = vmatpush1.bf16.msra.mxu1 %v3058_v14  ;;  %2228 = vmatmul.mubr.bf16.gmra.mrb[4].mxu0 %v3141_v35  ;;  %v3154_v14 = vld [vmem:[%s4482_s0 + $0x28] ss:$72 sps:$4 sm:$0xff]   ;;  %v3264_v35 = vld [vmem:[%s4482_s0 + $0x34] ss:$72 sps:$4 sm:$0xff]  }
  0x4c   :  { %2243 = vmatpush1.bf16.msra.mxu0 %v3061_v15  ;;  %2032 = vmatprep.subr.bf16.mxu1 %v3066_v16  ;;  %v3157_v15 = vld [vmem:[%s4481_s1 + $0x600] ss:$8 sps:$4 sm:$0xff]   ;;  %v3162_v16 = vld [vmem:[%s4481_s1 + $0x214] ss:$8 sps:$4 sm:$0xff]  }
  0x4d   :  { %2244 = vmatprep.subr.bf16.mxu0 %v3069_v17  ;;  %2058 = vmatprep.mubr.bf16.mxu1 %v3150_v40  ;;  %v3165_v17 = vld [vmem:[%s4481_s1 + $0x614] ss:$8 sps:$4 sm:$0xff]   ;;  %v3184_v40 = vld [vmem:[%s4481_s1 + $0x250] ss:$8 sps:$4 sm:$0xff]  }
  0x4e   :  { %2270 = vmatprep.mubr.bf16.mxu0 %v3156_v43  ;;  %v3195_v43 = vld [vmem:[%s4481_s1 + $0x664] ss:$8 sps:$4 sm:$0xff]  }
  0x4f   :  { %2033 = vmatpush1.bf16.msra.mxu1 %v3064_v18  ;;  %v3160_v18 = vld [vmem:[%s4481_s1 + $0x210] ss:$8 sps:$4 sm:$0xff]  }
  0x50   :  { %2245 = vmatpush1.bf16.msra.mxu0 %v3067_v19  ;;  %2034 = vmatprep.subr.bf16.mxu1 %v3072_v20  ;;  %v3163_v19 = vld [vmem:[%s4481_s1 + $0x610] ss:$8 sps:$4 sm:$0xff]   ;;  %v3238_v20 = vld [vmem:[%s4482_s0 + $0x9c] ss:$72 sps:$4 sm:$0xff]  }
  0x51   :  { %2246 = vmatprep.subr.bf16.mxu0 %v3075_v21  ;;  %v3168_v21 = vld [vmem:[%s4481_s1 + $0x224] ss:$8 sps:$4 sm:$0xff]  }
  0x53   :  { %2035 = vmatpush1.bf16.msra.mxu1 %v3070_v22  ;;  %v3171_v22 = vld [vmem:[%s4481_s1 + $0x624] ss:$8 sps:$4 sm:$0xff]  }
  0x54   :  { %2247 = vmatpush1.bf16.msra.mxu0 %v3073_v23  ;;  %2036 = vmatprep.subr.bf16.mxu1 %v3078_v24  ;;  %v3243_v23 = vld [vmem:[%s4482_s0 + $0xbc] ss:$72 sps:$4 sm:$0xff]   ;;  %v3166_v24 = vld [vmem:[%s4481_s1 + $0x220] ss:$8 sps:$4 sm:$0xff]  }
  0x55   :  { %2248 = vmatprep.subr.bf16.mxu0 %v3081_v25  ;;  %v3169_v25 = vld [vmem:[%s4481_s1 + $0x620] ss:$8 sps:$4 sm:$0xff]  }
  0x57   :  { %2037 = vmatpush1.bf16.msra.mxu1 %v3076_v26  ;;  %v3248_v26 = vld [vmem:[%s4482_s0 + $0x98] ss:$72 sps:$4 sm:$0xff]  }
  0x58   :  { %2249 = vmatpush1.bf16.msra.mxu0 %v3079_v27  ;;  %2038 = vmatprep.subr.bf16.mxu1 %v3084_v29  ;;  %v3249_v27 = vld [vmem:[%s4482_s0 + $0xb8] ss:$72 sps:$4 sm:$0xff]   ;;  %v3177_v29 = vld [vmem:[%s4481_s1 + $0x634] ss:$8 sps:$4 sm:$0xff]  }
  0x59   :  { %2250 = vmatprep.subr.bf16.mxu0 %v3087_v30  ;;  %v3172_v30 = vld [vmem:[%s4481_s1 + $0x230] ss:$8 sps:$4 sm:$0xff]  }
  0x5b   :  { %2039 = vmatpush1.bf16.msra.mxu1 %v3082_v32  ;;  %v3258_v32 = vld [vmem:[%s4482_s0 + $0x14] ss:$72 sps:$4 sm:$0xff]  }
  0x5c   :  { %2251 = vmatpush1.bf16.msra.mxu0 %v3085_v33  ;;  %2040 = vmatprep.subr.bf16.mxu1 %v3090_v36  ;;  %v3180_v33 = vld [vmem:[%s4481_s1 + $0x244] ss:$8 sps:$4 sm:$0xff]   ;;  %v3178_v36 = vld [vmem:[%s4481_s1 + $0x240] ss:$8 sps:$4 sm:$0xff]  }
  0x5d   :  { %2252 = vmatprep.subr.bf16.mxu0 %v3093_v37  ;;  %v3181_v37 = vld [vmem:[%s4481_s1 + $0x640] ss:$8 sps:$4 sm:$0xff]  }
  0x5f   :  { %2041 = vmatpush1.bf16.msra.mxu1 %v3088_v38  ;;  %v3186_v38 = vld [vmem:[%s4481_s1 + $0x254] ss:$8 sps:$4 sm:$0xff]  }
  0x60   :  { %2253 = vmatpush1.bf16.msra.mxu0 %v3091_v39  ;;  %2042 = vmatprep.subr.bf16.mxu1 %v3096_v41  ;;  %v3189_v39 = vld [vmem:[%s4481_s1 + $0x654] ss:$8 sps:$4 sm:$0xff]   ;;  %v3187_v41 = vld [vmem:[%s4481_s1 + $0x650] ss:$8 sps:$4 sm:$0xff]  }
  0x61   :  { %2254 = vmatprep.subr.bf16.mxu0 %v3099_v42  ;;  %v3192_v42 = vld [vmem:[%s4481_s1 + $0x264] ss:$8 sps:$4 sm:$0xff]  }
  0x63   :  { %2043 = vmatpush1.bf16.msra.mxu1 %v3094_v44  ;;  %v3190_v44 = vld [vmem:[%s4481_s1 + $0x260] ss:$8 sps:$4 sm:$0xff]  }
  0x64   :  { %2255 = vmatpush1.bf16.msra.mxu0 %v3097_v45  ;;  %2044 = vmatprep.subr.bf16.mxu1 %v3102_v46  ;;  %v3193_v45 = vld [vmem:[%s4481_s1 + $0x660] ss:$8 sps:$4 sm:$0xff]   ;;  %v3198_v46 = vld [vmem:[%s4481_s1 + $0x274] ss:$8 sps:$4 sm:$0xff]  }
  0x65   :  { %2256 = vmatprep.subr.bf16.mxu0 %v3105_v47  ;;  %v3201_v47 = vld [vmem:[%s4481_s1 + $0x674] ss:$8 sps:$4 sm:$0xff]  }
  0x67   :  { %2045 = vmatpush1.bf16.msra.mxu1 %v3100_v48  ;;  %v3196_v48 = vld [vmem:[%s4481_s1 + $0x270] ss:$8 sps:$4 sm:$0xff]  }
  0x68   :  { %2257 = vmatpush1.bf16.msra.mxu0 %v3103_v49  ;;  %2046 = vmatprep.subr.bf16.mxu1 %v3108_v50  ;;  %v3199_v49 = vld [vmem:[%s4481_s1 + $0x670] ss:$8 sps:$4 sm:$0xff]   ;;  %v3204_v50 = vld [vmem:[%s4481_s1 + $0x284] ss:$8 sps:$4 sm:$0xff]  }
  0x69   :  { %2258 = vmatprep.subr.bf16.mxu0 %v3111_v51  ;;  %v3207_v51 = vld [vmem:[%s4481_s1 + $0x684] ss:$8 sps:$4 sm:$0xff]  }
  0x6b   :  { %2047 = vmatpush1.bf16.msra.mxu1 %v3106_v52  ;;  %v3202_v52 = vld [vmem:[%s4481_s1 + $0x280] ss:$8 sps:$4 sm:$0xff]  }
  0x6c   :  { %2259 = vmatpush1.bf16.msra.mxu0 %v3109_v53  ;;  %2048 = vmatprep.subr.bf16.mxu1 %v3114_v54  ;;  %v3205_v53 = vld [vmem:[%s4481_s1 + $0x680] ss:$8 sps:$4 sm:$0xff]   ;;  %v3210_v54 = vld [vmem:[%s4481_s1 + $0x294] ss:$8 sps:$4 sm:$0xff]  }
  0x6d   :  { %2260 = vmatprep.subr.bf16.mxu0 %v3117_v55  ;;  %v3213_v55 = vld [vmem:[%s4481_s1 + $0x694] ss:$8 sps:$4 sm:$0xff]  }
  0x6f   :  { %2049 = vmatpush1.bf16.msra.mxu1 %v3112_v56  ;;  %v3208_v56 = vld [vmem:[%s4481_s1 + $0x290] ss:$8 sps:$4 sm:$0xff]  }
  0x70   :  { %2261 = vmatpush1.bf16.msra.mxu0 %v3115_v57  ;;  %2050 = vmatprep.subr.bf16.mxu1 %v3120_v58  ;;  %v3211_v57 = vld [vmem:[%s4481_s1 + $0x690] ss:$8 sps:$4 sm:$0xff]   ;;  %v3216_v58 = vld [vmem:[%s4481_s1 + $0x2a4] ss:$8 sps:$4 sm:$0xff]  }
  0x71   :  { %2262 = vmatprep.subr.bf16.mxu0 %v3123_v59  ;;  %v3219_v59 = vld [vmem:[%s4481_s1 + $0x6a4] ss:$8 sps:$4 sm:$0xff]  }
  0x73   :  { %2051 = vmatpush1.bf16.msra.mxu1 %v3118_v60  ;;  %v3214_v60 = vld [vmem:[%s4481_s1 + $0x2a0] ss:$8 sps:$4 sm:$0xff]  }
  0x74   :  { %2263 = vmatpush1.bf16.msra.mxu0 %v3121_v61  ;;  %2052 = vmatprep.subr.bf16.mxu1 %v3126_v62  ;;  %v3217_v61 = vld [vmem:[%s4481_s1 + $0x6a0] ss:$8 sps:$4 sm:$0xff]   ;;  %v3222_v62 = vld [vmem:[%s4481_s1 + $0x2b4] ss:$8 sps:$4 sm:$0xff]  }
  0x75   :  { %2264 = vmatprep.subr.bf16.mxu0 %v3129_v63  ;;  %v3225_v63 = vld [vmem:[%s4481_s1 + $0x6b4] ss:$8 sps:$4 sm:$0xff]  }
  0x77   :  { %2053 = vmatpush1.bf16.msra.mxu1 %v3124_v0  ;;  %v3220_v0 = vld [vmem:[%s4481_s1 + $0x2b0] ss:$8 sps:$4 sm:$0xff]  }
  0x78   :  { %2265 = vmatpush1.bf16.msra.mxu0 %v3127_v1  ;;  %2054 = vmatprep.subr.bf16.mxu1 %v3134_v2  ;;  %v3223_v1 = vld [vmem:[%s4481_s1 + $0x6b0] ss:$8 sps:$4 sm:$0xff]   ;;  %v3228_v2 = vld [vmem:[%s4481_s1 + $0x2c4] ss:$8 sps:$4 sm:$0xff]  }
  0x79   :  { %2266 = vmatprep.subr.bf16.mxu0 %v3139_v3  ;;  %v3231_v3 = vld [vmem:[%s4481_s1 + $0x6c4] ss:$8 sps:$4 sm:$0xff]  }
  0x7b   :  { %2055 = vmatpush1.bf16.msra.mxu1 %v3132_v4  ;;  %v3226_v4 = vld [vmem:[%s4481_s1 + $0x2c0] ss:$8 sps:$4 sm:$0xff]  }
  0x7c   :  { %2267 = vmatpush1.bf16.msra.mxu0 %v3137_v5  ;;  %2056 = vmatprep.subr.bf16.mxu1 %v3144_v6  ;;  %v3229_v5 = vld [vmem:[%s4481_s1 + $0x6c0] ss:$8 sps:$4 sm:$0xff]   ;;  %v3234_v6 = vld [vmem:[%s4481_s1 + $0x2d4] ss:$8 sps:$4 sm:$0xff]  }
  0x7d   :  { %2268 = vmatprep.subr.bf16.mxu0 %v3147_v7  ;;  %v3237_v7 = vld [vmem:[%s4481_s1 + $0x6d4] ss:$8 sps:$4 sm:$0xff]  }
  0x7f   :  { %2057 = vmatpush1.bf16.msra.mxu1 %v3142_v8  ;;  %v3232_v8 = vld [vmem:[%s4481_s1 + $0x2d0] ss:$8 sps:$4 sm:$0xff]  }
  0x80   :  { %2269 = vmatpush1.bf16.msra.mxu0 %v3145_v9  ;;  %2079 = vmatprep.subr.bf16.mxu1 %v3153_v10  ;;  %v3235_v9 = vld [vmem:[%s4481_s1 + $0x6d0] ss:$8 sps:$4 sm:$0xff]   ;;  %v3242_v10 = vld [vmem:[%s4481_s1 + $0x2e4] ss:$8 sps:$4 sm:$0xff]  }
  0x81   :  { %2291 = vmatprep.subr.bf16.mxu0 %v3159_v11  ;;  %v3247_v11 = vld [vmem:[%s4481_s1 + $0x6e4] ss:$8 sps:$4 sm:$0xff]  }
  0x82   :  { %2059 = vmatmul.mubr.bf16.vlgmr.msra.gmra.mrb[0].mxu1 %v3148_v12  ;;  %v3240_v12 = vld [vmem:[%s4481_s1 + $0x2e0] ss:$8 sps:$4 sm:$0xff]  }
  0x83   :  { %2271 = vmatmul.mubr.bf16.vlgmr.msra.gmra.mrb[0].mxu0 %v3154_v14  ;;  %2080 = vmatpush1.bf16.msra.mxu1 %v3151_v13  ;;  %v3245_v13 = vld [vmem:[%s4481_s1 + $0x6e0] ss:$8 sps:$4 sm:$0xff]   ;;  %v3252_v14 = vld [vmem:[%s4481_s1 + $0x2f4] ss:$8 sps:$4 sm:$0xff]  }
  0x84   :  { %2292 = vmatpush1.bf16.msra.mxu0 %v3157_v15  ;;  %2081 = vmatprep.subr.bf16.mxu1 %v3162_v16  ;;  %v3255_v15 = vld [vmem:[%s4481_s1 + $0x6f4] ss:$8 sps:$4 sm:$0xff]   ;;  %v3250_v16 = vld [vmem:[%s4481_s1 + $0x2f0] ss:$8 sps:$4 sm:$0xff]  }
  0x85   :  { %2293 = vmatprep.subr.bf16.mxu0 %v3165_v17  ;;  %2068 = vmatprep.mubr.bf16.mxu1 %v3238_v20  ;;  %v3253_v17 = vld [vmem:[%s4481_s1 + $0x6f0] ss:$8 sps:$4 sm:$0xff]  }
  0x86   :  { %2280 = vmatprep.mubr.bf16.mxu0 %v3243_v23  ;;  %v3256_v20 = vld [vmem:[%s4482_s0 + $0x10] ss:$72 sps:$4 sm:$0xff]   ;;  %v3265_v23 = vld [vmem:[%s4481_s1 + $0x700] ss:$8 sps:$4 sm:$0xff]  }
  0x87   :  { %2082 = vmatpush1.bf16.msra.mxu1 %v3160_v18  ;;  %v3261_v18 = vld [vmem:[%s4481_s1 + $0x304] ss:$8 sps:$4 sm:$0xff]  }
  0x88   :  { %2294 = vmatpush1.bf16.msra.mxu0 %v3163_v19  ;;  %2083 = vmatprep.subr.bf16.mxu1 %v3168_v21  ;;  %v3267_v19 = vld [vmem:[%s4481_s1 + $0x704] ss:$8 sps:$4 sm:$0xff]   ;;  %v3259_v21 = vld [vmem:[%s4481_s1 + $0x300] ss:$8 sps:$4 sm:$0xff]  }
  0x89   :  { %2295 = vmatprep.subr.bf16.mxu0 %v3171_v22  ;;  %v3262_v22 = vld [vmem:[%s4482_s0 + $0x30] ss:$72 sps:$4 sm:$0xff]  }
  0x8a   :  { %2069 = vmatmul.mubr.bf16.gmra.mrb[4].mxu1 %v3248_v26  ;;  %v3346_v26 = vld [vmem:[%s4482_s0 + $0xa4] ss:$72 sps:$4 sm:$0xff]  }
  0x8b   :  { %2281 = vmatmul.mubr.bf16.gmra.mrb[4].mxu0 %v3249_v27  ;;  %2084 = vmatpush1.bf16.msra.mxu1 %v3166_v24  ;;  %v3270_v24 = vld [vmem:[%s4481_s1 + $0x314] ss:$8 sps:$4 sm:$0xff]   ;;  %v3348_v27 = vld [vmem:[%s4482_s0 + $0xc4] ss:$72 sps:$4 sm:$0xff]  }
  0x8c   :  { %2296 = vmatpush1.bf16.msra.mxu0 %v3169_v25  ;;  %2085 = vmatprep.subr.bf16.mxu1 %v3174_v28  ;;  %v3273_v25 = vld [vmem:[%s4481_s1 + $0x714] ss:$8 sps:$4 sm:$0xff]   ;;  %v3268_v28 = vld [vmem:[%s4481_s1 + $0x310] ss:$8 sps:$4 sm:$0xff]  }
  0x8d   :  { %2297 = vmatprep.subr.bf16.mxu0 %v3177_v29  ;;  %2111 = vmatprep.mubr.bf16.mxu1 %v3258_v32  ;;  %v3271_v29 = vld [vmem:[%s4481_s1 + $0x710] ss:$8 sps:$4 sm:$0xff]   ;;  %v3274_v32 = vld [vmem:[%s4481_s1 + $0x320] ss:$8 sps:$4 sm:$0xff]  }
  0x8e   :  { %2323 = vmatprep.mubr.bf16.mxu0 %v3264_v35  ;;  %v3354_v35 = vld [vmem:[%s4482_s0 + $0xc0] ss:$72 sps:$4 sm:$0xff]  }
  0x8f   :  { %2086 = vmatpush1.bf16.msra.mxu1 %v3172_v30  ;;  %v3276_v30 = vld [vmem:[%s4481_s1 + $0x324] ss:$8 sps:$4 sm:$0xff]  }
  0x90   :  { %2298 = vmatpush1.bf16.msra.mxu0 %v3175_v31  ;;  %2087 = vmatprep.subr.bf16.mxu1 %v3180_v33  ;;  %v3279_v31 = vld [vmem:[%s4481_s1 + $0x724] ss:$8 sps:$4 sm:$0xff]   ;;  %v3277_v33 = vld [vmem:[%s4481_s1 + $0x720] ss:$8 sps:$4 sm:$0xff]  }
  0x91   :  { %2299 = vmatprep.subr.bf16.mxu0 %v3183_v34  ;;  %v3350_v34 = vld [vmem:[%s4482_s0 + $0xa0] ss:$72 sps:$4 sm:$0xff]  }
  0x93   :  { %2088 = vmatpush1.bf16.msra.mxu1 %v3178_v36  ;;  %v3282_v36 = vld [vmem:[%s4481_s1 + $0x334] ss:$8 sps:$4 sm:$0xff]  }
  0x94   :  { %2300 = vmatpush1.bf16.msra.mxu0 %v3181_v37  ;;  %2089 = vmatprep.subr.bf16.mxu1 %v3186_v38  ;;  %v3285_v37 = vld [vmem:[%s4481_s1 + $0x734] ss:$8 sps:$4 sm:$0xff]  }
  0x95   :  { %2301 = vmatprep.subr.bf16.mxu0 %v3189_v39  ;;  %v3366_v38 = vld [vmem:[%s4482_s0 + $0x1c] ss:$72 sps:$4 sm:$0xff]  }
  0x96   :  { %v3369_v39 = vld [vmem:[%s4482_s0 + $0x3c] ss:$72 sps:$4 sm:$0xff]  }
  0x97   :  { %2090 = vmatpush1.bf16.msra.mxu1 %v3184_v40  ;;  %v3280_v40 = vld [vmem:[%s4481_s1 + $0x330] ss:$8 sps:$4 sm:$0xff]  }
  0x98   :  { %2302 = vmatpush1.bf16.msra.mxu0 %v3187_v41  ;;  %2091 = vmatprep.subr.bf16.mxu1 %v3192_v42  ;;  %v3283_v41 = vld [vmem:[%s4481_s1 + $0x730] ss:$8 sps:$4 sm:$0xff]   ;;  %v3288_v42 = vld [vmem:[%s4481_s1 + $0x344] ss:$8 sps:$4 sm:$0xff]  }
  0x99   :  { %2303 = vmatprep.subr.bf16.mxu0 %v3195_v43  ;;  %v3291_v43 = vld [vmem:[%s4481_s1 + $0x744] ss:$8 sps:$4 sm:$0xff]  }
  0x9b   :  { %2092 = vmatpush1.bf16.msra.mxu1 %v3190_v44  ;;  %v3286_v44 = vld [vmem:[%s4481_s1 + $0x340] ss:$8 sps:$4 sm:$0xff]  }
  0x9c   :  { %2304 = vmatpush1.bf16.msra.mxu0 %v3193_v45  ;;  %2093 = vmatprep.subr.bf16.mxu1 %v3198_v46  ;;  %v3289_v45 = vld [vmem:[%s4481_s1 + $0x740] ss:$8 sps:$4 sm:$0xff]   ;;  %v3294_v46 = vld [vmem:[%s4481_s1 + $0x354] ss:$8 sps:$4 sm:$0xff]  }
  0x9d   :  { %2305 = vmatprep.subr.bf16.mxu0 %v3201_v47  ;;  %v3297_v47 = vld [vmem:[%s4481_s1 + $0x754] ss:$8 sps:$4 sm:$0xff]  }
  0x9f   :  { %2094 = vmatpush1.bf16.msra.mxu1 %v3196_v48  ;;  %v3292_v48 = vld [vmem:[%s4481_s1 + $0x350] ss:$8 sps:$4 sm:$0xff]  }
  0xa0   :  { %2306 = vmatpush1.bf16.msra.mxu0 %v3199_v49  ;;  %2095 = vmatprep.subr.bf16.mxu1 %v3204_v50  ;;  %v3295_v49 = vld [vmem:[%s4481_s1 + $0x750] ss:$8 sps:$4 sm:$0xff]   ;;  %v3300_v50 = vld [vmem:[%s4481_s1 + $0x364] ss:$8 sps:$4 sm:$0xff]  }
  0xa1   :  { %2307 = vmatprep.subr.bf16.mxu0 %v3207_v51  ;;  %v3303_v51 = vld [vmem:[%s4481_s1 + $0x764] ss:$8 sps:$4 sm:$0xff]  }
  0xa3   :  { %2096 = vmatpush1.bf16.msra.mxu1 %v3202_v52  ;;  %v3298_v52 = vld [vmem:[%s4481_s1 + $0x360] ss:$8 sps:$4 sm:$0xff]  }
  0xa4   :  { %2308 = vmatpush1.bf16.msra.mxu0 %v3205_v53  ;;  %2097 = vmatprep.subr.bf16.mxu1 %v3210_v54  ;;  %v3301_v53 = vld [vmem:[%s4481_s1 + $0x760] ss:$8 sps:$4 sm:$0xff]   ;;  %v3306_v54 = vld [vmem:[%s4481_s1 + $0x374] ss:$8 sps:$4 sm:$0xff]  }
  0xa5   :  { %2309 = vmatprep.subr.bf16.mxu0 %v3213_v55  ;;  %v3309_v55 = vld [vmem:[%s4481_s1 + $0x774] ss:$8 sps:$4 sm:$0xff]  }
  0xa7   :  { %2098 = vmatpush1.bf16.msra.mxu1 %v3208_v56  ;;  %v3304_v56 = vld [vmem:[%s4481_s1 + $0x370] ss:$8 sps:$4 sm:$0xff]  }
  0xa8   :  { %2310 = vmatpush1.bf16.msra.mxu0 %v3211_v57  ;;  %2099 = vmatprep.subr.bf16.mxu1 %v3216_v58  ;;  %v3307_v57 = vld [vmem:[%s4481_s1 + $0x770] ss:$8 sps:$4 sm:$0xff]   ;;  %v3312_v58 = vld [vmem:[%s4481_s1 + $0x384] ss:$8 sps:$4 sm:$0xff]  }
  0xa9   :  { %2311 = vmatprep.subr.bf16.mxu0 %v3219_v59  ;;  %v3315_v59 = vld [vmem:[%s4481_s1 + $0x784] ss:$8 sps:$4 sm:$0xff]  }
  0xab   :  { %2100 = vmatpush1.bf16.msra.mxu1 %v3214_v60  ;;  %v3310_v60 = vld [vmem:[%s4481_s1 + $0x380] ss:$8 sps:$4 sm:$0xff]  }
  0xac   :  { %2312 = vmatpush1.bf16.msra.mxu0 %v3217_v61  ;;  %2101 = vmatprep.subr.bf16.mxu1 %v3222_v62  ;;  %v3313_v61 = vld [vmem:[%s4481_s1 + $0x780] ss:$8 sps:$4 sm:$0xff]   ;;  %v3318_v62 = vld [vmem:[%s4481_s1 + $0x394] ss:$8 sps:$4 sm:$0xff]  }
  0xad   :  { %2313 = vmatprep.subr.bf16.mxu0 %v3225_v63  ;;  %v3321_v63 = vld [vmem:[%s4481_s1 + $0x794] ss:$8 sps:$4 sm:$0xff]  }
  0xaf   :  { %2102 = vmatpush1.bf16.msra.mxu1 %v3220_v0  ;;  %v3316_v0 = vld [vmem:[%s4481_s1 + $0x390] ss:$8 sps:$4 sm:$0xff]  }
  0xb0   :  { %2314 = vmatpush1.bf16.msra.mxu0 %v3223_v1  ;;  %2103 = vmatprep.subr.bf16.mxu1 %v3228_v2  ;;  %v3319_v1 = vld [vmem:[%s4481_s1 + $0x790] ss:$8 sps:$4 sm:$0xff]   ;;  %v3324_v2 = vld [vmem:[%s4481_s1 + $0x3a4] ss:$8 sps:$4 sm:$0xff]  }
  0xb1   :  { %2315 = vmatprep.subr.bf16.mxu0 %v3231_v3  ;;  %v3327_v3 = vld [vmem:[%s4481_s1 + $0x7a4] ss:$8 sps:$4 sm:$0xff]  }
  0xb3   :  { %2104 = vmatpush1.bf16.msra.mxu1 %v3226_v4  ;;  %v3322_v4 = vld [vmem:[%s4481_s1 + $0x3a0] ss:$8 sps:$4 sm:$0xff]  }
  0xb4   :  { %2316 = vmatpush1.bf16.msra.mxu0 %v3229_v5  ;;  %2105 = vmatprep.subr.bf16.mxu1 %v3234_v6  ;;  %v3325_v5 = vld [vmem:[%s4481_s1 + $0x7a0] ss:$8 sps:$4 sm:$0xff]   ;;  %v3330_v6 = vld [vmem:[%s4481_s1 + $0x3b4] ss:$8 sps:$4 sm:$0xff]  }
  0xb5   :  { %2317 = vmatprep.subr.bf16.mxu0 %v3237_v7  ;;  %v3333_v7 = vld [vmem:[%s4481_s1 + $0x7b4] ss:$8 sps:$4 sm:$0xff]  }
  0xb7   :  { %2106 = vmatpush1.bf16.msra.mxu1 %v3232_v8  ;;  %v3328_v8 = vld [vmem:[%s4481_s1 + $0x3b0] ss:$8 sps:$4 sm:$0xff]  }
  0xb8   :  { %2318 = vmatpush1.bf16.msra.mxu0 %v3235_v9  ;;  %2107 = vmatprep.subr.bf16.mxu1 %v3242_v10  ;;  %v3331_v9 = vld [vmem:[%s4481_s1 + $0x7b0] ss:$8 sps:$4 sm:$0xff]   ;;  %v3336_v10 = vld [vmem:[%s4481_s1 + $0x3c4] ss:$8 sps:$4 sm:$0xff]  }
  0xb9   :  { %2319 = vmatprep.subr.bf16.mxu0 %v3247_v11  ;;  %v3339_v11 = vld [vmem:[%s4481_s1 + $0x7c4] ss:$8 sps:$4 sm:$0xff]  }
  0xbb   :  { %2108 = vmatpush1.bf16.msra.mxu1 %v3240_v12  ;;  %v3334_v12 = vld [vmem:[%s4481_s1 + $0x3c0] ss:$8 sps:$4 sm:$0xff]  }
  0xbc   :  { %2320 = vmatpush1.bf16.msra.mxu0 %v3245_v13  ;;  %2109 = vmatprep.subr.bf16.mxu1 %v3252_v14  ;;  %v3337_v13 = vld [vmem:[%s4481_s1 + $0x7c0] ss:$8 sps:$4 sm:$0xff]   ;;  %v3342_v14 = vld [vmem:[%s4481_s1 + $0x3d4] ss:$8 sps:$4 sm:$0xff]  }
  0xbd   :  { %2321 = vmatprep.subr.bf16.mxu0 %v3255_v15  ;;  %v3345_v15 = vld [vmem:[%s4481_s1 + $0x7d4] ss:$8 sps:$4 sm:$0xff]  }
  0xbf   :  { %2110 = vmatpush1.bf16.msra.mxu1 %v3250_v16  ;;  %v3340_v16 = vld [vmem:[%s4481_s1 + $0x3d0] ss:$8 sps:$4 sm:$0xff]  }
  0xc0   :  { %2322 = vmatpush1.bf16.msra.mxu0 %v3253_v17  ;;  %2132 = vmatprep.subr.bf16.mxu1 %v3261_v18  ;;  %v3343_v17 = vld [vmem:[%s4481_s1 + $0x7d0] ss:$8 sps:$4 sm:$0xff]   ;;  %v3353_v18 = vld [vmem:[%s4481_s1 + $0x3e4] ss:$8 sps:$4 sm:$0xff]  }
  0xc1   :  { %2344 = vmatprep.subr.bf16.mxu0 %v3267_v19  ;;  %v3357_v19 = vld [vmem:[%s4481_s1 + $0x7e4] ss:$8 sps:$4 sm:$0xff]  }
  0xc2   :  { %2112 = vmatmul.mubr.bf16.vlgmr.msra.gmra.mrb[0].mxu1 %v3256_v20  ;;  %v3351_v20 = vld [vmem:[%s4481_s1 + $0x3e0] ss:$8 sps:$4 sm:$0xff]  }
  0xc3   :  { %2324 = vmatmul.mubr.bf16.vlgmr.msra.gmra.mrb[0].mxu0 %v3262_v22  ;;  %2133 = vmatpush1.bf16.msra.mxu1 %v3259_v21  ;;  %v3355_v21 = vld [vmem:[%s4481_s1 + $0x7e0] ss:$8 sps:$4 sm:$0xff]   ;;  %v3360_v22 = vld [vmem:[%s4481_s1 + $0x3f4] ss:$8 sps:$4 sm:$0xff]  }
  0xc4   :  { %2345 = vmatpush1.bf16.msra.mxu0 %v3265_v23  ;;  %2134 = vmatprep.subr.bf16.mxu1 %v3270_v24  ;;  %v3363_v23 = vld [vmem:[%s4481_s1 + $0x7f4] ss:$8 sps:$4 sm:$0xff]   ;;  %v3358_v24 = vld [vmem:[%s4481_s1 + $0x3f0] ss:$8 sps:$4 sm:$0xff]  }
  0xc5   :  { %2346 = vmatprep.subr.bf16.mxu0 %v3273_v25  ;;  %2121 = vmatprep.mubr.bf16.mxu1 %v3346_v26  ;;  %v3361_v25 = vld [vmem:[%s4481_s1 + $0x7f0] ss:$8 sps:$4 sm:$0xff]   ;;  %v3372_v26 = vld [vmem:[%s4481_s1 + $0x804] ss:$8 sps:$4 sm:$0xff]  }
  0xc6   :  { %2333 = vmatprep.mubr.bf16.mxu0 %v3348_v27  ;;  %v3364_v27 = vld [vmem:[%s4482_s0 + $0x18] ss:$72 sps:$4 sm:$0xff]  }
  0xc7   :  { %2135 = vmatpush1.bf16.msra.mxu1 %v3268_v28  ;;  %v3367_v28 = vld [vmem:[%s4482_s0 + $0x38] ss:$72 sps:$4 sm:$0xff]  }
  0xc8   :  { %2347 = vmatpush1.bf16.msra.mxu0 %v3271_v29  ;;  %2136 = vmatprep.subr.bf16.mxu1 %v3276_v30  ;;  %v3370_v29 = vld [vmem:[%s4481_s1 + $0x800] ss:$8 sps:$4 sm:$0xff]   ;;  %v3375_v30 = vld [vmem:[%s4481_s1 + $0x814] ss:$8 sps:$4 sm:$0xff]  }
  0xc9   :  { %2348 = vmatprep.subr.bf16.mxu0 %v3279_v31  ;;  %v3376_v31 = vld [vmem:[%s4482_s0 + $0xac] ss:$72 sps:$4 sm:$0xff]  }
  0xca   :  { %2122 = vmatmul.mubr.bf16.gmra.mrb[4].mxu1 %v3350_v34  ;;  %v3384_v34 = vld [vmem:[%s4481_s1 + $0x824] ss:$8 sps:$4 sm:$0xff]  }
  0xcb   :  { %2334 = vmatmul.mubr.bf16.gmra.mrb[4].mxu0 %v3354_v35  ;;  %2137 = vmatpush1.bf16.msra.mxu1 %v3274_v32  ;;  %v3378_v32 = vld [vmem:[%s4482_s0 + $0xcc] ss:$72 sps:$4 sm:$0xff]   ;;  %v3380_v35 = vld [vmem:[%s4482_s0 + $0xa8] ss:$72 sps:$4 sm:$0xff]  }
  0xcc   :  { %2349 = vmatpush1.bf16.msra.mxu0 %v3277_v33  ;;  %2138 = vmatprep.subr.bf16.mxu1 %v3282_v36  ;;  %v3373_v33 = vld [vmem:[%s4481_s1 + $0x810] ss:$8 sps:$4 sm:$0xff]  }
  0xcd   :  { %2350 = vmatprep.subr.bf16.mxu0 %v3285_v37  ;;  %2164 = vmatprep.mubr.bf16.mxu1 %v3366_v38  ;;  %v3381_v36 = vld [vmem:[%s4482_s0 + $0xc8] ss:$72 sps:$4 sm:$0xff]   ;;  %v3387_v38 = vld [vmem:[%s4481_s1 + $0x834] ss:$8 sps:$4 sm:$0xff]  }
  0xce   :  { %2376 = vmatprep.mubr.bf16.mxu0 %v3369_v39  ;;  %v3382_v37 = vld [vmem:[%s4481_s1 + $0x820] ss:$8 sps:$4 sm:$0xff]   ;;  %v3426_v39 = vld [vmem:[%s4482_s0 + $0x44] ss:$72 sps:$4 sm:$0xff]  }
  0xcf   :  { %2139 = vmatpush1.bf16.msra.mxu1 %v3280_v40  ;;  %v3429_v40 = vld [vmem:[%s4482_s0 + $0xd4] ss:$72 sps:$4 sm:$0xff]  }
  0xd0   :  { %2351 = vmatpush1.bf16.msra.mxu0 %v3283_v41  ;;  %2140 = vmatprep.subr.bf16.mxu1 %v3288_v42  ;;  %v3385_v41 = vld [vmem:[%s4481_s1 + $0x830] ss:$8 sps:$4 sm:$0xff]   ;;  %v3390_v42 = vld [vmem:[%s4481_s1 + $0x844] ss:$8 sps:$4 sm:$0xff]  }
  0xd1   :  { %2352 = vmatprep.subr.bf16.mxu0 %v3291_v43  ;;  %v3388_v43 = vld [vmem:[%s4481_s1 + $0x840] ss:$8 sps:$4 sm:$0xff]  }
  0xd3   :  { %2141 = vmatpush1.bf16.msra.mxu1 %v3286_v44  ;;  %v3393_v44 = vld [vmem:[%s4481_s1 + $0x854] ss:$8 sps:$4 sm:$0xff]  }
  0xd4   :  { %2353 = vmatpush1.bf16.msra.mxu0 %v3289_v45  ;;  %2142 = vmatprep.subr.bf16.mxu1 %v3294_v46  ;;  %v3391_v45 = vld [vmem:[%s4481_s1 + $0x850] ss:$8 sps:$4 sm:$0xff]   ;;  %v3396_v46 = vld [vmem:[%s4481_s1 + $0x864] ss:$8 sps:$4 sm:$0xff]  }
  0xd5   :  { %2354 = vmatprep.subr.bf16.mxu0 %v3297_v47  ;;  %v3394_v47 = vld [vmem:[%s4481_s1 + $0x860] ss:$8 sps:$4 sm:$0xff]  }
  0xd7   :  { %2143 = vmatpush1.bf16.msra.mxu1 %v3292_v48  ;;  %v3399_v48 = vld [vmem:[%s4481_s1 + $0x874] ss:$8 sps:$4 sm:$0xff]  }
  0xd8   :  { %2355 = vmatpush1.bf16.msra.mxu0 %v3295_v49  ;;  %2144 = vmatprep.subr.bf16.mxu1 %v3300_v50  ;;  %v3397_v49 = vld [vmem:[%s4481_s1 + $0x870] ss:$8 sps:$4 sm:$0xff]   ;;  %v3402_v50 = vld [vmem:[%s4481_s1 + $0x884] ss:$8 sps:$4 sm:$0xff]  }
  0xd9   :  { %2356 = vmatprep.subr.bf16.mxu0 %v3303_v51  ;;  %v3400_v51 = vld [vmem:[%s4481_s1 + $0x880] ss:$8 sps:$4 sm:$0xff]  }
  0xdb   :  { %2145 = vmatpush1.bf16.msra.mxu1 %v3298_v52  ;;  %v3405_v52 = vld [vmem:[%s4481_s1 + $0x894] ss:$8 sps:$4 sm:$0xff]  }
  0xdc   :  { %2357 = vmatpush1.bf16.msra.mxu0 %v3301_v53  ;;  %2146 = vmatprep.subr.bf16.mxu1 %v3306_v54  ;;  %v3403_v53 = vld [vmem:[%s4481_s1 + $0x890] ss:$8 sps:$4 sm:$0xff]   ;;  %v3408_v54 = vld [vmem:[%s4481_s1 + $0x8a4] ss:$8 sps:$4 sm:$0xff]  }
  0xdd   :  { %2358 = vmatprep.subr.bf16.mxu0 %v3309_v55  ;;  %v3406_v55 = vld [vmem:[%s4481_s1 + $0x8a0] ss:$8 sps:$4 sm:$0xff]  }
  0xdf   :  { %2147 = vmatpush1.bf16.msra.mxu1 %v3304_v56  ;;  %v3411_v56 = vld [vmem:[%s4481_s1 + $0x8b4] ss:$8 sps:$4 sm:$0xff]  }
  0xe0   :  { %2359 = vmatpush1.bf16.msra.mxu0 %v3307_v57  ;;  %2148 = vmatprep.subr.bf16.mxu1 %v3312_v58  ;;  %v3409_v57 = vld [vmem:[%s4481_s1 + $0x8b0] ss:$8 sps:$4 sm:$0xff]   ;;  %v3414_v58 = vld [vmem:[%s4481_s1 + $0x8c4] ss:$8 sps:$4 sm:$0xff]  }
  0xe1   :  { %2360 = vmatprep.subr.bf16.mxu0 %v3315_v59  ;;  %v3412_v59 = vld [vmem:[%s4481_s1 + $0x8c0] ss:$8 sps:$4 sm:$0xff]  }
  0xe3   :  { %2149 = vmatpush1.bf16.msra.mxu1 %v3310_v60  ;;  %v3417_v60 = vld [vmem:[%s4481_s1 + $0x8d4] ss:$8 sps:$4 sm:$0xff]  }
  0xe4   :  { %2361 = vmatpush1.bf16.msra.mxu0 %v3313_v61  ;;  %2150 = vmatprep.subr.bf16.mxu1 %v3318_v62  ;;  %v3415_v61 = vld [vmem:[%s4481_s1 + $0x8d0] ss:$8 sps:$4 sm:$0xff]   ;;  %v3420_v62 = vld [vmem:[%s4481_s1 + $0x8e4] ss:$8 sps:$4 sm:$0xff]  }
  0xe5   :  { %2362 = vmatprep.subr.bf16.mxu0 %v3321_v63  ;;  %v3418_v63 = vld [vmem:[%s4481_s1 + $0x8e0] ss:$8 sps:$4 sm:$0xff]  }
  0xe7   :  { %2151 = vmatpush1.bf16.msra.mxu1 %v3316_v0  ;;  %v3423_v0 = vld [vmem:[%s4481_s1 + $0x8f4] ss:$8 sps:$4 sm:$0xff]  }
  0xe8   :  { %2363 = vmatpush1.bf16.msra.mxu0 %v3319_v1  ;;  %2152 = vmatprep.subr.bf16.mxu1 %v3324_v2  ;;  %v3421_v1 = vld [vmem:[%s4481_s1 + $0x8f0] ss:$8 sps:$4 sm:$0xff]   ;;  %v3424_v2 = vld [vmem:[%s4482_s0 + $0x40] ss:$72 sps:$4 sm:$0xff]  }
  0xe9   :  { %2364 = vmatprep.subr.bf16.mxu0 %v3327_v3  ;;  %v3427_v3 = vld [vmem:[%s4482_s0 + $0xd0] ss:$72 sps:$4 sm:$0xff]  }
  0xeb   :  { %2153 = vmatpush1.bf16.msra.mxu1 %v3322_v4  ;;  %v343_v4 = vlaneseq }
  0xec   :  { %2365 = vmatpush1.bf16.msra.mxu0 %v3325_v5  ;;  %2154 = vmatprep.subr.bf16.mxu1 %v3330_v6 }
  0xed   :  { %2366 = vmatprep.subr.bf16.mxu0 %v3333_v7  ;;  %v344_v5 = vshrl.u32 %v343_v4, 7 }
  0xef   :  { %2155 = vmatpush1.bf16.msra.mxu1 %v3328_v8 }
  0xf0   :  { %2367 = vmatpush1.bf16.msra.mxu0 %v3331_v9  ;;  %2156 = vmatprep.subr.bf16.mxu1 %v3336_v10  ;;  %v345_v9 = vsub.s32 0, %v344_v5 }
  0xf1   :  { %2368 = vmatprep.subr.bf16.mxu0 %v3339_v11  ;;  %v341_v11 = vld [vmem:[%s4483_s2] ss:$8 sm:$0x3] }
  0xf3   :  { %2157 = vmatpush1.bf16.msra.mxu1 %v3334_v12  ;;  %v349_v12 = vsub.s32 1, %v344_v5  ;;  %v2489_v5 = vld [vmem:[%s4484_s3 + $0x10] sm:$0xff] }
  0xf4   :  { %2369 = vmatpush1.bf16.msra.mxu0 %v3337_v13  ;;  %2158 = vmatprep.subr.bf16.mxu1 %v3342_v14  ;;  %v346_v13 = vrot.slane %v341_v11, %v345_v9 }
  0xf5   :  { %2370 = vmatprep.subr.bf16.mxu0 %v3345_v15  ;;  %v350_v14 = vrot.slane %v341_v11, %v349_v12 }
  0xf7   :  { %2159 = vmatpush1.bf16.msra.mxu1 %v3340_v16 }
  0xf8   :  { %2371 = vmatpush1.bf16.msra.mxu0 %v3343_v17  ;;  %2160 = vmatprep.subr.bf16.mxu1 %v3353_v18 }
  0xf9   :  { %2372 = vmatprep.subr.bf16.mxu0 %v3357_v19 }
  0xfb   :  { %2161 = vmatpush1.bf16.msra.mxu1 %v3351_v20 }
  0xfc   :  { %2373 = vmatpush1.bf16.msra.mxu0 %v3355_v21  ;;  %2162 = vmatprep.subr.bf16.mxu1 %v3360_v22 }
  0xfd   :  { %2374 = vmatprep.subr.bf16.mxu0 %v3363_v23 }
  0xff   :  { %2163 = vmatpush1.bf16.msra.mxu1 %v3358_v24 }
 0x100   :  { %2375 = vmatpush1.bf16.msra.mxu0 %v3361_v25  ;;  %2840 = vmatprep.subr.bf16.mxu1 %v3372_v26 }
 0x101   :  { %2397 = vmatprep.subr.bf16.mxu0 %v3372_v26 }
 0x102   :  { %2165 = vmatmul.mubr.bf16.vlgmr.msra.gmra.mrb[0].mxu1 %v3364_v27 }
 0x103   :  { %2377 = vmatmul.mubr.bf16.vlgmr.msra.gmra.mrb[0].mxu0 %v3367_v28  ;;  %2856 = vmatpush1.bf16.msra.mxu1 %v3370_v29 }
 0x104   :  { %2398 = vmatpush1.bf16.msra.mxu0 %v3370_v29  ;;  %2841 = vmatprep.subr.bf16.mxu1 %v3375_v30 }
 0x105   :  { %2399 = vmatprep.subr.bf16.mxu0 %v3375_v30  ;;  %2174 = vmatprep.mubr.bf16.mxu1 %v3376_v31  ;;  %v2839_v31 = vld [vmem:[%s4483_s2 + $0x1] ss:$8 sm:$0x3] }
 0x106   :  { %2386 = vmatprep.mubr.bf16.mxu0 %v3378_v32 }
 0x107   :  { %2857 = vmatpush1.bf16.msra.mxu1 %v3373_v33 }
 0x108   :  { %2400 = vmatpush1.bf16.msra.mxu0 %v3373_v33  ;;  %2842 = vmatprep.subr.bf16.mxu1 %v3384_v34  ;;  %v2464_v33 = vrot.slane %v2839_v31, %v345_v9 }
 0x109   :  { %2401 = vmatprep.subr.bf16.mxu0 %v3384_v34 }
 0x10a   :  { %2175 = vmatmul.mubr.bf16.gmra.mrb[4].mxu1 %v3380_v35  ;;  %v2468_v35 = vrot.slane %v2839_v31, %v349_v12 }
 0x10b   :  { %2387 = vmatmul.mubr.bf16.gmra.mrb[4].mxu0 %v3381_v36  ;;  %2858 = vmatpush1.bf16.msra.mxu1 %v3382_v37 }
 0x10c   :  { %2402 = vmatpush1.bf16.msra.mxu0 %v3382_v37  ;;  %2843 = vmatprep.subr.bf16.mxu1 %v3387_v38 }
 0x10d   :  { %2403 = vmatprep.subr.bf16.mxu0 %v3387_v38  ;;  %2429 = vmatprep.mubr.bf16.mxu0 %v3426_v39 }
 0x10e   :  { %2439 = vmatprep.mubr.bf16.mxu1 %v3429_v40 }
 0x10f   :  { %2859 = vmatpush1.bf16.msra.mxu1 %v3385_v41 }
 0x110   :  { %2404 = vmatpush1.bf16.msra.mxu0 %v3385_v41  ;;  %2844 = vmatprep.subr.bf16.mxu1 %v3390_v42 }
 0x111   :  { %2405 = vmatprep.subr.bf16.mxu0 %v3390_v42 }
 0x113   :  { %2860 = vmatpush1.bf16.msra.mxu1 %v3388_v43 }
 0x114   :  { %2406 = vmatpush1.bf16.msra.mxu0 %v3388_v43  ;;  %2845 = vmatprep.subr.bf16.mxu1 %v3393_v44 }
 0x115   :  { %2407 = vmatprep.subr.bf16.mxu0 %v3393_v44 }
 0x117   :  { %2861 = vmatpush1.bf16.msra.mxu1 %v3391_v45 }
 0x118   :  { %2408 = vmatpush1.bf16.msra.mxu0 %v3391_v45  ;;  %2846 = vmatprep.subr.bf16.mxu1 %v3396_v46 }
 0x119   :  { %2409 = vmatprep.subr.bf16.mxu0 %v3396_v46 }
 0x11b   :  { %2862 = vmatpush1.bf16.msra.mxu1 %v3394_v47 }
 0x11c   :  { %2410 = vmatpush1.bf16.msra.mxu0 %v3394_v47  ;;  %2847 = vmatprep.subr.bf16.mxu1 %v3399_v48 }
 0x11d   :  { %2411 = vmatprep.subr.bf16.mxu0 %v3399_v48 }
 0x11f   :  { %2863 = vmatpush1.bf16.msra.mxu1 %v3397_v49 }
 0x120   :  { %2412 = vmatpush1.bf16.msra.mxu0 %v3397_v49  ;;  %2848 = vmatprep.subr.bf16.mxu1 %v3402_v50  ;;  %v2487_v49 = vld [vmem:[%s4484_s3] sm:$0xff] }
 0x121   :  { %2413 = vmatprep.subr.bf16.mxu0 %v3402_v50 }
 0x123   :  { %2864 = vmatpush1.bf16.msra.mxu1 %v3400_v51 }
 0x124   :  { %2414 = vmatpush1.bf16.msra.mxu0 %v3400_v51  ;;  %2849 = vmatprep.subr.bf16.mxu1 %v3405_v52  ;;  %v2491_v51 = vld [vmem:[%s4484_s3 + $0x20] sm:$0xff] }
 0x125   :  { %2415 = vmatprep.subr.bf16.mxu0 %v3405_v52 }
 0x127   :  { %2865 = vmatpush1.bf16.msra.mxu1 %v3403_v53 }
 0x128   :  { %2416 = vmatpush1.bf16.msra.mxu0 %v3403_v53  ;;  %2850 = vmatprep.subr.bf16.mxu1 %v3408_v54 }
 0x129   :  { %2417 = vmatprep.subr.bf16.mxu0 %v3408_v54 }
 0x12b   :  { %2866 = vmatpush1.bf16.msra.mxu1 %v3406_v55 }
 0x12c   :  { %2418 = vmatpush1.bf16.msra.mxu0 %v3406_v55  ;;  %2851 = vmatprep.subr.bf16.mxu1 %v3411_v56  ;;  %v2488_v55 = vld [vmem:[%s4484_s3 + $0x8] sm:$0xff] }
 0x12d   :  { %2419 = vmatprep.subr.bf16.mxu0 %v3411_v56 }
 0x12f   :  { %2867 = vmatpush1.bf16.msra.mxu1 %v3409_v57 }
 0x130   :  { %2420 = vmatpush1.bf16.msra.mxu0 %v3409_v57  ;;  %2852 = vmatprep.subr.bf16.mxu1 %v3414_v58  ;;  %v2492_v57 = vld [vmem:[%s4484_s3 + $0x28] sm:$0xff] }
 0x131   :  { %2421 = vmatprep.subr.bf16.mxu0 %v3414_v58 }
 0x133   :  { %2868 = vmatpush1.bf16.msra.mxu1 %v3412_v59 }
 0x134   :  { %2422 = vmatpush1.bf16.msra.mxu0 %v3412_v59  ;;  %2853 = vmatprep.subr.bf16.mxu1 %v3417_v60 }
 0x135   :  { %2423 = vmatprep.subr.bf16.mxu0 %v3417_v60 }
 0x137   :  { %2869 = vmatpush1.bf16.msra.mxu1 %v3415_v61 }
 0x138   :  { %2424 = vmatpush1.bf16.msra.mxu0 %v3415_v61  ;;  %2854 = vmatprep.subr.bf16.mxu1 %v3420_v62 }
 0x139   :  { %2425 = vmatprep.subr.bf16.mxu0 %v3420_v62 }
 0x13b   :  { %2870 = vmatpush1.bf16.msra.mxu1 %v3418_v63 }
 0x13c   :  { %2426 = vmatpush1.bf16.msra.mxu0 %v3418_v63  ;;  %2855 = vmatprep.subr.bf16.mxu1 %v3423_v0 }
 0x13d   :  { %2427 = vmatprep.subr.bf16.mxu0 %v3423_v0 }
 0x13f   :  { %2871 = vmatpush1.bf16.msra.mxu1 %v3421_v1 }
 0x140   :  { %2428 = vmatpush1.bf16.msra.mxu0 %v3421_v1 }
 0x142   :  { %2440 = vmatmul.mubr.bf16.vlgmr.msra.gmra.mrb[8].mxu1 %v3427_v3 }
 0x143   :  { %2430 = vmatmul.mubr.bf16.vlgmr.msra.gmra.mrb[0].mxu0 %v3424_v2 }
 0x1d5   :  { %v2166_v6 = vpop.f32.mrb[0].mxu1 }
 0x1d6   :  { %v2168_v7 = vpop.f32.mrb[1].mxu1  ;;  %v2872_v32 = vadd.f32 %v2166_v6, %v346_v13 }
 0x1d7   :  { %v2170_v8 = vpop.f32.mrb[2].mxu1  ;;  %v2874_v34 = vadd.f32 %v2168_v7, %v350_v14  ;;  %v2493_v7 = vld [vmem:[%s4484_s3 + $0x30] sm:$0xff] }
 0x1d8   :  { %v2172_v10 = vpop.f32.mrb[3].mxu1  ;;  %v2876_v42 = vadd.f32 %v2170_v8, %v346_v13 }
 0x1d9   :  { %v2878_v43 = vadd.f32 %v2172_v10, %v350_v14 }
 0x1dd   :  { %v2176_v15 = vpop.f32.mrb[4].mxu1 }
 0x1de   :  { %v2388_v16 = vpop.f32.mrb[4].mxu0  ;;  %v2880_v17 = vadd.f32 %v2176_v15, %v346_v13  ;;  %v2178_v18 = vpop.f32.mrb[5].mxu1 }
 0x1df   :  { %v2390_v19 = vpop.f32.mrb[5].mxu0  ;;  %v2883_v20 = vadd.f32 %v2178_v18, %v350_v14  ;;  %v2180_v21 = vpop.f32.mrb[6].mxu1 }
 0x1e0   :  { %v2392_v22 = vpop.f32.mrb[6].mxu0  ;;  %v2881_v23 = vadd.f32 %v2880_v17, %v2388_v16  ;;  %v2886_v24 = vadd.f32 %v2180_v21, %v346_v13  ;;  %v2182_v25 = vpop.f32.mrb[7].mxu1  ;;  %v2494_v17 = vld [vmem:[%s4484_s3 + $0x38] sm:$0xff] }
 0x1e1   :  { %v2394_v26 = vpop.f32.mrb[7].mxu0  ;;  %v2884_v27 = vadd.f32 %v2883_v20, %v2390_v19  ;;  %v2889_v28 = vadd.f32 %v2182_v25, %v350_v14  ;;  %v2490_v14 = vld [vmem:[%s4484_s3 + $0x18] sm:$0xff] }
 0x1e2   :  { %v2887_v29 = vadd.f32 %v2886_v24, %v2392_v22 }
 0x1e3   :  { %v2890_v30 = vadd.f32 %v2889_v28, %v2394_v26 }
 0x215   :  { %v2441_v37 = vpop.f32.mrb[8].mxu1 }
 0x216   :  { %v2431_v36 = vpop.f32.mrb[0].mxu0  ;;  %v2882_v39 = vadd.f32 %v2881_v23, %v2441_v37  ;;  %v2443_v41 = vpop.f32.mrb[9].mxu1 }
 0x217   :  { %v2873_v38 = vadd.f32 %v2872_v32, %v2431_v36  ;;  %v2433_v40 = vpop.f32.mrb[1].mxu0  ;;  %v2885_v45 = vadd.f32 %v2884_v27, %v2443_v41  ;;  %v2445_v47 = vpop.f32.mrb[10].mxu1 }
 0x218   :  { %v2875_v44 = vadd.f32 %v2874_v34, %v2433_v40  ;;  %v2435_v46 = vpop.f32.mrb[2].mxu0  ;;  %vm2454_vm1 = vcmp.ge.f32.partialorder %v2882_v39, 0.0  ;;  %v2475_v50 = vmul.f32 %v2882_v39, %v2464_v33  ;;  %v2447_v53 = vpop.f32.mrb[11].mxu1  ;;  %v2888_v61 = vadd.f32 %v2887_v29, %v2445_v47 }
 0x219   :  { %vm2450_vm0 = vcmp.ge.f32.partialorder %v2873_v38, 0.0  ;;  %v2471_v48 = vmul.f32 %v2873_v38, %v2464_v33  ;;  %v2437_v52 = vpop.f32.mrb[3].mxu0  ;;  %vm2455_vm3 = vcmp.ge.f32.partialorder %v2885_v45, 0.0  ;;  %v2476_v56 = vmul.f32 %v2885_v45, %v2468_v35 }
 0x21a   :  { %vm2451_vm2 = vcmp.ge.f32.partialorder %v2875_v44, 0.0  ;;  %v2472_v54 = vmul.f32 %v2875_v44, %v2468_v35  ;;  %v2483_v59 = vsel %vm2454_vm1, %v2882_v39, %v2475_v50  ;;  %v2877_v60 = vadd.f32 %v2876_v42, %v2435_v46 }
 0x21b   :  { %v2479_v58 = vsel %vm2450_vm0, %v2873_v38, %v2471_v48  ;;  %v2499_v63 = vadd.f32 %v2491_v51, %v2483_v59  ;;  %v2484_v1 = vsel %vm2455_vm3, %v2885_v45, %v2476_v56  ;;  %vm2456_vm5 = vcmp.ge.f32.partialorder %v2888_v61, 0.0 }
 0x21c   :  { %v2495_v62 = vadd.f32 %v2487_v49, %v2479_v58  ;;  %v2480_v0 = vsel %vm2451_vm2, %v2875_v44, %v2472_v54  ;;  %v2500_v3 = vadd.f32 %v2492_v57, %v2484_v1  ;;  %vm2452_vm4 = vcmp.ge.f32.partialorder %v2877_v60, 0.0 }
 0x21d   :  { %v2496_v2 = vadd.f32 %v2488_v55, %v2480_v0  ;;  %v2473_v4 = vmul.f32 %v2877_v60, %v2464_v33  ;;  %2507 = vst [vmem:[%s4485_s4 + $0x20] sm:$0xff] %v2499_v63  ;;  %v2477_v6 = vmul.f32 %v2888_v61, %v2464_v33  ;;  %v2879_v8 = vadd.f32 %v2878_v43, %v2437_v52 }
 0x21e   :  { %2503 = vst [vmem:[%s4485_s4] sm:$0xff] %v2495_v62  ;;  %v2891_v9 = vadd.f32 %v2890_v30, %v2447_v53  ;;  %2508 = vst [vmem:[%s4485_s4 + $0x28] sm:$0xff] %v2500_v3 }
 0x21f   :  { %2504 = vst [vmem:[%s4485_s4 + $0x8] sm:$0xff] %v2496_v2  ;;  %v2481_v10 = vsel %vm2452_vm4, %v2877_v60, %v2473_v4  ;;  %v2485_v12 = vsel %vm2456_vm5, %v2888_v61, %v2477_v6  ;;  %vm2453_vm6 = vcmp.ge.f32.partialorder %v2879_v8, 0.0  ;;  %v2474_v13 = vmul.f32 %v2879_v8, %v2468_v35 }
 0x220   :  { %v2497_v11 = vadd.f32 %v2489_v5, %v2481_v10  ;;  %v2501_v15 = vadd.f32 %v2493_v7, %v2485_v12  ;;  %vm2457_vm7 = vcmp.ge.f32.partialorder %v2891_v9, 0.0  ;;  %v2478_v16 = vmul.f32 %v2891_v9, %v2468_v35 }
 0x221   :  { %v2482_v18 = vsel %vm2453_vm6, %v2879_v8, %v2474_v13 }
 0x222   :  { %2505 = vst [vmem:[%s4485_s4 + $0x10] sm:$0xff] %v2497_v11  ;;  %2509 = vst [vmem:[%s4485_s4 + $0x30] sm:$0xff] %v2501_v15  ;;  %v2498_v19 = vadd.f32 %v2490_v14, %v2482_v18  ;;  %v2486_v20 = vsel %vm2457_vm7, %v2891_v9, %v2478_v16 }
 0x223   :  { %v2502_v21 = vadd.f32 %v2494_v17, %v2486_v20 }
 0x224   :  { %2506 = vst [vmem:[%s4485_s4 + $0x18] sm:$0xff] %v2498_v19 }
 0x225   :  { %2510 = vst [vmem:[%s4485_s4 + $0x38] sm:$0xff] %v2502_v21 }

// kernel: forward.19
= control target key start
LH: loop header
LB: loop body
LE: loop exit
PB: predicated region body
PF: predicated region fallthrough
CT: control target
= control target key end

     0   :  { %v852_v1 = vmov 0   ;;  %v49_v54 = vlaneseq  ;;  %s1227_s1 = inlined_call_operand.vmem [shape: bf16[128,256], index: 1, kind: input, shape index: {}]   ;;  %s1228_s0 = inlined_call_operand.vmem [shape: bf16[80,128], index: 0, kind: input, shape index: {}]   ;;  %s1229_s3 = inlined_call_operand.vmem [shape: bf16[256,256], index: 3, kind: input, shape index: {}]   ;;  %s1230_s2 = inlined_call_operand.vmem [shape: f32[8,256], index: 2, kind: input, shape index: {}]   ;;  %s1231_s4 = inlined_call_operand.vmem [shape: f32[8,256], index: 4, kind: input, shape index: {}]   ;;  %s1232_s5 = inlined_call_operand.vmem [shape: f32[80,256], index: 5, kind: output, shape index: {}]  }
   0x1   :  { %v775_v0 = vld [vmem:[%s1227_s1 + $0x4] ss:$8 sps:$4 sm:$0xff]   ;;  %201 = vmatprep.mubr.bf16.mxu0 %v852_v1  ;;  %v777_v2 = vld [vmem:[%s1227_s1] ss:$8 sps:$4 sm:$0xff]   ;;  %v778_v3 = vld [vmem:[%s1227_s1 + $0x14] ss:$8 sps:$4 sm:$0xff]  }
   0x2   :  { %169 = vmatprep.subr.bf16.mxu0 %v775_v0  ;;  %v780_v4 = vld [vmem:[%s1227_s1 + $0x10] ss:$8 sps:$4 sm:$0xff]   ;;  %v781_v5 = vld [vmem:[%s1227_s1 + $0x24] ss:$8 sps:$4 sm:$0xff]   ;;  %v783_v6 = vld [vmem:[%s1227_s1 + $0x20] ss:$8 sps:$4 sm:$0xff]  }
   0x3   :  { %170 = vmatpush1.bf16.msra.mxu0 %v777_v2  ;;  %v784_v7 = vld [vmem:[%s1227_s1 + $0x34] ss:$8 sps:$4 sm:$0xff]   ;;  %v786_v8 = vld [vmem:[%s1227_s1 + $0x30] ss:$8 sps:$4 sm:$0xff]   ;;  %v787_v9 = vld [vmem:[%s1227_s1 + $0x44] ss:$8 sps:$4 sm:$0xff]  }
   0x4   :  { %171 = vmatprep.subr.bf16.mxu0 %v778_v3  ;;  %v789_v10 = vld [vmem:[%s1227_s1 + $0x40] ss:$8 sps:$4 sm:$0xff]   ;;  %v790_v11 = vld [vmem:[%s1227_s1 + $0x54] ss:$8 sps:$4 sm:$0xff]   ;;  %v804_v12 = vld [vmem:[%s1229_s3 + $0x4] ss:$8 sps:$4 sm:$0xff]  }
   0x5   :  { %v806_v13 = vld [vmem:[%s1229_s3] ss:$8 sps:$4 sm:$0xff]   ;;  %v807_v14 = vld [vmem:[%s1229_s3 + $0x14] ss:$8 sps:$4 sm:$0xff]   ;;  %539 = vmatprep.subr.bf16.mxu1 %v804_v12  ;;  %v792_v15 = vld [vmem:[%s1227_s1 + $0x50] ss:$8 sps:$4 sm:$0xff]  }
   0x6   :  { %540 = vmatpush1.bf16.msra.mxu1 %v806_v13  ;;  %v809_v16 = vld [vmem:[%s1229_s3 + $0x10] ss:$8 sps:$4 sm:$0xff]   ;;  %v793_v17 = vld [vmem:[%s1227_s1 + $0x64] ss:$8 sps:$4 sm:$0xff]   ;;  %v795_v19 = vld [vmem:[%s1227_s1 + $0x60] ss:$8 sps:$4 sm:$0xff]  }
   0x7   :  { %172 = vmatpush1.bf16.msra.mxu0 %v780_v4  ;;  %541 = vmatprep.subr.bf16.mxu1 %v807_v14  ;;  %v810_v18 = vld [vmem:[%s1229_s3 + $0x24] ss:$8 sps:$4 sm:$0xff]   ;;  %v812_v20 = vld [vmem:[%s1229_s3 + $0x20] ss:$8 sps:$4 sm:$0xff]   ;;  %v796_v21 = vld [vmem:[%s1227_s1 + $0x74] ss:$8 sps:$4 sm:$0xff]  }
   0x8   :  { %173 = vmatprep.subr.bf16.mxu0 %v781_v5  ;;  %v813_v22 = vld [vmem:[%s1229_s3 + $0x34] ss:$8 sps:$4 sm:$0xff]   ;;  %v798_v23 = vld [vmem:[%s1227_s1 + $0x70] ss:$8 sps:$4 sm:$0xff]   ;;  %v816_v25 = vld [vmem:[%s1229_s3 + $0x44] ss:$8 sps:$4 sm:$0xff]  }
   0x9   :  { %v815_v24 = vld [vmem:[%s1229_s3 + $0x30] ss:$8 sps:$4 sm:$0xff]   ;;  %v799_v26 = vld [vmem:[%s1228_s0] sm:$0xff]   ;;  %v819_v28 = vld [vmem:[%s1229_s3 + $0x54] ss:$8 sps:$4 sm:$0xff]   ;;  %v50_v55 = vshrl.u32 %v49_v54, 7 }
   0xa   :  { %542 = vmatpush1.bf16.msra.mxu1 %v809_v16  ;;  %v818_v27 = vld [vmem:[%s1229_s3 + $0x40] ss:$8 sps:$4 sm:$0xff]   ;;  %v821_v29 = vld [vmem:[%s1229_s3 + $0x50] ss:$8 sps:$4 sm:$0xff]   ;;  %v822_v30 = vld [vmem:[%s1229_s3 + $0x64] ss:$8 sps:$4 sm:$0xff]  }
   0xb   :  { %174 = vmatpush1.bf16.msra.mxu0 %v783_v6  ;;  %543 = vmatprep.subr.bf16.mxu1 %v810_v18  ;;  %v800_v31 = vld [vmem:[%s1228_s0 + $0x8] sm:$0xff]   ;;  %v825_v33 = vld [vmem:[%s1229_s3 + $0x74] ss:$8 sps:$4 sm:$0xff]   ;;  %v827_v34 = vld [vmem:[%s1229_s3 + $0x70] ss:$8 sps:$4 sm:$0xff]   ;;  %v1047_v56 = vsub.s32 0, %v50_v55 }
   0xc   :  { %175 = vmatprep.subr.bf16.mxu0 %v784_v7  ;;  %v824_v32 = vld [vmem:[%s1229_s3 + $0x60] ss:$8 sps:$4 sm:$0xff]   ;;  %v828_v35 = vld [vmem:[%s1229_s3 + $0x84] ss:$8 sps:$4 sm:$0xff]   ;;  %v801_v36 = vld [vmem:[%s1228_s0 + $0x10] sm:$0xff]   ;;  %v1052_v58 = vsub.s32 1, %v50_v55 }
   0xd   :  { %v830_v37 = vld [vmem:[%s1229_s3 + $0x80] ss:$8 sps:$4 sm:$0xff]   ;;  %v831_v38 = vld [vmem:[%s1229_s3 + $0x94] ss:$8 sps:$4 sm:$0xff]   ;;  %v833_v39 = vld [vmem:[%s1229_s3 + $0x90] ss:$8 sps:$4 sm:$0xff]  }
   0xe   :  { %544 = vmatpush1.bf16.msra.mxu1 %v812_v20  ;;  %v834_v40 = vld [vmem:[%s1229_s3 + $0xa4] ss:$8 sps:$4 sm:$0xff]   ;;  %v802_v41 = vld [vmem:[%s1228_s0 + $0x18] sm:$0xff]   ;;  %v836_v42 = vld [vmem:[%s1229_s3 + $0xa0] ss:$8 sps:$4 sm:$0xff]  }
   0xf   :  { %176 = vmatpush1.bf16.msra.mxu0 %v786_v8  ;;  %545 = vmatprep.subr.bf16.mxu1 %v813_v22  ;;  %v837_v43 = vld [vmem:[%s1229_s3 + $0xb4] ss:$8 sps:$4 sm:$0xff]   ;;  %v839_v44 = vld [vmem:[%s1229_s3 + $0xb0] ss:$8 sps:$4 sm:$0xff]   ;;  %v840_v45 = vld [vmem:[%s1229_s3 + $0xc4] ss:$8 sps:$4 sm:$0xff]  }
  0x10   :  { %177 = vmatprep.subr.bf16.mxu0 %v787_v9  ;;  %v803_v46 = vld [vmem:[%s1228_s0 + $0x20] sm:$0xff]   ;;  %v843_v48 = vld [vmem:[%s1229_s3 + $0xd4] ss:$8 sps:$4 sm:$0xff]   ;;  %v845_v49 = vld [vmem:[%s1229_s3 + $0xd0] ss:$8 sps:$4 sm:$0xff]  }
  0x11   :  { %v842_v47 = vld [vmem:[%s1229_s3 + $0xc0] ss:$8 sps:$4 sm:$0xff]   ;;  %v846_v50 = vld [vmem:[%s1229_s3 + $0xe4] ss:$8 sps:$4 sm:$0xff]   ;;  %v849_v52 = vld [vmem:[%s1229_s3 + $0xf4] ss:$8 sps:$4 sm:$0xff]  }
  0x12   :  { %546 = vmatpush1.bf16.msra.mxu1 %v815_v24  ;;  %v848_v51 = vld [vmem:[%s1229_s3 + $0xe0] ss:$8 sps:$4 sm:$0xff]   ;;  %v851_v53 = vld [vmem:[%s1229_s3 + $0xf0] ss:$8 sps:$4 sm:$0xff]  }
  0x13   :  { %178 = vmatpush1.bf16.msra.mxu0 %v789_v10  ;;  %547 = vmatprep.subr.bf16.mxu1 %v816_v25  ;;  %v47_v57 = vld [vmem:[%s1230_s2] ss:$8 sm:$0x3]  ;;  %v740_v59 = vld [vmem:[%s1230_s2 + $0x1] ss:$8 sm:$0x3] }
  0x14   :  { %179 = vmatprep.subr.bf16.mxu0 %v790_v11  ;;  %v1058_v60 = vrot.slane %v47_v57, %v1047_v56  ;;  %v1061_v61 = vrot.slane %v47_v57, %v1052_v58  ;;  %v1064_v62 = vrot.slane %v740_v59, %v1047_v56  ;;  %v1067_v0 = vrot.slane %v740_v59, %v1052_v58 }
  0x16   :  { %548 = vmatpush1.bf16.msra.mxu1 %v818_v27 }
  0x17   :  { %180 = vmatpush1.bf16.msra.mxu0 %v792_v15  ;;  %549 = vmatprep.subr.bf16.mxu1 %v819_v28 }
  0x18   :  { %181 = vmatprep.subr.bf16.mxu0 %v793_v17 }
  0x1a   :  { %550 = vmatpush1.bf16.msra.mxu1 %v821_v29 }
  0x1b   :  { %182 = vmatpush1.bf16.msra.mxu0 %v795_v19  ;;  %551 = vmatprep.subr.bf16.mxu1 %v822_v30 }
  0x1c   :  { %183 = vmatprep.subr.bf16.mxu0 %v796_v21 }
  0x1e   :  { %552 = vmatpush1.bf16.msra.mxu1 %v824_v32 }
  0x1f   :  { %184 = vmatpush1.bf16.msra.mxu0 %v798_v23  ;;  %553 = vmatprep.subr.bf16.mxu1 %v825_v33 }
  0x22   :  { %202 = vmatmul.mubr.bf16.vlgmr.msra.gmra.mrb[0].mxu0 %v799_v26  ;;  %554 = vmatpush1.bf16.msra.mxu1 %v827_v34 }
  0x23   :  { %211 = vmatprep.mubr.bf16.mxu0 %v852_v1  ;;  %555 = vmatprep.subr.bf16.mxu1 %v828_v35 }
  0x26   :  { %556 = vmatpush1.bf16.msra.mxu1 %v830_v37 }
  0x27   :  { %557 = vmatprep.subr.bf16.mxu1 %v831_v38 }
  0x2a   :  { %212 = vmatmul.mubr.bf16.gmra.mrb[4].mxu0 %v800_v31  ;;  %558 = vmatpush1.bf16.msra.mxu1 %v833_v39 }
  0x2b   :  { %221 = vmatprep.mubr.bf16.mxu0 %v852_v1  ;;  %559 = vmatprep.subr.bf16.mxu1 %v834_v40 }
  0x2e   :  { %560 = vmatpush1.bf16.msra.mxu1 %v836_v42 }
  0x2f   :  { %561 = vmatprep.subr.bf16.mxu1 %v837_v43 }
  0x32   :  { %222 = vmatmul.mubr.bf16.gmra.mrb[8].mxu0 %v801_v36  ;;  %562 = vmatpush1.bf16.msra.mxu1 %v839_v44 }
  0x33   :  { %231 = vmatprep.mubr.bf16.mxu0 %v852_v1  ;;  %563 = vmatprep.subr.bf16.mxu1 %v840_v45 }
  0x36   :  { %564 = vmatpush1.bf16.msra.mxu1 %v842_v47 }
  0x37   :  { %565 = vmatprep.subr.bf16.mxu1 %v843_v48 }
  0x3a   :  { %232 = vmatmul.mubr.bf16.gmra.mrb[12].mxu0 %v802_v41  ;;  %566 = vmatpush1.bf16.msra.mxu1 %v845_v49 }
  0x3b   :  { %241 = vmatprep.mubr.bf16.mxu0 %v852_v1  ;;  %567 = vmatprep.subr.bf16.mxu1 %v846_v50 }
  0x3e   :  { %568 = vmatpush1.bf16.msra.mxu1 %v848_v51 }
  0x3f   :  { %569 = vmatprep.subr.bf16.mxu1 %v849_v52 }
  0x42   :  { %242 = vmatmul.mubr.bf16.gmra.mrb[16].mxu0 %v803_v46  ;;  %570 = vmatpush1.bf16.msra.mxu1 %v851_v53 }
  0xf5   :  { %v203_v63 = vpop.f32.mrb[0].mxu0 }
  0xf6   :  { %v204_v1 = vadd.f32 %v203_v63, %v1058_v60  ;;  %v205_v2 = vpop.f32.mrb[1].mxu0 }
  0xf7   :  { %v206_v3 = vadd.f32 %v205_v2, %v1061_v61  ;;  %v207_v4 = vpop.f32.mrb[2].mxu0 }
  0xf8   :  { %v285_v5 = vmul.f32 %v1064_v62, %v204_v1  ;;  %v208_v6 = vadd.f32 %v207_v4, %v1058_v60  ;;  %v209_v7 = vpop.f32.mrb[3].mxu0  ;;  %vm252_vm0 = vcmp.ge.f32.partialorder %v204_v1, 0.0 }
  0xf9   :  { %v286_v8 = vmul.f32 %v1067_v0, %v206_v3  ;;  %v210_v9 = vadd.f32 %v209_v7, %v1061_v61  ;;  %vm253_vm2 = vcmp.ge.f32.partialorder %v206_v3, 0.0 }
  0xfa   :  { %vm254_vm1 = vcmp.ge.f32.partialorder %v208_v6, 0.0  ;;  %v287_v10 = vmul.f32 %v1064_v62, %v208_v6  ;;  %v305_v12 = vsel %vm252_vm0, %v204_v1, %v285_v5 }
  0xfb   :  { %v288_v11 = vmul.f32 %v1067_v0, %v210_v9  ;;  %vm255_vm3 = vcmp.ge.f32.partialorder %v210_v9, 0.0  ;;  %v306_v15 = vsel %vm253_vm2, %v206_v3, %v286_v8 }
  0xfc   :  { %v307_v13 = vsel %vm254_vm1, %v208_v6, %v287_v10 }
  0xfd   :  { %v213_v14 = vpop.f32.mrb[4].mxu0  ;;  %v308_v16 = vsel %vm255_vm3, %v210_v9, %v288_v11  ;;  %v325_v17 = vpack.c.bf16 %v307_v13, %v305_v12 }
  0xfe   :  { %v214_v18 = vadd.f32 %v213_v14, %v1058_v60  ;;  %v215_v19 = vpop.f32.mrb[5].mxu0  ;;  %v326_v20 = vpack.c.bf16 %v308_v16, %v306_v15 }
  0xff   :  { %v216_v21 = vadd.f32 %v215_v19, %v1061_v61  ;;  %v217_v22 = vpop.f32.mrb[6].mxu0 }
 0x100   :  { %v289_v23 = vmul.f32 %v1064_v62, %v214_v18  ;;  %v218_v24 = vadd.f32 %v217_v22, %v1058_v60  ;;  %v219_v25 = vpop.f32.mrb[7].mxu0  ;;  %571 = vmatprep.mubr.bf16.mxu1 %v326_v20  ;;  %vm256_vm4 = vcmp.ge.f32.partialorder %v214_v18, 0.0 }
 0x101   :  { %v290_v26 = vmul.f32 %v1067_v0, %v216_v21  ;;  %v220_v27 = vadd.f32 %v219_v25, %v1061_v61  ;;  %572 = vmatmul.mubr.bf16.vlgmr.msra.gmra.mrb[0].mxu1 %v325_v17  ;;  %vm257_vm5 = vcmp.ge.f32.partialorder %v216_v21, 0.0 }
 0x102   :  { %vm258_vm6 = vcmp.ge.f32.partialorder %v218_v24, 0.0  ;;  %v291_v28 = vmul.f32 %v1064_v62, %v218_v24  ;;  %v309_v30 = vsel %vm256_vm4, %v214_v18, %v289_v23 }
 0x103   :  { %vm259_vm7 = vcmp.ge.f32.partialorder %v220_v27, 0.0  ;;  %v292_v29 = vmul.f32 %v1067_v0, %v220_v27  ;;  %v310_v33 = vsel %vm257_vm5, %v216_v21, %v290_v26 }
 0x104   :  { %v311_v31 = vsel %vm258_vm6, %v218_v24, %v291_v28 }
 0x105   :  { %v223_v32 = vpop.f32.mrb[8].mxu0  ;;  %v312_v34 = vsel %vm259_vm7, %v220_v27, %v292_v29  ;;  %v327_v35 = vpack.c.bf16 %v311_v31, %v309_v30  ;;  %v773_v31 = vld [vmem:[%s1231_s4 + $0x1] ss:$8 sm:$0x3] }
 0x106   :  { %v224_v36 = vadd.f32 %v223_v32, %v1058_v60  ;;  %v225_v37 = vpop.f32.mrb[9].mxu0  ;;  %v328_v38 = vpack.c.bf16 %v312_v34, %v310_v33  ;;  %v1122_v32 = vrot.slane %v773_v31, %v1047_v56  ;;  %v1125_v34 = vrot.slane %v773_v31, %v1052_v58 }
 0x107   :  { %v226_v39 = vadd.f32 %v225_v37, %v1061_v61  ;;  %v227_v40 = vpop.f32.mrb[10].mxu0 }
 0x108   :  { %v293_v41 = vmul.f32 %v1064_v62, %v224_v36  ;;  %v228_v42 = vadd.f32 %v227_v40, %v1058_v60  ;;  %v229_v43 = vpop.f32.mrb[11].mxu0  ;;  %581 = vmatprep.mubr.bf16.mxu1 %v328_v38  ;;  %vm260_vm8 = vcmp.ge.f32.partialorder %v224_v36, 0.0 }
 0x109   :  { %v294_v44 = vmul.f32 %v1067_v0, %v226_v39  ;;  %v230_v45 = vadd.f32 %v229_v43, %v1061_v61  ;;  %582 = vmatmul.mubr.bf16.gmra.mrb[4].mxu1 %v327_v35  ;;  %vm261_vm9 = vcmp.ge.f32.partialorder %v226_v39, 0.0 }
 0x10a   :  { %vm262_vm10 = vcmp.ge.f32.partialorder %v228_v42, 0.0  ;;  %v295_v46 = vmul.f32 %v1064_v62, %v228_v42  ;;  %v313_v48 = vsel %vm260_vm8, %v224_v36, %v293_v41 }
 0x10b   :  { %vm263_vm11 = vcmp.ge.f32.partialorder %v230_v45, 0.0  ;;  %v296_v47 = vmul.f32 %v1067_v0, %v230_v45  ;;  %v314_v51 = vsel %vm261_vm9, %v226_v39, %v294_v44 }
 0x10c   :  { %v315_v49 = vsel %vm262_vm10, %v228_v42, %v295_v46 }
 0x10d   :  { %v233_v50 = vpop.f32.mrb[12].mxu0  ;;  %v316_v52 = vsel %vm263_vm11, %v230_v45, %v296_v47  ;;  %v329_v53 = vpack.c.bf16 %v315_v49, %v313_v48 }
 0x10e   :  { %v234_v54 = vadd.f32 %v233_v50, %v1058_v60  ;;  %v235_v55 = vpop.f32.mrb[13].mxu0  ;;  %v330_v57 = vpack.c.bf16 %v316_v52, %v314_v51 }
 0x10f   :  { %v236_v59 = vadd.f32 %v235_v55, %v1061_v61  ;;  %v237_v63 = vpop.f32.mrb[14].mxu0 }
 0x110   :  { %v297_v1 = vmul.f32 %v1064_v62, %v234_v54  ;;  %v238_v2 = vadd.f32 %v237_v63, %v1058_v60  ;;  %v239_v3 = vpop.f32.mrb[15].mxu0  ;;  %591 = vmatprep.mubr.bf16.mxu1 %v330_v57  ;;  %vm264_vm12 = vcmp.ge.f32.partialorder %v234_v54, 0.0 }
 0x111   :  { %v298_v4 = vmul.f32 %v1067_v0, %v236_v59  ;;  %v240_v5 = vadd.f32 %v239_v3, %v1061_v61  ;;  %592 = vmatmul.mubr.bf16.gmra.mrb[8].mxu1 %v329_v53  ;;  %vm265_vm13 = vcmp.ge.f32.partialorder %v236_v59, 0.0 }
 0x112   :  { %vm266_vm14 = vcmp.ge.f32.partialorder %v238_v2, 0.0  ;;  %v299_v6 = vmul.f32 %v1064_v62, %v238_v2  ;;  %v317_v8 = vsel %vm264_vm12, %v234_v54, %v297_v1 }
 0x113   :  { %vm267_vm15 = vcmp.ge.f32.partialorder %v240_v5, 0.0  ;;  %v300_v7 = vmul.f32 %v1067_v0, %v240_v5  ;;  %v318_v11 = vsel %vm265_vm13, %v236_v59, %v298_v4 }
 0x114   :  { %v319_v9 = vsel %vm266_vm14, %v238_v2, %v299_v6 }
 0x115   :  { %v243_v10 = vpop.f32.mrb[16].mxu0  ;;  %v320_v12 = vsel %vm267_vm15, %v240_v5, %v300_v7  ;;  %v331_v13 = vpack.c.bf16 %v319_v9, %v317_v8 }
 0x116   :  { %v244_v14 = vadd.f32 %v243_v10, %v1058_v60  ;;  %v245_v15 = vpop.f32.mrb[17].mxu0  ;;  %v332_v16 = vpack.c.bf16 %v320_v12, %v318_v11 }
 0x117   :  { %v246_v17 = vadd.f32 %v245_v15, %v1061_v61  ;;  %v247_v18 = vpop.f32.mrb[18].mxu0 }
 0x118   :  { %v301_v19 = vmul.f32 %v1064_v62, %v244_v14  ;;  %v248_v20 = vadd.f32 %v247_v18, %v1058_v60  ;;  %v249_v21 = vpop.f32.mrb[19].mxu0  ;;  %601 = vmatprep.mubr.bf16.mxu1 %v332_v16  ;;  %vm268_vm0 = vcmp.ge.f32.partialorder %v244_v14, 0.0 }
 0x119   :  { %v302_v22 = vmul.f32 %v1067_v0, %v246_v17  ;;  %v250_v23 = vadd.f32 %v249_v21, %v1061_v61  ;;  %602 = vmatmul.mubr.bf16.gmra.mrb[12].mxu1 %v331_v13  ;;  %vm269_vm1 = vcmp.ge.f32.partialorder %v246_v17, 0.0  ;;  %v367_v61 = vld [vmem:[%s1231_s4] ss:$8 sm:$0x3] }
 0x11a   :  { %vm270_vm2 = vcmp.ge.f32.partialorder %v248_v20, 0.0  ;;  %v303_v24 = vmul.f32 %v1064_v62, %v248_v20  ;;  %v321_v26 = vsel %vm268_vm0, %v244_v14, %v301_v19  ;;  %v1116_v62 = vrot.slane %v367_v61, %v1047_v56 }
 0x11b   :  { %vm271_vm3 = vcmp.ge.f32.partialorder %v250_v23, 0.0  ;;  %v304_v25 = vmul.f32 %v1067_v0, %v250_v23  ;;  %v322_v28 = vsel %vm269_vm1, %v246_v17, %v302_v22  ;;  %v1119_v0 = vrot.slane %v367_v61, %v1052_v58 }
 0x11c   :  { %v323_v27 = vsel %vm270_vm2, %v248_v20, %v303_v24 }
 0x11d   :  { %v324_v29 = vsel %vm271_vm3, %v250_v23, %v304_v25  ;;  %v333_v60 = vpack.c.bf16 %v323_v27, %v321_v26 }
 0x11e   :  { %v334_v30 = vpack.c.bf16 %v324_v29, %v322_v28 }
 0x120   :  { %611 = vmatprep.mubr.bf16.mxu1 %v334_v30 }
 0x121   :  { %612 = vmatmul.mubr.bf16.gmra.mrb[16].mxu1 %v333_v60 }
 0x1d4   :  { %v573_v33 = vpop.f32.mrb[0].mxu1 }
 0x1d5   :  { %v574_v35 = vadd.f32 %v573_v33, %v1116_v62  ;;  %v575_v36 = vpop.f32.mrb[1].mxu1 }
 0x1d6   :  { %v576_v37 = vadd.f32 %v575_v36, %v1119_v0  ;;  %v577_v38 = vpop.f32.mrb[2].mxu1 }
 0x1d7   :  { %vm622_vm4 = vcmp.ge.f32.partialorder %v574_v35, 0.0  ;;  %v655_v39 = vmul.f32 %v1122_v32, %v574_v35  ;;  %v578_v40 = vadd.f32 %v577_v38, %v1116_v62  ;;  %v579_v41 = vpop.f32.mrb[3].mxu1 }
 0x1d8   :  { %vm623_vm5 = vcmp.ge.f32.partialorder %v576_v37, 0.0  ;;  %v656_v56 = vmul.f32 %v1125_v34, %v576_v37  ;;  %v580_v42 = vadd.f32 %v579_v41, %v1119_v0 }
 0x1d9   :  { %v675_v43 = vsel %vm622_vm4, %v574_v35, %v655_v39  ;;  %vm624_vm6 = vcmp.ge.f32.partialorder %v578_v40, 0.0  ;;  %v657_v58 = vmul.f32 %v1122_v32, %v578_v40 }
 0x1da   :  { %695 = vst [vmem:[%s1232_s5] sm:$0xff] %v675_v43  ;;  %v676_v44 = vsel %vm623_vm5, %v576_v37, %v656_v56  ;;  %vm625_vm7 = vcmp.ge.f32.partialorder %v580_v42, 0.0  ;;  %v658_v45 = vmul.f32 %v1125_v34, %v580_v42 }
 0x1db   :  { %696 = vst [vmem:[%s1232_s5 + $0x8] sm:$0xff] %v676_v44  ;;  %v677_v46 = vsel %vm624_vm6, %v578_v40, %v657_v58 }
 0x1dc   :  { %697 = vst [vmem:[%s1232_s5 + $0x10] sm:$0xff] %v677_v46  ;;  %v678_v47 = vsel %vm625_vm7, %v580_v42, %v658_v45  ;;  %v583_v48 = vpop.f32.mrb[4].mxu1 }
 0x1dd   :  { %698 = vst [vmem:[%s1232_s5 + $0x18] sm:$0xff] %v678_v47  ;;  %v584_v49 = vadd.f32 %v583_v48, %v1116_v62  ;;  %v585_v50 = vpop.f32.mrb[5].mxu1 }
 0x1de   :  { %v586_v51 = vadd.f32 %v585_v50, %v1119_v0  ;;  %v587_v52 = vpop.f32.mrb[6].mxu1 }
 0x1df   :  { %vm626_vm8 = vcmp.ge.f32.partialorder %v584_v49, 0.0  ;;  %v659_v53 = vmul.f32 %v1122_v32, %v584_v49  ;;  %v588_v54 = vadd.f32 %v587_v52, %v1116_v62  ;;  %v589_v55 = vpop.f32.mrb[7].mxu1 }
 0x1e0   :  { %vm627_vm9 = vcmp.ge.f32.partialorder %v586_v51, 0.0  ;;  %v660_v57 = vmul.f32 %v1125_v34, %v586_v51  ;;  %v590_v59 = vadd.f32 %v589_v55, %v1119_v0 }
 0x1e1   :  { %v679_v63 = vsel %vm626_vm8, %v584_v49, %v659_v53  ;;  %vm628_vm10 = vcmp.ge.f32.partialorder %v588_v54, 0.0  ;;  %v661_v1 = vmul.f32 %v1122_v32, %v588_v54 }
 0x1e2   :  { %699 = vst [vmem:[%s1232_s5 + $0x20] sm:$0xff] %v679_v63  ;;  %v680_v2 = vsel %vm627_vm9, %v586_v51, %v660_v57  ;;  %vm629_vm11 = vcmp.ge.f32.partialorder %v590_v59, 0.0  ;;  %v662_v3 = vmul.f32 %v1125_v34, %v590_v59 }
 0x1e3   :  { %700 = vst [vmem:[%s1232_s5 + $0x28] sm:$0xff] %v680_v2  ;;  %v681_v4 = vsel %vm628_vm10, %v588_v54, %v661_v1 }
 0x1e4   :  { %701 = vst [vmem:[%s1232_s5 + $0x30] sm:$0xff] %v681_v4  ;;  %v682_v5 = vsel %vm629_vm11, %v590_v59, %v662_v3  ;;  %v593_v6 = vpop.f32.mrb[8].mxu1 }
 0x1e5   :  { %702 = vst [vmem:[%s1232_s5 + $0x38] sm:$0xff] %v682_v5  ;;  %v594_v7 = vadd.f32 %v593_v6, %v1116_v62  ;;  %v595_v8 = vpop.f32.mrb[9].mxu1 }
 0x1e6   :  { %v596_v9 = vadd.f32 %v595_v8, %v1119_v0  ;;  %v597_v10 = vpop.f32.mrb[10].mxu1 }
 0x1e7   :  { %vm630_vm12 = vcmp.ge.f32.partialorder %v594_v7, 0.0  ;;  %v663_v11 = vmul.f32 %v1122_v32, %v594_v7  ;;  %v598_v12 = vadd.f32 %v597_v10, %v1116_v62  ;;  %v599_v13 = vpop.f32.mrb[11].mxu1 }
 0x1e8   :  { %vm631_vm13 = vcmp.ge.f32.partialorder %v596_v9, 0.0  ;;  %v664_v14 = vmul.f32 %v1125_v34, %v596_v9  ;;  %v600_v15 = vadd.f32 %v599_v13, %v1119_v0 }
 0x1e9   :  { %v683_v16 = vsel %vm630_vm12, %v594_v7, %v663_v11  ;;  %vm632_vm14 = vcmp.ge.f32.partialorder %v598_v12, 0.0  ;;  %v665_v17 = vmul.f32 %v1122_v32, %v598_v12 }
 0x1ea   :  { %703 = vst [vmem:[%s1232_s5 + $0x40] sm:$0xff] %v683_v16  ;;  %v684_v18 = vsel %vm631_vm13, %v596_v9, %v664_v14  ;;  %vm633_vm15 = vcmp.ge.f32.partialorder %v600_v15, 0.0  ;;  %v666_v19 = vmul.f32 %v1125_v34, %v600_v15 }
 0x1eb   :  { %704 = vst [vmem:[%s1232_s5 + $0x48] sm:$0xff] %v684_v18  ;;  %v685_v20 = vsel %vm632_vm14, %v598_v12, %v665_v17 }
 0x1ec   :  { %705 = vst [vmem:[%s1232_s5 + $0x50] sm:$0xff] %v685_v20  ;;  %v686_v21 = vsel %vm633_vm15, %v600_v15, %v666_v19  ;;  %v603_v22 = vpop.f32.mrb[12].mxu1 }
 0x1ed   :  { %706 = vst [vmem:[%s1232_s5 + $0x58] sm:$0xff] %v686_v21  ;;  %v604_v23 = vadd.f32 %v603_v22, %v1116_v62  ;;  %v605_v24 = vpop.f32.mrb[13].mxu1 }
 0x1ee   :  { %v606_v25 = vadd.f32 %v605_v24, %v1119_v0  ;;  %v607_v26 = vpop.f32.mrb[14].mxu1 }
 0x1ef   :  { %vm634_vm0 = vcmp.ge.f32.partialorder %v604_v23, 0.0  ;;  %v667_v27 = vmul.f32 %v1122_v32, %v604_v23  ;;  %v608_v28 = vadd.f32 %v607_v26, %v1116_v62  ;;  %v609_v29 = vpop.f32.mrb[15].mxu1 }
 0x1f0   :  { %vm635_vm1 = vcmp.ge.f32.partialorder %v606_v25, 0.0  ;;  %v668_v60 = vmul.f32 %v1125_v34, %v606_v25  ;;  %v610_v30 = vadd.f32 %v609_v29, %v1119_v0 }
 0x1f1   :  { %v687_v61 = vsel %vm634_vm0, %v604_v23, %v667_v27  ;;  %vm636_vm2 = vcmp.ge.f32.partialorder %v608_v28, 0.0  ;;  %v669_v31 = vmul.f32 %v1122_v32, %v608_v28 }
 0x1f2   :  { %707 = vst [vmem:[%s1232_s5 + $0x60] sm:$0xff] %v687_v61  ;;  %v688_v33 = vsel %vm635_vm1, %v606_v25, %v668_v60  ;;  %vm637_vm3 = vcmp.ge.f32.partialorder %v610_v30, 0.0  ;;  %v670_v35 = vmul.f32 %v1125_v34, %v610_v30 }
 0x1f3   :  { %708 = vst [vmem:[%s1232_s5 + $0x68] sm:$0xff] %v688_v33  ;;  %v689_v36 = vsel %vm636_vm2, %v608_v28, %v669_v31 }
 0x1f4   :  { %709 = vst [vmem:[%s1232_s5 + $0x70] sm:$0xff] %v689_v36  ;;  %v690_v37 = vsel %vm637_vm3, %v610_v30, %v670_v35  ;;  %v613_v38 = vpop.f32.mrb[16].mxu1 }
 0x1f5   :  { %710 = vst [vmem:[%s1232_s5 + $0x78] sm:$0xff] %v690_v37  ;;  %v614_v39 = vadd.f32 %v613_v38, %v1116_v62  ;;  %v615_v40 = vpop.f32.mrb[17].mxu1 }
 0x1f6   :  { %v616_v41 = vadd.f32 %v615_v40, %v1119_v0  ;;  %v617_v56 = vpop.f32.mrb[18].mxu1 }
 0x1f7   :  { %vm638_vm4 = vcmp.ge.f32.partialorder %v614_v39, 0.0  ;;  %v671_v42 = vmul.f32 %v1122_v32, %v614_v39  ;;  %v618_v43 = vadd.f32 %v617_v56, %v1116_v62  ;;  %v619_v58 = vpop.f32.mrb[19].mxu1 }
 0x1f8   :  { %vm639_vm5 = vcmp.ge.f32.partialorder %v616_v41, 0.0  ;;  %v672_v44 = vmul.f32 %v1125_v34, %v616_v41  ;;  %v620_v45 = vadd.f32 %v619_v58, %v1119_v0 }
 0x1f9   :  { %v691_v46 = vsel %vm638_vm4, %v614_v39, %v671_v42  ;;  %vm640_vm6 = vcmp.ge.f32.partialorder %v618_v43, 0.0  ;;  %v673_v47 = vmul.f32 %v1122_v32, %v618_v43 }
 0x1fa   :  { %711 = vst [vmem:[%s1232_s5 + $0x80] sm:$0xff] %v691_v46  ;;  %v692_v48 = vsel %vm639_vm5, %v616_v41, %v672_v44  ;;  %vm641_vm7 = vcmp.ge.f32.partialorder %v620_v45, 0.0  ;;  %v674_v49 = vmul.f32 %v1125_v34, %v620_v45 }
 0x1fb   :  { %712 = vst [vmem:[%s1232_s5 + $0x88] sm:$0xff] %v692_v48  ;;  %v693_v62 = vsel %vm640_vm6, %v618_v43, %v673_v47 }
 0x1fc   :  { %713 = vst [vmem:[%s1232_s5 + $0x90] sm:$0xff] %v693_v62  ;;  %v694_v0 = vsel %vm641_vm7, %v620_v45, %v674_v49 }
 0x1fd   :  { %714 = vst [vmem:[%s1232_s5 + $0x98] sm:$0xff] %v694_v0 }

// kernel: forward.20
= control target key start
LH: loop header
LB: loop body
LE: loop exit
PB: predicated region body
PF: predicated region fallthrough
CT: control target
= control target key end

     0   :  { %s5623_s18 = smov 0   ;;  %s6670_s0 = inlined_call_operand.vmem [shape: bf16[512,1600], index: 0, kind: input, shape index: {}]   ;;  %s6671_s1 = inlined_call_operand.vmem [shape: bf16[1600,128], index: 1, kind: input, shape index: {}]   ;;  %s6672_s2 = inlined_call_operand.vmem [shape: f32[8,128], index: 2, kind: input, shape index: {}]   ;;  %s6673_s3 = inlined_call_operand.vmem [shape: bf16[128,128], index: 3, kind: input, shape index: {}]   ;;  %s6674_s4 = inlined_call_operand.vmem [shape: f32[8,128], index: 4, kind: input, shape index: {}]   ;;  %s6675_s5 = inlined_call_operand.vmem [shape: f32[512,128], index: 5, kind: output, shape index: {}]  }
   0x1 LB: > { %s4013_s19 = sadd.s32 4294967295, %s5591_s18   ;;  %p4017_p0 = scmp.ge.s32.totalorder %s5591_s18, 1  ;;  %s5591_s18 = sphi %s5623_s18, %s15_s18  }
   0x2   : > { %p189_p1 = scmp.lt.s32.totalorder %s5591_s18, 3 }
   0x4   : > { %p190_p2 = pnand %p4017_p0, %p189_p1 }
   0x5   : > { %v5173_v0 = vld [vmem:[%s6671_s1 + $0x40] sm:$0xff] (!%p190_p2)   ;;  %v5177_v4 = vld [vmem:[%s6671_s1 + $0x48] sm:$0xff] (!%p190_p2)   ;;  %v5181_v8 = vld [vmem:[%s6671_s1 + $0x50] sm:$0xff] (!%p190_p2)   ;;  %s4018_s25 = sshll.u32 (!%p190_p2), %s4013_s19, 5  ;;  %vm2301_vm0 = vcmask (!%p190_p2), 523264  }
   0x6   : > { %193 = sbr.rel (%p190_p2) target bundleno = 922 (0x39a), region = 40  ;;  %v5174_v1 = vld [vmem:[%s6671_s1] sm:$0xff] (!%p190_p2)   ;;  %4360 = vmatprep.subr.bf16.mxu0 (!%p190_p2), %v5173_v0  ;;  %v5178_v5 = vld [vmem:[%s6671_s1 + $0x8] sm:$0xff] (!%p190_p2)   ;;  %v5182_v9 = vld [vmem:[%s6671_s1 + $0x10] sm:$0xff] (!%p190_p2)   ;;  %p219_p3 = scmp.lt.s32.totalorder (!%p190_p2), %s4018_s25, 63 }
   0x7   : > { %v5175_v2 = vld [vmem:[%s6671_s1 + $0xc0] sm:$0xff] (!%p190_p2)   ;;  %4361 = vmatpush3.bf16.msra.mxu0 (!%p190_p2), %v5174_v1  ;;  %v5179_v6 = vld [vmem:[%s6671_s1 + $0xc8] sm:$0xff] (!%p190_p2)   ;;  %v5183_v10 = vld [vmem:[%s6671_s1 + $0xd0] sm:$0xff] (!%p190_p2)  }
   0x8   : > { %v5176_v3 = vld [vmem:[%s6671_s1 + $0x80] sm:$0xff] (!%p190_p2)   ;;  %4472 = vmatprep.subr.bf16.mxu1 (!%p190_p2), %v5175_v2  ;;  %4362 = vmatprep.subr.bf16.mxu0 (!%p190_p2), %v5177_v4  ;;  %v5180_v7 = vld [vmem:[%s6671_s1 + $0x88] sm:$0xff] (!%p190_p2)   ;;  %v5184_v11 = vld [vmem:[%s6671_s1 + $0x90] sm:$0xff] (!%p190_p2)  }
   0x9   : > { %4473 = vmatpush3.bf16.msra.mxu1 (!%p190_p2), %v5176_v3  ;;  %v5185_v12 = vld [vmem:[%s6671_s1 + $0x58] sm:$0xff] (!%p190_p2)   ;;  %v5189_v16 = vld [vmem:[%s6671_s1 + $0x60] sm:$0xff] (!%p190_p2)   ;;  %v5193_v20 = vld [vmem:[%s6671_s1 + $0x68] sm:$0xff] (!%p190_p2)  }
   0xa   : > { %4474 = vmatprep.subr.bf16.mxu1 (!%p190_p2), %v5179_v6  ;;  %v5186_v13 = vld [vmem:[%s6671_s1 + $0x18] sm:$0xff] (!%p190_p2)   ;;  %v5190_v17 = vld [vmem:[%s6671_s1 + $0x20] sm:$0xff] (!%p190_p2)   ;;  %v5194_v21 = vld [vmem:[%s6671_s1 + $0x28] sm:$0xff] (!%p190_p2)  }
   0xb   : > { %4363 = vmatpush3.bf16.msra.mxu0 (!%p190_p2), %v5178_v5  ;;  %v5187_v14 = vld [vmem:[%s6671_s1 + $0xd8] sm:$0xff] (!%p190_p2)   ;;  %v5191_v18 = vld [vmem:[%s6671_s1 + $0xe0] sm:$0xff] (!%p190_p2)   ;;  %v5195_v22 = vld [vmem:[%s6671_s1 + $0xe8] sm:$0xff] (!%p190_p2)  }
   0xc   : > { %4364 = vmatprep.subr.bf16.mxu0 (!%p190_p2), %v5181_v8  ;;  %v5188_v15 = vld [vmem:[%s6671_s1 + $0x98] sm:$0xff] (!%p190_p2)   ;;  %v5192_v19 = vld [vmem:[%s6671_s1 + $0xa0] sm:$0xff] (!%p190_p2)   ;;  %v5196_v23 = vld [vmem:[%s6671_s1 + $0xa8] sm:$0xff] (!%p190_p2)  }
   0xd   : > { %4475 = vmatpush3.bf16.msra.mxu1 %v5180_v7  ;;  %s6677_s25 = smov (!%p219_p3, %s4018_s25), 63  ;;  %v5197_v24 = vld [vmem:[%s6671_s1 + $0x70] sm:$0xff]   ;;  %v5201_v28 = vld [vmem:[%s6671_s1 + $0x78] sm:$0xff]   ;;  %v5208_v34 = vld [vmem:[%s6671_s1 + $0x140] sm:$0xff]  }
   0xe   : > { %4476 = vmatprep.subr.bf16.mxu1 %v5183_v10  ;;  %s5164_s24 = smul.u32 52, %s6677_s25  ;;  %v5198_v25 = vld [vmem:[%s6671_s1 + $0x30] sm:$0xff]   ;;  %v5202_v29 = vld [vmem:[%s6671_s1 + $0x38] sm:$0xff]   ;;  %v5212_v37 = vld [vmem:[%s6671_s1 + $0x100] sm:$0xff]   ;;  %s4021_s22 = sshll.u32 %s6677_s25, 3 }
   0xf   : > { %4365 = vmatpush3.bf16.msra.mxu0 %v5182_v9  ;;  %v5199_v26 = vld [vmem:[%s6671_s1 + $0xf0] sm:$0xff]   ;;  %v5203_v30 = vld [vmem:[%s6671_s1 + $0xf8] sm:$0xff]   ;;  %v5222_v42 = vld [vmem:[%s6671_s1 + $0x148] sm:$0xff]   ;;  %s6571_s28 = scalar_lea.vmem %s6675_s5, %s4021_s22 }
  0x10   : > { %4366 = vmatprep.subr.bf16.mxu0 %v5185_v12  ;;  %v5200_v27 = vld [vmem:[%s6671_s1 + $0xb0] sm:$0xff]   ;;  %s5726_s10 = scalar_lea.vmem %s6670_s0, %s5164_s24  ;;  %v5207_v33 = vld [vmem:[%s6671_s1 + $0xb8] sm:$0xff]   ;;  %v5225_v45 = vld [vmem:[%s6671_s1 + $0x108] sm:$0xff]  }
  0x11   : > { %4477 = vmatpush3.bf16.msra.mxu1 %v5184_v11  ;;  %v5204_v31 = vld [vmem:[%s5726_s10] ss:$52 sps:$4 sm:$0xff]   ;;  %v5206_v32 = vld [vmem:[%s5726_s10 + $0x4] ss:$52 sps:$4 sm:$0xff]   ;;  %v5209_v35 = vld [vmem:[%s5726_s10 + $0x8] ss:$52 sps:$4 sm:$0xff]  }
  0x12   : > { %4478 = vmatprep.subr.bf16.mxu1 %v5187_v14  ;;  %2382 = vmatprep.mubr.bf16.mxu0 %v5206_v32  ;;  %v5211_v36 = vld [vmem:[%s5726_s10 + $0xc] ss:$52 sps:$4 sm:$0xff]   ;;  %v5216_v39 = vld [vmem:[%s5726_s10 + $0x74] ss:$52 sps:$4 sm:$0xff]   ;;  %v5218_v43 = vld [vmem:[%s5726_s10 + $0x70] ss:$52 sps:$4 sm:$0xff]  }
  0x13   : > { %4367 = vmatpush3.bf16.msra.mxu0 %v5186_v13  ;;  %2543 = vmatprep.mubr.bf16.mxu1 %v5211_v36  ;;  %v5213_v38 = vld [vmem:[%s5726_s10 + $0x6c] ss:$52 sps:$4 sm:$0xff]   ;;  %v5215_v40 = vld [vmem:[%s5726_s10 + $0x68] ss:$52 sps:$4 sm:$0xff]   ;;  %v5221_v46 = vld [vmem:[%s5726_s10 + $0xd0] ss:$52 sps:$4 sm:$0xff]  }
  0x14   : > { %4368 = vmatprep.subr.bf16.mxu0 %v5189_v16  ;;  %v5219_v41 = vld [vmem:[%s5726_s10 + $0xd4] ss:$52 sps:$4 sm:$0xff]   ;;  %v5223_v44 = vld [vmem:[%s5726_s10 + $0xdc] ss:$52 sps:$4 sm:$0xff]   ;;  %v5226_v49 = vld [vmem:[%s5726_s10 + $0xd8] ss:$52 sps:$4 sm:$0xff]  }
  0x15   : > { %4479 = vmatpush3.bf16.msra.mxu1 %v5188_v15  ;;  %v5227_v47 = vld [vmem:[%s5726_s10 + $0x13c] ss:$52 sps:$4 sm:$0xff]   ;;  %v5230_v51 = vld [vmem:[%s5726_s10 + $0x144] ss:$52 sps:$4 sm:$0xff]   ;;  %v5232_v55 = vld [vmem:[%s5726_s10 + $0x140] ss:$52 sps:$4 sm:$0xff]  }
  0x16   : > { %4480 = vmatprep.subr.bf16.mxu1 %v5191_v18  ;;  %v5236_v48 = vld [vmem:[%s6671_s1 + $0x150] sm:$0xff]   ;;  %v5229_v52 = vld [vmem:[%s5726_s10 + $0x138] ss:$52 sps:$4 sm:$0xff]   ;;  %v5261_v59 = vld [vmem:[%s6671_s1 + $0x1c0] sm:$0xff]  }
  0x17   : > { %4369 = vmatpush3.bf16.msra.mxu0 %v5190_v17  ;;  %v5239_v50 = vld [vmem:[%s6671_s1 + $0x110] sm:$0xff]   ;;  %v5233_v53 = vld [vmem:[%s5726_s10 + $0x1a4] ss:$52 sps:$4 sm:$0xff]   ;;  %v5237_v57 = vld [vmem:[%s5726_s10 + $0x1ac] ss:$52 sps:$4 sm:$0xff]  }
  0x18   : > { %4370 = vmatprep.subr.bf16.mxu0 %v5193_v20  ;;  %v5250_v54 = vld [vmem:[%s6671_s1 + $0x158] sm:$0xff]   ;;  %v5235_v58 = vld [vmem:[%s5726_s10 + $0x1a0] ss:$52 sps:$4 sm:$0xff]   ;;  %v5277_v4 = vld [vmem:[%s6671_s1 + $0x1c8] sm:$0xff]  }
  0x19   : > { %4481 = vmatpush3.bf16.msra.mxu1 %v5192_v19  ;;  %v5253_v56 = vld [vmem:[%s6671_s1 + $0x118] sm:$0xff]   ;;  %v5262_v60 = vld [vmem:[%s6671_s1 + $0x180] sm:$0xff]   ;;  %v5244_v0 = vld [vmem:[%s5726_s10 + $0x214] ss:$52 sps:$4 sm:$0xff]  }
  0x1a   : > { %4482 = vmatprep.subr.bf16.mxu1 %v5195_v22  ;;  %v5241_v61 = vld [vmem:[%s5726_s10 + $0x20c] ss:$52 sps:$4 sm:$0xff]   ;;  %v5240_v63 = vld [vmem:[%s5726_s10 + $0x1a8] ss:$52 sps:$4 sm:$0xff]   ;;  %v5246_v6 = vld [vmem:[%s5726_s10 + $0x210] ss:$52 sps:$4 sm:$0xff]  }
  0x1b   : > { %4371 = vmatpush3.bf16.msra.mxu0 %v5194_v21  ;;  %v5266_v62 = vld [vmem:[%s6671_s1 + $0x160] sm:$0xff]   ;;  %v5243_v2 = vld [vmem:[%s5726_s10 + $0x208] ss:$52 sps:$4 sm:$0xff]   ;;  %v5293_v12 = vld [vmem:[%s6671_s1 + $0x1d0] sm:$0xff]  }
  0x1c   : > { %4372 = vmatprep.subr.bf16.mxu0 %v5197_v24  ;;  %v5269_v1 = vld [vmem:[%s6671_s1 + $0x120] sm:$0xff]   ;;  %v5247_v3 = vld [vmem:[%s5726_s10 + $0x274] ss:$52 sps:$4 sm:$0xff]   ;;  %v5251_v8 = vld [vmem:[%s5726_s10 + $0x27c] ss:$52 sps:$4 sm:$0xff]  }
  0x1d   : > { %4483 = vmatpush3.bf16.msra.mxu1 %v5196_v23  ;;  %v5278_v5 = vld [vmem:[%s6671_s1 + $0x188] sm:$0xff]   ;;  %v5249_v10 = vld [vmem:[%s5726_s10 + $0x270] ss:$52 sps:$4 sm:$0xff]   ;;  %v5260_v19 = vld [vmem:[%s5726_s10 + $0x2e0] ss:$52 sps:$4 sm:$0xff]  }
  0x1e   : > { %4484 = vmatprep.subr.bf16.mxu1 %v5199_v26  ;;  %v5282_v7 = vld [vmem:[%s6671_s1 + $0x168] sm:$0xff]   ;;  %v5255_v11 = vld [vmem:[%s5726_s10 + $0x2dc] ss:$52 sps:$4 sm:$0xff]   ;;  %v5258_v15 = vld [vmem:[%s5726_s10 + $0x2e4] ss:$52 sps:$4 sm:$0xff]  }
  0x1f   : > { %4373 = vmatpush3.bf16.msra.mxu0 %v5198_v25  ;;  %v5285_v9 = vld [vmem:[%s6671_s1 + $0x128] sm:$0xff]   ;;  %v5294_v13 = vld [vmem:[%s6671_s1 + $0x190] sm:$0xff]   ;;  %v5263_v20 = vld [vmem:[%s5726_s10 + $0x344] ss:$52 sps:$4 sm:$0xff]  }
  0x20   : > { %4374 = vmatprep.subr.bf16.mxu0 %v5201_v28  ;;  %v5254_v14 = vld [vmem:[%s5726_s10 + $0x278] ss:$52 sps:$4 sm:$0xff]   ;;  %v5298_v16 = vld [vmem:[%s6671_s1 + $0x170] sm:$0xff]   ;;  %v5270_v28 = vld [vmem:[%s5726_s10 + $0x348] ss:$52 sps:$4 sm:$0xff]  }
  0x21   : > { %4485 = vmatpush3.bf16.msra.mxu1 %v5200_v27  ;;  %v5301_v17 = vld [vmem:[%s6671_s1 + $0x130] sm:$0xff]   ;;  %v5257_v18 = vld [vmem:[%s5726_s10 + $0x2d8] ss:$52 sps:$4 sm:$0xff]  }
  0x22   : > { %4486 = vmatprep.subr.bf16.mxu1 %v5203_v30  ;;  %v5267_v21 = vld [vmem:[%s5726_s10 + $0x34c] ss:$52 sps:$4 sm:$0xff]   ;;  %v5309_v22 = vld [vmem:[%s6671_s1 + $0x1d8] sm:$0xff]   ;;  %v5274_v32 = vld [vmem:[%s5726_s10 + $0x3b4] ss:$52 sps:$4 sm:$0xff]  }
  0x23   : > { %4375 = vmatpush3.bf16.msra.mxu0 %v5202_v29  ;;  %v5310_v23 = vld [vmem:[%s6671_s1 + $0x198] sm:$0xff]   ;;  %v5265_v25 = vld [vmem:[%s5726_s10 + $0x340] ss:$52 sps:$4 sm:$0xff]  }
  0x24   : > { %4584 = vmatprep.subr.bf16.mxu0 %v5208_v34  ;;  %v5314_v24 = vld [vmem:[%s6671_s1 + $0x178] sm:$0xff]   ;;  %v5271_v26 = vld [vmem:[%s5726_s10 + $0x3ac] ss:$52 sps:$4 sm:$0xff]   ;;  %v5329_v36 = vld [vmem:[%s6671_s1 + $0x1f0] sm:$0xff]  }
  0x25   : > { %4487 = vmatpush3.bf16.msra.mxu1 %v5207_v33  ;;  %v5317_v27 = vld [vmem:[%s6671_s1 + $0x138] sm:$0xff]   ;;  %v5319_v29 = vld [vmem:[%s6671_s1 + $0x1e0] sm:$0xff]   ;;  %v5324_v33 = vld [vmem:[%s6671_s1 + $0x1a8] sm:$0xff]  }
  0x26   : > { %2383 = vmatmul.mubr.bf16.vlgmr.msra.gmra.mrb[0].mxu0 %v5204_v31  ;;  %4696 = vmatprep.subr.bf16.mxu1 %v5261_v59  ;;  %v5320_v30 = vld [vmem:[%s6671_s1 + $0x1a0] sm:$0xff]   ;;  %v5321_v31 = vld [vmem:[%s6671_s1 + $0x1e8] sm:$0xff]   ;;  %v5315_v59 = vld [vmem:[%s5726_s10 + $0x5bc] ss:$52 sps:$4 sm:$0xff]  }
  0x27   : > { %4585 = vmatpush3.bf16.msra.mxu0 %v5212_v37  ;;  %2390 = vmatprep.mubr.bf16.mxu0 %v5213_v38  ;;  %v5273_v34 = vld [vmem:[%s5726_s10 + $0x3a8] ss:$52 sps:$4 sm:$0xff]   ;;  %v5330_v37 = vld [vmem:[%s6671_s1 + $0x1b0] sm:$0xff]  }
  0x28   : > { %2544 = vmatmul.mubr.bf16.vlgmr.msra.gmra.mrb[0].mxu1 %v5209_v35  ;;  %4586 = vmatprep.subr.bf16.mxu0 %v5222_v42  ;;  %v5279_v35 = vld [vmem:[%s5726_s10 + $0x414] ss:$52 sps:$4 sm:$0xff]   ;;  %v5331_v38 = vld [vmem:[%s6671_s1 + $0x1f8] sm:$0xff]   ;;  %v5336_v42 = vld [vmem:[%s6671_s1 + $0x240] sm:$0xff]  }
  0x29   : > { %2551 = vmatprep.mubr.bf16.mxu1 %v5216_v39  ;;  %4697 = vmatpush3.bf16.msra.mxu1 %v5262_v60  ;;  %v5276_v39 = vld [vmem:[%s5726_s10 + $0x3b0] ss:$52 sps:$4 sm:$0xff]  }
  0x2a   : > { %4698 = vmatprep.subr.bf16.mxu1 %v5277_v4  ;;  %v5313_v60 = vld [vmem:[%s5726_s10 + $0x5b0] ss:$52 sps:$4 sm:$0xff]  }
  0x2b   : > { %4587 = vmatpush3.bf16.msra.mxu0 %v5225_v45  ;;  %v5286_v45 = vld [vmem:[%s5726_s10 + $0x418] ss:$52 sps:$4 sm:$0xff]   ;;  %v5332_v4 = vld [vmem:[%s5726_s10 + $0x10] ss:$52 sps:$4 sm:$0xff]  }
  0x2c   : > { %4588 = vmatprep.subr.bf16.mxu0 %v5236_v48  ;;  %v5295_v48 = vld [vmem:[%s5726_s10 + $0x4e4] ss:$52 sps:$4 sm:$0xff]  }
  0x2d   : > { %4699 = vmatpush3.bf16.msra.mxu1 %v5278_v5  ;;  %v5340_v5 = vld [vmem:[%s6671_s1 + $0x200] sm:$0xff]  }
  0x2e   : > { %2391 = vmatmul.mubr.bf16.gmra.mrb[4].mxu0 %v5215_v40  ;;  %4700 = vmatprep.subr.bf16.mxu1 %v5293_v12  ;;  %v5283_v40 = vld [vmem:[%s5726_s10 + $0x41c] ss:$52 sps:$4 sm:$0xff]   ;;  %v5405_v12 = vld [vmem:[%s6671_s1 + $0x2c8] sm:$0xff]  }
  0x2f   : > { %2398 = vmatprep.mubr.bf16.mxu0 %v5219_v41  ;;  %4589 = vmatpush3.bf16.msra.mxu0 %v5239_v50  ;;  %v5335_v41 = vld [vmem:[%s6671_s1 + $0x1b8] sm:$0xff]   ;;  %v5299_v50 = vld [vmem:[%s5726_s10 + $0x4ec] ss:$52 sps:$4 sm:$0xff]  }
  0x30   : > { %2552 = vmatmul.mubr.bf16.gmra.mrb[4].mxu1 %v5218_v43  ;;  %4590 = vmatprep.subr.bf16.mxu0 %v5250_v54  ;;  %v5281_v43 = vld [vmem:[%s5726_s10 + $0x410] ss:$52 sps:$4 sm:$0xff]   ;;  %v5306_v54 = vld [vmem:[%s5726_s10 + $0x554] ss:$52 sps:$4 sm:$0xff]  }
  0x31   : > { %2559 = vmatprep.mubr.bf16.mxu1 %v5223_v44  ;;  %4701 = vmatpush3.bf16.msra.mxu1 %v5294_v13  ;;  %v5287_v44 = vld [vmem:[%s5726_s10 + $0x47c] ss:$52 sps:$4 sm:$0xff]   ;;  %v5343_v13 = vld [vmem:[%s5726_s10 + $0x78] ss:$52 sps:$4 sm:$0xff]  }
  0x32   : > { %4702 = vmatprep.subr.bf16.mxu1 %v5309_v22  ;;  %v5381_v22 = vld [vmem:[%s6671_s1 + $0x218] sm:$0xff]  }
  0x33   : > { %4591 = vmatpush3.bf16.msra.mxu0 %v5253_v56  ;;  %v5311_v56 = vld [vmem:[%s5726_s10 + $0x5b4] ss:$52 sps:$4 sm:$0xff]  }
  0x34   : > { %4592 = vmatprep.subr.bf16.mxu0 %v5266_v62  ;;  %v5318_v62 = vld [vmem:[%s5726_s10 + $0x5b8] ss:$52 sps:$4 sm:$0xff]  }
  0x35   : > { %4703 = vmatpush3.bf16.msra.mxu1 %v5310_v23  ;;  %v5422_v23 = vld [vmem:[%s6671_s1 + $0x290] sm:$0xff]  }
  0x36   : > { %2399 = vmatmul.mubr.bf16.gmra.mrb[8].mxu0 %v5221_v46  ;;  %4704 = vmatprep.subr.bf16.mxu1 %v5319_v29  ;;  %v5290_v46 = vld [vmem:[%s5726_s10 + $0x484] ss:$52 sps:$4 sm:$0xff]   ;;  %v5354_v29 = vld [vmem:[%s5726_s10 + $0xe8] ss:$52 sps:$4 sm:$0xff]  }
  0x37   : > { %2406 = vmatprep.mubr.bf16.mxu0 %v5227_v47  ;;  %4593 = vmatpush3.bf16.msra.mxu0 %v5269_v1  ;;  %v5289_v47 = vld [vmem:[%s5726_s10 + $0x478] ss:$52 sps:$4 sm:$0xff]   ;;  %v5334_v1 = vld [vmem:[%s5726_s10 + $0x14] ss:$52 sps:$4 sm:$0xff]  }
  0x38   : > { %2560 = vmatmul.mubr.bf16.gmra.mrb[8].mxu1 %v5226_v49  ;;  %4594 = vmatprep.subr.bf16.mxu0 %v5282_v7  ;;  %v5292_v49 = vld [vmem:[%s5726_s10 + $0x480] ss:$52 sps:$4 sm:$0xff]   ;;  %v5337_v7 = vld [vmem:[%s5726_s10 + $0x18] ss:$52 sps:$4 sm:$0xff]  }
  0x39   : > { %2567 = vmatprep.mubr.bf16.mxu1 %v5230_v51  ;;  %4705 = vmatpush3.bf16.msra.mxu1 %v5320_v30  ;;  %v5297_v51 = vld [vmem:[%s5726_s10 + $0x4e0] ss:$52 sps:$4 sm:$0xff]  }
  0x3a   : > { %4706 = vmatprep.subr.bf16.mxu1 %v5321_v31  ;;  %v5397_v30 = vld [vmem:[%s6671_s1 + $0x220] sm:$0xff]   ;;  %v5358_v31 = vld [vmem:[%s5726_s10 + $0x154] ss:$52 sps:$4 sm:$0xff]  }
  0x3b   : > { %4595 = vmatpush3.bf16.msra.mxu0 %v5285_v9  ;;  %v5344_v9 = vld [vmem:[%s5726_s10 + $0x84] ss:$52 sps:$4 sm:$0xff]  }
  0x3c   : > { %4596 = vmatprep.subr.bf16.mxu0 %v5298_v16  ;;  %v5367_v16 = vld [vmem:[%s6671_s1 + $0x210] sm:$0xff]  }
  0x3d   : > { %4707 = vmatpush3.bf16.msra.mxu1 %v5324_v33  ;;  %v5447_v33 = vld [vmem:[%s6671_s1 + $0x2e0] sm:$0xff]  }
  0x3e   : > { %2407 = vmatmul.mubr.bf16.gmra.mrb[12].mxu0 %v5229_v52  ;;  %4708 = vmatprep.subr.bf16.mxu1 %v5329_v36  ;;  %v5303_v52 = vld [vmem:[%s5726_s10 + $0x54c] ss:$52 sps:$4 sm:$0xff]  }
  0x3f   : > { %2414 = vmatprep.mubr.bf16.mxu0 %v5233_v53  ;;  %4597 = vmatpush3.bf16.msra.mxu0 %v5301_v17  ;;  %v5302_v53 = vld [vmem:[%s5726_s10 + $0x4e8] ss:$52 sps:$4 sm:$0xff]  }
  0x40   : > { %2568 = vmatmul.mubr.bf16.gmra.mrb[12].mxu1 %v5232_v55  ;;  %4598 = vmatprep.subr.bf16.mxu0 %v5314_v24  ;;  %v5305_v55 = vld [vmem:[%s5726_s10 + $0x548] ss:$52 sps:$4 sm:$0xff]  }
  0x41   : > { %2575 = vmatprep.mubr.bf16.mxu1 %v5237_v57  ;;  %4709 = vmatpush3.bf16.msra.mxu1 %v5330_v37  ;;  %v5389_v57 = vld [vmem:[%s6671_s1 + $0x2c0] sm:$0xff]   ;;  %v5406_v17 = vld [vmem:[%s6671_s1 + $0x288] sm:$0xff]   ;;  %v5437_v24 = vld [vmem:[%s6671_s1 + $0x2d8] sm:$0xff]  }
  0x42   : > { %4710 = vmatprep.subr.bf16.mxu1 %v5331_v38  ;;  %v5449_v36 = vld [vmem:[%s6671_s1 + $0x2e8] sm:$0xff]   ;;  %v5426_v38 = vld [vmem:[%s6671_s1 + $0x270] sm:$0xff]  }
  0x43   : > { %4599 = vmatpush3.bf16.msra.mxu0 %v5317_v27  ;;  %v5355_v27 = vld [vmem:[%s5726_s10 + $0x14c] ss:$52 sps:$4 sm:$0xff]   ;;  %v5357_v37 = vld [vmem:[%s5726_s10 + $0x148] ss:$52 sps:$4 sm:$0xff]  }
  0x44   : > { %4808 = vmatprep.subr.bf16.mxu0 %v5336_v42  ;;  %v5442_v42 = vld [vmem:[%s6671_s1 + $0x278] sm:$0xff]  }
  0x45   : > { %4711 = vmatpush3.bf16.msra.mxu1 %v5335_v41  ;;  %v5452_v41 = vld [vmem:[%s6671_s1 + $0x2a8] sm:$0xff]  }
  0x46   : > { %2415 = vmatmul.mubr.bf16.gmra.mrb[16].mxu0 %v5235_v58  ;;  %v5308_v58 = vld [vmem:[%s5726_s10 + $0x550] ss:$52 sps:$4 sm:$0xff]   ;;  %4920 = vmatprep.subr.bf16.mxu1 %v5389_v57  ;;  %v5374_v57 = vld [vmem:[%s5726_s10 + $0x220] ss:$52 sps:$4 sm:$0xff]  }
  0x47   : > { %2422 = vmatprep.mubr.bf16.mxu0 %v5241_v61  ;;  %v5322_v61 = vld [vmem:[%s5726_s10 + $0x61c] ss:$52 sps:$4 sm:$0xff]  }
  0x48   : > { %2576 = vmatmul.mubr.bf16.gmra.mrb[16].mxu1 %v5240_v63  ;;  %v5326_v63 = vld [vmem:[%s5726_s10 + $0x624] ss:$52 sps:$4 sm:$0xff]  }
  0x49   : > { %2583 = vmatprep.mubr.bf16.mxu1 %v5244_v0  ;;  %v5325_v0 = vld [vmem:[%s5726_s10 + $0x618] ss:$52 sps:$4 sm:$0xff]  }
  0x4e   : > { %2423 = vmatmul.mubr.bf16.gmra.mrb[20].mxu0 %v5243_v2  ;;  %v5328_v2 = vld [vmem:[%s5726_s10 + $0x620] ss:$52 sps:$4 sm:$0xff]  }
  0x4f   : > { %2430 = vmatprep.mubr.bf16.mxu0 %v5247_v3  ;;  %v5339_v3 = vld [vmem:[%s5726_s10 + $0x1c] ss:$52 sps:$4 sm:$0xff]  }
  0x50   : > { %2584 = vmatmul.mubr.bf16.gmra.mrb[20].mxu1 %v5246_v6  ;;  %v5341_v6 = vld [vmem:[%s5726_s10 + $0x7c] ss:$52 sps:$4 sm:$0xff]  }
  0x51   : > { %2591 = vmatprep.mubr.bf16.mxu1 %v5251_v8  ;;  %v5350_v8 = vld [vmem:[%s6671_s1 + $0x248] sm:$0xff]  }
  0x56   : > { %2431 = vmatmul.mubr.bf16.gmra.mrb[24].mxu0 %v5249_v10  ;;  %v5353_v10 = vld [vmem:[%s6671_s1 + $0x208] sm:$0xff]  }
  0x57   : > { %2438 = vmatprep.mubr.bf16.mxu0 %v5255_v11  ;;  %v5390_v11 = vld [vmem:[%s6671_s1 + $0x280] sm:$0xff]  }
  0x58   : > { %2592 = vmatmul.mubr.bf16.gmra.mrb[24].mxu1 %v5254_v14  ;;  %v5364_v14 = vld [vmem:[%s6671_s1 + $0x250] sm:$0xff]  }
  0x59   : > { %2599 = vmatprep.mubr.bf16.mxu1 %v5258_v15  ;;  %v5347_v15 = vld [vmem:[%s5726_s10 + $0xe4] ss:$52 sps:$4 sm:$0xff]  }
  0x5e   : > { %2439 = vmatmul.mubr.bf16.gmra.mrb[28].mxu0 %v5257_v18  ;;  %v5346_v18 = vld [vmem:[%s5726_s10 + $0x80] ss:$52 sps:$4 sm:$0xff]  }
  0x5f   : > { %2446 = vmatprep.mubr.bf16.mxu0 %v5263_v20  ;;  %v5421_v20 = vld [vmem:[%s6671_s1 + $0x2d0] sm:$0xff]  }
  0x60   : > { %2600 = vmatmul.mubr.bf16.gmra.mrb[28].mxu1 %v5260_v19  ;;  %v5378_v19 = vld [vmem:[%s6671_s1 + $0x258] sm:$0xff]  }
  0x61   : > { %2607 = vmatprep.mubr.bf16.mxu1 %v5267_v21  ;;  %v5351_v21 = vld [vmem:[%s5726_s10 + $0xec] ss:$52 sps:$4 sm:$0xff]  }
  0x66   : > { %2447 = vmatmul.mubr.bf16.gmra.mrb[32].mxu0 %v5265_v25  ;;  %v5349_v25 = vld [vmem:[%s5726_s10 + $0xe0] ss:$52 sps:$4 sm:$0xff]  }
  0x67   : > { %2454 = vmatprep.mubr.bf16.mxu0 %v5271_v26  ;;  %v5394_v26 = vld [vmem:[%s6671_s1 + $0x260] sm:$0xff]  }
  0x68   : > { %2608 = vmatmul.mubr.bf16.gmra.mrb[32].mxu1 %v5270_v28  ;;  %v5438_v28 = vld [vmem:[%s6671_s1 + $0x298] sm:$0xff]  }
  0x69   : > { %2615 = vmatprep.mubr.bf16.mxu1 %v5274_v32  ;;  %v5410_v32 = vld [vmem:[%s6671_s1 + $0x268] sm:$0xff]  }
  0x6e   : > { %2455 = vmatmul.mubr.bf16.gmra.mrb[36].mxu0 %v5273_v34  ;;  %v5413_v34 = vld [vmem:[%s6671_s1 + $0x228] sm:$0xff]  }
  0x6f   : > { %2462 = vmatprep.mubr.bf16.mxu0 %v5279_v35  ;;  %v5448_v35 = vld [vmem:[%s6671_s1 + $0x2a0] sm:$0xff]  }
  0x70   : > { %2616 = vmatmul.mubr.bf16.gmra.mrb[36].mxu1 %v5276_v39  ;;  %v5361_v39 = vld [vmem:[%s5726_s10 + $0x1b4] ss:$52 sps:$4 sm:$0xff]  }
  0x71   : > { %2623 = vmatprep.mubr.bf16.mxu1 %v5283_v40  ;;  %v5429_v40 = vld [vmem:[%s6671_s1 + $0x230] sm:$0xff]  }
  0x76   : > { %2463 = vmatmul.mubr.bf16.gmra.mrb[40].mxu0 %v5281_v43  ;;  %v5457_v43 = vld [vmem:[%s6671_s1 + $0x2f0] sm:$0xff]  }
  0x77   : > { %2470 = vmatprep.mubr.bf16.mxu0 %v5287_v44  ;;  %v5360_v44 = vld [vmem:[%s5726_s10 + $0x150] ss:$52 sps:$4 sm:$0xff]  }
  0x78   : > { %2624 = vmatmul.mubr.bf16.gmra.mrb[40].mxu1 %v5286_v45  ;;  %v5365_v45 = vld [vmem:[%s5726_s10 + $0x1bc] ss:$52 sps:$4 sm:$0xff]  }
  0x79   : > { %2631 = vmatprep.mubr.bf16.mxu1 %v5290_v46  ;;  %v5445_v46 = vld [vmem:[%s6671_s1 + $0x238] sm:$0xff]  }
  0x7e   : > { %2471 = vmatmul.mubr.bf16.gmra.mrb[44].mxu0 %v5289_v47  ;;  %v5458_v47 = vld [vmem:[%s6671_s1 + $0x2b0] sm:$0xff]  }
  0x7f   : > { %2478 = vmatprep.mubr.bf16.mxu0 %v5295_v48  ;;  %v5459_v48 = vld [vmem:[%s6671_s1 + $0x2f8] sm:$0xff]  }
  0x80   : > { %2632 = vmatmul.mubr.bf16.gmra.mrb[44].mxu1 %v5292_v49  ;;  %v6011_v49 = vld [vmem:[%s6671_s1 + $0x300] sm:$0xff]  }
  0x81   : > { %2639 = vmatprep.mubr.bf16.mxu1 %v5299_v50  ;;  %v5363_v50 = vld [vmem:[%s5726_s10 + $0x1b0] ss:$52 sps:$4 sm:$0xff]  }
  0x86   : > { %2479 = vmatmul.mubr.bf16.gmra.mrb[48].mxu0 %v5297_v51  ;;  %v5463_v51 = vld [vmem:[%s6671_s1 + $0x2b8] sm:$0xff]  }
  0x87   : > { %2486 = vmatprep.mubr.bf16.mxu0 %v5303_v52  ;;  %v5369_v52 = vld [vmem:[%s5726_s10 + $0x21c] ss:$52 sps:$4 sm:$0xff]  }
  0x88   : > { %2640 = vmatmul.mubr.bf16.gmra.mrb[48].mxu1 %v5302_v53  ;;  %v5368_v53 = vld [vmem:[%s5726_s10 + $0x1b8] ss:$52 sps:$4 sm:$0xff]  }
  0x89   : > { %2647 = vmatprep.mubr.bf16.mxu1 %v5306_v54  ;;  %v5372_v54 = vld [vmem:[%s5726_s10 + $0x224] ss:$52 sps:$4 sm:$0xff]  }
  0x8e   : > { %2487 = vmatmul.mubr.bf16.gmra.mrb[52].mxu0 %v5305_v55  ;;  %v5371_v55 = vld [vmem:[%s5726_s10 + $0x218] ss:$52 sps:$4 sm:$0xff]  }
  0x8f   : > { %2494 = vmatprep.mubr.bf16.mxu0 %v5311_v56  ;;  %v5375_v56 = vld [vmem:[%s5726_s10 + $0x284] ss:$52 sps:$4 sm:$0xff]  }
  0x90   : > { %2648 = vmatmul.mubr.bf16.gmra.mrb[52].mxu1 %v5308_v58  ;;  %v5379_v58 = vld [vmem:[%s5726_s10 + $0x28c] ss:$52 sps:$4 sm:$0xff]  }
  0x91   : > { %2655 = vmatprep.mubr.bf16.mxu1 %v5315_v59  ;;  %v5377_v59 = vld [vmem:[%s5726_s10 + $0x280] ss:$52 sps:$4 sm:$0xff]  }
  0x96   : > { %2495 = vmatmul.mubr.bf16.gmra.mrb[56].mxu0 %v5313_v60  ;;  %v5383_v60 = vld [vmem:[%s5726_s10 + $0x2ec] ss:$52 sps:$4 sm:$0xff]  }
  0x97   : > { %2502 = vmatprep.mubr.bf16.mxu0 %v5322_v61  ;;  %v5382_v61 = vld [vmem:[%s5726_s10 + $0x288] ss:$52 sps:$4 sm:$0xff]  }
  0x98   : > { %2656 = vmatmul.mubr.bf16.gmra.mrb[56].mxu1 %v5318_v62  ;;  %v5386_v62 = vld [vmem:[%s5726_s10 + $0x2f4] ss:$52 sps:$4 sm:$0xff]  }
  0x99   : > { %2663 = vmatprep.mubr.bf16.mxu1 %v5326_v63  ;;  %v5385_v63 = vld [vmem:[%s5726_s10 + $0x2e8] ss:$52 sps:$4 sm:$0xff]  }
  0x9e   : > { %2503 = vmatmul.mubr.bf16.gmra.mrb[60].mxu0 %v5325_v0  ;;  %v5391_v0 = vld [vmem:[%s5726_s10 + $0x354] ss:$52 sps:$4 sm:$0xff]  }
  0x9f   : > { %2704 = vmatprep.mubr.bf16.mxu0 %v5334_v1  ;;  %v5388_v1 = vld [vmem:[%s5726_s10 + $0x2f0] ss:$52 sps:$4 sm:$0xff]  }
  0xa0   : > { %2664 = vmatmul.mubr.bf16.gmra.mrb[60].mxu1 %v5328_v2  ;;  %v5395_v2 = vld [vmem:[%s5726_s10 + $0x35c] ss:$52 sps:$4 sm:$0xff]  }
  0xa1   : > { %2865 = vmatprep.mubr.bf16.mxu1 %v5339_v3  ;;  %v5393_v3 = vld [vmem:[%s5726_s10 + $0x350] ss:$52 sps:$4 sm:$0xff]  }
  0xa6   : > { %2705 = vmatmul.mubr.bf16.vlgmr.msra.gmra.mrb[64].mxu0 %v5332_v4  ;;  %v5399_v4 = vld [vmem:[%s5726_s10 + $0x3bc] ss:$52 sps:$4 sm:$0xff]  }
  0xa7   : > { %4809 = vmatpush3.bf16.msra.mxu0 %v5340_v5  ;;  %2712 = vmatprep.mubr.bf16.mxu0 %v5341_v6  ;;  %v5398_v5 = vld [vmem:[%s5726_s10 + $0x358] ss:$52 sps:$4 sm:$0xff]  }
  0xa8   : > { %4810 = vmatprep.subr.bf16.mxu0 %v5350_v8  ;;  %2866 = vmatmul.mubr.bf16.vlgmr.msra.gmra.mrb[64].mxu1 %v5337_v7  ;;  %v5402_v6 = vld [vmem:[%s5726_s10 + $0x3c4] ss:$52 sps:$4 sm:$0xff]  }
  0xa9   : > { %2873 = vmatprep.mubr.bf16.mxu1 %v5344_v9  ;;  %4921 = vmatpush3.bf16.msra.mxu1 %v5390_v11  ;;  %v5401_v7 = vld [vmem:[%s5726_s10 + $0x3b8] ss:$52 sps:$4 sm:$0xff]   ;;  %v5404_v9 = vld [vmem:[%s5726_s10 + $0x3c0] ss:$52 sps:$4 sm:$0xff]  }
  0xaa   : > { %4922 = vmatprep.subr.bf16.mxu1 %v5405_v12  ;;  %v5407_v8 = vld [vmem:[%s5726_s10 + $0x424] ss:$52 sps:$4 sm:$0xff]   ;;  %v5409_v11 = vld [vmem:[%s5726_s10 + $0x420] ss:$52 sps:$4 sm:$0xff]  }
  0xab   : > { %4811 = vmatpush3.bf16.msra.mxu0 %v5353_v10  ;;  %v5411_v10 = vld [vmem:[%s5726_s10 + $0x42c] ss:$52 sps:$4 sm:$0xff]  }
  0xac   : > { %4812 = vmatprep.subr.bf16.mxu0 %v5364_v14  ;;  %v5415_v12 = vld [vmem:[%s5726_s10 + $0x48c] ss:$52 sps:$4 sm:$0xff]   ;;  %v5418_v14 = vld [vmem:[%s5726_s10 + $0x494] ss:$52 sps:$4 sm:$0xff]  }
  0xad   : > { %4923 = vmatpush3.bf16.msra.mxu1 %v5406_v17 }
  0xae   : > { %2713 = vmatmul.mubr.bf16.gmra.mrb[68].mxu0 %v5343_v13  ;;  %4924 = vmatprep.subr.bf16.mxu1 %v5421_v20  ;;  %v5414_v13 = vld [vmem:[%s5726_s10 + $0x428] ss:$52 sps:$4 sm:$0xff]  }
  0xaf   : > { %2720 = vmatprep.mubr.bf16.mxu0 %v5347_v15  ;;  %4813 = vmatpush3.bf16.msra.mxu0 %v5367_v16  ;;  %v6048_v16 = vld [vmem:[%s6672_s2] ss:$0 sm:$0xff] }
  0xb0   : > { %4814 = vmatprep.subr.bf16.mxu0 %v5378_v19  ;;  %2874 = vmatmul.mubr.bf16.gmra.mrb[68].mxu1 %v5346_v18  ;;  %v5417_v18 = vld [vmem:[%s5726_s10 + $0x488] ss:$52 sps:$4 sm:$0xff]  }
  0xb1   : > { %2881 = vmatprep.mubr.bf16.mxu1 %v5351_v21  ;;  %4925 = vmatpush3.bf16.msra.mxu1 %v5422_v23  ;;  %v5423_v21 = vld [vmem:[%s5726_s10 + $0x4f4] ss:$52 sps:$4 sm:$0xff]  }
  0xb2   : > { %4926 = vmatprep.subr.bf16.mxu1 %v5437_v24 }
  0xb3   : > { %4815 = vmatpush3.bf16.msra.mxu0 %v5381_v22 }
  0xb4   : > { %4816 = vmatprep.subr.bf16.mxu0 %v5394_v26 }
  0xb5   : > { %4927 = vmatpush3.bf16.msra.mxu1 %v5438_v28 }
  0xb6   : > { %2721 = vmatmul.mubr.bf16.gmra.mrb[72].mxu0 %v5349_v25  ;;  %4928 = vmatprep.subr.bf16.mxu1 %v5447_v33 }
  0xb7   : > { %2728 = vmatprep.mubr.bf16.mxu0 %v5355_v27  ;;  %4817 = vmatpush3.bf16.msra.mxu0 %v5397_v30  ;;  %v5420_v27 = vld [vmem:[%s5726_s10 + $0x490] ss:$52 sps:$4 sm:$0xff]  }
  0xb8   : > { %4818 = vmatprep.subr.bf16.mxu0 %v5410_v32  ;;  %2882 = vmatmul.mubr.bf16.gmra.mrb[72].mxu1 %v5354_v29  ;;  %v5427_v30 = vld [vmem:[%s5726_s10 + $0x4fc] ss:$52 sps:$4 sm:$0xff]  }
  0xb9   : > { %2889 = vmatprep.mubr.bf16.mxu1 %v5358_v31  ;;  %4929 = vmatpush3.bf16.msra.mxu1 %v5448_v35 }
  0xba   : > { %4930 = vmatprep.subr.bf16.mxu1 %v5449_v36 }
  0xbb   : > { %4819 = vmatpush3.bf16.msra.mxu0 %v5413_v34 }
  0xbc   : > { %4820 = vmatprep.subr.bf16.mxu0 %v5426_v38  ;;  %v5425_v38 = vld [vmem:[%s5726_s10 + $0x4f0] ss:$52 sps:$4 sm:$0xff]  }
  0xbd   : > { %4931 = vmatpush3.bf16.msra.mxu1 %v5452_v41  ;;  %v5431_v41 = vld [vmem:[%s5726_s10 + $0x55c] ss:$52 sps:$4 sm:$0xff]  }
  0xbe   : > { %2729 = vmatmul.mubr.bf16.gmra.mrb[76].mxu0 %v5357_v37  ;;  %4932 = vmatprep.subr.bf16.mxu1 %v5457_v43 }
  0xbf   : > { %2736 = vmatprep.mubr.bf16.mxu0 %v5361_v39  ;;  %4821 = vmatpush3.bf16.msra.mxu0 %v5429_v40 }
  0xc0   : > { %4822 = vmatprep.subr.bf16.mxu0 %v5442_v42  ;;  %2890 = vmatmul.mubr.bf16.gmra.mrb[76].mxu1 %v5360_v44 }
  0xc1   : > { %2897 = vmatprep.mubr.bf16.mxu1 %v5365_v45  ;;  %4933 = vmatpush3.bf16.msra.mxu1 %v5458_v47  ;;  %v5430_v47 = vld [vmem:[%s5726_s10 + $0x4f8] ss:$52 sps:$4 sm:$0xff]  }
  0xc2   : > { %4934 = vmatprep.subr.bf16.mxu1 %v5459_v48 }
  0xc3   : > { %4823 = vmatpush3.bf16.msra.mxu0 %v5445_v46 }
  0xc4   : > { %5076 = vmatprep.subr.bf16.mxu0 %v6011_v49 }
  0xc5   : > { %4935 = vmatpush3.bf16.msra.mxu1 %v5463_v51  ;;  %v5434_v51 = vld [vmem:[%s5726_s10 + $0x564] ss:$52 sps:$4 sm:$0xff]  }
  0xc6   : > { %2737 = vmatmul.mubr.bf16.gmra.mrb[80].mxu0 %v5363_v50 }
  0xc7   : > { %2744 = vmatprep.mubr.bf16.mxu0 %v5369_v52 }
  0xc8   : > { %2898 = vmatmul.mubr.bf16.gmra.mrb[80].mxu1 %v5368_v53 }
  0xc9   : > { %2905 = vmatprep.mubr.bf16.mxu1 %v5372_v54 }
  0xce   : > { %2745 = vmatmul.mubr.bf16.gmra.mrb[84].mxu0 %v5371_v55 }
  0xcf   : > { %2752 = vmatprep.mubr.bf16.mxu0 %v5375_v56 }
  0xd0   : > { %2906 = vmatmul.mubr.bf16.gmra.mrb[84].mxu1 %v5374_v57 }
  0xd1   : > { %2913 = vmatprep.mubr.bf16.mxu1 %v5379_v58 }
  0xd6   : > { %2753 = vmatmul.mubr.bf16.gmra.mrb[88].mxu0 %v5377_v59  ;;  %v5433_v59 = vld [vmem:[%s5726_s10 + $0x558] ss:$52 sps:$4 sm:$0xff]  }
  0xd7   : > { %2760 = vmatprep.mubr.bf16.mxu0 %v5383_v60 }
  0xd8   : > { %2914 = vmatmul.mubr.bf16.gmra.mrb[88].mxu1 %v5382_v61 }
  0xd9   : > { %2921 = vmatprep.mubr.bf16.mxu1 %v5386_v62  ;;  %v5439_v62 = vld [vmem:[%s5726_s10 + $0x5c4] ss:$52 sps:$4 sm:$0xff]  }
  0xde   : > { %2761 = vmatmul.mubr.bf16.gmra.mrb[92].mxu0 %v5385_v63 }
  0xdf   : > { %2768 = vmatprep.mubr.bf16.mxu0 %v5391_v0 }
  0xe0   : > { %2922 = vmatmul.mubr.bf16.gmra.mrb[92].mxu1 %v5388_v1 }
  0xe1   : > { %2929 = vmatprep.mubr.bf16.mxu1 %v5395_v2 }
  0xe6   : > { %2769 = vmatmul.mubr.bf16.gmra.mrb[96].mxu0 %v5393_v3 }
  0xe7   : > { %2776 = vmatprep.mubr.bf16.mxu0 %v5399_v4  ;;  %v5436_v4 = vld [vmem:[%s5726_s10 + $0x560] ss:$52 sps:$4 sm:$0xff]  }
  0xe8   : > { %2930 = vmatmul.mubr.bf16.gmra.mrb[96].mxu1 %v5398_v5 }
  0xe9   : > { %2937 = vmatprep.mubr.bf16.mxu1 %v5402_v6 }
  0xee   : > { %2777 = vmatmul.mubr.bf16.gmra.mrb[100].mxu0 %v5401_v7  ;;  %v5443_v7 = vld [vmem:[%s5726_s10 + $0x5cc] ss:$52 sps:$4 sm:$0xff]  }
  0xef   : > { %2784 = vmatprep.mubr.bf16.mxu0 %v5407_v8 }
  0xf0   : > { %2938 = vmatmul.mubr.bf16.gmra.mrb[100].mxu1 %v5404_v9 }
  0xf1   : > { %2945 = vmatprep.mubr.bf16.mxu1 %v5411_v10 }
  0xf6   : > { %2785 = vmatmul.mubr.bf16.gmra.mrb[104].mxu0 %v5409_v11 }
  0xf7   : > { %2792 = vmatprep.mubr.bf16.mxu0 %v5415_v12 }
  0xf8   : > { %2946 = vmatmul.mubr.bf16.gmra.mrb[104].mxu1 %v5414_v13 }
  0xf9   : > { %v4376_v15 = vpop.f32.mrb[0].mxu0  ;;  %2953 = vmatprep.mubr.bf16.mxu1 %v5418_v14 }
  0xfa   : > { %v4377_v17 = vpop.f32.mrb[1].mxu0 }
  0xfb   : > { %v4378_v19 = vadd.f32 %v4377_v17, %v4376_v15  ;;  %v4379_v20 = vpop.f32.mrb[2].mxu0  ;;  %v4488_v22 = vpop.f32.mrb[0].mxu1  ;;  %v5441_v15 = vld [vmem:[%s5726_s10 + $0x5c0] ss:$52 sps:$4 sm:$0xff]  }
  0xfc   : > { %v4380_v23 = vpop.f32.mrb[3].mxu0  ;;  %v4489_v26 = vpop.f32.mrb[1].mxu1 }
  0xfd   : > { %v2385_v24 = vadd.f32 %v4378_v19, %v6048_v16  ;;  %v4381_v25 = vadd.f32 %v4380_v23, %v4379_v20  ;;  %v4490_v28 = vadd.f32 %v4489_v26, %v4488_v22  ;;  %v4491_v29 = vpop.f32.mrb[2].mxu1  ;;  %v5450_v19 = vld [vmem:[%s5726_s10 + $0x62c] ss:$52 sps:$4 sm:$0xff]  }
  0xfe   : > { %2793 = vmatmul.mubr.bf16.gmra.mrb[108].mxu0 %v5417_v18  ;;  %v4492_v32 = vpop.f32.mrb[3].mxu1 }
  0xff   : > { %v2388_v31 = vadd.f32 %v4381_v25, %v6048_v16  ;;  %2800 = vmatprep.mubr.bf16.mxu0 %v5423_v21  ;;  %v6056_v33 = vadd.f32 %v4490_v28, %v2385_v24  ;;  %v4493_v34 = vadd.f32 %v4492_v32, %v4491_v29  ;;  %v5446_v25 = vld [vmem:[%s5726_s10 + $0x5c8] ss:$52 sps:$4 sm:$0xff]  }
 0x100   : > { %2954 = vmatmul.mubr.bf16.gmra.mrb[108].mxu1 %v5420_v27  ;;  %v5454_v28 = vld [vmem:[%s5726_s10 + $0x634] ss:$52 sps:$4 sm:$0xff]  }
 0x101   : > { %v4382_v35 = vpop.f32.mrb[4].mxu0  ;;  %v6058_v36 = vadd.f32 %v4493_v34, %v2388_v31  ;;  %2961 = vmatprep.mubr.bf16.mxu1 %v5427_v30 }
 0x102   : > { %v4383_v37 = vpop.f32.mrb[5].mxu0 }
 0x103   : > { %v4384_v39 = vadd.f32 %v4383_v37, %v4382_v35  ;;  %v4385_v40 = vpop.f32.mrb[6].mxu0  ;;  %v4494_v42 = vpop.f32.mrb[4].mxu1 }
 0x104   : > { %v4386_v43 = vpop.f32.mrb[7].mxu0  ;;  %v4495_v46 = vpop.f32.mrb[5].mxu1 }
 0x105   : > { %v2393_v44 = vadd.f32 %v4384_v39, %v6048_v16  ;;  %v4387_v45 = vadd.f32 %v4386_v43, %v4385_v40  ;;  %v4496_v48 = vadd.f32 %v4495_v46, %v4494_v42  ;;  %v4497_v50 = vpop.f32.mrb[6].mxu1 }
 0x106   : > { %2801 = vmatmul.mubr.bf16.gmra.mrb[112].mxu0 %v5425_v38  ;;  %v4498_v53 = vpop.f32.mrb[7].mxu1  ;;  %v5453_v38 = vld [vmem:[%s5726_s10 + $0x628] ss:$52 sps:$4 sm:$0xff]  }
 0x107   : > { %v2396_v52 = vadd.f32 %v4387_v45, %v6048_v16  ;;  %2808 = vmatprep.mubr.bf16.mxu0 %v5431_v41  ;;  %v6066_v54 = vadd.f32 %v4496_v48, %v2393_v44  ;;  %v4499_v55 = vadd.f32 %v4498_v53, %v4497_v50  ;;  %v5462_v41 = vld [vmem:[%s5726_s10 + $0x24] ss:$52 sps:$4 sm:$0xff]  }
 0x108   : > { %2962 = vmatmul.mubr.bf16.gmra.mrb[112].mxu1 %v5430_v47  ;;  %v5456_v47 = vld [vmem:[%s5726_s10 + $0x630] ss:$52 sps:$4 sm:$0xff]  }
 0x109   : > { %v4388_v56 = vpop.f32.mrb[8].mxu0  ;;  %v6068_v57 = vadd.f32 %v4499_v55, %v2396_v52  ;;  %2969 = vmatprep.mubr.bf16.mxu1 %v5434_v51  ;;  %v5467_v51 = vld [vmem:[%s5726_s10 + $0x2c] ss:$52 sps:$4 sm:$0xff]  }
 0x10a   : > { %v4389_v58 = vpop.f32.mrb[9].mxu0 }
 0x10b   : > { %v4390_v60 = vadd.f32 %v4389_v58, %v4388_v56  ;;  %v4391_v61 = vpop.f32.mrb[10].mxu0  ;;  %v4500_v63 = vpop.f32.mrb[8].mxu1 }
 0x10c   : > { %v4392_v0 = vpop.f32.mrb[11].mxu0  ;;  %v4501_v3 = vpop.f32.mrb[9].mxu1 }
 0x10d   : > { %v2401_v1 = vadd.f32 %v4390_v60, %v6048_v16  ;;  %v4393_v2 = vadd.f32 %v4392_v0, %v4391_v61  ;;  %v4502_v5 = vadd.f32 %v4501_v3, %v4500_v63  ;;  %v4503_v6 = vpop.f32.mrb[10].mxu1  ;;  %v5460_v61 = vld [vmem:[%s5726_s10 + $0x20] ss:$52 sps:$4 sm:$0xff]   ;;  %v5489_v3 = vld [vmem:[%s6671_s1 + $0x308] sm:$0xff]  }
 0x10e   : > { %2809 = vmatmul.mubr.bf16.gmra.mrb[116].mxu0 %v5433_v59  ;;  %v4504_v9 = vpop.f32.mrb[11].mxu1  ;;  %v5468_v0 = vld [vmem:[%s5726_s10 + $0x8c] ss:$52 sps:$4 sm:$0xff]  }
 0x10f   : > { %v2404_v8 = vadd.f32 %v4393_v2, %v6048_v16  ;;  %2816 = vmatprep.mubr.bf16.mxu0 %v5439_v62  ;;  %v6076_v10 = vadd.f32 %v4502_v5, %v2401_v1  ;;  %v4505_v11 = vadd.f32 %v4504_v9, %v4503_v6 }
 0x110   : > { %2970 = vmatmul.mubr.bf16.gmra.mrb[116].mxu1 %v5436_v4 }
 0x111   : > { %v4394_v12 = vpop.f32.mrb[12].mxu0  ;;  %v6078_v13 = vadd.f32 %v4505_v11, %v2404_v8  ;;  %2977 = vmatprep.mubr.bf16.mxu1 %v5443_v7  ;;  %v5465_v7 = vld [vmem:[%s5726_s10 + $0x28] ss:$52 sps:$4 sm:$0xff]  }
 0x112   : > { %v4395_v14 = vpop.f32.mrb[13].mxu0  ;;  %v5471_v11 = vld [vmem:[%s5726_s10 + $0x94] ss:$52 sps:$4 sm:$0xff]  }
 0x113   : > { %v4396_v17 = vadd.f32 %v4395_v14, %v4394_v12  ;;  %v4397_v18 = vpop.f32.mrb[14].mxu0  ;;  %v4506_v20 = vpop.f32.mrb[12].mxu1 }
 0x114   : > { %v4398_v21 = vpop.f32.mrb[15].mxu0  ;;  %v4507_v24 = vpop.f32.mrb[13].mxu1 }
 0x115   : > { %v2409_v22 = vadd.f32 %v4396_v17, %v6048_v16  ;;  %v4399_v23 = vadd.f32 %v4398_v21, %v4397_v18  ;;  %v4508_v26 = vadd.f32 %v4507_v24, %v4506_v20  ;;  %v4509_v27 = vpop.f32.mrb[14].mxu1  ;;  %v5514_v18 = vld [vmem:[%s6671_s1 + $0x310] sm:$0xff]  }
 0x116   : > { %2817 = vmatmul.mubr.bf16.gmra.mrb[120].mxu0 %v5441_v15  ;;  %v4510_v30 = vpop.f32.mrb[15].mxu1  ;;  %v5474_v24 = vld [vmem:[%s5726_s10 + $0xf4] ss:$52 sps:$4 sm:$0xff]  }
 0x117   : > { %v2412_v29 = vadd.f32 %v4399_v23, %v6048_v16  ;;  %2824 = vmatprep.mubr.bf16.mxu0 %v5450_v19  ;;  %v6086_v31 = vadd.f32 %v4508_v26, %v2409_v22  ;;  %v4511_v32 = vadd.f32 %v4510_v30, %v4509_v27  ;;  %v5470_v22 = vld [vmem:[%s5726_s10 + $0x88] ss:$52 sps:$4 sm:$0xff]  }
 0x118   : > { %2978 = vmatmul.mubr.bf16.gmra.mrb[120].mxu1 %v5446_v25  ;;  %v5539_v27 = vld [vmem:[%s6671_s1 + $0x318] sm:$0xff]  }
 0x119   : > { %v4400_v34 = vpop.f32.mrb[16].mxu0  ;;  %v6088_v35 = vadd.f32 %v4511_v32, %v2412_v29  ;;  %2985 = vmatprep.mubr.bf16.mxu1 %v5454_v28  ;;  %v5473_v32 = vld [vmem:[%s5726_s10 + $0x90] ss:$52 sps:$4 sm:$0xff]  }
 0x11a   : > { %v4401_v37 = vpop.f32.mrb[17].mxu0 }
 0x11b   : > { %v4402_v39 = vadd.f32 %v4401_v37, %v4400_v34  ;;  %v4403_v40 = vpop.f32.mrb[18].mxu0  ;;  %v4512_v42 = vpop.f32.mrb[16].mxu1 }
 0x11c   : > { %v4404_v43 = vpop.f32.mrb[19].mxu0  ;;  %v4513_v46 = vpop.f32.mrb[17].mxu1 }
 0x11d   : > { %v2417_v44 = vadd.f32 %v4402_v39, %v6048_v16  ;;  %v4405_v45 = vadd.f32 %v4404_v43, %v4403_v40  ;;  %v4514_v48 = vadd.f32 %v4513_v46, %v4512_v42  ;;  %v4515_v50 = vpop.f32.mrb[18].mxu1  ;;  %v5476_v46 = vld [vmem:[%s5726_s10 + $0xf0] ss:$52 sps:$4 sm:$0xff]  }
 0x11e   : > { %2825 = vmatmul.mubr.bf16.gmra.mrb[124].mxu0 %v5453_v38  ;;  %v4516_v53 = vpop.f32.mrb[19].mxu1  ;;  %v5477_v38 = vld [vmem:[%s5726_s10 + $0xfc] ss:$52 sps:$4 sm:$0xff]  }
 0x11f   : > { %v2420_v52 = vadd.f32 %v4405_v45, %v6048_v16  ;;  %3026 = vmatprep.mubr.bf16.mxu0 %v5462_v41  ;;  %v6096_v55 = vadd.f32 %v4514_v48, %v2417_v44  ;;  %v4517_v56 = vadd.f32 %v4516_v53, %v4515_v50  ;;  %v5480_v50 = vld [vmem:[%s5726_s10 + $0x15c] ss:$52 sps:$4 sm:$0xff]  }
 0x120   : > { %2986 = vmatmul.mubr.bf16.gmra.mrb[124].mxu1 %v5456_v47 }
 0x121   : > { %v4406_v58 = vpop.f32.mrb[20].mxu0  ;;  %v6098_v59 = vadd.f32 %v4517_v56, %v2420_v52  ;;  %3187 = vmatprep.mubr.bf16.mxu1 %v5467_v51 }
 0x122   : > { %v4407_v60 = vpop.f32.mrb[21].mxu0 }
 0x123   : > { %v4408_v62 = vadd.f32 %v4407_v60, %v4406_v58  ;;  %v4409_v63 = vpop.f32.mrb[22].mxu0  ;;  %v4518_v1 = vpop.f32.mrb[20].mxu1  ;;  %v5479_v60 = vld [vmem:[%s5726_s10 + $0xf8] ss:$52 sps:$4 sm:$0xff]  }
 0x124   : > { %v4410_v2 = vpop.f32.mrb[23].mxu0  ;;  %v4519_v6 = vpop.f32.mrb[21].mxu1 }
 0x125   : > { %v2425_v4 = vadd.f32 %v4408_v62, %v6048_v16  ;;  %v4411_v5 = vadd.f32 %v4410_v2, %v4409_v63  ;;  %v4520_v8 = vadd.f32 %v4519_v6, %v4518_v1  ;;  %v4521_v9 = vpop.f32.mrb[22].mxu1  ;;  %v5483_v63 = vld [vmem:[%s5726_s10 + $0x164] ss:$52 sps:$4 sm:$0xff]  }
 0x126   : > { %3027 = vmatmul.mubr.bf16.vlgmr.msra.gmra.mrb[128].mxu0 %v5460_v61  ;;  %v4522_v14 = vpop.f32.mrb[23].mxu1 }
 0x127   : > { %v2428_v12 = vadd.f32 %v4411_v5, %v6048_v16  ;;  %5077 = vmatpush3.bf16.msra.mxu0 %v6011_v49  ;;  %3034 = vmatprep.mubr.bf16.mxu0 %v5468_v0  ;;  %v6110_v15 = vadd.f32 %v4520_v8, %v2425_v4  ;;  %v4523_v17 = vadd.f32 %v4522_v14, %v4521_v9 }
 0x128   : > { %5078 = vmatprep.subr.bf16.mxu0 %v5489_v3  ;;  %3188 = vmatmul.mubr.bf16.vlgmr.msra.gmra.mrb[128].mxu1 %v5465_v7  ;;  %v5482_v7 = vld [vmem:[%s5726_s10 + $0x158] ss:$52 sps:$4 sm:$0xff]  }
 0x129   : > { %v4412_v19 = vpop.f32.mrb[24].mxu0  ;;  %v6115_v20 = vadd.f32 %v4523_v17, %v2428_v12  ;;  %3195 = vmatprep.mubr.bf16.mxu1 %v5471_v11  ;;  %v5486_v11 = vld [vmem:[%s5726_s10 + $0x1c4] ss:$52 sps:$4 sm:$0xff]  }
 0x12a   : > { %v4413_v21 = vpop.f32.mrb[25].mxu0 }
 0x12b   : > { %v4414_v23 = vadd.f32 %v4413_v21, %v4412_v19  ;;  %v4415_v49 = vpop.f32.mrb[26].mxu0  ;;  %5079 = vmatpush3.bf16.msra.mxu0 %v5489_v3  ;;  %v4524_v25 = vpop.f32.mrb[24].mxu1  ;;  %v5485_v21 = vld [vmem:[%s5726_s10 + $0x160] ss:$52 sps:$4 sm:$0xff]  }
 0x12c   : > { %v4416_v26 = vpop.f32.mrb[27].mxu0  ;;  %5080 = vmatprep.subr.bf16.mxu0 %v5514_v18  ;;  %v4525_v30 = vpop.f32.mrb[25].mxu1 }
 0x12d   : > { %v2433_v28 = vadd.f32 %v4414_v23, %v6048_v16  ;;  %v4417_v29 = vadd.f32 %v4416_v26, %v4415_v49  ;;  %v4526_v34 = vadd.f32 %v4525_v30, %v4524_v25  ;;  %v4527_v37 = vpop.f32.mrb[26].mxu1  ;;  %v5490_v49 = vld [vmem:[%s5726_s10 + $0x1cc] ss:$52 sps:$4 sm:$0xff]  }
 0x12e   : > { %3035 = vmatmul.mubr.bf16.gmra.mrb[132].mxu0 %v5470_v22  ;;  %v4528_v40 = vpop.f32.mrb[27].mxu1 }
 0x12f   : > { %v2436_v39 = vadd.f32 %v4417_v29, %v6048_v16  ;;  %3042 = vmatprep.mubr.bf16.mxu0 %v5474_v24  ;;  %5081 = vmatpush3.bf16.msra.mxu0 %v5514_v18  ;;  %v6126_v41 = vadd.f32 %v4526_v34, %v2433_v28  ;;  %v4529_v42 = vadd.f32 %v4528_v40, %v4527_v37 }
 0x130   : > { %5082 = vmatprep.subr.bf16.mxu0 %v5539_v27  ;;  %3196 = vmatmul.mubr.bf16.gmra.mrb[132].mxu1 %v5473_v32  ;;  %v5488_v32 = vld [vmem:[%s5726_s10 + $0x1c0] ss:$52 sps:$4 sm:$0xff]  }
 0x131   : > { %v4418_v43 = vpop.f32.mrb[28].mxu0  ;;  %v6128_v44 = vadd.f32 %v4529_v42, %v2436_v39  ;;  %3203 = vmatprep.mubr.bf16.mxu1 %v5477_v38  ;;  %v5493_v38 = vld [vmem:[%s5726_s10 + $0x22c] ss:$52 sps:$4 sm:$0xff]  }
 0x132   : > { %v4419_v45 = vpop.f32.mrb[29].mxu0 }
 0x133   : > { %v4420_v47 = vadd.f32 %v4419_v45, %v4418_v43  ;;  %v4421_v48 = vpop.f32.mrb[30].mxu0  ;;  %5083 = vmatpush3.bf16.msra.mxu0 %v5539_v27  ;;  %v4530_v51 = vpop.f32.mrb[28].mxu1 }
 0x134   : > { %v4422_v52 = vpop.f32.mrb[31].mxu0  ;;  %v4531_v58 = vpop.f32.mrb[29].mxu1 }
 0x135   : > { %v2441_v53 = vadd.f32 %v4420_v47, %v6048_v16  ;;  %v4423_v56 = vadd.f32 %v4422_v52, %v4421_v48  ;;  %v4532_v61 = vadd.f32 %v4531_v58, %v4530_v51  ;;  %v4533_v62 = vpop.f32.mrb[30].mxu1 }
 0x136   : > { %3043 = vmatmul.mubr.bf16.gmra.mrb[136].mxu0 %v5476_v46  ;;  %v4534_v1 = vpop.f32.mrb[31].mxu1  ;;  %v5492_v46 = vld [vmem:[%s5726_s10 + $0x1c8] ss:$52 sps:$4 sm:$0xff]  }
 0x137   : > { %v2444_v0 = vadd.f32 %v4423_v56, %v6048_v16  ;;  %3050 = vmatprep.mubr.bf16.mxu0 %v5480_v50  ;;  %v6136_v2 = vadd.f32 %v4532_v61, %v2441_v53  ;;  %v4535_v3 = vadd.f32 %v4534_v1, %v4533_v62  ;;  %v5496_v50 = vld [vmem:[%s5726_s10 + $0x234] ss:$52 sps:$4 sm:$0xff]  }
 0x138   : > { %3204 = vmatmul.mubr.bf16.gmra.mrb[136].mxu1 %v5479_v60  ;;  %v5495_v62 = vld [vmem:[%s5726_s10 + $0x228] ss:$52 sps:$4 sm:$0xff]  }
 0x139   : > { %v4424_v4 = vpop.f32.mrb[32].mxu0  ;;  %v6138_v5 = vadd.f32 %v4535_v3, %v2444_v0  ;;  %3211 = vmatprep.mubr.bf16.mxu1 %v5483_v63  ;;  %v5499_v1 = vld [vmem:[%s5726_s10 + $0x294] ss:$52 sps:$4 sm:$0xff]  }
 0x13a   : > { %v4425_v6 = vpop.f32.mrb[33].mxu0 }
 0x13b   : > { %v4426_v8 = vadd.f32 %v4425_v6, %v4424_v4  ;;  %v4427_v9 = vpop.f32.mrb[34].mxu0  ;;  %v4536_v12 = vpop.f32.mrb[32].mxu1 }
 0x13c   : > { %v4428_v14 = vpop.f32.mrb[35].mxu0  ;;  %v4537_v19 = vpop.f32.mrb[33].mxu1 }
 0x13d   : > { %v2449_v17 = vadd.f32 %v4426_v8, %v6048_v16  ;;  %v4429_v18 = vadd.f32 %v4428_v14, %v4427_v9  ;;  %v4538_v22 = vadd.f32 %v4537_v19, %v4536_v12  ;;  %v4539_v23 = vpop.f32.mrb[34].mxu1  ;;  %v5498_v9 = vld [vmem:[%s5726_s10 + $0x230] ss:$52 sps:$4 sm:$0xff]  }
 0x13e   : > { %3051 = vmatmul.mubr.bf16.gmra.mrb[140].mxu0 %v5482_v7  ;;  %v4540_v25 = vpop.f32.mrb[35].mxu1  ;;  %v5502_v14 = vld [vmem:[%s5726_s10 + $0x29c] ss:$52 sps:$4 sm:$0xff]  }
 0x13f   : > { %v2452_v24 = vadd.f32 %v4429_v18, %v6048_v16  ;;  %3058 = vmatprep.mubr.bf16.mxu0 %v5486_v11  ;;  %v6146_v26 = vadd.f32 %v4538_v22, %v2449_v17  ;;  %v4541_v27 = vadd.f32 %v4540_v25, %v4539_v23 }
 0x140   : > { %3212 = vmatmul.mubr.bf16.gmra.mrb[140].mxu1 %v5485_v21 }
 0x141   : > { %v4430_v28 = vpop.f32.mrb[36].mxu0  ;;  %v6148_v29 = vadd.f32 %v4541_v27, %v2452_v24  ;;  %3219 = vmatprep.mubr.bf16.mxu1 %v5490_v49  ;;  %v5501_v24 = vld [vmem:[%s5726_s10 + $0x290] ss:$52 sps:$4 sm:$0xff]  }
 0x142   : > { %v4431_v30 = vpop.f32.mrb[37].mxu0 }
 0x143   : > { %v4432_v34 = vadd.f32 %v4431_v30, %v4430_v28  ;;  %v4433_v37 = vpop.f32.mrb[38].mxu0  ;;  %v4542_v39 = vpop.f32.mrb[36].mxu1  ;;  %v5505_v28 = vld [vmem:[%s5726_s10 + $0x2fc] ss:$52 sps:$4 sm:$0xff]  }
 0x144   : > { %v4434_v40 = vpop.f32.mrb[39].mxu0  ;;  %v4543_v45 = vpop.f32.mrb[37].mxu1 }
 0x145   : > { %v2457_v42 = vadd.f32 %v4432_v34, %v6048_v16  ;;  %v4435_v43 = vadd.f32 %v4434_v40, %v4433_v37  ;;  %v4544_v47 = vadd.f32 %v4543_v45, %v4542_v39  ;;  %v4545_v48 = vpop.f32.mrb[38].mxu1  ;;  %v5504_v39 = vld [vmem:[%s5726_s10 + $0x298] ss:$52 sps:$4 sm:$0xff]  }
 0x146   : > { %3059 = vmatmul.mubr.bf16.gmra.mrb[144].mxu0 %v5488_v32  ;;  %v4546_v52 = vpop.f32.mrb[39].mxu1 }
 0x147   : > { %v2460_v51 = vadd.f32 %v4435_v43, %v6048_v16  ;;  %3066 = vmatprep.mubr.bf16.mxu0 %v5493_v38  ;;  %v6156_v53 = vadd.f32 %v4544_v47, %v2457_v42  ;;  %v4547_v56 = vadd.f32 %v4546_v52, %v4545_v48  ;;  %v5508_v43 = vld [vmem:[%s5726_s10 + $0x304] ss:$52 sps:$4 sm:$0xff]  }
 0x148   : > { %3220 = vmatmul.mubr.bf16.gmra.mrb[144].mxu1 %v5492_v46 }
 0x149   : > { %v4436_v58 = vpop.f32.mrb[40].mxu0  ;;  %v6158_v60 = vadd.f32 %v4547_v56, %v2460_v51  ;;  %3227 = vmatprep.mubr.bf16.mxu1 %v5496_v50  ;;  %v5507_v56 = vld [vmem:[%s5726_s10 + $0x2f8] ss:$52 sps:$4 sm:$0xff]  }
 0x14a   : > { %v4437_v61 = vpop.f32.mrb[41].mxu0 }
 0x14b   : > { %v4438_v63 = vadd.f32 %v4437_v61, %v4436_v58  ;;  %v4439_v0 = vpop.f32.mrb[42].mxu0  ;;  %v4548_v3 = vpop.f32.mrb[40].mxu1 }
 0x14c   : > { %v4440_v4 = vpop.f32.mrb[43].mxu0  ;;  %v4549_v8 = vpop.f32.mrb[41].mxu1 }
 0x14d   : > { %v2465_v6 = vadd.f32 %v4438_v63, %v6048_v16  ;;  %v4441_v7 = vadd.f32 %v4440_v4, %v4439_v0  ;;  %v4550_v11 = vadd.f32 %v4549_v8, %v4548_v3  ;;  %v4551_v12 = vpop.f32.mrb[42].mxu1 }
 0x14e   : > { %3067 = vmatmul.mubr.bf16.gmra.mrb[148].mxu0 %v5495_v62  ;;  %v4552_v18 = vpop.f32.mrb[43].mxu1  ;;  %v5511_v62 = vld [vmem:[%s5726_s10 + $0x364] ss:$52 sps:$4 sm:$0xff]  }
 0x14f   : > { %v2468_v17 = vadd.f32 %v4441_v7, %v6048_v16  ;;  %3074 = vmatprep.mubr.bf16.mxu0 %v5499_v1  ;;  %v6166_v19 = vadd.f32 %v4550_v11, %v2465_v6  ;;  %v4553_v21 = vadd.f32 %v4552_v18, %v4551_v12  ;;  %v5510_v6 = vld [vmem:[%s5726_s10 + $0x300] ss:$52 sps:$4 sm:$0xff]  }
 0x150   : > { %3228 = vmatmul.mubr.bf16.gmra.mrb[148].mxu1 %v5498_v9  ;;  %v5515_v9 = vld [vmem:[%s5726_s10 + $0x36c] ss:$52 sps:$4 sm:$0xff]  }
 0x151   : > { %v4442_v22 = vpop.f32.mrb[44].mxu0  ;;  %v6168_v23 = vadd.f32 %v4553_v21, %v2468_v17  ;;  %3235 = vmatprep.mubr.bf16.mxu1 %v5502_v14 }
 0x152   : > { %v4443_v49 = vpop.f32.mrb[45].mxu0 }
 0x153   : > { %v4444_v25 = vadd.f32 %v4443_v49, %v4442_v22  ;;  %v4445_v27 = vpop.f32.mrb[46].mxu0  ;;  %v4554_v30 = vpop.f32.mrb[44].mxu1  ;;  %v5513_v49 = vld [vmem:[%s5726_s10 + $0x360] ss:$52 sps:$4 sm:$0xff]  }
 0x154   : > { %v4446_v32 = vpop.f32.mrb[47].mxu0  ;;  %v4555_v38 = vpop.f32.mrb[45].mxu1 }
 0x155   : > { %v2473_v34 = vadd.f32 %v4444_v25, %v6048_v16  ;;  %v4447_v37 = vadd.f32 %v4446_v32, %v4445_v27  ;;  %v4556_v40 = vadd.f32 %v4555_v38, %v4554_v30  ;;  %v4557_v42 = vpop.f32.mrb[46].mxu1  ;;  %v5518_v27 = vld [vmem:[%s5726_s10 + $0x3cc] ss:$52 sps:$4 sm:$0xff]   ;;  %v5517_v38 = vld [vmem:[%s5726_s10 + $0x368] ss:$52 sps:$4 sm:$0xff]  }
 0x156   : > { %3075 = vmatmul.mubr.bf16.gmra.mrb[152].mxu0 %v5501_v24  ;;  %v4558_v46 = vpop.f32.mrb[47].mxu1 }
 0x157   : > { %v2476_v45 = vadd.f32 %v4447_v37, %v6048_v16  ;;  %3082 = vmatprep.mubr.bf16.mxu0 %v5505_v28  ;;  %v6176_v47 = vadd.f32 %v4556_v40, %v2473_v34  ;;  %v4559_v48 = vadd.f32 %v4558_v46, %v4557_v42  ;;  %v5521_v42 = vld [vmem:[%s5726_s10 + $0x3d4] ss:$52 sps:$4 sm:$0xff]  }
 0x158   : > { %3236 = vmatmul.mubr.bf16.gmra.mrb[152].mxu1 %v5504_v39 }
 0x159   : > { %v4448_v50 = vpop.f32.mrb[48].mxu0  ;;  %v6178_v51 = vadd.f32 %v4559_v48, %v2476_v45  ;;  %3243 = vmatprep.mubr.bf16.mxu1 %v5508_v43 }
 0x15a   : > { %v4449_v52 = vpop.f32.mrb[49].mxu0 }
 0x15b   : > { %v4450_v58 = vadd.f32 %v4449_v52, %v4448_v50  ;;  %v4451_v61 = vpop.f32.mrb[50].mxu0  ;;  %v4560_v63 = vpop.f32.mrb[48].mxu1 }
 0x15c   : > { %v4452_v0 = vpop.f32.mrb[51].mxu0  ;;  %v4561_v4 = vpop.f32.mrb[49].mxu1 }
 0x15d   : > { %v2481_v1 = vadd.f32 %v4450_v58, %v6048_v16  ;;  %v4453_v3 = vadd.f32 %v4452_v0, %v4451_v61  ;;  %v4562_v7 = vadd.f32 %v4561_v4, %v4560_v63  ;;  %v4563_v8 = vpop.f32.mrb[50].mxu1  ;;  %v5520_v58 = vld [vmem:[%s5726_s10 + $0x3c8] ss:$52 sps:$4 sm:$0xff]  }
 0x15e   : > { %3083 = vmatmul.mubr.bf16.gmra.mrb[156].mxu0 %v5507_v56  ;;  %v4564_v12 = vpop.f32.mrb[51].mxu1  ;;  %v5524_v63 = vld [vmem:[%s5726_s10 + $0x434] ss:$52 sps:$4 sm:$0xff]  }
 0x15f   : > { %v2484_v11 = vadd.f32 %v4453_v3, %v6048_v16  ;;  %3090 = vmatprep.mubr.bf16.mxu0 %v5511_v62  ;;  %v6186_v14 = vadd.f32 %v4562_v7, %v2481_v1  ;;  %v4565_v17 = vadd.f32 %v4564_v12, %v4563_v8  ;;  %v5523_v7 = vld [vmem:[%s5726_s10 + $0x3d0] ss:$52 sps:$4 sm:$0xff]  }
 0x160   : > { %3244 = vmatmul.mubr.bf16.gmra.mrb[156].mxu1 %v5510_v6 }
 0x161   : > { %v4454_v18 = vpop.f32.mrb[52].mxu0  ;;  %v6188_v21 = vadd.f32 %v4565_v17, %v2484_v11  ;;  %3251 = vmatprep.mubr.bf16.mxu1 %v5515_v9  ;;  %v5527_v11 = vld [vmem:[%s5726_s10 + $0x43c] ss:$52 sps:$4 sm:$0xff]  }
 0x162   : > { %v4455_v22 = vpop.f32.mrb[53].mxu0 }
 0x163   : > { %v4456_v24 = vadd.f32 %v4455_v22, %v4454_v18  ;;  %v4457_v25 = vpop.f32.mrb[54].mxu0  ;;  %v4566_v28 = vpop.f32.mrb[52].mxu1 }
 0x164   : > { %v4458_v30 = vpop.f32.mrb[55].mxu0  ;;  %v4567_v37 = vpop.f32.mrb[53].mxu1 }
 0x165   : > { %v2489_v32 = vadd.f32 %v4456_v24, %v6048_v16  ;;  %v4459_v34 = vadd.f32 %v4458_v30, %v4457_v25  ;;  %v4568_v39 = vadd.f32 %v4567_v37, %v4566_v28  ;;  %v4569_v40 = vpop.f32.mrb[54].mxu1 }
 0x166   : > { %3091 = vmatmul.mubr.bf16.gmra.mrb[160].mxu0 %v5513_v49  ;;  %v4570_v45 = vpop.f32.mrb[55].mxu1 }
 0x167   : > { %v2492_v43 = vadd.f32 %v4459_v34, %v6048_v16  ;;  %3098 = vmatprep.mubr.bf16.mxu0 %v5518_v27  ;;  %v6196_v46 = vadd.f32 %v4568_v39, %v2489_v32  ;;  %v4571_v48 = vadd.f32 %v4570_v45, %v4569_v40  ;;  %v5526_v27 = vld [vmem:[%s5726_s10 + $0x430] ss:$52 sps:$4 sm:$0xff]  }
 0x168   : > { %3252 = vmatmul.mubr.bf16.gmra.mrb[160].mxu1 %v5517_v38  ;;  %v5530_v32 = vld [vmem:[%s5726_s10 + $0x49c] ss:$52 sps:$4 sm:$0xff]  }
 0x169   : > { %v4460_v50 = vpop.f32.mrb[56].mxu0  ;;  %v6198_v52 = vadd.f32 %v4571_v48, %v2492_v43  ;;  %3259 = vmatprep.mubr.bf16.mxu1 %v5521_v42  ;;  %v5529_v42 = vld [vmem:[%s5726_s10 + $0x438] ss:$52 sps:$4 sm:$0xff]  }
 0x16a   : > { %v4461_v56 = vpop.f32.mrb[57].mxu0  ;;  %v5533_v48 = vld [vmem:[%s5726_s10 + $0x4a4] ss:$52 sps:$4 sm:$0xff]  }
 0x16b   : > { %v4462_v61 = vadd.f32 %v4461_v56, %v4460_v50  ;;  %v4463_v62 = vpop.f32.mrb[58].mxu0  ;;  %v4572_v0 = vpop.f32.mrb[56].mxu1 }
 0x16c   : > { %v4464_v1 = vpop.f32.mrb[59].mxu0  ;;  %v4573_v6 = vpop.f32.mrb[57].mxu1 }
 0x16d   : > { %v2497_v3 = vadd.f32 %v4462_v61, %v6048_v16  ;;  %v4465_v4 = vadd.f32 %v4464_v1, %v4463_v62  ;;  %v4574_v8 = vadd.f32 %v4573_v6, %v4572_v0  ;;  %v4575_v9 = vpop.f32.mrb[58].mxu1  ;;  %v5532_v1 = vld [vmem:[%s5726_s10 + $0x498] ss:$52 sps:$4 sm:$0xff]  }
 0x16e   : > { %3099 = vmatmul.mubr.bf16.gmra.mrb[164].mxu0 %v5520_v58  ;;  %v4576_v17 = vpop.f32.mrb[59].mxu1  ;;  %v5536_v6 = vld [vmem:[%s5726_s10 + $0x504] ss:$52 sps:$4 sm:$0xff]  }
 0x16f   : > { %v2500_v12 = vadd.f32 %v4465_v4, %v6048_v16  ;;  %3106 = vmatprep.mubr.bf16.mxu0 %v5524_v63  ;;  %v6206_v18 = vadd.f32 %v4574_v8, %v2497_v3  ;;  %v4577_v22 = vadd.f32 %v4576_v17, %v4575_v9 }
 0x170   : > { %3260 = vmatmul.mubr.bf16.gmra.mrb[164].mxu1 %v5523_v7 }
 0x171   : > { %v4466_v49 = vpop.f32.mrb[60].mxu0  ;;  %v6208_v24 = vadd.f32 %v4577_v22, %v2500_v12  ;;  %3267 = vmatprep.mubr.bf16.mxu1 %v5527_v11  ;;  %v5535_v12 = vld [vmem:[%s5726_s10 + $0x4a0] ss:$52 sps:$4 sm:$0xff]  }
 0x172   : > { %v4467_v25 = vpop.f32.mrb[61].mxu0 }
 0x173   : > { %v4468_v28 = vadd.f32 %v4467_v25, %v4466_v49  ;;  %v4469_v30 = vpop.f32.mrb[62].mxu0  ;;  %v4578_v34 = vpop.f32.mrb[60].mxu1  ;;  %v5540_v49 = vld [vmem:[%s5726_s10 + $0x50c] ss:$52 sps:$4 sm:$0xff]  }
 0x174   : > { %v4470_v37 = vpop.f32.mrb[63].mxu0  ;;  %v4579_v40 = vpop.f32.mrb[61].mxu1 }
 0x175   : > { %v2505_v38 = vadd.f32 %v4468_v28, %v6048_v16  ;;  %v4471_v39 = vadd.f32 %v4470_v37, %v4469_v30  ;;  %v4580_v43 = vadd.f32 %v4579_v40, %v4578_v34  ;;  %v4581_v45 = vpop.f32.mrb[62].mxu1  ;;  %v5538_v37 = vld [vmem:[%s5726_s10 + $0x500] ss:$52 sps:$4 sm:$0xff]  }
 0x176   : > { %3107 = vmatmul.mubr.bf16.gmra.mrb[168].mxu0 %v5526_v27  ;;  %v4582_v56 = vpop.f32.mrb[63].mxu1  ;;  %v5543_v40 = vld [vmem:[%s5726_s10 + $0x56c] ss:$52 sps:$4 sm:$0xff]  }
 0x177   : > { %v2508_v50 = vadd.f32 %v4471_v39, %v6048_v16  ;;  %3114 = vmatprep.mubr.bf16.mxu0 %v5530_v32  ;;  %v6216_v58 = vadd.f32 %v4580_v43, %v2505_v38  ;;  %v4583_v61 = vadd.f32 %v4582_v56, %v4581_v45 }
 0x178   : > { %3268 = vmatmul.mubr.bf16.gmra.mrb[168].mxu1 %v5529_v42 }
 0x179   : > { %v4600_v62 = vpop.f32.mrb[64].mxu0  ;;  %v6218_v63 = vadd.f32 %v4583_v61, %v2508_v50  ;;  %3275 = vmatprep.mubr.bf16.mxu1 %v5533_v48  ;;  %v5542_v50 = vld [vmem:[%s5726_s10 + $0x508] ss:$52 sps:$4 sm:$0xff]  }
 0x17a   : > { %v4601_v0 = vpop.f32.mrb[65].mxu0 }
 0x17b   : > { %v4602_v3 = vadd.f32 %v4601_v0, %v4600_v62  ;;  %v4603_v4 = vpop.f32.mrb[66].mxu0  ;;  %v4712_v7 = vpop.f32.mrb[64].mxu1  ;;  %v5546_v62 = vld [vmem:[%s5726_s10 + $0x574] ss:$52 sps:$4 sm:$0xff]  }
 0x17c   : > { %v4604_v8 = vpop.f32.mrb[67].mxu0  ;;  %v4713_v11 = vpop.f32.mrb[65].mxu1 }
 0x17d   : > { %v2707_v16 = vadd.f32 %v4602_v3, %v6056_v33  ;;  %v4605_v9 = vadd.f32 %v4604_v8, %v4603_v4  ;;  %v4714_v17 = vadd.f32 %v4713_v11, %v4712_v7  ;;  %v4715_v22 = vpop.f32.mrb[66].mxu1  ;;  %v5577_v3 = vld [vmem:[%s6673_s3] sm:$0xff]   ;;  %v5549_v11 = vld [vmem:[%s5726_s10 + $0x5d4] ss:$52 sps:$4 sm:$0xff]  }
 0x17e   : > { %3115 = vmatmul.mubr.bf16.gmra.mrb[172].mxu0 %v5532_v1  ;;  %v4716_v27 = vpop.f32.mrb[67].mxu1  ;;  %5116 = vmatprep.subr.bf16.mxu1 %v5577_v3 }
 0x17f   : > { %v2710_v25 = vadd.f32 %v4605_v9, %v6058_v36  ;;  %3122 = vmatprep.mubr.bf16.mxu0 %v5536_v6  ;;  %v6226_v28 = vadd.f32 %v4714_v17, %v2707_v16  ;;  %v4717_v30 = vadd.f32 %v4716_v27, %v4715_v22  ;;  %v5545_v16 = vld [vmem:[%s5726_s10 + $0x568] ss:$52 sps:$4 sm:$0xff]   ;;  %5117 = vmatpush3.bf16.msra.mxu1 %v5577_v3  ;;  %v5548_v27 = vld [vmem:[%s5726_s10 + $0x570] ss:$52 sps:$4 sm:$0xff]  }
 0x180   : > { %3276 = vmatmul.mubr.bf16.gmra.mrb[172].mxu1 %v5535_v12 }
 0x181   : > { %v4606_v32 = vpop.f32.mrb[68].mxu0  ;;  %v6228_v33 = vadd.f32 %v4717_v30, %v2710_v25  ;;  %3283 = vmatprep.mubr.bf16.mxu1 %v5540_v49 }
 0x182   : > { %v4607_v34 = vpop.f32.mrb[69].mxu0 }
 0x183   : > { %v4608_v38 = vadd.f32 %v4607_v34, %v4606_v32  ;;  %v4609_v39 = vpop.f32.mrb[70].mxu0  ;;  %v4718_v42 = vpop.f32.mrb[68].mxu1  ;;  %v5552_v34 = vld [vmem:[%s5726_s10 + $0x5dc] ss:$52 sps:$4 sm:$0xff]  }
 0x184   : > { %v4610_v43 = vpop.f32.mrb[71].mxu0  ;;  %v4719_v48 = vpop.f32.mrb[69].mxu1 }
 0x185   : > { %v2715_v36 = vadd.f32 %v4608_v38, %v6066_v54  ;;  %v4611_v45 = vadd.f32 %v4610_v43, %v4609_v39  ;;  %v4720_v56 = vadd.f32 %v4719_v48, %v4718_v42  ;;  %v4721_v61 = vpop.f32.mrb[70].mxu1 }
 0x186   : > { %3123 = vmatmul.mubr.bf16.gmra.mrb[176].mxu0 %v5538_v37  ;;  %v4722_v1 = vpop.f32.mrb[71].mxu1 }
 0x187   : > { %v2718_v0 = vadd.f32 %v4611_v45, %v6068_v57  ;;  %3130 = vmatprep.mubr.bf16.mxu0 %v5543_v40  ;;  %v6239_v4 = vadd.f32 %v4720_v56, %v2715_v36  ;;  %v4723_v54 = vadd.f32 %v4722_v1, %v4721_v61  ;;  %v5551_v36 = vld [vmem:[%s5726_s10 + $0x5d0] ss:$52 sps:$4 sm:$0xff]   ;;  %v5554_v1 = vld [vmem:[%s5726_s10 + $0x5d8] ss:$52 sps:$4 sm:$0xff]  }
 0x188   : > { %3284 = vmatmul.mubr.bf16.gmra.mrb[176].mxu1 %v5542_v50  ;;  %v5555_v50 = vld [vmem:[%s5726_s10 + $0x63c] ss:$52 sps:$4 sm:$0xff]  }
 0x189   : > { %v4612_v6 = vpop.f32.mrb[72].mxu0  ;;  %v6241_v7 = vadd.f32 %v4723_v54, %v2718_v0  ;;  %3291 = vmatprep.mubr.bf16.mxu1 %v5546_v62 }
 0x18a   : > { %v4613_v8 = vpop.f32.mrb[73].mxu0 }
 0x18b   : > { %v4614_v57 = vadd.f32 %v4613_v8, %v4612_v6  ;;  %v4615_v9 = vpop.f32.mrb[74].mxu0  ;;  %v4724_v12 = vpop.f32.mrb[72].mxu1  ;;  %v5558_v6 = vld [vmem:[%s5726_s10 + $0x644] ss:$52 sps:$4 sm:$0xff]  }
 0x18c   : > { %v4616_v17 = vpop.f32.mrb[75].mxu0  ;;  %v4725_v25 = vpop.f32.mrb[73].mxu1 }
 0x18d   : > { %v2723_v22 = vadd.f32 %v4614_v57, %v6076_v10  ;;  %v4617_v49 = vadd.f32 %v4616_v17, %v4615_v9  ;;  %v4726_v30 = vadd.f32 %v4725_v25, %v4724_v12  ;;  %v4727_v32 = vpop.f32.mrb[74].mxu1  ;;  %v5578_v57 = vld [vmem:[%s6673_s3 + $0x8] sm:$0xff]   ;;  %v5561_v25 = vld [vmem:[%s5726_s10 + $0x30] ss:$52 sps:$4 sm:$0xff]  }
 0x18e   : > { %3131 = vmatmul.mubr.bf16.gmra.mrb[180].mxu0 %v5545_v16  ;;  %v4728_v38 = vpop.f32.mrb[75].mxu1  ;;  %5118 = vmatprep.subr.bf16.mxu1 %v5578_v57 }
 0x18f   : > { %v2726_v37 = vadd.f32 %v4617_v49, %v6078_v13  ;;  %3138 = vmatprep.mubr.bf16.mxu0 %v5549_v11  ;;  %v6249_v39 = vadd.f32 %v4726_v30, %v2723_v22  ;;  %v4729_v40 = vadd.f32 %v4728_v38, %v4727_v32  ;;  %v5557_v22 = vld [vmem:[%s5726_s10 + $0x638] ss:$52 sps:$4 sm:$0xff]   ;;  %5119 = vmatpush3.bf16.msra.mxu1 %v5578_v57  ;;  %v5560_v38 = vld [vmem:[%s5726_s10 + $0x640] ss:$52 sps:$4 sm:$0xff]  }
 0x190   : > { %3292 = vmatmul.mubr.bf16.gmra.mrb[180].mxu1 %v5548_v27 }
 0x191   : > { %v4618_v42 = vpop.f32.mrb[76].mxu0  ;;  %v6251_v10 = vadd.f32 %v4729_v40, %v2726_v37  ;;  %3299 = vmatprep.mubr.bf16.mxu1 %v5552_v34 }
 0x192   : > { %v4619_v43 = vpop.f32.mrb[77].mxu0 }
 0x193   : > { %v4620_v45 = vadd.f32 %v4619_v43, %v4618_v42  ;;  %v4621_v48 = vpop.f32.mrb[78].mxu0  ;;  %v4730_v56 = vpop.f32.mrb[76].mxu1 }
 0x194   : > { %v4622_v61 = vpop.f32.mrb[79].mxu0  ;;  %v4731_v0 = vpop.f32.mrb[77].mxu1 }
 0x195   : > { %v2731_v13 = vadd.f32 %v4620_v45, %v6086_v31  ;;  %v4623_v62 = vadd.f32 %v4622_v61, %v4621_v48  ;;  %v4732_v3 = vadd.f32 %v4731_v0, %v4730_v56  ;;  %v4733_v54 = vpop.f32.mrb[78].mxu1  ;;  %v5562_v61 = vld [vmem:[%s5726_s10 + $0x98] ss:$52 sps:$4 sm:$0xff]   ;;  %v5563_v0 = vld [vmem:[%s5726_s10 + $0x100] ss:$52 sps:$4 sm:$0xff]  }
 0x196   : > { %3139 = vmatmul.mubr.bf16.gmra.mrb[184].mxu0 %v5551_v36  ;;  %v4734_v16 = vpop.f32.mrb[79].mxu1 }
 0x197   : > { %v2734_v8 = vadd.f32 %v4623_v62, %v6088_v35  ;;  %3146 = vmatprep.mubr.bf16.mxu0 %v5555_v50  ;;  %v6262_v9 = vadd.f32 %v4732_v3, %v2731_v13  ;;  %v4735_v31 = vadd.f32 %v4734_v16, %v4733_v54 }
 0x198   : > { %3300 = vmatmul.mubr.bf16.gmra.mrb[184].mxu1 %v5554_v1 }
 0x199   : > { %v4624_v11 = vpop.f32.mrb[80].mxu0  ;;  %v6264_v12 = vadd.f32 %v4735_v31, %v2734_v8  ;;  %3307 = vmatprep.mubr.bf16.mxu1 %v5558_v6 }
 0x19a   : > { %v4625_v17 = vpop.f32.mrb[81].mxu0 }
 0x19b   : > { %v4626_v35 = vadd.f32 %v4625_v17, %v4624_v11  ;;  %v4627_v49 = vpop.f32.mrb[82].mxu0  ;;  %v4736_v27 = vpop.f32.mrb[80].mxu1  ;;  %v5579_v11 = vld [vmem:[%s6673_s3 + $0x10] sm:$0xff]  }
 0x19c   : > { %v4628_v30 = vpop.f32.mrb[83].mxu0  ;;  %v4737_v37 = vpop.f32.mrb[81].mxu1  ;;  %5120 = vmatprep.subr.bf16.mxu1 %v5579_v11 }
 0x19d   : > { %v2739_v32 = vadd.f32 %v4626_v35, %v6096_v55  ;;  %v4629_v34 = vadd.f32 %v4628_v30, %v4627_v49  ;;  %v4738_v40 = vadd.f32 %v4737_v37, %v4736_v27  ;;  %v4739_v42 = vpop.f32.mrb[82].mxu1  ;;  %5121 = vmatpush3.bf16.msra.mxu1 %v5579_v11 }
 0x19e   : > { %3147 = vmatmul.mubr.bf16.gmra.mrb[188].mxu0 %v5557_v22  ;;  %v4740_v36 = vpop.f32.mrb[83].mxu1 }
 0x19f   : > { %v2742_v43 = vadd.f32 %v4629_v34, %v6098_v59  ;;  %5084 = vmatprep.mubr.msk.bf16.mxu0 %vm2301_vm0, %v5561_v25  ;;  %v6272_v45 = vadd.f32 %v4738_v40, %v2739_v32  ;;  %v4741_v48 = vadd.f32 %v4740_v36, %v4739_v42  ;;  %v5564_v25 = vld [vmem:[%s5726_s10 + $0x168] ss:$52 sps:$4 sm:$0xff]  }
 0x1a0   : > { %3308 = vmatmul.mubr.bf16.gmra.mrb[188].mxu1 %v5560_v38 }
 0x1a1   : > { %v4630_v50 = vpop.f32.mrb[84].mxu0  ;;  %v6274_v56 = vadd.f32 %v4741_v48, %v2742_v43 }
 0x1a2   : > { %v4631_v55 = vpop.f32.mrb[85].mxu0 }
 0x1a3   : > { %v4632_v13 = vadd.f32 %v4631_v55, %v4630_v50  ;;  %v4633_v62 = vpop.f32.mrb[86].mxu0  ;;  %v4742_v1 = vpop.f32.mrb[84].mxu1 }
 0x1a4   : > { %v4634_v3 = vpop.f32.mrb[87].mxu0  ;;  %v4743_v6 = vpop.f32.mrb[85].mxu1 }
 0x1a5   : > { %v2747_v54 = vadd.f32 %v4632_v13, %v6110_v15  ;;  %v4635_v59 = vadd.f32 %v4634_v3, %v4633_v62  ;;  %v4744_v8 = vadd.f32 %v4743_v6, %v4742_v1  ;;  %v4745_v16 = vpop.f32.mrb[86].mxu1  ;;  %v5567_v3 = vld [vmem:[%s5726_s10 + $0x2a0] ss:$52 sps:$4 sm:$0xff]  }
 0x1a6   : > { %5085 = vmatmul.mubr.msk.bf16.vlgmr.msra.gmra.mrb[192].mxu0 %vm2301_vm0, %v5562_v61  ;;  %v4746_v31 = vpop.f32.mrb[87].mxu1 }
 0x1a7   : > { %v2750_v57 = vadd.f32 %v4635_v59, %v6115_v20  ;;  %5088 = vmatprep.mubr.msk.bf16.mxu0 %vm2301_vm0, %v5563_v0  ;;  %v6285_v17 = vadd.f32 %v4744_v8, %v2747_v54  ;;  %v4747_v15 = vadd.f32 %v4746_v31, %v4745_v16  ;;  %v5565_v20 = vld [vmem:[%s5726_s10 + $0x1d0] ss:$52 sps:$4 sm:$0xff]  }
 0x1a9   : > { %v4636_v22 = vpop.f32.mrb[88].mxu0  ;;  %v6287_v35 = vadd.f32 %v4747_v15, %v2750_v57  ;;  %v5580_v15 = vld [vmem:[%s6673_s3 + $0x18] sm:$0xff]  }
 0x1aa   : > { %v4637_v49 = vpop.f32.mrb[89].mxu0  ;;  %5122 = vmatprep.subr.bf16.mxu1 %v5580_v15 }
 0x1ab   : > { %v4638_v27 = vadd.f32 %v4637_v49, %v4636_v22  ;;  %v4639_v30 = vpop.f32.mrb[90].mxu0  ;;  %v4748_v32 = vpop.f32.mrb[88].mxu1  ;;  %5123 = vmatpush3.bf16.msra.mxu1 %v5580_v15 }
 0x1ac   : > { %v4640_v34 = vpop.f32.mrb[91].mxu0  ;;  %v4749_v40 = vpop.f32.mrb[89].mxu1 }
 0x1ad   : > { %v2755_v37 = vadd.f32 %v4638_v27, %v6126_v41  ;;  %v4641_v38 = vadd.f32 %v4640_v34, %v4639_v30  ;;  %v4750_v42 = vadd.f32 %v4749_v40, %v4748_v32  ;;  %v4751_v43 = vpop.f32.mrb[90].mxu1  ;;  %v5566_v41 = vld [vmem:[%s5726_s10 + $0x238] ss:$52 sps:$4 sm:$0xff]   ;;  %v5568_v30 = vld [vmem:[%s5726_s10 + $0x308] ss:$52 sps:$4 sm:$0xff]  }
 0x1ae   : > { %5089 = vmatmul.mubr.msk.bf16.gmra.mrb[196].mxu0 %vm2301_vm0, %v5564_v25  ;;  %v4752_v48 = vpop.f32.mrb[91].mxu1 }
 0x1af   : > { %v2758_v36 = vadd.f32 %v4641_v38, %v6128_v44  ;;  %5092 = vmatprep.mubr.msk.bf16.mxu0 %vm2301_vm0, %v5565_v20  ;;  %v6295_v50 = vadd.f32 %v4750_v42, %v2755_v37  ;;  %v4753_v55 = vadd.f32 %v4752_v48, %v4751_v43 }
 0x1b1   : > { %v4642_v61 = vpop.f32.mrb[92].mxu0  ;;  %v6297_v13 = vadd.f32 %v4753_v55, %v2758_v36 }
 0x1b2   : > { %v4643_v62 = vpop.f32.mrb[93].mxu0 }
 0x1b3   : > { %v4644_v0 = vadd.f32 %v4643_v62, %v4642_v61  ;;  %v4645_v1 = vpop.f32.mrb[94].mxu0  ;;  %v4754_v54 = vpop.f32.mrb[92].mxu1 }
 0x1b4   : > { %v4646_v59 = vpop.f32.mrb[95].mxu0  ;;  %v4755_v8 = vpop.f32.mrb[93].mxu1 }
 0x1b5   : > { %v2763_v6 = vadd.f32 %v4644_v0, %v6136_v2  ;;  %v4647_v44 = vadd.f32 %v4646_v59, %v4645_v1  ;;  %v4756_v16 = vadd.f32 %v4755_v8, %v4754_v54  ;;  %v4757_v57 = vpop.f32.mrb[94].mxu1  ;;  %v5571_v59 = vld [vmem:[%s5726_s10 + $0x440] ss:$52 sps:$4 sm:$0xff]  }
 0x1b6   : > { %5093 = vmatmul.mubr.msk.bf16.gmra.mrb[200].mxu0 %vm2301_vm0, %v5566_v41  ;;  %v4758_v11 = vpop.f32.mrb[95].mxu1 }
 0x1b7   : > { %v2766_v31 = vadd.f32 %v4647_v44, %v6138_v5  ;;  %5096 = vmatprep.mubr.msk.bf16.mxu0 %vm2301_vm0, %v5567_v3  ;;  %v6308_v22 = vadd.f32 %v4756_v16, %v2763_v6  ;;  %v4759_v2 = vadd.f32 %v4758_v11, %v4757_v57  ;;  %v5569_v5 = vld [vmem:[%s5726_s10 + $0x370] ss:$52 sps:$4 sm:$0xff]  }
 0x1b9   : > { %v4648_v49 = vpop.f32.mrb[96].mxu0  ;;  %v6310_v25 = vadd.f32 %v4759_v2, %v2766_v31  ;;  %v5581_v2 = vld [vmem:[%s6673_s3 + $0x20] sm:$0xff]  }
 0x1ba   : > { %v4649_v27 = vpop.f32.mrb[97].mxu0  ;;  %5124 = vmatprep.subr.bf16.mxu1 %v5581_v2 }
 0x1bb   : > { %v4650_v20 = vadd.f32 %v4649_v27, %v4648_v49  ;;  %v4651_v32 = vpop.f32.mrb[98].mxu0  ;;  %v4760_v34 = vpop.f32.mrb[96].mxu1  ;;  %5125 = vmatpush3.bf16.msra.mxu1 %v5581_v2 }
 0x1bc   : > { %v4652_v37 = vpop.f32.mrb[99].mxu0  ;;  %v4761_v42 = vpop.f32.mrb[97].mxu1 }
 0x1bd   : > { %v2771_v38 = vadd.f32 %v4650_v20, %v6146_v26  ;;  %v4653_v40 = vadd.f32 %v4652_v37, %v4651_v32  ;;  %v4762_v43 = vadd.f32 %v4761_v42, %v4760_v34  ;;  %v4763_v36 = vpop.f32.mrb[98].mxu1  ;;  %v5570_v26 = vld [vmem:[%s5726_s10 + $0x3d8] ss:$52 sps:$4 sm:$0xff]   ;;  %v5572_v32 = vld [vmem:[%s5726_s10 + $0x4a8] ss:$52 sps:$4 sm:$0xff]  }
 0x1be   : > { %5097 = vmatmul.mubr.msk.bf16.gmra.mrb[204].mxu0 %vm2301_vm0, %v5568_v30  ;;  %v4764_v55 = vpop.f32.mrb[99].mxu1 }
 0x1bf   : > { %v2774_v48 = vadd.f32 %v4653_v40, %v6148_v29  ;;  %5100 = vmatprep.mubr.msk.bf16.mxu0 %vm2301_vm0, %v5569_v5  ;;  %v6318_v61 = vadd.f32 %v4762_v43, %v2771_v38  ;;  %v4765_v62 = vadd.f32 %v4764_v55, %v4763_v36 }
 0x1c1   : > { %v4654_v41 = vpop.f32.mrb[100].mxu0  ;;  %v6320_v0 = vadd.f32 %v4765_v62, %v2774_v48 }
 0x1c2   : > { %v4655_v1 = vpop.f32.mrb[101].mxu0 }
 0x1c3   : > { %v4656_v3 = vadd.f32 %v4655_v1, %v4654_v41  ;;  %v4657_v54 = vpop.f32.mrb[102].mxu0  ;;  %v4766_v6 = vpop.f32.mrb[100].mxu1 }
 0x1c4   : > { %v4658_v44 = vpop.f32.mrb[103].mxu0  ;;  %v4767_v16 = vpop.f32.mrb[101].mxu1 }
 0x1c5   : > { %v2779_v8 = vadd.f32 %v4656_v3, %v6156_v53  ;;  %v4659_v29 = vadd.f32 %v4658_v44, %v4657_v54  ;;  %v4768_v57 = vadd.f32 %v4767_v16, %v4766_v6  ;;  %v4769_v31 = vpop.f32.mrb[102].mxu1  ;;  %v5575_v44 = vld [vmem:[%s5726_s10 + $0x5e0] ss:$52 sps:$4 sm:$0xff]  }
 0x1c6   : > { %5101 = vmatmul.mubr.msk.bf16.gmra.mrb[208].mxu0 %vm2301_vm0, %v5570_v26  ;;  %v4770_v15 = vpop.f32.mrb[103].mxu1 }
 0x1c7   : > { %v2782_v11 = vadd.f32 %v4659_v29, %v6158_v60  ;;  %5104 = vmatprep.mubr.msk.bf16.mxu0 %vm2301_vm0, %v5571_v59  ;;  %v6331_v49 = vadd.f32 %v4768_v57, %v2779_v8  ;;  %v4771_v53 = vadd.f32 %v4770_v15, %v4769_v31  ;;  %v5573_v60 = vld [vmem:[%s5726_s10 + $0x510] ss:$52 sps:$4 sm:$0xff]  }
 0x1c9   : > { %v4660_v27 = vpop.f32.mrb[104].mxu0  ;;  %v6333_v30 = vadd.f32 %v4771_v53, %v2782_v11  ;;  %v5582_v53 = vld [vmem:[%s6673_s3 + $0x28] sm:$0xff]  }
 0x1ca   : > { %v4661_v20 = vpop.f32.mrb[105].mxu0  ;;  %5126 = vmatprep.subr.bf16.mxu1 %v5582_v53 }
 0x1cb   : > { %v4662_v5 = vadd.f32 %v4661_v20, %v4660_v27  ;;  %v4663_v34 = vpop.f32.mrb[106].mxu0  ;;  %v4772_v37 = vpop.f32.mrb[104].mxu1  ;;  %5127 = vmatpush3.bf16.msra.mxu1 %v5582_v53 }
 0x1cc   : > { %v4664_v38 = vpop.f32.mrb[107].mxu0  ;;  %v4773_v43 = vpop.f32.mrb[105].mxu1 }
 0x1cd   : > { %v2787_v40 = vadd.f32 %v4662_v5, %v6166_v19  ;;  %v4665_v42 = vadd.f32 %v4664_v38, %v4663_v34  ;;  %v4774_v36 = vadd.f32 %v4773_v43, %v4772_v37  ;;  %v4775_v48 = vpop.f32.mrb[106].mxu1  ;;  %v5574_v19 = vld [vmem:[%s5726_s10 + $0x578] ss:$52 sps:$4 sm:$0xff]   ;;  %v5576_v34 = vld [vmem:[%s5726_s10 + $0x648] ss:$52 sps:$4 sm:$0xff]  }
 0x1ce   : > { %5105 = vmatmul.mubr.msk.bf16.gmra.mrb[212].mxu0 %vm2301_vm0, %v5572_v32  ;;  %v4776_v62 = vpop.f32.mrb[107].mxu1 }
 0x1cf   : > { %v2790_v55 = vadd.f32 %v4665_v42, %v6168_v23  ;;  %5108 = vmatprep.mubr.msk.bf16.mxu0 %vm2301_vm0, %v5573_v60  ;;  %v6341_v41 = vadd.f32 %v4774_v36, %v2787_v40  ;;  %v4777_v1 = vadd.f32 %v4776_v62, %v4775_v48 }
 0x1d1   : > { %v4666_v26 = vpop.f32.mrb[108].mxu0  ;;  %v6343_v3 = vadd.f32 %v4777_v1, %v2790_v55 }
 0x1d2   : > { %v4667_v54 = vpop.f32.mrb[109].mxu0 }
 0x1d3   : > { %v4668_v59 = vadd.f32 %v4667_v54, %v4666_v26  ;;  %v4669_v6 = vpop.f32.mrb[110].mxu0  ;;  %v4778_v8 = vpop.f32.mrb[108].mxu1 }
 0x1d4   : > { %v4670_v29 = vpop.f32.mrb[111].mxu0  ;;  %v4779_v57 = vpop.f32.mrb[109].mxu1 }
 0x1d5   : > { %v2795_v16 = vadd.f32 %v4668_v59, %v6176_v47  ;;  %v4671_v23 = vadd.f32 %v4670_v29, %v4669_v6  ;;  %v4780_v31 = vadd.f32 %v4779_v57, %v4778_v8  ;;  %v4781_v11 = vpop.f32.mrb[110].mxu1 }
 0x1d6   : > { %5109 = vmatmul.mubr.msk.bf16.gmra.mrb[216].mxu0 %vm2301_vm0, %v5574_v19  ;;  %v4782_v2 = vpop.f32.mrb[111].mxu1 }
 0x1d7   : > { %v2798_v15 = vadd.f32 %v4671_v23, %v6178_v51  ;;  %5112 = vmatprep.mubr.msk.bf16.mxu0 %vm2301_vm0, %v5575_v44  ;;  %v6354_v27 = vadd.f32 %v4780_v31, %v2795_v16  ;;  %v4783_v20 = vadd.f32 %v4782_v2, %v4781_v11 }
 0x1d9   : > { %v4672_v47 = vpop.f32.mrb[112].mxu0  ;;  %v6356_v32 = vadd.f32 %v4783_v20, %v2798_v15  ;;  %v5583_v15 = vld [vmem:[%s6673_s3 + $0x30] sm:$0xff]  }
 0x1da   : > { %v4673_v5 = vpop.f32.mrb[113].mxu0  ;;  %5128 = vmatprep.subr.bf16.mxu1 %v5583_v15 }
 0x1db   : > { %v4674_v60 = vadd.f32 %v4673_v5, %v4672_v47  ;;  %v4675_v37 = vpop.f32.mrb[114].mxu0  ;;  %v4784_v51 = vpop.f32.mrb[112].mxu1  ;;  %5129 = vmatpush3.bf16.msra.mxu1 %v5583_v15 }
 0x1dc   : > { %v4676_v38 = vpop.f32.mrb[115].mxu0  ;;  %v4785_v43 = vpop.f32.mrb[113].mxu1 }
 0x1dd   : > { %v2803_v40 = vadd.f32 %v4674_v60, %v6186_v14  ;;  %v4677_v42 = vadd.f32 %v4676_v38, %v4675_v37  ;;  %v4786_v36 = vadd.f32 %v4785_v43, %v4784_v51  ;;  %v4787_v48 = vpop.f32.mrb[114].mxu1 }
 0x1de   : > { %5113 = vmatmul.mubr.msk.bf16.gmra.mrb[220].mxu0 %vm2301_vm0, %v5576_v34  ;;  %v4788_v62 = vpop.f32.mrb[115].mxu1 }
 0x1df   : > { %v2806_v55 = vadd.f32 %v4677_v42, %v6188_v21  ;;  %v6362_v1 = vadd.f32 %v4786_v36, %v2803_v40  ;;  %v4789_v26 = vadd.f32 %v4788_v62, %v4787_v48 }
 0x1e1   : > { %v4678_v54 = vpop.f32.mrb[116].mxu0  ;;  %v6364_v19 = vadd.f32 %v4789_v26, %v2806_v55 }
 0x1e2   : > { %v4679_v59 = vpop.f32.mrb[117].mxu0 }
 0x1e3   : > { %v4680_v6 = vadd.f32 %v4679_v59, %v4678_v54  ;;  %v4681_v44 = vpop.f32.mrb[118].mxu0  ;;  %v4790_v8 = vpop.f32.mrb[116].mxu1 }
 0x1e4   : > { %v4682_v14 = vpop.f32.mrb[119].mxu0  ;;  %v4791_v23 = vpop.f32.mrb[117].mxu1 }
 0x1e5   : > { %v2811_v29 = vadd.f32 %v4680_v6, %v6196_v46  ;;  %v4683_v16 = vadd.f32 %v4682_v14, %v4681_v44  ;;  %v4792_v57 = vadd.f32 %v4791_v23, %v4790_v8  ;;  %v4793_v31 = vpop.f32.mrb[118].mxu1 }
 0x1e6   : > { %v4794_v11 = vpop.f32.mrb[119].mxu1 }
 0x1e7   : > { %v2814_v21 = vadd.f32 %v4683_v16, %v6198_v52  ;;  %v6371_v2 = vadd.f32 %v4792_v57, %v2811_v29  ;;  %v4795_v53 = vadd.f32 %v4794_v11, %v4793_v31  ;;  %v5584_v31 = vld [vmem:[%s6673_s3 + $0x38] sm:$0xff]  }
 0x1e8   : > { %5130 = vmatprep.subr.bf16.mxu1 %v5584_v31 }
 0x1e9   : > { %v4684_v20 = vpop.f32.mrb[120].mxu0  ;;  %v6373_v47 = vadd.f32 %v4795_v53, %v2814_v21  ;;  %5131 = vmatpush3.bf16.msra.mxu1 %v5584_v31 }
 0x1ea   : > { %v4685_v5 = vpop.f32.mrb[121].mxu0 }
 0x1eb   : > { %v4686_v46 = vadd.f32 %v4685_v5, %v4684_v20  ;;  %v4687_v34 = vpop.f32.mrb[122].mxu0  ;;  %v4796_v60 = vpop.f32.mrb[120].mxu1 }
 0x1ec   : > { %v4688_v37 = vpop.f32.mrb[123].mxu0  ;;  %v4797_v38 = vpop.f32.mrb[121].mxu1 }
 0x1ed   : > { %v2819_v52 = vadd.f32 %v4686_v46, %v6206_v18  ;;  %v4689_v51 = vadd.f32 %v4688_v37, %v4687_v34  ;;  %v4798_v40 = vadd.f32 %v4797_v38, %v4796_v60  ;;  %v4799_v42 = vpop.f32.mrb[122].mxu1 }
 0x1ee   : > { %v4800_v36 = vpop.f32.mrb[123].mxu1 }
 0x1ef   : > { %v2822_v43 = vadd.f32 %v4689_v51, %v6208_v24  ;;  %v6377_v48 = vadd.f32 %v4798_v40, %v2819_v52  ;;  %v4801_v55 = vadd.f32 %v4800_v36, %v4799_v42 }
 0x1f1   : > { %v4690_v62 = vpop.f32.mrb[124].mxu0  ;;  %v6379_v26 = vadd.f32 %v4801_v55, %v2822_v43 }
 0x1f2   : > { %v4691_v54 = vpop.f32.mrb[125].mxu0 }
 0x1f3   : > { %v4692_v59 = vadd.f32 %v4691_v54, %v4690_v62  ;;  %v4693_v6 = vpop.f32.mrb[126].mxu0  ;;  %v4802_v44 = vpop.f32.mrb[124].mxu1 }
 0x1f4   : > { %v4694_v8 = vpop.f32.mrb[127].mxu0  ;;  %v4803_v29 = vpop.f32.mrb[125].mxu1 }
 0x1f5   : > { %v2827_v18 = vadd.f32 %v4692_v59, %v6216_v58  ;;  %v4695_v14 = vadd.f32 %v4694_v8, %v4693_v6  ;;  %v4804_v16 = vadd.f32 %v4803_v29, %v4802_v44  ;;  %v4805_v23 = vpop.f32.mrb[126].mxu1 }
 0x1f6   : > { %v4806_v57 = vpop.f32.mrb[127].mxu1 }
 0x1f7   : > { %v2830_v24 = vadd.f32 %v4695_v14, %v6218_v63  ;;  %v6386_v21 = vadd.f32 %v4804_v16, %v2827_v18  ;;  %v4807_v11 = vadd.f32 %v4806_v57, %v4805_v23 }
 0x1f9   : > { %v4824_v15 = vpop.f32.mrb[128].mxu0  ;;  %v6388_v53 = vadd.f32 %v4807_v11, %v2830_v24 }
 0x1fa   : > { %v4825_v20 = vpop.f32.mrb[129].mxu0 }
 0x1fb   : > { %v4826_v58 = vadd.f32 %v4825_v20, %v4824_v15  ;;  %v4827_v5 = vpop.f32.mrb[130].mxu0  ;;  %v4936_v46 = vpop.f32.mrb[128].mxu1 }
 0x1fc   : > { %v4828_v34 = vpop.f32.mrb[131].mxu0  ;;  %v4937_v37 = vpop.f32.mrb[129].mxu1 }
 0x1fd   : > { %v3029_v63 = vadd.f32 %v4826_v58, %v6226_v28  ;;  %v4829_v60 = vadd.f32 %v4828_v34, %v4827_v5  ;;  %v4938_v52 = vadd.f32 %v4937_v37, %v4936_v46  ;;  %v4939_v51 = vpop.f32.mrb[130].mxu1 }
 0x1fe   : > { %v4940_v40 = vpop.f32.mrb[131].mxu1 }
 0x1ff   : > { %v3032_v38 = vadd.f32 %v4829_v60, %v6228_v33  ;;  %v4941_v42 = vadd.f32 %v4940_v40, %v4939_v51  ;;  %v6392_v43 = vadd.f32 %v4938_v52, %v3029_v63 }
 0x201   : > { %v4830_v36 = vpop.f32.mrb[132].mxu0  ;;  %v6394_v62 = vadd.f32 %v4941_v42, %v3032_v38 }
 0x202   : > { %v4831_v55 = vpop.f32.mrb[133].mxu0 }
 0x203   : > { %v4832_v54 = vadd.f32 %v4831_v55, %v4830_v36  ;;  %v4833_v59 = vpop.f32.mrb[134].mxu0  ;;  %v4942_v6 = vpop.f32.mrb[132].mxu1 }
 0x204   : > { %v4834_v44 = vpop.f32.mrb[135].mxu0  ;;  %v4943_v18 = vpop.f32.mrb[133].mxu1 }
 0x205   : > { %v3037_v28 = vadd.f32 %v4832_v54, %v6239_v4  ;;  %v4835_v8 = vadd.f32 %v4834_v44, %v4833_v59  ;;  %v4944_v14 = vadd.f32 %v4943_v18, %v4942_v6  ;;  %v4945_v29 = vpop.f32.mrb[134].mxu1 }
 0x206   : > { %v4946_v16 = vpop.f32.mrb[135].mxu1 }
 0x207   : > { %v3040_v33 = vadd.f32 %v4835_v8, %v6241_v7  ;;  %v4947_v23 = vadd.f32 %v4946_v16, %v4945_v29  ;;  %v6398_v24 = vadd.f32 %v4944_v14, %v3037_v28 }
 0x209   : > { %v4836_v57 = vpop.f32.mrb[136].mxu0  ;;  %v6400_v11 = vadd.f32 %v4947_v23, %v3040_v33 }
 0x20a   : > { %v4837_v31 = vpop.f32.mrb[137].mxu0 }
 0x20b   : > { %v4838_v15 = vadd.f32 %v4837_v31, %v4836_v57  ;;  %v4839_v20 = vpop.f32.mrb[138].mxu0  ;;  %v4948_v58 = vpop.f32.mrb[136].mxu1 }
 0x20c   : > { %v4840_v5 = vpop.f32.mrb[139].mxu0  ;;  %v4949_v34 = vpop.f32.mrb[137].mxu1 }
 0x20d   : > { %v3045_v4 = vadd.f32 %v4838_v15, %v6249_v39  ;;  %v4841_v46 = vadd.f32 %v4840_v5, %v4839_v20  ;;  %v4950_v63 = vadd.f32 %v4949_v34, %v4948_v58  ;;  %v4951_v60 = vpop.f32.mrb[138].mxu1 }
 0x20e   : > { %v4952_v37 = vpop.f32.mrb[139].mxu1 }
 0x20f   : > { %v3048_v7 = vadd.f32 %v4841_v46, %v6251_v10  ;;  %v4953_v52 = vadd.f32 %v4952_v37, %v4951_v60  ;;  %v6404_v51 = vadd.f32 %v4950_v63, %v3045_v4 }
 0x211   : > { %v4842_v38 = vpop.f32.mrb[140].mxu0  ;;  %v6406_v42 = vadd.f32 %v4953_v52, %v3048_v7 }
 0x212   : > { %v4843_v40 = vpop.f32.mrb[141].mxu0 }
 0x213   : > { %v4844_v36 = vadd.f32 %v4843_v40, %v4842_v38  ;;  %v4845_v55 = vpop.f32.mrb[142].mxu0  ;;  %v4954_v54 = vpop.f32.mrb[140].mxu1 }
 0x214   : > { %v4846_v59 = vpop.f32.mrb[143].mxu0  ;;  %v4955_v44 = vpop.f32.mrb[141].mxu1 }
 0x215   : > { %v3053_v39 = vadd.f32 %v4844_v36, %v6262_v9  ;;  %v4847_v6 = vadd.f32 %v4846_v59, %v4845_v55  ;;  %v4956_v28 = vadd.f32 %v4955_v44, %v4954_v54  ;;  %v4957_v8 = vpop.f32.mrb[142].mxu1 }
 0x216   : > { %v4958_v18 = vpop.f32.mrb[143].mxu1 }
 0x217   : > { %v3056_v10 = vadd.f32 %v4847_v6, %v6264_v12  ;;  %v4959_v14 = vadd.f32 %v4958_v18, %v4957_v8  ;;  %v6410_v29 = vadd.f32 %v4956_v28, %v3053_v39 }
 0x219   : > { %v4848_v33 = vpop.f32.mrb[144].mxu0  ;;  %v6412_v23 = vadd.f32 %v4959_v14, %v3056_v10 }
 0x21a   : > { %v4849_v16 = vpop.f32.mrb[145].mxu0 }
 0x21b   : > { %v4850_v57 = vadd.f32 %v4849_v16, %v4848_v33  ;;  %v4851_v31 = vpop.f32.mrb[146].mxu0  ;;  %v4960_v15 = vpop.f32.mrb[144].mxu1 }
 0x21c   : > { %v4852_v20 = vpop.f32.mrb[147].mxu0  ;;  %v4961_v5 = vpop.f32.mrb[145].mxu1 }
 0x21d   : > { %v3061_v9 = vadd.f32 %v4850_v57, %v6272_v45  ;;  %v4853_v58 = vadd.f32 %v4852_v20, %v4851_v31  ;;  %v4962_v4 = vadd.f32 %v4961_v5, %v4960_v15  ;;  %v4963_v46 = vpop.f32.mrb[146].mxu1 }
 0x21e   : > { %v4964_v34 = vpop.f32.mrb[147].mxu1 }
 0x21f   : > { %v3064_v12 = vadd.f32 %v4853_v58, %v6274_v56  ;;  %v4965_v63 = vadd.f32 %v4964_v34, %v4963_v46  ;;  %v6416_v60 = vadd.f32 %v4962_v4, %v3061_v9 }
 0x221   : > { %v4854_v7 = vpop.f32.mrb[148].mxu0  ;;  %v6418_v52 = vadd.f32 %v4965_v63, %v3064_v12 }
 0x222   : > { %v4855_v37 = vpop.f32.mrb[149].mxu0 }
 0x223   : > { %v4856_v38 = vadd.f32 %v4855_v37, %v4854_v7  ;;  %v4857_v40 = vpop.f32.mrb[150].mxu0  ;;  %v4966_v36 = vpop.f32.mrb[148].mxu1 }
 0x224   : > { %v4858_v55 = vpop.f32.mrb[151].mxu0  ;;  %v4967_v59 = vpop.f32.mrb[149].mxu1 }
 0x225   : > { %v3069_v45 = vadd.f32 %v4856_v38, %v6285_v17  ;;  %v4859_v54 = vadd.f32 %v4858_v55, %v4857_v40  ;;  %v4968_v39 = vadd.f32 %v4967_v59, %v4966_v36  ;;  %v4969_v6 = vpop.f32.mrb[150].mxu1 }
 0x226   : > { %v4970_v44 = vpop.f32.mrb[151].mxu1 }
 0x227   : > { %v3072_v56 = vadd.f32 %v4859_v54, %v6287_v35  ;;  %v4971_v28 = vadd.f32 %v4970_v44, %v4969_v6  ;;  %v6422_v8 = vadd.f32 %v4968_v39, %v3069_v45 }
 0x229   : > { %v4860_v10 = vpop.f32.mrb[152].mxu0  ;;  %v6424_v14 = vadd.f32 %v4971_v28, %v3072_v56 }
 0x22a   : > { %v4861_v18 = vpop.f32.mrb[153].mxu0 }
 0x22b   : > { %v4862_v33 = vadd.f32 %v4861_v18, %v4860_v10  ;;  %v4863_v16 = vpop.f32.mrb[154].mxu0  ;;  %v4972_v57 = vpop.f32.mrb[152].mxu1 }
 0x22c   : > { %v4864_v31 = vpop.f32.mrb[155].mxu0  ;;  %v4973_v20 = vpop.f32.mrb[153].mxu1 }
 0x22d   : > { %v3077_v17 = vadd.f32 %v4862_v33, %v6295_v50  ;;  %v4865_v15 = vadd.f32 %v4864_v31, %v4863_v16  ;;  %v4974_v9 = vadd.f32 %v4973_v20, %v4972_v57  ;;  %v4975_v58 = vpop.f32.mrb[154].mxu1 }
 0x22e   : > { %v4976_v5 = vpop.f32.mrb[155].mxu1 }
 0x22f   : > { %v3080_v35 = vadd.f32 %v4865_v15, %v6297_v13  ;;  %v4977_v4 = vadd.f32 %v4976_v5, %v4975_v58  ;;  %v6428_v46 = vadd.f32 %v4974_v9, %v3077_v17 }
 0x231   : > { %v4866_v12 = vpop.f32.mrb[156].mxu0  ;;  %v6430_v63 = vadd.f32 %v4977_v4, %v3080_v35 }
 0x232   : > { %v4867_v34 = vpop.f32.mrb[157].mxu0 }
 0x233   : > { %v4868_v7 = vadd.f32 %v4867_v34, %v4866_v12  ;;  %v4869_v37 = vpop.f32.mrb[158].mxu0  ;;  %v4978_v38 = vpop.f32.mrb[156].mxu1 }
 0x234   : > { %v4870_v40 = vpop.f32.mrb[159].mxu0  ;;  %v4979_v55 = vpop.f32.mrb[157].mxu1 }
 0x235   : > { %v3085_v50 = vadd.f32 %v4868_v7, %v6308_v22  ;;  %v4871_v36 = vadd.f32 %v4870_v40, %v4869_v37  ;;  %v4980_v45 = vadd.f32 %v4979_v55, %v4978_v38  ;;  %v4981_v54 = vpop.f32.mrb[158].mxu1 }
 0x236   : > { %v4982_v59 = vpop.f32.mrb[159].mxu1 }
 0x237   : > { %v3088_v13 = vadd.f32 %v4871_v36, %v6310_v25  ;;  %v4983_v39 = vadd.f32 %v4982_v59, %v4981_v54  ;;  %v6434_v6 = vadd.f32 %v4980_v45, %v3085_v50 }
 0x239   : > { %v4872_v56 = vpop.f32.mrb[160].mxu0  ;;  %v6436_v28 = vadd.f32 %v4983_v39, %v3088_v13 }
 0x23a   : > { %v4873_v44 = vpop.f32.mrb[161].mxu0 }
 0x23b   : > { %v4874_v10 = vadd.f32 %v4873_v44, %v4872_v56  ;;  %v4875_v18 = vpop.f32.mrb[162].mxu0  ;;  %v4984_v33 = vpop.f32.mrb[160].mxu1 }
 0x23c   : > { %v4876_v16 = vpop.f32.mrb[163].mxu0  ;;  %v4985_v31 = vpop.f32.mrb[161].mxu1 }
 0x23d   : > { %v3093_v22 = vadd.f32 %v4874_v10, %v6318_v61  ;;  %v4877_v57 = vadd.f32 %v4876_v16, %v4875_v18  ;;  %v4986_v17 = vadd.f32 %v4985_v31, %v4984_v33  ;;  %v4987_v15 = vpop.f32.mrb[162].mxu1 }
 0x23e   : > { %v4988_v20 = vpop.f32.mrb[163].mxu1 }
 0x23f   : > { %v3096_v25 = vadd.f32 %v4877_v57, %v6320_v0  ;;  %v4989_v9 = vadd.f32 %v4988_v20, %v4987_v15  ;;  %v6440_v58 = vadd.f32 %v4986_v17, %v3093_v22 }
 0x241   : > { %v4878_v35 = vpop.f32.mrb[164].mxu0  ;;  %v6442_v4 = vadd.f32 %v4989_v9, %v3096_v25 }
 0x242   : > { %v4879_v5 = vpop.f32.mrb[165].mxu0 }
 0x243   : > { %v4880_v12 = vadd.f32 %v4879_v5, %v4878_v35  ;;  %v4881_v34 = vpop.f32.mrb[166].mxu0  ;;  %v4990_v7 = vpop.f32.mrb[164].mxu1 }
 0x244   : > { %v4882_v37 = vpop.f32.mrb[167].mxu0  ;;  %v4991_v40 = vpop.f32.mrb[165].mxu1 }
 0x245   : > { %v3101_v61 = vadd.f32 %v4880_v12, %v6331_v49  ;;  %v4883_v38 = vadd.f32 %v4882_v37, %v4881_v34  ;;  %v4992_v50 = vadd.f32 %v4991_v40, %v4990_v7  ;;  %v4993_v36 = vpop.f32.mrb[166].mxu1 }
 0x246   : > { %v4994_v55 = vpop.f32.mrb[167].mxu1 }
 0x247   : > { %v3104_v0 = vadd.f32 %v4883_v38, %v6333_v30  ;;  %v4995_v45 = vadd.f32 %v4994_v55, %v4993_v36  ;;  %v6446_v54 = vadd.f32 %v4992_v50, %v3101_v61 }
 0x249   : > { %v4884_v13 = vpop.f32.mrb[168].mxu0  ;;  %v6448_v39 = vadd.f32 %v4995_v45, %v3104_v0 }
 0x24a   : > { %v4885_v59 = vpop.f32.mrb[169].mxu0 }
 0x24b   : > { %v4886_v56 = vadd.f32 %v4885_v59, %v4884_v13  ;;  %v4887_v44 = vpop.f32.mrb[170].mxu0  ;;  %v4996_v10 = vpop.f32.mrb[168].mxu1 }
 0x24c   : > { %v4888_v18 = vpop.f32.mrb[171].mxu0  ;;  %v4997_v16 = vpop.f32.mrb[169].mxu1 }
 0x24d   : > { %v3109_v49 = vadd.f32 %v4886_v56, %v6341_v41  ;;  %v4889_v33 = vadd.f32 %v4888_v18, %v4887_v44  ;;  %v4998_v22 = vadd.f32 %v4997_v16, %v4996_v10  ;;  %v4999_v57 = vpop.f32.mrb[170].mxu1 }
 0x24e   : > { %v5000_v31 = vpop.f32.mrb[171].mxu1 }
 0x24f   : > { %v3112_v30 = vadd.f32 %v4889_v33, %v6343_v3  ;;  %v5001_v17 = vadd.f32 %v5000_v31, %v4999_v57  ;;  %v6452_v15 = vadd.f32 %v4998_v22, %v3109_v49 }
 0x251   : > { %v4890_v25 = vpop.f32.mrb[172].mxu0  ;;  %v6454_v9 = vadd.f32 %v5001_v17, %v3112_v30 }
 0x252   : > { %v4891_v20 = vpop.f32.mrb[173].mxu0 }
 0x253   : > { %v4892_v35 = vadd.f32 %v4891_v20, %v4890_v25  ;;  %v4893_v5 = vpop.f32.mrb[174].mxu0  ;;  %v5002_v12 = vpop.f32.mrb[172].mxu1 }
 0x254   : > { %v4894_v34 = vpop.f32.mrb[175].mxu0  ;;  %v5003_v37 = vpop.f32.mrb[173].mxu1 }
 0x255   : > { %v3117_v41 = vadd.f32 %v4892_v35, %v6354_v27  ;;  %v4895_v7 = vadd.f32 %v4894_v34, %v4893_v5  ;;  %v5004_v61 = vadd.f32 %v5003_v37, %v5002_v12  ;;  %v5005_v38 = vpop.f32.mrb[174].mxu1 }
 0x256   : > { %v5006_v40 = vpop.f32.mrb[175].mxu1 }
 0x257   : > { %v3120_v3 = vadd.f32 %v4895_v7, %v6356_v32  ;;  %v5007_v50 = vadd.f32 %v5006_v40, %v5005_v38  ;;  %v6458_v36 = vadd.f32 %v5004_v61, %v3117_v41 }
 0x259   : > { %v4896_v0 = vpop.f32.mrb[176].mxu0  ;;  %v6460_v45 = vadd.f32 %v5007_v50, %v3120_v3 }
 0x25a   : > { %v4897_v55 = vpop.f32.mrb[177].mxu0 }
 0x25b   : > { %v4898_v13 = vadd.f32 %v4897_v55, %v4896_v0  ;;  %v4899_v59 = vpop.f32.mrb[178].mxu0  ;;  %v5008_v56 = vpop.f32.mrb[176].mxu1 }
 0x25c   : > { %v4900_v44 = vpop.f32.mrb[179].mxu0  ;;  %v5009_v18 = vpop.f32.mrb[177].mxu1 }
 0x25d   : > { %v3125_v27 = vadd.f32 %v4898_v13, %v6362_v1  ;;  %v4901_v10 = vadd.f32 %v4900_v44, %v4899_v59  ;;  %v5010_v49 = vadd.f32 %v5009_v18, %v5008_v56  ;;  %v5011_v33 = vpop.f32.mrb[178].mxu1 }
 0x25e   : > { %v5012_v16 = vpop.f32.mrb[179].mxu1 }
 0x25f   : > { %v3128_v32 = vadd.f32 %v4901_v10, %v6364_v19  ;;  %v5013_v22 = vadd.f32 %v5012_v16, %v5011_v33  ;;  %v6464_v57 = vadd.f32 %v5010_v49, %v3125_v27 }
 0x261   : > { %v4902_v30 = vpop.f32.mrb[180].mxu0  ;;  %v6466_v17 = vadd.f32 %v5013_v22, %v3128_v32 }
 0x262   : > { %v4903_v31 = vpop.f32.mrb[181].mxu0 }
 0x263   : > { %v4904_v25 = vadd.f32 %v4903_v31, %v4902_v30  ;;  %v4905_v20 = vpop.f32.mrb[182].mxu0  ;;  %v5014_v35 = vpop.f32.mrb[180].mxu1 }
 0x264   : > { %v4906_v5 = vpop.f32.mrb[183].mxu0  ;;  %v5015_v34 = vpop.f32.mrb[181].mxu1 }
 0x265   : > { %v3133_v1 = vadd.f32 %v4904_v25, %v6371_v2  ;;  %v4907_v12 = vadd.f32 %v4906_v5, %v4905_v20  ;;  %v5016_v41 = vadd.f32 %v5015_v34, %v5014_v35  ;;  %v5017_v7 = vpop.f32.mrb[182].mxu1 }
 0x266   : > { %v5018_v37 = vpop.f32.mrb[183].mxu1 }
 0x267   : > { %v3136_v19 = vadd.f32 %v4907_v12, %v6373_v47  ;;  %v5019_v61 = vadd.f32 %v5018_v37, %v5017_v7  ;;  %v6470_v38 = vadd.f32 %v5016_v41, %v3133_v1  ;;  %v6487_v37 = vld [vmem:[%s6672_s2 + $0x1] ss:$0 sm:$0xff] }
 0x269   : > { %v4908_v3 = vpop.f32.mrb[184].mxu0  ;;  %v6472_v50 = vadd.f32 %v5019_v61, %v3136_v19 }
 0x26a   : > { %v4909_v40 = vpop.f32.mrb[185].mxu0 }
 0x26b   : > { %v4910_v0 = vadd.f32 %v4909_v40, %v4908_v3  ;;  %v4911_v55 = vpop.f32.mrb[186].mxu0  ;;  %v5020_v13 = vpop.f32.mrb[184].mxu1 }
 0x26c   : > { %v4912_v59 = vpop.f32.mrb[187].mxu0  ;;  %v5021_v44 = vpop.f32.mrb[185].mxu1 }
 0x26d   : > { %v3141_v2 = vadd.f32 %v4910_v0, %v6377_v48  ;;  %v4913_v56 = vadd.f32 %v4912_v59, %v4911_v55  ;;  %v5022_v27 = vadd.f32 %v5021_v44, %v5020_v13  ;;  %v5023_v10 = vpop.f32.mrb[186].mxu1 }
 0x26e   : > { %v5024_v18 = vpop.f32.mrb[187].mxu1 }
 0x26f   : > { %v3144_v47 = vadd.f32 %v4913_v56, %v6379_v26  ;;  %v5025_v49 = vadd.f32 %v5024_v18, %v5023_v10  ;;  %v6476_v33 = vadd.f32 %v5022_v27, %v3141_v2 }
 0x271   : > { %v4914_v32 = vpop.f32.mrb[188].mxu0  ;;  %v6478_v22 = vadd.f32 %v5025_v49, %v3144_v47 }
 0x272   : > { %v4915_v16 = vpop.f32.mrb[189].mxu0 }
 0x273   : > { %v4916_v30 = vadd.f32 %v4915_v16, %v4914_v32  ;;  %v4917_v31 = vpop.f32.mrb[190].mxu0  ;;  %v5026_v25 = vpop.f32.mrb[188].mxu1 }
 0x274   : > { %v4918_v20 = vpop.f32.mrb[191].mxu0  ;;  %v5027_v5 = vpop.f32.mrb[189].mxu1 }
 0x275   : > { %v3149_v48 = vadd.f32 %v4916_v30, %v6386_v21  ;;  %v4919_v35 = vadd.f32 %v4918_v20, %v4917_v31  ;;  %v5028_v1 = vadd.f32 %v5027_v5, %v5026_v25  ;;  %v5029_v12 = vpop.f32.mrb[190].mxu1 }
 0x276   : > { %v5030_v34 = vpop.f32.mrb[191].mxu1 }
 0x277   : > { %v3152_v26 = vadd.f32 %v4919_v35, %v6388_v53  ;;  %v5031_v41 = vadd.f32 %v5030_v34, %v5029_v12  ;;  %v6482_v7 = vadd.f32 %v5028_v1, %v3149_v48 }
 0x279   : > { %v5086_v19 = vpop.f32.mrb[192].mxu0  ;;  %v6490_v21 = vadd.f32 %v5031_v41, %v3152_v26 }
 0x27a   : > { %v3359_v61 = vadd.f32 %v5086_v19, %v6398_v24  ;;  %v3350_v3 = vpop.f32.mrb[193].mxu0 }
 0x27b   : > { %v3351_v40 = vadd.f32 %v3350_v3, %v6392_v43  ;;  %v5087_v0 = vpop.f32.mrb[194].mxu0 }
 0x27c   : > { %v3516_v53 = vmul.f32 %v6487_v37, %v3359_v61  ;;  %v3362_v55 = vadd.f32 %v5087_v0, %v6400_v11  ;;  %v3353_v13 = vpop.f32.mrb[195].mxu0  ;;  %vm3479_vm1 = vcmp.ge.f32.partialorder %v3359_v61, 0.0 }
 0x27d   : > { %v3514_v59 = vmul.f32 %v6487_v37, %v3351_v40  ;;  %v3354_v2 = vadd.f32 %v3353_v13, %v6394_v62  ;;  %vm3477_vm2 = vcmp.ge.f32.partialorder %v3351_v40, 0.0 }
 0x27e   : > { %vm3480_vm3 = vcmp.ge.f32.partialorder %v3362_v55, 0.0  ;;  %v3517_v24 = vmul.f32 %v6487_v37, %v3362_v55  ;;  %v3548_v44 = vsel %vm3479_vm1, %v3359_v61, %v3516_v53 }
 0x27f   : > { %vm3478_vm4 = vcmp.ge.f32.partialorder %v3354_v2, 0.0  ;;  %v3515_v56 = vmul.f32 %v6487_v37, %v3354_v2  ;;  %v3546_v47 = vsel %vm3477_vm2, %v3351_v40, %v3514_v59 }
 0x280   : > { %v3549_v43 = vsel %vm3480_vm3, %v3362_v55, %v3517_v24 }
 0x281   : > { %v3579_v27 = vpack.c.bf16 %v3549_v43, %v3548_v44  ;;  %v5090_v10 = vpop.f32.mrb[196].mxu0  ;;  %v3547_v18 = vsel %vm3478_vm4, %v3354_v2, %v3515_v56 }
 0x282   : > { %v3375_v11 = vadd.f32 %v5090_v10, %v6410_v29  ;;  %v3366_v49 = vpop.f32.mrb[197].mxu0  ;;  %v3578_v32 = vpack.c.bf16 %v3547_v18, %v3546_v47 }
 0x283   : > { %v3367_v16 = vadd.f32 %v3366_v49, %v6404_v51  ;;  %v5091_v62 = vpop.f32.mrb[198].mxu0 }
 0x284   : > { %v3520_v30 = vmul.f32 %v6487_v37, %v3375_v11  ;;  %v3378_v31 = vadd.f32 %v5091_v62, %v6412_v23  ;;  %v3369_v25 = vpop.f32.mrb[199].mxu0  ;;  %5132 = vmatprep.mubr.bf16.mxu1 %v3578_v32  ;;  %vm3483_vm5 = vcmp.ge.f32.partialorder %v3375_v11, 0.0 }
 0x285   : > { %v3518_v20 = vmul.f32 %v6487_v37, %v3367_v16  ;;  %v3370_v48 = vadd.f32 %v3369_v25, %v6406_v42  ;;  %5133 = vmatmul.mubr.bf16.vlgmr.msra.gmra.mrb[192].mxu1 %v3579_v27  ;;  %vm3481_vm6 = vcmp.ge.f32.partialorder %v3367_v16, 0.0 }
 0x286   : > { %vm3484_vm7 = vcmp.ge.f32.partialorder %v3378_v31, 0.0  ;;  %v3521_v29 = vmul.f32 %v6487_v37, %v3378_v31  ;;  %v3552_v35 = vsel %vm3483_vm5, %v3375_v11, %v3520_v30 }
 0x287   : > { %vm3482_vm8 = vcmp.ge.f32.partialorder %v3370_v48, 0.0  ;;  %v3519_v51 = vmul.f32 %v6487_v37, %v3370_v48  ;;  %v3550_v12 = vsel %vm3481_vm6, %v3367_v16, %v3518_v20 }
 0x288   : > { %v3553_v5 = vsel %vm3484_vm7, %v3378_v31, %v3521_v29 }
 0x289   : > { %v5094_v1 = vpop.f32.mrb[200].mxu0  ;;  %v3551_v23 = vsel %vm3482_vm8, %v3370_v48, %v3519_v51  ;;  %v3581_v26 = vpack.c.bf16 %v3553_v5, %v3552_v35 }
 0x28a   : > { %v3391_v34 = vadd.f32 %v5094_v1, %v6422_v8  ;;  %v3382_v41 = vpop.f32.mrb[201].mxu0  ;;  %v3580_v19 = vpack.c.bf16 %v3551_v23, %v3550_v12 }
 0x28b   : > { %v3383_v42 = vadd.f32 %v3382_v41, %v6416_v60  ;;  %v5095_v61 = vpop.f32.mrb[202].mxu0 }
 0x28c   : > { %v3524_v3 = vmul.f32 %v6487_v37, %v3391_v34  ;;  %v3394_v40 = vadd.f32 %v5095_v61, %v6424_v14  ;;  %v3385_v0 = vpop.f32.mrb[203].mxu0  ;;  %5136 = vmatprep.mubr.bf16.mxu1 %v3580_v19  ;;  %vm3487_vm9 = vcmp.ge.f32.partialorder %v3391_v34, 0.0 }
 0x28d   : > { %v3522_v53 = vmul.f32 %v6487_v37, %v3383_v42  ;;  %v3386_v55 = vadd.f32 %v3385_v0, %v6418_v52  ;;  %5137 = vmatmul.mubr.bf16.gmra.mrb[196].mxu1 %v3581_v26  ;;  %vm3485_vm10 = vcmp.ge.f32.partialorder %v3383_v42, 0.0 }
 0x28e   : > { %vm3488_vm11 = vcmp.ge.f32.partialorder %v3394_v40, 0.0  ;;  %v3525_v8 = vmul.f32 %v6487_v37, %v3394_v40  ;;  %v3556_v13 = vsel %vm3487_vm9, %v3391_v34, %v3524_v3 }
 0x28f   : > { %vm3486_vm12 = vcmp.ge.f32.partialorder %v3386_v55, 0.0  ;;  %v3523_v60 = vmul.f32 %v6487_v37, %v3386_v55  ;;  %v3554_v24 = vsel %vm3485_vm10, %v3383_v42, %v3522_v53 }
 0x290   : > { %v3557_v59 = vsel %vm3488_vm11, %v3394_v40, %v3525_v8 }
 0x291   : > { %v5098_v2 = vpop.f32.mrb[204].mxu0  ;;  %v3555_v14 = vsel %vm3486_vm12, %v3386_v55, %v3523_v60  ;;  %v3583_v56 = vpack.c.bf16 %v3557_v59, %v3556_v13 }
 0x292   : > { %v3407_v44 = vadd.f32 %v5098_v2, %v6434_v6  ;;  %v3398_v43 = vpop.f32.mrb[205].mxu0  ;;  %v3582_v27 = vpack.c.bf16 %v3555_v14, %v3554_v24 }
 0x293   : > { %v3399_v52 = vadd.f32 %v3398_v43, %v6428_v46  ;;  %v5099_v10 = vpop.f32.mrb[206].mxu0 }
 0x294   : > { %v3528_v47 = vmul.f32 %v6487_v37, %v3407_v44  ;;  %v3410_v18 = vadd.f32 %v5099_v10, %v6436_v28  ;;  %v3401_v11 = vpop.f32.mrb[207].mxu0  ;;  %5140 = vmatprep.mubr.bf16.mxu1 %v3582_v27  ;;  %vm3491_vm13 = vcmp.ge.f32.partialorder %v3407_v44, 0.0 }
 0x295   : > { %v3526_v49 = vmul.f32 %v6487_v37, %v3399_v52  ;;  %v3402_v32 = vadd.f32 %v3401_v11, %v6430_v63  ;;  %5141 = vmatmul.mubr.bf16.gmra.mrb[200].mxu1 %v3583_v56  ;;  %vm3489_vm14 = vcmp.ge.f32.partialorder %v3399_v52, 0.0 }
 0x296   : > { %vm3492_vm15 = vcmp.ge.f32.partialorder %v3410_v18, 0.0  ;;  %v3529_v6 = vmul.f32 %v6487_v37, %v3410_v18  ;;  %v3560_v16 = vsel %vm3491_vm13, %v3407_v44, %v3528_v47 }
 0x297   : > { %vm3490_vm0 = vcmp.ge.f32.partialorder %v3402_v32, 0.0  ;;  %v3527_v46 = vmul.f32 %v6487_v37, %v3402_v32  ;;  %v3558_v31 = vsel %vm3489_vm14, %v3399_v52, %v3526_v49 }
 0x298   : > { %v3561_v62 = vsel %vm3492_vm15, %v3410_v18, %v3529_v6 }
 0x299   : > { %v5102_v30 = vpop.f32.mrb[208].mxu0  ;;  %v3559_v28 = vsel %vm3490_vm0, %v3402_v32, %v3527_v46  ;;  %v3585_v25 = vpack.c.bf16 %v3561_v62, %v3560_v16 }
 0x29a   : > { %v3423_v20 = vadd.f32 %v5102_v30, %v6446_v54  ;;  %v3414_v48 = vpop.f32.mrb[209].mxu0  ;;  %v3584_v29 = vpack.c.bf16 %v3559_v28, %v3558_v31 }
 0x29b   : > { %v3415_v63 = vadd.f32 %v3414_v48, %v6440_v58  ;;  %v5103_v51 = vpop.f32.mrb[210].mxu0 }
 0x29c   : > { %v3532_v35 = vmul.f32 %v6487_v37, %v3423_v20  ;;  %v3426_v5 = vadd.f32 %v5103_v51, %v6448_v39  ;;  %v3417_v1 = vpop.f32.mrb[211].mxu0  ;;  %5144 = vmatprep.mubr.bf16.mxu1 %v3584_v29  ;;  %vm3495_vm1 = vcmp.ge.f32.partialorder %v3423_v20, 0.0 }
 0x29d   : > { %v3530_v12 = vmul.f32 %v6487_v37, %v3415_v63  ;;  %v3418_v23 = vadd.f32 %v3417_v1, %v6442_v4  ;;  %5145 = vmatmul.mubr.bf16.gmra.mrb[204].mxu1 %v3585_v25  ;;  %vm3493_vm2 = vcmp.ge.f32.partialorder %v3415_v63, 0.0 }
 0x29e   : > { %vm3496_vm3 = vcmp.ge.f32.partialorder %v3426_v5, 0.0  ;;  %v3533_v54 = vmul.f32 %v6487_v37, %v3426_v5  ;;  %v3564_v26 = vsel %vm3495_vm1, %v3423_v20, %v3532_v35 }
 0x29f   : > { %vm3494_vm4 = vcmp.ge.f32.partialorder %v3418_v23, 0.0  ;;  %v3531_v58 = vmul.f32 %v6487_v37, %v3418_v23  ;;  %v3562_v19 = vsel %vm3493_vm2, %v3415_v63, %v3530_v12 }
 0x2a0   : > { %v3565_v34 = vsel %vm3496_vm3, %v3426_v5, %v3533_v54 }
 0x2a1   : > { %v5106_v41 = vpop.f32.mrb[212].mxu0  ;;  %v3563_v39 = vsel %vm3494_vm4, %v3418_v23, %v3531_v58  ;;  %v3587_v42 = vpack.c.bf16 %v3565_v34, %v3564_v26  ;;  %v6564_v58 = vld [vmem:[%s6674_s4 + $0x1] ss:$0 sm:$0xff] }
 0x2a2   : > { %v3439_v61 = vadd.f32 %v5106_v41, %v6458_v36  ;;  %v3430_v3 = vpop.f32.mrb[213].mxu0  ;;  %v3586_v40 = vpack.c.bf16 %v3563_v39, %v3562_v19 }
 0x2a3   : > { %v3431_v4 = vadd.f32 %v3430_v3, %v6452_v15  ;;  %v5107_v0 = vpop.f32.mrb[214].mxu0 }
 0x2a4   : > { %v3536_v53 = vmul.f32 %v6487_v37, %v3439_v61  ;;  %v3442_v55 = vadd.f32 %v5107_v0, %v6460_v45  ;;  %v3433_v8 = vpop.f32.mrb[215].mxu0  ;;  %5148 = vmatprep.mubr.bf16.mxu1 %v3586_v40  ;;  %vm3499_vm5 = vcmp.ge.f32.partialorder %v3439_v61, 0.0 }
 0x2a5   : > { %v3534_v60 = vmul.f32 %v6487_v37, %v3431_v4  ;;  %v3434_v13 = vadd.f32 %v3433_v8, %v6454_v9  ;;  %5149 = vmatmul.mubr.bf16.gmra.mrb[208].mxu1 %v3587_v42  ;;  %vm3497_vm6 = vcmp.ge.f32.partialorder %v3431_v4, 0.0 }
 0x2a6   : > { %vm3500_vm7 = vcmp.ge.f32.partialorder %v3442_v55, 0.0  ;;  %v3537_v36 = vmul.f32 %v6487_v37, %v3442_v55  ;;  %v3568_v59 = vsel %vm3499_vm5, %v3439_v61, %v3536_v53 }
 0x2a7   : > { %vm3498_vm8 = vcmp.ge.f32.partialorder %v3434_v13, 0.0  ;;  %v3535_v15 = vmul.f32 %v6487_v37, %v3434_v13  ;;  %v3566_v14 = vsel %vm3497_vm6, %v3431_v4, %v3534_v60 }
 0x2a8   : > { %v3569_v2 = vsel %vm3500_vm7, %v3442_v55, %v3537_v36 }
 0x2a9   : > { %v5110_v24 = vpop.f32.mrb[216].mxu0  ;;  %v3567_v45 = vsel %vm3498_vm8, %v3434_v13, %v3535_v15  ;;  %v3589_v56 = vpack.c.bf16 %v3569_v2, %v3568_v59 }
 0x2aa   : > { %v3455_v44 = vadd.f32 %v5110_v24, %v6470_v38  ;;  %v3446_v43 = vpop.f32.mrb[217].mxu0  ;;  %v3588_v27 = vpack.c.bf16 %v3567_v45, %v3566_v14 }
 0x2ab   : > { %v3447_v9 = vadd.f32 %v3446_v43, %v6464_v57  ;;  %v5111_v52 = vpop.f32.mrb[218].mxu0 }
 0x2ac   : > { %v3540_v10 = vmul.f32 %v6487_v37, %v3455_v44  ;;  %v3458_v47 = vadd.f32 %v5111_v52, %v6472_v50  ;;  %v3449_v18 = vpop.f32.mrb[219].mxu0  ;;  %5152 = vmatprep.mubr.bf16.mxu1 %v3588_v27  ;;  %vm3503_vm9 = vcmp.ge.f32.partialorder %v3455_v44, 0.0 }
 0x2ad   : > { %v3538_v11 = vmul.f32 %v6487_v37, %v3447_v9  ;;  %v3450_v49 = vadd.f32 %v3449_v18, %v6466_v17  ;;  %5153 = vmatmul.mubr.bf16.gmra.mrb[212].mxu1 %v3589_v56  ;;  %vm3501_vm10 = vcmp.ge.f32.partialorder %v3447_v9, 0.0 }
 0x2ae   : > { %vm3504_vm11 = vcmp.ge.f32.partialorder %v3458_v47, 0.0  ;;  %v3541_v38 = vmul.f32 %v6487_v37, %v3458_v47  ;;  %v3572_v32 = vsel %vm3503_vm9, %v3455_v44, %v3540_v10 }
 0x2af   : > { %vm3502_vm12 = vcmp.ge.f32.partialorder %v3450_v49, 0.0  ;;  %v3539_v57 = vmul.f32 %v6487_v37, %v3450_v49  ;;  %v3570_v16 = vsel %vm3501_vm10, %v3447_v9, %v3538_v11 }
 0x2b0   : > { %v3573_v6 = vsel %vm3504_vm11, %v3458_v47, %v3541_v38 }
 0x2b1   : > { %v5114_v46 = vpop.f32.mrb[220].mxu0  ;;  %v3571_v50 = vsel %vm3502_vm12, %v3450_v49, %v3539_v57  ;;  %v3591_v62 = vpack.c.bf16 %v3573_v6, %v3572_v32 }
 0x2b2   : > { %v3471_v30 = vadd.f32 %v5114_v46, %v6482_v7  ;;  %v3462_v31 = vpop.f32.mrb[221].mxu0  ;;  %v3590_v28 = vpack.c.bf16 %v3571_v50, %v3570_v16 }
 0x2b3   : > { %v3463_v17 = vadd.f32 %v3462_v31, %v6476_v33  ;;  %v5115_v25 = vpop.f32.mrb[222].mxu0 }
 0x2b4   : > { %v3544_v20 = vmul.f32 %v6487_v37, %v3471_v30  ;;  %v3474_v48 = vadd.f32 %v5115_v25, %v6490_v21  ;;  %v3465_v29 = vpop.f32.mrb[223].mxu0  ;;  %5156 = vmatprep.mubr.bf16.mxu1 %v3590_v28  ;;  %vm3507_vm13 = vcmp.ge.f32.partialorder %v3471_v30, 0.0 }
 0x2b5   : > { %v3542_v63 = vmul.f32 %v6487_v37, %v3463_v17  ;;  %v3466_v51 = vadd.f32 %v3465_v29, %v6478_v22  ;;  %5157 = vmatmul.mubr.bf16.gmra.mrb[216].mxu1 %v3591_v62  ;;  %vm3505_vm14 = vcmp.ge.f32.partialorder %v3463_v17, 0.0  ;;  %v6558_v22 = vld [vmem:[%s6674_s4] ss:$0 sm:$0xff] }
 0x2b6   : > { %vm3508_vm15 = vcmp.ge.f32.partialorder %v3474_v48, 0.0  ;;  %v3545_v7 = vmul.f32 %v6487_v37, %v3474_v48  ;;  %v3576_v35 = vsel %vm3507_vm13, %v3471_v30, %v3544_v20 }
 0x2b7   : > { %vm3506_vm0 = vcmp.ge.f32.partialorder %v3466_v51, 0.0  ;;  %v3543_v33 = vmul.f32 %v6487_v37, %v3466_v51  ;;  %v3574_v1 = vsel %vm3505_vm14, %v3463_v17, %v3542_v63 }
 0x2b8   : > { %v3577_v5 = vsel %vm3508_vm15, %v3474_v48, %v3545_v7 }
 0x2b9   : > { %v3575_v21 = vsel %vm3506_vm0, %v3466_v51, %v3543_v33  ;;  %v3593_v12 = vpack.c.bf16 %v3577_v5, %v3576_v35 }
 0x2ba   : > { %v3592_v23 = vpack.c.bf16 %v3575_v21, %v3574_v1 }
 0x2bc   : > { %5160 = vmatprep.mubr.bf16.mxu1 %v3592_v23 }
 0x2bd   : > { %5161 = vmatmul.mubr.bf16.gmra.mrb[220].mxu1 %v3593_v12 }
 0x358   : > { %v5134_v54 = vpop.f32.mrb[192].mxu1 }
 0x359   : > { %v3706_v37 = vadd.f32 %v5134_v54, %v6558_v22  ;;  %v3697_v26 = vpop.f32.mrb[193].mxu1 }
 0x35a   : > { %v3698_v34 = vadd.f32 %v6558_v22, %v3697_v26  ;;  %v5135_v41 = vpop.f32.mrb[194].mxu1 }
 0x35b   : > { %vm3826_vm1 = vcmp.ge.f32.partialorder %v3706_v37, 0.0  ;;  %v3863_v19 = vmul.f32 %v6564_v58, %v3706_v37  ;;  %v3709_v39 = vadd.f32 %v5135_v41, %v6558_v22  ;;  %v3700_v42 = vpop.f32.mrb[195].mxu1 }
 0x35c   : > { %vm3824_vm2 = vcmp.ge.f32.partialorder %v3698_v34, 0.0  ;;  %v3861_v61 = vmul.f32 %v6564_v58, %v3698_v34  ;;  %v3701_v3 = vadd.f32 %v6558_v22, %v3700_v42 }
 0x35d   : > { %v3895_v40 = vsel %vm3826_vm1, %v3706_v37, %v3863_v19  ;;  %vm3827_vm3 = vcmp.ge.f32.partialorder %v3709_v39, 0.0  ;;  %v3864_v4 = vmul.f32 %v6564_v58, %v3709_v39 }
 0x35e   : > { %3927 = vst [vmem:[%s6571_s28 + $0x10] sm:$0xff] %v3895_v40  ;;  %v3893_v0 = vsel %vm3824_vm2, %v3698_v34, %v3861_v61  ;;  %vm3825_vm4 = vcmp.ge.f32.partialorder %v3701_v3, 0.0  ;;  %v3862_v53 = vmul.f32 %v6564_v58, %v3701_v3 }
 0x35f   : > { %3925 = vst [vmem:[%s6571_s28] sm:$0xff] %v3893_v0  ;;  %v3896_v55 = vsel %vm3827_vm3, %v3709_v39, %v3864_v4 }
 0x360   : > { %3928 = vst [vmem:[%s6571_s28 + $0x18] sm:$0xff] %v3896_v55  ;;  %v3894_v8 = vsel %vm3825_vm4, %v3701_v3, %v3862_v53  ;;  %v5138_v60 = vpop.f32.mrb[196].mxu1 }
 0x361   : > { %3926 = vst [vmem:[%s6571_s28 + $0x8] sm:$0xff] %v3894_v8  ;;  %v3722_v13 = vadd.f32 %v5138_v60, %v6558_v22  ;;  %v3713_v36 = vpop.f32.mrb[197].mxu1 }
 0x362   : > { %v3714_v15 = vadd.f32 %v6558_v22, %v3713_v36  ;;  %v5139_v59 = vpop.f32.mrb[198].mxu1 }
 0x363   : > { %vm3830_vm5 = vcmp.ge.f32.partialorder %v3722_v13, 0.0  ;;  %v3867_v2 = vmul.f32 %v6564_v58, %v3722_v13  ;;  %v3725_v24 = vadd.f32 %v5139_v59, %v6558_v22  ;;  %v3716_v14 = vpop.f32.mrb[199].mxu1 }
 0x364   : > { %vm3828_vm6 = vcmp.ge.f32.partialorder %v3714_v15, 0.0  ;;  %v3865_v45 = vmul.f32 %v6564_v58, %v3714_v15  ;;  %v3717_v56 = vadd.f32 %v6558_v22, %v3716_v14 }
 0x365   : > { %v3899_v44 = vsel %vm3830_vm5, %v3722_v13, %v3867_v2  ;;  %vm3831_vm7 = vcmp.ge.f32.partialorder %v3725_v24, 0.0  ;;  %v3868_v43 = vmul.f32 %v6564_v58, %v3725_v24 }
 0x366   : > { %3931 = vst [vmem:[%s6571_s28 + $0x30] sm:$0xff] %v3899_v44  ;;  %v3897_v27 = vsel %vm3828_vm6, %v3714_v15, %v3865_v45  ;;  %vm3829_vm8 = vcmp.ge.f32.partialorder %v3717_v56, 0.0  ;;  %v3866_v9 = vmul.f32 %v6564_v58, %v3717_v56 }
 0x367   : > { %3929 = vst [vmem:[%s6571_s28 + $0x20] sm:$0xff] %v3897_v27  ;;  %v3900_v52 = vsel %vm3831_vm7, %v3725_v24, %v3868_v43 }
 0x368   : > { %3932 = vst [vmem:[%s6571_s28 + $0x38] sm:$0xff] %v3900_v52  ;;  %v3898_v10 = vsel %vm3829_vm8, %v3717_v56, %v3866_v9  ;;  %v5142_v47 = vpop.f32.mrb[200].mxu1 }
 0x369   : > { %3930 = vst [vmem:[%s6571_s28 + $0x28] sm:$0xff] %v3898_v10  ;;  %v3738_v18 = vadd.f32 %v5142_v47, %v6558_v22  ;;  %v3729_v11 = vpop.f32.mrb[201].mxu1 }
 0x36a   : > { %v3730_v49 = vadd.f32 %v6558_v22, %v3729_v11  ;;  %v5143_v38 = vpop.f32.mrb[202].mxu1 }
 0x36b   : > { %vm3834_vm9 = vcmp.ge.f32.partialorder %v3738_v18, 0.0  ;;  %v3871_v57 = vmul.f32 %v6564_v58, %v3738_v18  ;;  %v3741_v32 = vadd.f32 %v5143_v38, %v6558_v22  ;;  %v3732_v6 = vpop.f32.mrb[203].mxu1 }
 0x36c   : > { %vm3832_vm10 = vcmp.ge.f32.partialorder %v3730_v49, 0.0  ;;  %v3869_v46 = vmul.f32 %v6564_v58, %v3730_v49  ;;  %v3733_v16 = vadd.f32 %v6558_v22, %v3732_v6 }
 0x36d   : > { %v3903_v50 = vsel %vm3834_vm9, %v3738_v18, %v3871_v57  ;;  %vm3835_vm11 = vcmp.ge.f32.partialorder %v3741_v32, 0.0  ;;  %v3872_v62 = vmul.f32 %v6564_v58, %v3741_v32 }
 0x36e   : > { %3935 = vst [vmem:[%s6571_s28 + $0x50] sm:$0xff] %v3903_v50  ;;  %v3901_v30 = vsel %vm3832_vm10, %v3730_v49, %v3869_v46  ;;  %vm3833_vm12 = vcmp.ge.f32.partialorder %v3733_v16, 0.0  ;;  %v3870_v31 = vmul.f32 %v6564_v58, %v3733_v16 }
 0x36f   : > { %3933 = vst [vmem:[%s6571_s28 + $0x40] sm:$0xff] %v3901_v30  ;;  %v3904_v28 = vsel %vm3835_vm11, %v3741_v32, %v3872_v62 }
 0x370   : > { %3936 = vst [vmem:[%s6571_s28 + $0x58] sm:$0xff] %v3904_v28  ;;  %v3902_v17 = vsel %vm3833_vm12, %v3733_v16, %v3870_v31  ;;  %v5146_v25 = vpop.f32.mrb[204].mxu1 }
 0x371   : > { %3934 = vst [vmem:[%s6571_s28 + $0x48] sm:$0xff] %v3902_v17  ;;  %v3754_v20 = vadd.f32 %v5146_v25, %v6558_v22  ;;  %v3745_v48 = vpop.f32.mrb[205].mxu1 }
 0x372   : > { %v3746_v29 = vadd.f32 %v6558_v22, %v3745_v48  ;;  %v5147_v63 = vpop.f32.mrb[206].mxu1 }
 0x373   : > { %vm3838_vm13 = vcmp.ge.f32.partialorder %v3754_v20, 0.0  ;;  %v3875_v51 = vmul.f32 %v6564_v58, %v3754_v20  ;;  %v3757_v7 = vadd.f32 %v5147_v63, %v6558_v22  ;;  %v3748_v33 = vpop.f32.mrb[207].mxu1 }
 0x374   : > { %vm3836_vm14 = vcmp.ge.f32.partialorder %v3746_v29, 0.0  ;;  %v3873_v35 = vmul.f32 %v6564_v58, %v3746_v29  ;;  %v3749_v5 = vadd.f32 %v6558_v22, %v3748_v33 }
 0x375   : > { %v3907_v1 = vsel %vm3838_vm13, %v3754_v20, %v3875_v51  ;;  %vm3839_vm15 = vcmp.ge.f32.partialorder %v3757_v7, 0.0  ;;  %v3876_v21 = vmul.f32 %v6564_v58, %v3757_v7 }
 0x376   : > { %3939 = vst [vmem:[%s6571_s28 + $0x70] sm:$0xff] %v3907_v1  ;;  %v3905_v12 = vsel %vm3836_vm14, %v3746_v29, %v3873_v35  ;;  %vm3837_vm0 = vcmp.ge.f32.partialorder %v3749_v5, 0.0  ;;  %v3874_v23 = vmul.f32 %v6564_v58, %v3749_v5 }
 0x377   : > { %3937 = vst [vmem:[%s6571_s28 + $0x60] sm:$0xff] %v3905_v12  ;;  %v3908_v54 = vsel %vm3839_vm15, %v3757_v7, %v3876_v21 }
 0x378   : > { %3940 = vst [vmem:[%s6571_s28 + $0x78] sm:$0xff] %v3908_v54  ;;  %v3906_v37 = vsel %vm3837_vm0, %v3749_v5, %v3874_v23  ;;  %v5150_v26 = vpop.f32.mrb[208].mxu1 }
 0x379   : > { %3938 = vst [vmem:[%s6571_s28 + $0x68] sm:$0xff] %v3906_v37  ;;  %v3770_v34 = vadd.f32 %v5150_v26, %v6558_v22  ;;  %v3761_v41 = vpop.f32.mrb[209].mxu1 }
 0x37a   : > { %v3762_v19 = vadd.f32 %v6558_v22, %v3761_v41  ;;  %v5151_v39 = vpop.f32.mrb[210].mxu1 }
 0x37b   : > { %vm3842_vm1 = vcmp.ge.f32.partialorder %v3770_v34, 0.0  ;;  %v3879_v42 = vmul.f32 %v6564_v58, %v3770_v34  ;;  %v3773_v61 = vadd.f32 %v5151_v39, %v6558_v22  ;;  %v3764_v3 = vpop.f32.mrb[211].mxu1 }
 0x37c   : > { %vm3840_vm2 = vcmp.ge.f32.partialorder %v3762_v19, 0.0  ;;  %v3877_v40 = vmul.f32 %v6564_v58, %v3762_v19  ;;  %v3765_v4 = vadd.f32 %v6558_v22, %v3764_v3 }
 0x37d   : > { %v3911_v0 = vsel %vm3842_vm1, %v3770_v34, %v3879_v42  ;;  %vm3843_vm3 = vcmp.ge.f32.partialorder %v3773_v61, 0.0  ;;  %v3880_v53 = vmul.f32 %v6564_v58, %v3773_v61 }
 0x37e   : > { %3943 = vst [vmem:[%s6571_s28 + $0x90] sm:$0xff] %v3911_v0  ;;  %v3909_v55 = vsel %vm3840_vm2, %v3762_v19, %v3877_v40  ;;  %vm3841_vm4 = vcmp.ge.f32.partialorder %v3765_v4, 0.0  ;;  %v3878_v8 = vmul.f32 %v6564_v58, %v3765_v4 }
 0x37f   : > { %3941 = vst [vmem:[%s6571_s28 + $0x80] sm:$0xff] %v3909_v55  ;;  %v3912_v60 = vsel %vm3843_vm3, %v3773_v61, %v3880_v53 }
 0x380   : > { %3944 = vst [vmem:[%s6571_s28 + $0x98] sm:$0xff] %v3912_v60  ;;  %v3910_v13 = vsel %vm3841_vm4, %v3765_v4, %v3878_v8  ;;  %v5154_v36 = vpop.f32.mrb[212].mxu1 }
 0x381   : > { %3942 = vst [vmem:[%s6571_s28 + $0x88] sm:$0xff] %v3910_v13  ;;  %v3786_v15 = vadd.f32 %v5154_v36, %v6558_v22  ;;  %v3777_v59 = vpop.f32.mrb[213].mxu1 }
 0x382   : > { %v3778_v2 = vadd.f32 %v6558_v22, %v3777_v59  ;;  %v5155_v24 = vpop.f32.mrb[214].mxu1 }
 0x383   : > { %vm3846_vm5 = vcmp.ge.f32.partialorder %v3786_v15, 0.0  ;;  %v3883_v14 = vmul.f32 %v6564_v58, %v3786_v15  ;;  %v3789_v45 = vadd.f32 %v5155_v24, %v6558_v22  ;;  %v3780_v56 = vpop.f32.mrb[215].mxu1 }
 0x384   : > { %vm3844_vm6 = vcmp.ge.f32.partialorder %v3778_v2, 0.0  ;;  %v3881_v44 = vmul.f32 %v6564_v58, %v3778_v2  ;;  %v3781_v43 = vadd.f32 %v6558_v22, %v3780_v56 }
 0x385   : > { %v3915_v27 = vsel %vm3846_vm5, %v3786_v15, %v3883_v14  ;;  %vm3847_vm7 = vcmp.ge.f32.partialorder %v3789_v45, 0.0  ;;  %v3884_v9 = vmul.f32 %v6564_v58, %v3789_v45 }
 0x386   : > { %3947 = vst [vmem:[%s6571_s28 + $0xb0] sm:$0xff] %v3915_v27  ;;  %v3913_v52 = vsel %vm3844_vm6, %v3778_v2, %v3881_v44  ;;  %vm3845_vm8 = vcmp.ge.f32.partialorder %v3781_v43, 0.0  ;;  %v3882_v10 = vmul.f32 %v6564_v58, %v3781_v43 }
 0x387   : > { %3945 = vst [vmem:[%s6571_s28 + $0xa0] sm:$0xff] %v3913_v52  ;;  %v3916_v47 = vsel %vm3847_vm7, %v3789_v45, %v3884_v9 }
 0x388   : > { %3948 = vst [vmem:[%s6571_s28 + $0xb8] sm:$0xff] %v3916_v47  ;;  %v3914_v18 = vsel %vm3845_vm8, %v3781_v43, %v3882_v10  ;;  %v5158_v11 = vpop.f32.mrb[216].mxu1 }
 0x389   : > { %3946 = vst [vmem:[%s6571_s28 + $0xa8] sm:$0xff] %v3914_v18  ;;  %v3802_v49 = vadd.f32 %v5158_v11, %v6558_v22  ;;  %v3793_v38 = vpop.f32.mrb[217].mxu1 }
 0x38a   : > { %v3794_v57 = vadd.f32 %v6558_v22, %v3793_v38  ;;  %v5159_v32 = vpop.f32.mrb[218].mxu1 }
 0x38b   : > { %vm3850_vm9 = vcmp.ge.f32.partialorder %v3802_v49, 0.0  ;;  %v3887_v6 = vmul.f32 %v6564_v58, %v3802_v49  ;;  %v3805_v46 = vadd.f32 %v5159_v32, %v6558_v22  ;;  %v3796_v16 = vpop.f32.mrb[219].mxu1 }
 0x38c   : > { %vm3848_vm10 = vcmp.ge.f32.partialorder %v3794_v57, 0.0  ;;  %v3885_v50 = vmul.f32 %v6564_v58, %v3794_v57  ;;  %v3797_v62 = vadd.f32 %v6558_v22, %v3796_v16 }
 0x38d   : > { %v3919_v30 = vsel %vm3850_vm9, %v3802_v49, %v3887_v6  ;;  %vm3851_vm11 = vcmp.ge.f32.partialorder %v3805_v46, 0.0  ;;  %v3888_v31 = vmul.f32 %v6564_v58, %v3805_v46 }
 0x38e   : > { %3951 = vst [vmem:[%s6571_s28 + $0xd0] sm:$0xff] %v3919_v30  ;;  %v3917_v28 = vsel %vm3848_vm10, %v3794_v57, %v3885_v50  ;;  %vm3849_vm12 = vcmp.ge.f32.partialorder %v3797_v62, 0.0  ;;  %v3886_v17 = vmul.f32 %v6564_v58, %v3797_v62 }
 0x38f   : > { %3949 = vst [vmem:[%s6571_s28 + $0xc0] sm:$0xff] %v3917_v28  ;;  %v3920_v25 = vsel %vm3851_vm11, %v3805_v46, %v3888_v31 }
 0x390   : > { %3952 = vst [vmem:[%s6571_s28 + $0xd8] sm:$0xff] %v3920_v25  ;;  %v3918_v20 = vsel %vm3849_vm12, %v3797_v62, %v3886_v17  ;;  %v5162_v48 = vpop.f32.mrb[220].mxu1 }
 0x391   : > { %3950 = vst [vmem:[%s6571_s28 + $0xc8] sm:$0xff] %v3918_v20  ;;  %v3818_v29 = vadd.f32 %v5162_v48, %v6558_v22  ;;  %v3809_v63 = vpop.f32.mrb[221].mxu1 }
 0x392   : > { %v3810_v51 = vadd.f32 %v6558_v22, %v3809_v63  ;;  %v5163_v7 = vpop.f32.mrb[222].mxu1 }
 0x393   : > { %vm3854_vm13 = vcmp.ge.f32.partialorder %v3818_v29, 0.0  ;;  %v3891_v33 = vmul.f32 %v6564_v58, %v3818_v29  ;;  %v3821_v35 = vadd.f32 %v5163_v7, %v6558_v22  ;;  %v3812_v5 = vpop.f32.mrb[223].mxu1 }
 0x394   : > { %vm3852_vm14 = vcmp.ge.f32.partialorder %v3810_v51, 0.0  ;;  %v3889_v1 = vmul.f32 %v6564_v58, %v3810_v51  ;;  %v3813_v21 = vadd.f32 %v6558_v22, %v3812_v5 }
 0x395   : > { %v3923_v12 = vsel %vm3854_vm13, %v3818_v29, %v3891_v33  ;;  %vm3855_vm15 = vcmp.ge.f32.partialorder %v3821_v35, 0.0  ;;  %v3892_v23 = vmul.f32 %v6564_v58, %v3821_v35 }
 0x396   : > { %3955 = vst [vmem:[%s6571_s28 + $0xf0] sm:$0xff] %v3923_v12  ;;  %v3921_v54 = vsel %vm3852_vm14, %v3810_v51, %v3889_v1  ;;  %vm3853_vm0 = vcmp.ge.f32.partialorder %v3813_v21, 0.0  ;;  %v3890_v37 = vmul.f32 %v6564_v58, %v3813_v21 }
 0x397   : > { %3953 = vst [vmem:[%s6571_s28 + $0xe0] sm:$0xff] %v3921_v54  ;;  %v3924_v26 = vsel %vm3855_vm15, %v3821_v35, %v3892_v23 }
 0x398   : > { %3956 = vst [vmem:[%s6571_s28 + $0xf8] sm:$0xff] %v3924_v26  ;;  %v3922_v34 = vsel %vm3853_vm0, %v3813_v21, %v3890_v37 }
 0x399   : > { %3954 = vst [vmem:[%s6571_s28 + $0xe8] sm:$0xff] %v3922_v34 }
 0x39a PF: > { %s15_s18 = sadd.s32 1, %s5591_s18  }
 0x39b   : > { %p12_p4 = scmp.ge.s32.totalorder %s15_s18, 4  }
 0x39d   :  { %14 = sbr.rel (!%p12_p4) target bundleno = 1 (0x1), region = 70 }

// kernel: forward.21
= control target key start
LH: loop header
LB: loop body
LE: loop exit
PB: predicated region body
PF: predicated region fallthrough
CT: control target
= control target key end

     0   :  { %s2072_s18 = smov 0   ;;  %s2497_s0 = inlined_call_operand.vmem [shape: bf16[512,288], index: 0, kind: input, shape index: {}]   ;;  %s2498_s1 = inlined_call_operand.vmem [shape: bf16[288,128], index: 1, kind: input, shape index: {}]   ;;  %s2499_s2 = inlined_call_operand.vmem [shape: f32[8,128], index: 2, kind: input, shape index: {}]   ;;  %s2500_s3 = inlined_call_operand.vmem [shape: bf16[128,128], index: 3, kind: input, shape index: {}]   ;;  %s2501_s4 = inlined_call_operand.vmem [shape: f32[8,128], index: 4, kind: input, shape index: {}]   ;;  %s2502_s5 = inlined_call_operand.vmem [shape: f32[512,128], index: 5, kind: output, shape index: {}]  }
   0x1 LB: > { %s1592_s19 = sadd.s32 4294967295, %s2040_s18   ;;  %p1596_p0 = scmp.ge.s32.totalorder %s2040_s18, 1  ;;  %s2040_s18 = sphi %s2072_s18, %s15_s18  }
   0x2   : > { %p189_p1 = scmp.lt.s32.totalorder %s2040_s18, 3 }
   0x4   : > { %p190_p2 = pnand %p1596_p0, %p189_p1 }
   0x5   : > { %v1944_v0 = vld [vmem:[%s2498_s1 + $0x40] sm:$0xff] (!%p190_p2)   ;;  %s1597_s22 = sshll.u32 (!%p190_p2), %s1592_s19, 5  ;;  %v1946_v2 = vld [vmem:[%s2498_s1 + $0x48] sm:$0xff] (!%p190_p2)   ;;  %v1948_v4 = vld [vmem:[%s2498_s1 + $0x50] sm:$0xff] (!%p190_p2)   ;;  %vm685_vm0 = vcmask (!%p190_p2), 261120  }
   0x6   : > { %193 = sbr.rel (%p190_p2) target bundleno = 605 (0x25d), region = 40  ;;  %v1945_v1 = vld [vmem:[%s2498_s1] sm:$0xff] (!%p190_p2)   ;;  %1697 = vmatprep.subr.bf16.mxu0 (!%p190_p2), %v1944_v0  ;;  %v1947_v3 = vld [vmem:[%s2498_s1 + $0x8] sm:$0xff] (!%p190_p2)   ;;  %p219_p3 = scmp.lt.s32.totalorder (!%p190_p2), %s1597_s22, 63  ;;  %v1949_v5 = vld [vmem:[%s2498_s1 + $0x10] sm:$0xff] (!%p190_p2)  }
   0x7   : > { %1698 = vmatpush3.bf16.msra.mxu0 (!%p190_p2), %v1945_v1  ;;  %v1950_v6 = vld [vmem:[%s2498_s1 + $0x58] sm:$0xff] (!%p190_p2)   ;;  %v1952_v8 = vld [vmem:[%s2498_s1 + $0x60] sm:$0xff] (!%p190_p2)   ;;  %v1954_v11 = vld [vmem:[%s2498_s1 + $0x68] sm:$0xff] (!%p190_p2)  }
   0x8   : > { %1699 = vmatprep.subr.bf16.mxu0 (!%p190_p2), %v1946_v2  ;;  %v1951_v7 = vld [vmem:[%s2498_s1 + $0x18] sm:$0xff] (!%p190_p2)   ;;  %v1953_v9 = vld [vmem:[%s2498_s1 + $0x20] sm:$0xff] (!%p190_p2)   ;;  %v1955_v12 = vld [vmem:[%s2498_s1 + $0x28] sm:$0xff] (!%p190_p2)  }
   0x9   : > { %v1959_v10 = vld [vmem:[%s2498_s1 + $0x80] sm:$0xff] (!%p190_p2)   ;;  %v1956_v13 = vld [vmem:[%s2498_s1 + $0x70] sm:$0xff] (!%p190_p2)   ;;  %v1964_v15 = vld [vmem:[%s2498_s1 + $0x88] sm:$0xff] (!%p190_p2)  }
   0xa   : > { %1851 = vmatprep.subr.bf16.mxu1 (!%p190_p2), %v1959_v10  ;;  %v1957_v18 = vld [vmem:[%s2498_s1 + $0x30] sm:$0xff] (!%p190_p2)   ;;  %v1958_v19 = vld [vmem:[%s2498_s1 + $0x78] sm:$0xff] (!%p190_p2)   ;;  %v2026_v38 = vld [vmem:[%s2500_s3] sm:$0xff] (!%p190_p2)  }
   0xb   : > { %1700 = vmatpush3.bf16.msra.mxu0 (!%p190_p2), %v1947_v3  ;;  %1852 = vmatpush3.bf16.msra.mxu1 (!%p190_p2), %v1959_v10  ;;  %v1960_v21 = vld [vmem:[%s2498_s1 + $0x38] sm:$0xff] (!%p190_p2)   ;;  %v2027_v39 = vld [vmem:[%s2500_s3 + $0x8] sm:$0xff] (!%p190_p2)   ;;  %v2028_v41 = vld [vmem:[%s2500_s3 + $0x10] sm:$0xff] (!%p190_p2)  }
   0xc   : > { %1701 = vmatprep.subr.bf16.mxu0 (!%p190_p2), %v1948_v4  ;;  %1853 = vmatprep.subr.bf16.mxu1 (!%p190_p2), %v1964_v15  ;;  %v2029_v61 = vld [vmem:[%s2500_s3 + $0x18] sm:$0xff] (!%p190_p2)   ;;  %v2030_v63 = vld [vmem:[%s2500_s3 + $0x20] sm:$0xff] (!%p190_p2)   ;;  %v2031_v1 = vld [vmem:[%s2500_s3 + $0x28] sm:$0xff] (!%p190_p2)  }
   0xd   : > { %s2504_s22 = smov (!%p219_p3, %s1597_s22), 63  ;;  %v2032_v3 = vld [vmem:[%s2500_s3 + $0x30] sm:$0xff]  }
   0xe   : > { %s1935_s12 = smul.u32 12, %s2504_s22 }
   0xf   : > { %1702 = vmatpush3.bf16.msra.mxu0 %v1949_v5  ;;  %1854 = vmatpush3.bf16.msra.mxu1 %v1964_v15  ;;  %v2033_v5 = vld [vmem:[%s2500_s3 + $0x38] sm:$0xff]  }
  0x10   : > { %1703 = vmatprep.subr.bf16.mxu0 %v1950_v6  ;;  %s2119_s23 = scalar_lea.vmem %s2497_s0, %s1935_s12  ;;  %1887 = vmatprep.subr.bf16.mxu1 %v2026_v38  ;;  %s1600_s12 = sshll.u32 %s2504_s22, 3 }
  0x11   : > { %v1963_v14 = vld [vmem:[%s2119_s23 + $0x4] ss:$12 sps:$4 sm:$0xff]   ;;  %v1965_v16 = vld [vmem:[%s2119_s23 + $0x8] ss:$12 sps:$4 sm:$0xff]   ;;  %v1966_v17 = vld [vmem:[%s2119_s23 + $0x20] ss:$12 sps:$4 sm:$0xff]   ;;  %s2398_s17 = scalar_lea.vmem %s2502_s5, %s1600_s12 }
  0x12   : > { %766 = vmatprep.mubr.bf16.mxu0 %v1963_v14  ;;  %1855 = vmatprep.mubr.msk.bf16.mxu1 %vm685_vm0, %v1965_v16  ;;  %v1973_v20 = vld [vmem:[%s2119_s23 + $0x38] ss:$12 sps:$4 sm:$0xff]   ;;  %v1961_v22 = vld [vmem:[%s2119_s23] ss:$12 sps:$4 sm:$0xff]   ;;  %v1974_v23 = vld [vmem:[%s2119_s23 + $0x50] ss:$12 sps:$4 sm:$0xff]  }
  0x13   : > { %1704 = vmatpush3.bf16.msra.mxu0 %v1951_v7  ;;  %1856 = vmatmul.mubr.msk.bf16.vlgmr.msra.gmra.mrb[0].mxu1 %vm685_vm0, %v1966_v17  ;;  %v1981_v24 = vld [vmem:[%s2119_s23 + $0x68] ss:$12 sps:$4 sm:$0xff]   ;;  %v1969_v26 = vld [vmem:[%s2119_s23 + $0x18] ss:$12 sps:$4 sm:$0xff]   ;;  %v1982_v27 = vld [vmem:[%s2119_s23 + $0x80] ss:$12 sps:$4 sm:$0xff]  }
  0x14   : > { %1705 = vmatprep.subr.bf16.mxu0 %v1952_v8  ;;  %1859 = vmatprep.mubr.msk.bf16.mxu1 %vm685_vm0, %v1973_v20  ;;  %v1967_v25 = vld [vmem:[%s2119_s23 + $0x1c] ss:$12 sps:$4 sm:$0xff]   ;;  %v1989_v28 = vld [vmem:[%s2119_s23 + $0x98] ss:$12 sps:$4 sm:$0xff]   ;;  %v1970_v29 = vld [vmem:[%s2119_s23 + $0x34] ss:$12 sps:$4 sm:$0xff]  }
  0x15   : > { %v1972_v30 = vld [vmem:[%s2119_s23 + $0x30] ss:$12 sps:$4 sm:$0xff]   ;;  %v1997_v32 = vld [vmem:[%s2119_s23 + $0xc8] ss:$12 sps:$4 sm:$0xff]   ;;  %v1975_v33 = vld [vmem:[%s2119_s23 + $0x4c] ss:$12 sps:$4 sm:$0xff]   ;;  %1888 = vmatpush3.bf16.msra.mxu1 %v2026_v38 }
  0x16   : > { %v1990_v31 = vld [vmem:[%s2119_s23 + $0xb0] ss:$12 sps:$4 sm:$0xff]   ;;  %v1977_v34 = vld [vmem:[%s2119_s23 + $0x48] ss:$12 sps:$4 sm:$0xff]   ;;  %v1998_v35 = vld [vmem:[%s2119_s23 + $0xe0] ss:$12 sps:$4 sm:$0xff]   ;;  %1889 = vmatprep.subr.bf16.mxu1 %v2027_v39 }
  0x17   : > { %1706 = vmatpush3.bf16.msra.mxu0 %v1953_v9  ;;  %v2005_v36 = vld [vmem:[%s2119_s23 + $0xf8] ss:$12 sps:$4 sm:$0xff]   ;;  %v2006_v40 = vld [vmem:[%s2119_s23 + $0x110] ss:$12 sps:$4 sm:$0xff]   ;;  %v1980_v42 = vld [vmem:[%s2119_s23 + $0x60] ss:$12 sps:$4 sm:$0xff]  }
  0x18   : > { %1707 = vmatprep.subr.bf16.mxu0 %v1954_v11  ;;  %v1978_v37 = vld [vmem:[%s2119_s23 + $0x64] ss:$12 sps:$4 sm:$0xff]   ;;  %v2013_v43 = vld [vmem:[%s2119_s23 + $0x128] ss:$12 sps:$4 sm:$0xff]   ;;  %v2014_v45 = vld [vmem:[%s2119_s23 + $0x140] ss:$12 sps:$4 sm:$0xff]  }
  0x19   : > { %v1983_v44 = vld [vmem:[%s2119_s23 + $0x7c] ss:$12 sps:$4 sm:$0xff]   ;;  %1890 = vmatpush3.bf16.msra.mxu1 %v2027_v39  ;;  %v1985_v46 = vld [vmem:[%s2119_s23 + $0x78] ss:$12 sps:$4 sm:$0xff]   ;;  %v1986_v48 = vld [vmem:[%s2119_s23 + $0x94] ss:$12 sps:$4 sm:$0xff]  }
  0x1a   : > { %1891 = vmatprep.subr.bf16.mxu1 %v2028_v41  ;;  %v2021_v47 = vld [vmem:[%s2119_s23 + $0x158] ss:$12 sps:$4 sm:$0xff]   ;;  %v2022_v49 = vld [vmem:[%s2119_s23 + $0x170] ss:$12 sps:$4 sm:$0xff]   ;;  %v1993_v52 = vld [vmem:[%s2119_s23 + $0xa8] ss:$12 sps:$4 sm:$0xff]  }
  0x1b   : > { %1708 = vmatpush3.bf16.msra.mxu0 %v1955_v12  ;;  %1860 = vmatmul.mubr.msk.bf16.gmra.mrb[4].mxu1 %vm685_vm0, %v1974_v23  ;;  %v1988_v50 = vld [vmem:[%s2119_s23 + $0x90] ss:$12 sps:$4 sm:$0xff]   ;;  %v1991_v51 = vld [vmem:[%s2119_s23 + $0xac] ss:$12 sps:$4 sm:$0xff]   ;;  %v2002_v57 = vld [vmem:[%s2119_s23 + $0xf4] ss:$12 sps:$4 sm:$0xff]  }
  0x1c   : > { %1709 = vmatprep.subr.bf16.mxu0 %v1956_v13  ;;  %1863 = vmatprep.mubr.msk.bf16.mxu1 %vm685_vm0, %v1981_v24  ;;  %v1994_v53 = vld [vmem:[%s2119_s23 + $0xc4] ss:$12 sps:$4 sm:$0xff]   ;;  %v1996_v54 = vld [vmem:[%s2119_s23 + $0xc0] ss:$12 sps:$4 sm:$0xff]   ;;  %v1999_v55 = vld [vmem:[%s2119_s23 + $0xdc] ss:$12 sps:$4 sm:$0xff]  }
  0x1d   : > { %1892 = vmatpush3.bf16.msra.mxu1 %v2028_v41  ;;  %v2001_v56 = vld [vmem:[%s2119_s23 + $0xd8] ss:$12 sps:$4 sm:$0xff]   ;;  %v2004_v58 = vld [vmem:[%s2119_s23 + $0xf0] ss:$12 sps:$4 sm:$0xff]   ;;  %v2009_v60 = vld [vmem:[%s2119_s23 + $0x108] ss:$12 sps:$4 sm:$0xff]  }
  0x1e   : > { %v2007_v59 = vld [vmem:[%s2119_s23 + $0x10c] ss:$12 sps:$4 sm:$0xff]   ;;  %v2010_v62 = vld [vmem:[%s2119_s23 + $0x124] ss:$12 sps:$4 sm:$0xff]   ;;  %1893 = vmatprep.subr.bf16.mxu1 %v2029_v61  ;;  %v2015_v2 = vld [vmem:[%s2119_s23 + $0x13c] ss:$12 sps:$4 sm:$0xff]  }
  0x1f   : > { %1710 = vmatpush3.bf16.msra.mxu0 %v1957_v18  ;;  %v2012_v0 = vld [vmem:[%s2119_s23 + $0x120] ss:$12 sps:$4 sm:$0xff]   ;;  %v2017_v4 = vld [vmem:[%s2119_s23 + $0x138] ss:$12 sps:$4 sm:$0xff]   ;;  %v2020_v7 = vld [vmem:[%s2119_s23 + $0x150] ss:$12 sps:$4 sm:$0xff]  }
  0x20   : > { %1711 = vmatprep.subr.bf16.mxu0 %v1958_v19  ;;  %v2018_v6 = vld [vmem:[%s2119_s23 + $0x154] ss:$12 sps:$4 sm:$0xff]   ;;  %v2023_v8 = vld [vmem:[%s2119_s23 + $0x16c] ss:$12 sps:$4 sm:$0xff]  }
  0x21   : > { %1894 = vmatpush3.bf16.msra.mxu1 %v2029_v61  ;;  %v2025_v9 = vld [vmem:[%s2119_s23 + $0x168] ss:$12 sps:$4 sm:$0xff]   ;;  %v2235_v18 = vld [vmem:[%s2499_s2] ss:$0 sm:$0xff] }
  0x22   : > { %1895 = vmatprep.subr.bf16.mxu1 %v2030_v63 }
  0x23   : > { %1712 = vmatpush3.bf16.msra.mxu0 %v1960_v21  ;;  %1864 = vmatmul.mubr.msk.bf16.gmra.mrb[8].mxu1 %vm685_vm0, %v1982_v27 }
  0x24   : > { %1867 = vmatprep.mubr.msk.bf16.mxu1 %vm685_vm0, %v1989_v28 }
  0x25   : > { %1896 = vmatpush3.bf16.msra.mxu1 %v2030_v63 }
  0x26   : > { %767 = vmatmul.mubr.bf16.vlgmr.msra.gmra.mrb[0].mxu0 %v1961_v22  ;;  %1897 = vmatprep.subr.bf16.mxu1 %v2031_v1 }
  0x27   : > { %774 = vmatprep.mubr.bf16.mxu0 %v1967_v25 }
  0x29   : > { %1898 = vmatpush3.bf16.msra.mxu1 %v2031_v1 }
  0x2a   : > { %1899 = vmatprep.subr.bf16.mxu1 %v2032_v3 }
  0x2b   : > { %1868 = vmatmul.mubr.msk.bf16.gmra.mrb[12].mxu1 %vm685_vm0, %v1990_v31 }
  0x2c   : > { %1871 = vmatprep.mubr.msk.bf16.mxu1 %vm685_vm0, %v1997_v32 }
  0x2d   : > { %1900 = vmatpush3.bf16.msra.mxu1 %v2032_v3 }
  0x2e   : > { %775 = vmatmul.mubr.bf16.gmra.mrb[4].mxu0 %v1969_v26  ;;  %1901 = vmatprep.subr.bf16.mxu1 %v2033_v5  ;;  %v2243_v26 = vld [vmem:[%s2499_s2 + $0x1] ss:$0 sm:$0xff] }
  0x2f   : > { %782 = vmatprep.mubr.bf16.mxu0 %v1970_v29 }
  0x31   : > { %1902 = vmatpush3.bf16.msra.mxu1 %v2033_v5 }
  0x33   : > { %1872 = vmatmul.mubr.msk.bf16.gmra.mrb[16].mxu1 %vm685_vm0, %v1998_v35 }
  0x34   : > { %1875 = vmatprep.mubr.msk.bf16.mxu1 %vm685_vm0, %v2005_v36 }
  0x36   : > { %783 = vmatmul.mubr.bf16.gmra.mrb[8].mxu0 %v1972_v30 }
  0x37   : > { %790 = vmatprep.mubr.bf16.mxu0 %v1975_v33 }
  0x3b   : > { %1876 = vmatmul.mubr.msk.bf16.gmra.mrb[20].mxu1 %vm685_vm0, %v2006_v40 }
  0x3c   : > { %1879 = vmatprep.mubr.msk.bf16.mxu1 %vm685_vm0, %v2013_v43 }
  0x3e   : > { %791 = vmatmul.mubr.bf16.gmra.mrb[12].mxu0 %v1977_v34 }
  0x3f   : > { %798 = vmatprep.mubr.bf16.mxu0 %v1978_v37 }
  0x43   : > { %1880 = vmatmul.mubr.msk.bf16.gmra.mrb[24].mxu1 %vm685_vm0, %v2014_v45 }
  0x44   : > { %1883 = vmatprep.mubr.msk.bf16.mxu1 %vm685_vm0, %v2021_v47 }
  0x46   : > { %799 = vmatmul.mubr.bf16.gmra.mrb[16].mxu0 %v1980_v42 }
  0x47   : > { %806 = vmatprep.mubr.bf16.mxu0 %v1983_v44 }
  0x4b   : > { %1884 = vmatmul.mubr.msk.bf16.gmra.mrb[28].mxu1 %vm685_vm0, %v2022_v49 }
  0x4e   : > { %807 = vmatmul.mubr.bf16.gmra.mrb[20].mxu0 %v1985_v46 }
  0x4f   : > { %814 = vmatprep.mubr.bf16.mxu0 %v1986_v48 }
  0x56   : > { %815 = vmatmul.mubr.bf16.gmra.mrb[24].mxu0 %v1988_v50 }
  0x57   : > { %822 = vmatprep.mubr.bf16.mxu0 %v1991_v51 }
  0x5e   : > { %823 = vmatmul.mubr.bf16.gmra.mrb[28].mxu0 %v1993_v52 }
  0x5f   : > { %830 = vmatprep.mubr.bf16.mxu0 %v1994_v53 }
  0x66   : > { %831 = vmatmul.mubr.bf16.gmra.mrb[32].mxu0 %v1996_v54 }
  0x67   : > { %838 = vmatprep.mubr.bf16.mxu0 %v1999_v55 }
  0x6e   : > { %839 = vmatmul.mubr.bf16.gmra.mrb[36].mxu0 %v2001_v56 }
  0x6f   : > { %846 = vmatprep.mubr.bf16.mxu0 %v2002_v57 }
  0x76   : > { %847 = vmatmul.mubr.bf16.gmra.mrb[40].mxu0 %v2004_v58 }
  0x77   : > { %854 = vmatprep.mubr.bf16.mxu0 %v2007_v59 }
  0x7e   : > { %855 = vmatmul.mubr.bf16.gmra.mrb[44].mxu0 %v2009_v60 }
  0x7f   : > { %862 = vmatprep.mubr.bf16.mxu0 %v2010_v62 }
  0x86   : > { %863 = vmatmul.mubr.bf16.gmra.mrb[48].mxu0 %v2012_v0 }
  0x87   : > { %870 = vmatprep.mubr.bf16.mxu0 %v2015_v2 }
  0x8e   : > { %871 = vmatmul.mubr.bf16.gmra.mrb[52].mxu0 %v2017_v4 }
  0x8f   : > { %878 = vmatprep.mubr.bf16.mxu0 %v2018_v6 }
  0x96   : > { %879 = vmatmul.mubr.bf16.gmra.mrb[56].mxu0 %v2020_v7 }
  0x97   : > { %886 = vmatprep.mubr.bf16.mxu0 %v2023_v8 }
  0x9e   : > { %887 = vmatmul.mubr.bf16.gmra.mrb[60].mxu0 %v2025_v9 }
  0xe6   : > { %v1857_v10 = vpop.f32.mrb[0].mxu1 }
  0xe7   : > { %v929_v11 = vpop.f32.mrb[1].mxu1 }
  0xe8   : > { %v1858_v12 = vpop.f32.mrb[2].mxu1 }
  0xe9   : > { %v932_v13 = vpop.f32.mrb[3].mxu1 }
  0xee   : > { %v2230_v14 = vpop.f32.mrb[4].mxu1 }
  0xef   : > { %v945_v16 = vpop.f32.mrb[5].mxu1 }
  0xf0   : > { %v2237_v19 = vpop.f32.mrb[6].mxu1 }
  0xf1   : > { %v948_v22 = vpop.f32.mrb[7].mxu1 }
  0xf6   : > { %v2246_v29 = vpop.f32.mrb[8].mxu1 }
  0xf7   : > { %v2249_v33 = vpop.f32.mrb[9].mxu1 }
  0xf8   : > { %v2251_v35 = vpop.f32.mrb[10].mxu1 }
  0xf9   : > { %v1713_v15 = vpop.f32.mrb[0].mxu0  ;;  %v2254_v39 = vpop.f32.mrb[11].mxu1 }
  0xfa   : > { %v1714_v17 = vpop.f32.mrb[1].mxu0 }
  0xfb   : > { %v1715_v20 = vadd.f32 %v1714_v17, %v1713_v15  ;;  %v1716_v21 = vpop.f32.mrb[2].mxu0 }
  0xfc   : > { %v1717_v23 = vpop.f32.mrb[3].mxu0 }
  0xfd   : > { %v1718_v24 = vadd.f32 %v1717_v23, %v1716_v21  ;;  %v769_v25 = vadd.f32 %v1715_v20, %v2235_v18 }
  0xfe   : > { %v2258_v48 = vpop.f32.mrb[12].mxu1 }
  0xff   : > { %v930_v27 = vadd.f32 %v929_v11, %v769_v25  ;;  %v772_v28 = vadd.f32 %v1718_v24, %v2235_v18  ;;  %v2261_v52 = vpop.f32.mrb[13].mxu1 }
 0x100   : > { %v2263_v54 = vpop.f32.mrb[14].mxu1 }
 0x101   : > { %v1093_v30 = vmul.f32 %v2243_v26, %v930_v27  ;;  %v933_v31 = vadd.f32 %v932_v13, %v772_v28  ;;  %v1719_v32 = vpop.f32.mrb[4].mxu0  ;;  %vm1056_vm1 = vcmp.ge.f32.partialorder %v930_v27, 0.0  ;;  %v2266_v58 = vpop.f32.mrb[15].mxu1 }
 0x102   : > { %v1720_v34 = vpop.f32.mrb[5].mxu0 }
 0x103   : > { %vm1057_vm2 = vcmp.ge.f32.partialorder %v933_v31, 0.0  ;;  %v1094_v36 = vmul.f32 %v2243_v26, %v933_v31  ;;  %v1721_v37 = vadd.f32 %v1720_v34, %v1719_v32  ;;  %v1722_v38 = vpop.f32.mrb[6].mxu0  ;;  %v1125_v43 = vsel %vm1056_vm1, %v930_v27, %v1093_v30 }
 0x104   : > { %v1723_v40 = vpop.f32.mrb[7].mxu0 }
 0x105   : > { %v777_v41 = vadd.f32 %v1721_v37, %v2235_v18  ;;  %v1724_v42 = vadd.f32 %v1723_v40, %v1722_v38  ;;  %v1126_v44 = vsel %vm1057_vm2, %v933_v31, %v1094_v36 }
 0x106   : > { %v1157_v45 = vpack.c.bf16 %v1126_v44, %v1125_v43  ;;  %v2270_v3 = vpop.f32.mrb[16].mxu1 }
 0x107   : > { %v938_v46 = vadd.f32 %v1857_v10, %v777_v41  ;;  %v780_v47 = vadd.f32 %v1724_v42, %v2235_v18  ;;  %v2273_v7 = vpop.f32.mrb[17].mxu1 }
 0x108   : > { %1903 = vmatprep.mubr.bf16.mxu1 %v1157_v45  ;;  %v2275_v9 = vpop.f32.mrb[18].mxu1 }
 0x109   : > { %v1095_v49 = vmul.f32 %v2243_v26, %v938_v46  ;;  %v941_v50 = vadd.f32 %v1858_v12, %v780_v47  ;;  %v1725_v51 = vpop.f32.mrb[8].mxu0  ;;  %vm1058_vm3 = vcmp.ge.f32.partialorder %v938_v46, 0.0  ;;  %v2278_v13 = vpop.f32.mrb[19].mxu1 }
 0x10a   : > { %v1726_v53 = vpop.f32.mrb[9].mxu0 }
 0x10b   : > { %vm1059_vm4 = vcmp.ge.f32.partialorder %v941_v50, 0.0  ;;  %v1096_v55 = vmul.f32 %v2243_v26, %v941_v50  ;;  %v1727_v56 = vadd.f32 %v1726_v53, %v1725_v51  ;;  %v1728_v57 = vpop.f32.mrb[10].mxu0  ;;  %v1127_v60 = vsel %vm1058_vm3, %v938_v46, %v1095_v49 }
 0x10c   : > { %v1729_v59 = vpop.f32.mrb[11].mxu0 }
 0x10d   : > { %v1128_v61 = vsel %vm1059_vm4, %v941_v50, %v1096_v55  ;;  %v1730_v62 = vadd.f32 %v1729_v59, %v1728_v57  ;;  %v785_v63 = vadd.f32 %v1727_v56, %v2235_v18 }
 0x10e   : > { %v1158_v0 = vpack.c.bf16 %v1128_v61, %v1127_v60  ;;  %v2283_v25 = vpop.f32.mrb[20].mxu1 }
 0x10f   : > { %v946_v1 = vadd.f32 %v945_v16, %v785_v63  ;;  %v788_v2 = vadd.f32 %v1730_v62, %v2235_v18  ;;  %v2287_v31 = vpop.f32.mrb[21].mxu1 }
 0x110   : > { %1904 = vmatmul.mubr.bf16.vlgmr.msra.gmra.mrb[32].mxu1 %v1158_v0  ;;  %v2289_v34 = vpop.f32.mrb[22].mxu1 }
 0x111   : > { %v1097_v4 = vmul.f32 %v2243_v26, %v946_v1  ;;  %v949_v5 = vadd.f32 %v948_v22, %v788_v2  ;;  %v1731_v6 = vpop.f32.mrb[12].mxu0  ;;  %vm1060_vm5 = vcmp.ge.f32.partialorder %v946_v1, 0.0  ;;  %v2292_v38 = vpop.f32.mrb[23].mxu1 }
 0x112   : > { %v1732_v8 = vpop.f32.mrb[13].mxu0 }
 0x113   : > { %vm1061_vm6 = vcmp.ge.f32.partialorder %v949_v5, 0.0  ;;  %v1098_v10 = vmul.f32 %v2243_v26, %v949_v5  ;;  %v1733_v11 = vadd.f32 %v1732_v8, %v1731_v6  ;;  %v1734_v12 = vpop.f32.mrb[14].mxu0  ;;  %v1129_v20 = vsel %vm1060_vm5, %v946_v1, %v1097_v4 }
 0x114   : > { %v1735_v15 = vpop.f32.mrb[15].mxu0 }
 0x115   : > { %v793_v16 = vadd.f32 %v1733_v11, %v2235_v18  ;;  %v1736_v17 = vadd.f32 %v1735_v15, %v1734_v12  ;;  %v1130_v21 = vsel %vm1061_vm6, %v949_v5, %v1098_v10 }
 0x116   : > { %v1159_v22 = vpack.c.bf16 %v1130_v21, %v1129_v20  ;;  %v2297_v47 = vpop.f32.mrb[24].mxu1 }
 0x117   : > { %v954_v23 = vadd.f32 %v2230_v14, %v793_v16  ;;  %v796_v24 = vadd.f32 %v1736_v17, %v2235_v18  ;;  %v2301_v53 = vpop.f32.mrb[25].mxu1 }
 0x118   : > { %1907 = vmatprep.mubr.bf16.mxu1 %v1159_v22  ;;  %v2303_v56 = vpop.f32.mrb[26].mxu1 }
 0x119   : > { %v1099_v27 = vmul.f32 %v2243_v26, %v954_v23  ;;  %v957_v28 = vadd.f32 %v2237_v19, %v796_v24  ;;  %v1737_v30 = vpop.f32.mrb[16].mxu0  ;;  %vm1062_vm7 = vcmp.ge.f32.partialorder %v954_v23, 0.0  ;;  %v2306_v60 = vpop.f32.mrb[27].mxu1 }
 0x11a   : > { %v1738_v32 = vpop.f32.mrb[17].mxu0 }
 0x11b   : > { %v1100_v36 = vmul.f32 %v2243_v26, %v957_v28  ;;  %v1739_v37 = vadd.f32 %v1738_v32, %v1737_v30  ;;  %v1740_v14 = vpop.f32.mrb[18].mxu0  ;;  %vm1063_vm8 = vcmp.ge.f32.partialorder %v957_v28, 0.0  ;;  %v1131_v43 = vsel %vm1062_vm7, %v954_v23, %v1099_v27 }
 0x11c   : > { %v1741_v40 = vpop.f32.mrb[19].mxu0 }
 0x11d   : > { %v1742_v41 = vadd.f32 %v1741_v40, %v1740_v14  ;;  %v801_v42 = vadd.f32 %v1739_v37, %v2235_v18  ;;  %v1132_v19 = vsel %vm1063_vm8, %v957_v28, %v1100_v36 }
 0x11e   : > { %v1160_v44 = vpack.c.bf16 %v1132_v19, %v1131_v43  ;;  %v2311_v5 = vpop.f32.mrb[28].mxu1 }
 0x11f   : > { %v962_v45 = vadd.f32 %v2249_v33, %v801_v42  ;;  %v804_v46 = vadd.f32 %v1742_v41, %v2235_v18  ;;  %v2315_v11 = vpop.f32.mrb[29].mxu1 }
 0x120   : > { %1908 = vmatmul.mubr.bf16.gmra.mrb[36].mxu1 %v1160_v44  ;;  %v2317_v15 = vpop.f32.mrb[30].mxu1 }
 0x121   : > { %v1101_v49 = vmul.f32 %v2243_v26, %v962_v45  ;;  %v965_v50 = vadd.f32 %v2254_v39, %v804_v46  ;;  %v1743_v51 = vpop.f32.mrb[20].mxu0  ;;  %vm1064_vm9 = vcmp.ge.f32.partialorder %v962_v45, 0.0  ;;  %v2320_v20 = vpop.f32.mrb[31].mxu1 }
 0x122   : > { %v1744_v55 = vpop.f32.mrb[21].mxu0 }
 0x123   : > { %vm1065_vm10 = vcmp.ge.f32.partialorder %v965_v50, 0.0  ;;  %v1102_v57 = vmul.f32 %v2243_v26, %v965_v50  ;;  %v1745_v33 = vadd.f32 %v1744_v55, %v1743_v51  ;;  %v1746_v59 = vpop.f32.mrb[22].mxu0  ;;  %v1133_v0 = vsel %vm1064_vm9, %v962_v45, %v1101_v49 }
 0x124   : > { %v1747_v61 = vpop.f32.mrb[23].mxu0 }
 0x125   : > { %v809_v62 = vadd.f32 %v1745_v33, %v2235_v18  ;;  %v1748_v63 = vadd.f32 %v1747_v61, %v1746_v59  ;;  %v1134_v39 = vsel %vm1065_vm10, %v965_v50, %v1102_v57 }
 0x126   : > { %v1161_v1 = vpack.c.bf16 %v1134_v39, %v1133_v0 }
 0x127   : > { %v970_v2 = vadd.f32 %v2246_v29, %v809_v62  ;;  %v812_v4 = vadd.f32 %v1748_v63, %v2235_v18 }
 0x128   : > { %1911 = vmatprep.mubr.bf16.mxu1 %v1161_v1 }
 0x129   : > { %v1103_v6 = vmul.f32 %v2243_v26, %v970_v2  ;;  %v973_v8 = vadd.f32 %v2251_v35, %v812_v4  ;;  %v1749_v10 = vpop.f32.mrb[24].mxu0  ;;  %vm1066_vm11 = vcmp.ge.f32.partialorder %v970_v2, 0.0 }
 0x12a   : > { %v1750_v12 = vpop.f32.mrb[25].mxu0 }
 0x12b   : > { %v1104_v16 = vmul.f32 %v2243_v26, %v973_v8  ;;  %v1751_v17 = vadd.f32 %v1750_v12, %v1749_v10  ;;  %v1752_v29 = vpop.f32.mrb[26].mxu0  ;;  %vm1067_vm12 = vcmp.ge.f32.partialorder %v973_v8, 0.0  ;;  %v1135_v24 = vsel %vm1066_vm11, %v970_v2, %v1103_v6 }
 0x12c   : > { %v1753_v21 = vpop.f32.mrb[27].mxu0 }
 0x12d   : > { %v1754_v22 = vadd.f32 %v1753_v21, %v1752_v29  ;;  %v817_v23 = vadd.f32 %v1751_v17, %v2235_v18  ;;  %v1136_v35 = vsel %vm1067_vm12, %v973_v8, %v1104_v16 }
 0x12e   : > { %v1162_v27 = vpack.c.bf16 %v1136_v35, %v1135_v24 }
 0x12f   : > { %v978_v28 = vadd.f32 %v2261_v52, %v817_v23  ;;  %v820_v30 = vadd.f32 %v1754_v22, %v2235_v18 }
 0x130   : > { %1912 = vmatmul.mubr.bf16.gmra.mrb[40].mxu1 %v1162_v27 }
 0x131   : > { %v1105_v32 = vmul.f32 %v2243_v26, %v978_v28  ;;  %v981_v36 = vadd.f32 %v2266_v58, %v820_v30  ;;  %v1755_v37 = vpop.f32.mrb[28].mxu0  ;;  %vm1068_vm13 = vcmp.ge.f32.partialorder %v978_v28, 0.0 }
 0x132   : > { %v1756_v14 = vpop.f32.mrb[29].mxu0 }
 0x133   : > { %vm1069_vm14 = vcmp.ge.f32.partialorder %v981_v36, 0.0  ;;  %v1106_v40 = vmul.f32 %v2243_v26, %v981_v36  ;;  %v1757_v41 = vadd.f32 %v1756_v14, %v1755_v37  ;;  %v1758_v42 = vpop.f32.mrb[30].mxu0  ;;  %v1137_v52 = vsel %vm1068_vm13, %v978_v28, %v1105_v32 }
 0x134   : > { %v1759_v43 = vpop.f32.mrb[31].mxu0 }
 0x135   : > { %v825_v19 = vadd.f32 %v1757_v41, %v2235_v18  ;;  %v1760_v44 = vadd.f32 %v1759_v43, %v1758_v42  ;;  %v1138_v45 = vsel %vm1069_vm14, %v981_v36, %v1106_v40 }
 0x136   : > { %v1163_v46 = vpack.c.bf16 %v1138_v45, %v1137_v52 }
 0x137   : > { %v986_v49 = vadd.f32 %v2258_v48, %v825_v19  ;;  %v828_v50 = vadd.f32 %v1760_v44, %v2235_v18 }
 0x138   : > { %1915 = vmatprep.mubr.bf16.mxu1 %v1163_v46 }
 0x139   : > { %v1107_v58 = vmul.f32 %v2243_v26, %v986_v49  ;;  %v989_v51 = vadd.f32 %v2263_v54, %v828_v50  ;;  %v1761_v55 = vpop.f32.mrb[32].mxu0  ;;  %vm1070_vm15 = vcmp.ge.f32.partialorder %v986_v49, 0.0 }
 0x13a   : > { %v1762_v57 = vpop.f32.mrb[33].mxu0 }
 0x13b   : > { %v1108_v33 = vmul.f32 %v2243_v26, %v989_v51  ;;  %v1763_v59 = vadd.f32 %v1762_v57, %v1761_v55  ;;  %v1764_v61 = vpop.f32.mrb[34].mxu0  ;;  %vm1071_vm0 = vcmp.ge.f32.partialorder %v989_v51, 0.0  ;;  %v1139_v48 = vsel %vm1070_vm15, %v986_v49, %v1107_v58 }
 0x13c   : > { %v1765_v62 = vpop.f32.mrb[35].mxu0 }
 0x13d   : > { %v1766_v63 = vadd.f32 %v1765_v62, %v1764_v61  ;;  %v833_v0 = vadd.f32 %v1763_v59, %v2235_v18  ;;  %v1140_v39 = vsel %vm1071_vm0, %v989_v51, %v1108_v33 }
 0x13e   : > { %v1164_v1 = vpack.c.bf16 %v1140_v39, %v1139_v48 }
 0x13f   : > { %v994_v2 = vadd.f32 %v2273_v7, %v833_v0  ;;  %v836_v4 = vadd.f32 %v1766_v63, %v2235_v18 }
 0x140   : > { %1916 = vmatmul.mubr.bf16.gmra.mrb[44].mxu1 %v1164_v1 }
 0x141   : > { %v1109_v54 = vmul.f32 %v2243_v26, %v994_v2  ;;  %v997_v6 = vadd.f32 %v2278_v13, %v836_v4  ;;  %v1767_v8 = vpop.f32.mrb[36].mxu0  ;;  %vm1072_vm1 = vcmp.ge.f32.partialorder %v994_v2, 0.0 }
 0x142   : > { %v1768_v10 = vpop.f32.mrb[37].mxu0 }
 0x143   : > { %vm1073_vm2 = vcmp.ge.f32.partialorder %v997_v6, 0.0  ;;  %v1110_v12 = vmul.f32 %v2243_v26, %v997_v6  ;;  %v1769_v16 = vadd.f32 %v1768_v10, %v1767_v8  ;;  %v1770_v17 = vpop.f32.mrb[38].mxu0  ;;  %v1141_v7 = vsel %vm1072_vm1, %v994_v2, %v1109_v54 }
 0x144   : > { %v1771_v29 = vpop.f32.mrb[39].mxu0 }
 0x145   : > { %v841_v21 = vadd.f32 %v1769_v16, %v2235_v18  ;;  %v1772_v22 = vadd.f32 %v1771_v29, %v1770_v17  ;;  %v1142_v23 = vsel %vm1073_vm2, %v997_v6, %v1110_v12 }
 0x146   : > { %v1165_v24 = vpack.c.bf16 %v1142_v23, %v1141_v7 }
 0x147   : > { %v1002_v35 = vadd.f32 %v2270_v3, %v841_v21  ;;  %v844_v27 = vadd.f32 %v1772_v22, %v2235_v18 }
 0x148   : > { %1919 = vmatprep.mubr.bf16.mxu1 %v1165_v24 }
 0x149   : > { %v1111_v13 = vmul.f32 %v2243_v26, %v1002_v35  ;;  %v1005_v28 = vadd.f32 %v2275_v9, %v844_v27  ;;  %v1773_v30 = vpop.f32.mrb[40].mxu0  ;;  %vm1074_vm3 = vcmp.ge.f32.partialorder %v1002_v35, 0.0 }
 0x14a   : > { %v1774_v32 = vpop.f32.mrb[41].mxu0 }
 0x14b   : > { %v1112_v36 = vmul.f32 %v2243_v26, %v1005_v28  ;;  %v1775_v37 = vadd.f32 %v1774_v32, %v1773_v30  ;;  %v1776_v14 = vpop.f32.mrb[42].mxu0  ;;  %vm1075_vm4 = vcmp.ge.f32.partialorder %v1005_v28, 0.0  ;;  %v1143_v3 = vsel %vm1074_vm3, %v1002_v35, %v1111_v13 }
 0x14c   : > { %v1777_v40 = vpop.f32.mrb[43].mxu0 }
 0x14d   : > { %v1778_v41 = vadd.f32 %v1777_v40, %v1776_v14  ;;  %v849_v42 = vadd.f32 %v1775_v37, %v2235_v18  ;;  %v1144_v43 = vsel %vm1075_vm4, %v1005_v28, %v1112_v36 }
 0x14e   : > { %v1166_v19 = vpack.c.bf16 %v1144_v43, %v1143_v3 }
 0x14f   : > { %v1010_v44 = vadd.f32 %v2287_v31, %v849_v42  ;;  %v852_v52 = vadd.f32 %v1778_v41, %v2235_v18 }
 0x150   : > { %1920 = vmatmul.mubr.bf16.gmra.mrb[48].mxu1 %v1166_v19 }
 0x151   : > { %v1113_v9 = vmul.f32 %v2243_v26, %v1010_v44  ;;  %v1013_v45 = vadd.f32 %v2292_v38, %v852_v52  ;;  %v1779_v46 = vpop.f32.mrb[44].mxu0  ;;  %vm1076_vm5 = vcmp.ge.f32.partialorder %v1010_v44, 0.0 }
 0x152   : > { %v1780_v49 = vpop.f32.mrb[45].mxu0 }
 0x153   : > { %vm1077_vm6 = vcmp.ge.f32.partialorder %v1013_v45, 0.0  ;;  %v1114_v50 = vmul.f32 %v2243_v26, %v1013_v45  ;;  %v1781_v58 = vadd.f32 %v1780_v49, %v1779_v46  ;;  %v1782_v51 = vpop.f32.mrb[46].mxu0  ;;  %v1145_v31 = vsel %vm1076_vm5, %v1010_v44, %v1113_v9 }
 0x154   : > { %v1783_v55 = vpop.f32.mrb[47].mxu0 }
 0x155   : > { %v857_v57 = vadd.f32 %v1781_v58, %v2235_v18  ;;  %v1784_v33 = vadd.f32 %v1783_v55, %v1782_v51  ;;  %v1146_v59 = vsel %vm1077_vm6, %v1013_v45, %v1114_v50 }
 0x156   : > { %v1167_v61 = vpack.c.bf16 %v1146_v59, %v1145_v31 }
 0x157   : > { %v1018_v62 = vadd.f32 %v2283_v25, %v857_v57  ;;  %v860_v63 = vadd.f32 %v1784_v33, %v2235_v18 }
 0x158   : > { %1923 = vmatprep.mubr.bf16.mxu1 %v1167_v61 }
 0x159   : > { %v1115_v38 = vmul.f32 %v2243_v26, %v1018_v62  ;;  %v1021_v0 = vadd.f32 %v2289_v34, %v860_v63  ;;  %v1785_v48 = vpop.f32.mrb[48].mxu0  ;;  %vm1078_vm7 = vcmp.ge.f32.partialorder %v1018_v62, 0.0 }
 0x15a   : > { %v1786_v39 = vpop.f32.mrb[49].mxu0 }
 0x15b   : > { %v1116_v1 = vmul.f32 %v2243_v26, %v1021_v0  ;;  %v1787_v2 = vadd.f32 %v1786_v39, %v1785_v48  ;;  %v1788_v4 = vpop.f32.mrb[50].mxu0  ;;  %vm1079_vm8 = vcmp.ge.f32.partialorder %v1021_v0, 0.0  ;;  %v1147_v25 = vsel %vm1078_vm7, %v1018_v62, %v1115_v38 }
 0x15c   : > { %v1789_v54 = vpop.f32.mrb[51].mxu0 }
 0x15d   : > { %v1790_v6 = vadd.f32 %v1789_v54, %v1788_v4  ;;  %v865_v8 = vadd.f32 %v1787_v2, %v2235_v18  ;;  %v1148_v10 = vsel %vm1079_vm8, %v1021_v0, %v1116_v1  ;;  %v2385_v4 = vld [vmem:[%s2501_s4] ss:$0 sm:$0xff] }
 0x15e   : > { %v1168_v12 = vpack.c.bf16 %v1148_v10, %v1147_v25 }
 0x15f   : > { %v1026_v16 = vadd.f32 %v2301_v53, %v865_v8  ;;  %v868_v17 = vadd.f32 %v1790_v6, %v2235_v18 }
 0x160   : > { %1924 = vmatmul.mubr.bf16.gmra.mrb[52].mxu1 %v1168_v12 }
 0x161   : > { %v1117_v34 = vmul.f32 %v2243_v26, %v1026_v16  ;;  %v1029_v29 = vadd.f32 %v2306_v60, %v868_v17  ;;  %v1791_v21 = vpop.f32.mrb[52].mxu0  ;;  %vm1080_vm9 = vcmp.ge.f32.partialorder %v1026_v16, 0.0 }
 0x162   : > { %v1792_v22 = vpop.f32.mrb[53].mxu0 }
 0x163   : > { %vm1081_vm10 = vcmp.ge.f32.partialorder %v1029_v29, 0.0  ;;  %v1118_v7 = vmul.f32 %v2243_v26, %v1029_v29  ;;  %v1793_v23 = vadd.f32 %v1792_v22, %v1791_v21  ;;  %v1794_v24 = vpop.f32.mrb[54].mxu0  ;;  %v1149_v53 = vsel %vm1080_vm9, %v1026_v16, %v1117_v34 }
 0x164   : > { %v1795_v35 = vpop.f32.mrb[55].mxu0 }
 0x165   : > { %v873_v27 = vadd.f32 %v1793_v23, %v2235_v18  ;;  %v1796_v13 = vadd.f32 %v1795_v35, %v1794_v24  ;;  %v1150_v28 = vsel %vm1081_vm10, %v1029_v29, %v1118_v7 }
 0x166   : > { %v1169_v30 = vpack.c.bf16 %v1150_v28, %v1149_v53 }
 0x167   : > { %v1034_v32 = vadd.f32 %v2297_v47, %v873_v27  ;;  %v876_v36 = vadd.f32 %v1796_v13, %v2235_v18 }
 0x168   : > { %1927 = vmatprep.mubr.bf16.mxu1 %v1169_v30 }
 0x169   : > { %v1119_v60 = vmul.f32 %v2243_v26, %v1034_v32  ;;  %v1037_v37 = vadd.f32 %v2303_v56, %v876_v36  ;;  %v1797_v14 = vpop.f32.mrb[56].mxu0  ;;  %vm1082_vm11 = vcmp.ge.f32.partialorder %v1034_v32, 0.0 }
 0x16a   : > { %v1798_v40 = vpop.f32.mrb[57].mxu0 }
 0x16b   : > { %v1120_v41 = vmul.f32 %v2243_v26, %v1037_v37  ;;  %v1799_v42 = vadd.f32 %v1798_v40, %v1797_v14  ;;  %v1800_v3 = vpop.f32.mrb[58].mxu0  ;;  %vm1083_vm12 = vcmp.ge.f32.partialorder %v1037_v37, 0.0  ;;  %v1151_v47 = vsel %vm1082_vm11, %v1034_v32, %v1119_v60 }
 0x16c   : > { %v1801_v43 = vpop.f32.mrb[59].mxu0 }
 0x16d   : > { %v1802_v19 = vadd.f32 %v1801_v43, %v1800_v3  ;;  %v881_v44 = vadd.f32 %v1799_v42, %v2235_v18  ;;  %v1152_v52 = vsel %vm1083_vm12, %v1037_v37, %v1120_v41 }
 0x16e   : > { %v1170_v9 = vpack.c.bf16 %v1152_v52, %v1151_v47 }
 0x16f   : > { %v1042_v45 = vadd.f32 %v2315_v11, %v881_v44  ;;  %v884_v46 = vadd.f32 %v1802_v19, %v2235_v18 }
 0x170   : > { %1928 = vmatmul.mubr.bf16.gmra.mrb[56].mxu1 %v1170_v9 }
 0x171   : > { %v1121_v56 = vmul.f32 %v2243_v26, %v1042_v45  ;;  %v1045_v49 = vadd.f32 %v2320_v20, %v884_v46  ;;  %v1803_v50 = vpop.f32.mrb[60].mxu0  ;;  %vm1084_vm13 = vcmp.ge.f32.partialorder %v1042_v45, 0.0 }
 0x172   : > { %v1804_v58 = vpop.f32.mrb[61].mxu0 }
 0x173   : > { %vm1085_vm14 = vcmp.ge.f32.partialorder %v1045_v49, 0.0  ;;  %v1122_v51 = vmul.f32 %v2243_v26, %v1045_v49  ;;  %v1805_v55 = vadd.f32 %v1804_v58, %v1803_v50  ;;  %v1806_v57 = vpop.f32.mrb[62].mxu0  ;;  %v1153_v11 = vsel %vm1084_vm13, %v1042_v45, %v1121_v56 }
 0x174   : > { %v1807_v33 = vpop.f32.mrb[63].mxu0 }
 0x175   : > { %v889_v31 = vadd.f32 %v1805_v55, %v2235_v18  ;;  %v1808_v59 = vadd.f32 %v1807_v33, %v1806_v57  ;;  %v1154_v61 = vsel %vm1085_vm14, %v1045_v49, %v1122_v51 }
 0x176   : > { %v1171_v62 = vpack.c.bf16 %v1154_v61, %v1153_v11 }
 0x177   : > { %v1050_v63 = vadd.f32 %v2311_v5, %v889_v31  ;;  %v892_v20 = vadd.f32 %v1808_v59, %v2235_v18  ;;  %v2391_v5 = vld [vmem:[%s2501_s4 + $0x1] ss:$0 sm:$0xff] }
 0x178   : > { %1931 = vmatprep.mubr.bf16.mxu1 %v1171_v62 }
 0x179   : > { %v1123_v38 = vmul.f32 %v2243_v26, %v1050_v63  ;;  %v1053_v0 = vadd.f32 %v2317_v15, %v892_v20  ;;  %vm1086_vm15 = vcmp.ge.f32.partialorder %v1050_v63, 0.0 }
 0x17b   : > { %v1124_v48 = vmul.f32 %v2243_v26, %v1053_v0  ;;  %vm1087_vm0 = vcmp.ge.f32.partialorder %v1053_v0, 0.0  ;;  %v1155_v39 = vsel %vm1086_vm15, %v1050_v63, %v1123_v38 }
 0x17d   : > { %v1156_v1 = vsel %vm1087_vm0, %v1053_v0, %v1124_v48 }
 0x17e   : > { %v1172_v2 = vpack.c.bf16 %v1156_v1, %v1155_v39 }
 0x180   : > { %1932 = vmatmul.mubr.bf16.gmra.mrb[60].mxu1 %v1172_v2 }
 0x1e3   : > { %v1905_v18 = vpop.f32.mrb[32].mxu1 }
 0x1e4   : > { %v1285_v15 = vadd.f32 %v1905_v18, %v2385_v4  ;;  %v1276_v26 = vpop.f32.mrb[33].mxu1 }
 0x1e5   : > { %v1277_v54 = vadd.f32 %v2385_v4, %v1276_v26  ;;  %v1906_v6 = vpop.f32.mrb[34].mxu1 }
 0x1e6   : > { %vm1405_vm1 = vcmp.ge.f32.partialorder %v1285_v15, 0.0  ;;  %v1442_v8 = vmul.f32 %v2391_v5, %v1285_v15  ;;  %v1288_v25 = vadd.f32 %v1906_v6, %v2385_v4  ;;  %v1279_v10 = vpop.f32.mrb[35].mxu1 }
 0x1e7   : > { %vm1403_vm2 = vcmp.ge.f32.partialorder %v1277_v54, 0.0  ;;  %v1440_v12 = vmul.f32 %v2391_v5, %v1277_v54  ;;  %v1280_v16 = vadd.f32 %v2385_v4, %v1279_v10 }
 0x1e8   : > { %v1474_v17 = vsel %vm1405_vm1, %v1285_v15, %v1442_v8  ;;  %vm1406_vm3 = vcmp.ge.f32.partialorder %v1288_v25, 0.0  ;;  %v1443_v34 = vmul.f32 %v2391_v5, %v1288_v25 }
 0x1e9   : > { %1506 = vst [vmem:[%s2398_s17 + $0x10] sm:$0xff] %v1474_v17  ;;  %v1472_v29 = vsel %vm1403_vm2, %v1277_v54, %v1440_v12  ;;  %vm1404_vm4 = vcmp.ge.f32.partialorder %v1280_v16, 0.0  ;;  %v1441_v21 = vmul.f32 %v2391_v5, %v1280_v16 }
 0x1ea   : > { %1504 = vst [vmem:[%s2398_s17] sm:$0xff] %v1472_v29  ;;  %v1475_v22 = vsel %vm1406_vm3, %v1288_v25, %v1443_v34 }
 0x1eb   : > { %1507 = vst [vmem:[%s2398_s17 + $0x18] sm:$0xff] %v1475_v22  ;;  %v1473_v7 = vsel %vm1404_vm4, %v1280_v16, %v1441_v21 }
 0x1ec   : > { %1505 = vst [vmem:[%s2398_s17 + $0x8] sm:$0xff] %v1473_v7 }
 0x1f3   : > { %v1909_v23 = vpop.f32.mrb[36].mxu1 }
 0x1f4   : > { %v1301_v24 = vadd.f32 %v1909_v23, %v2385_v4  ;;  %v1292_v35 = vpop.f32.mrb[37].mxu1 }
 0x1f5   : > { %v1293_v27 = vadd.f32 %v2385_v4, %v1292_v35  ;;  %v1910_v13 = vpop.f32.mrb[38].mxu1 }
 0x1f6   : > { %vm1409_vm5 = vcmp.ge.f32.partialorder %v1301_v24, 0.0  ;;  %v1446_v53 = vmul.f32 %v2391_v5, %v1301_v24  ;;  %v1304_v28 = vadd.f32 %v1910_v13, %v2385_v4  ;;  %v1295_v30 = vpop.f32.mrb[39].mxu1 }
 0x1f7   : > { %vm1407_vm6 = vcmp.ge.f32.partialorder %v1293_v27, 0.0  ;;  %v1444_v32 = vmul.f32 %v2391_v5, %v1293_v27  ;;  %v1296_v36 = vadd.f32 %v2385_v4, %v1295_v30 }
 0x1f8   : > { %v1478_v60 = vsel %vm1409_vm5, %v1301_v24, %v1446_v53  ;;  %vm1410_vm7 = vcmp.ge.f32.partialorder %v1304_v28, 0.0  ;;  %v1447_v37 = vmul.f32 %v2391_v5, %v1304_v28 }
 0x1f9   : > { %1510 = vst [vmem:[%s2398_s17 + $0x30] sm:$0xff] %v1478_v60  ;;  %v1476_v14 = vsel %vm1407_vm6, %v1293_v27, %v1444_v32  ;;  %vm1408_vm8 = vcmp.ge.f32.partialorder %v1296_v36, 0.0  ;;  %v1445_v40 = vmul.f32 %v2391_v5, %v1296_v36 }
 0x1fa   : > { %1508 = vst [vmem:[%s2398_s17 + $0x20] sm:$0xff] %v1476_v14  ;;  %v1479_v41 = vsel %vm1410_vm7, %v1304_v28, %v1447_v37 }
 0x1fb   : > { %1511 = vst [vmem:[%s2398_s17 + $0x38] sm:$0xff] %v1479_v41  ;;  %v1477_v42 = vsel %vm1408_vm8, %v1296_v36, %v1445_v40 }
 0x1fc   : > { %1509 = vst [vmem:[%s2398_s17 + $0x28] sm:$0xff] %v1477_v42 }
 0x203   : > { %v1913_v3 = vpop.f32.mrb[40].mxu1 }
 0x204   : > { %v1317_v43 = vadd.f32 %v1913_v3, %v2385_v4  ;;  %v1308_v19 = vpop.f32.mrb[41].mxu1 }
 0x205   : > { %v1309_v44 = vadd.f32 %v2385_v4, %v1308_v19  ;;  %v1914_v47 = vpop.f32.mrb[42].mxu1 }
 0x206   : > { %vm1413_vm9 = vcmp.ge.f32.partialorder %v1317_v43, 0.0  ;;  %v1450_v52 = vmul.f32 %v2391_v5, %v1317_v43  ;;  %v1320_v9 = vadd.f32 %v1914_v47, %v2385_v4  ;;  %v1311_v45 = vpop.f32.mrb[43].mxu1 }
 0x207   : > { %vm1411_vm10 = vcmp.ge.f32.partialorder %v1309_v44, 0.0  ;;  %v1448_v46 = vmul.f32 %v2391_v5, %v1309_v44  ;;  %v1312_v56 = vadd.f32 %v2385_v4, %v1311_v45 }
 0x208   : > { %v1482_v49 = vsel %vm1413_vm9, %v1317_v43, %v1450_v52  ;;  %vm1414_vm11 = vcmp.ge.f32.partialorder %v1320_v9, 0.0  ;;  %v1451_v50 = vmul.f32 %v2391_v5, %v1320_v9 }
 0x209   : > { %1514 = vst [vmem:[%s2398_s17 + $0x50] sm:$0xff] %v1482_v49  ;;  %v1480_v58 = vsel %vm1411_vm10, %v1309_v44, %v1448_v46  ;;  %vm1412_vm12 = vcmp.ge.f32.partialorder %v1312_v56, 0.0  ;;  %v1449_v51 = vmul.f32 %v2391_v5, %v1312_v56 }
 0x20a   : > { %1512 = vst [vmem:[%s2398_s17 + $0x40] sm:$0xff] %v1480_v58  ;;  %v1483_v55 = vsel %vm1414_vm11, %v1320_v9, %v1451_v50 }
 0x20b   : > { %1515 = vst [vmem:[%s2398_s17 + $0x58] sm:$0xff] %v1483_v55  ;;  %v1481_v57 = vsel %vm1412_vm12, %v1312_v56, %v1449_v51 }
 0x20c   : > { %1513 = vst [vmem:[%s2398_s17 + $0x48] sm:$0xff] %v1481_v57 }
 0x213   : > { %v1917_v33 = vpop.f32.mrb[44].mxu1 }
 0x214   : > { %v1333_v31 = vadd.f32 %v1917_v33, %v2385_v4  ;;  %v1324_v59 = vpop.f32.mrb[45].mxu1 }
 0x215   : > { %v1325_v11 = vadd.f32 %v2385_v4, %v1324_v59  ;;  %v1918_v61 = vpop.f32.mrb[46].mxu1 }
 0x216   : > { %vm1417_vm13 = vcmp.ge.f32.partialorder %v1333_v31, 0.0  ;;  %v1454_v62 = vmul.f32 %v2391_v5, %v1333_v31  ;;  %v1336_v63 = vadd.f32 %v1918_v61, %v2385_v4  ;;  %v1327_v20 = vpop.f32.mrb[47].mxu1 }
 0x217   : > { %vm1415_vm14 = vcmp.ge.f32.partialorder %v1325_v11, 0.0  ;;  %v1452_v38 = vmul.f32 %v2391_v5, %v1325_v11  ;;  %v1328_v0 = vadd.f32 %v2385_v4, %v1327_v20 }
 0x218   : > { %v1486_v48 = vsel %vm1417_vm13, %v1333_v31, %v1454_v62  ;;  %vm1418_vm15 = vcmp.ge.f32.partialorder %v1336_v63, 0.0  ;;  %v1455_v39 = vmul.f32 %v2391_v5, %v1336_v63 }
 0x219   : > { %1518 = vst [vmem:[%s2398_s17 + $0x70] sm:$0xff] %v1486_v48  ;;  %v1484_v1 = vsel %vm1415_vm14, %v1325_v11, %v1452_v38  ;;  %vm1416_vm0 = vcmp.ge.f32.partialorder %v1328_v0, 0.0  ;;  %v1453_v2 = vmul.f32 %v2391_v5, %v1328_v0 }
 0x21a   : > { %1516 = vst [vmem:[%s2398_s17 + $0x60] sm:$0xff] %v1484_v1  ;;  %v1487_v18 = vsel %vm1418_vm15, %v1336_v63, %v1455_v39 }
 0x21b   : > { %1519 = vst [vmem:[%s2398_s17 + $0x78] sm:$0xff] %v1487_v18  ;;  %v1485_v15 = vsel %vm1416_vm0, %v1328_v0, %v1453_v2 }
 0x21c   : > { %1517 = vst [vmem:[%s2398_s17 + $0x68] sm:$0xff] %v1485_v15 }
 0x223   : > { %v1921_v26 = vpop.f32.mrb[48].mxu1 }
 0x224   : > { %v1349_v54 = vadd.f32 %v1921_v26, %v2385_v4  ;;  %v1340_v6 = vpop.f32.mrb[49].mxu1 }
 0x225   : > { %v1341_v8 = vadd.f32 %v2385_v4, %v1340_v6  ;;  %v1922_v25 = vpop.f32.mrb[50].mxu1 }
 0x226   : > { %vm1421_vm1 = vcmp.ge.f32.partialorder %v1349_v54, 0.0  ;;  %v1458_v10 = vmul.f32 %v2391_v5, %v1349_v54  ;;  %v1352_v12 = vadd.f32 %v1922_v25, %v2385_v4  ;;  %v1343_v16 = vpop.f32.mrb[51].mxu1 }
 0x227   : > { %vm1419_vm2 = vcmp.ge.f32.partialorder %v1341_v8, 0.0  ;;  %v1456_v17 = vmul.f32 %v2391_v5, %v1341_v8  ;;  %v1344_v34 = vadd.f32 %v2385_v4, %v1343_v16 }
 0x228   : > { %v1490_v29 = vsel %vm1421_vm1, %v1349_v54, %v1458_v10  ;;  %vm1422_vm3 = vcmp.ge.f32.partialorder %v1352_v12, 0.0  ;;  %v1459_v21 = vmul.f32 %v2391_v5, %v1352_v12 }
 0x229   : > { %1522 = vst [vmem:[%s2398_s17 + $0x90] sm:$0xff] %v1490_v29  ;;  %v1488_v22 = vsel %vm1419_vm2, %v1341_v8, %v1456_v17  ;;  %vm1420_vm4 = vcmp.ge.f32.partialorder %v1344_v34, 0.0  ;;  %v1457_v7 = vmul.f32 %v2391_v5, %v1344_v34 }
 0x22a   : > { %1520 = vst [vmem:[%s2398_s17 + $0x80] sm:$0xff] %v1488_v22  ;;  %v1491_v23 = vsel %vm1422_vm3, %v1352_v12, %v1459_v21 }
 0x22b   : > { %1523 = vst [vmem:[%s2398_s17 + $0x98] sm:$0xff] %v1491_v23  ;;  %v1489_v24 = vsel %vm1420_vm4, %v1344_v34, %v1457_v7 }
 0x22c   : > { %1521 = vst [vmem:[%s2398_s17 + $0x88] sm:$0xff] %v1489_v24 }
 0x233   : > { %v1925_v35 = vpop.f32.mrb[52].mxu1 }
 0x234   : > { %v1365_v27 = vadd.f32 %v1925_v35, %v2385_v4  ;;  %v1356_v13 = vpop.f32.mrb[53].mxu1 }
 0x235   : > { %v1357_v53 = vadd.f32 %v2385_v4, %v1356_v13  ;;  %v1926_v28 = vpop.f32.mrb[54].mxu1 }
 0x236   : > { %vm1425_vm5 = vcmp.ge.f32.partialorder %v1365_v27, 0.0  ;;  %v1462_v30 = vmul.f32 %v2391_v5, %v1365_v27  ;;  %v1368_v32 = vadd.f32 %v1926_v28, %v2385_v4  ;;  %v1359_v36 = vpop.f32.mrb[55].mxu1 }
 0x237   : > { %vm1423_vm6 = vcmp.ge.f32.partialorder %v1357_v53, 0.0  ;;  %v1460_v60 = vmul.f32 %v2391_v5, %v1357_v53  ;;  %v1360_v37 = vadd.f32 %v2385_v4, %v1359_v36 }
 0x238   : > { %v1494_v14 = vsel %vm1425_vm5, %v1365_v27, %v1462_v30  ;;  %vm1426_vm7 = vcmp.ge.f32.partialorder %v1368_v32, 0.0  ;;  %v1463_v40 = vmul.f32 %v2391_v5, %v1368_v32 }
 0x239   : > { %1526 = vst [vmem:[%s2398_s17 + $0xb0] sm:$0xff] %v1494_v14  ;;  %v1492_v41 = vsel %vm1423_vm6, %v1357_v53, %v1460_v60  ;;  %vm1424_vm8 = vcmp.ge.f32.partialorder %v1360_v37, 0.0  ;;  %v1461_v42 = vmul.f32 %v2391_v5, %v1360_v37 }
 0x23a   : > { %1524 = vst [vmem:[%s2398_s17 + $0xa0] sm:$0xff] %v1492_v41  ;;  %v1495_v3 = vsel %vm1426_vm7, %v1368_v32, %v1463_v40 }
 0x23b   : > { %1527 = vst [vmem:[%s2398_s17 + $0xb8] sm:$0xff] %v1495_v3  ;;  %v1493_v43 = vsel %vm1424_vm8, %v1360_v37, %v1461_v42 }
 0x23c   : > { %1525 = vst [vmem:[%s2398_s17 + $0xa8] sm:$0xff] %v1493_v43 }
 0x243   : > { %v1929_v19 = vpop.f32.mrb[56].mxu1 }
 0x244   : > { %v1381_v44 = vadd.f32 %v1929_v19, %v2385_v4  ;;  %v1372_v47 = vpop.f32.mrb[57].mxu1 }
 0x245   : > { %v1373_v52 = vadd.f32 %v2385_v4, %v1372_v47  ;;  %v1930_v9 = vpop.f32.mrb[58].mxu1 }
 0x246   : > { %vm1429_vm9 = vcmp.ge.f32.partialorder %v1381_v44, 0.0  ;;  %v1466_v45 = vmul.f32 %v2391_v5, %v1381_v44  ;;  %v1384_v46 = vadd.f32 %v1930_v9, %v2385_v4  ;;  %v1375_v56 = vpop.f32.mrb[59].mxu1 }
 0x247   : > { %vm1427_vm10 = vcmp.ge.f32.partialorder %v1373_v52, 0.0  ;;  %v1464_v49 = vmul.f32 %v2391_v5, %v1373_v52  ;;  %v1376_v50 = vadd.f32 %v2385_v4, %v1375_v56 }
 0x248   : > { %v1498_v58 = vsel %vm1429_vm9, %v1381_v44, %v1466_v45  ;;  %vm1430_vm11 = vcmp.ge.f32.partialorder %v1384_v46, 0.0  ;;  %v1467_v51 = vmul.f32 %v2391_v5, %v1384_v46 }
 0x249   : > { %1530 = vst [vmem:[%s2398_s17 + $0xd0] sm:$0xff] %v1498_v58  ;;  %v1496_v55 = vsel %vm1427_vm10, %v1373_v52, %v1464_v49  ;;  %vm1428_vm12 = vcmp.ge.f32.partialorder %v1376_v50, 0.0  ;;  %v1465_v57 = vmul.f32 %v2391_v5, %v1376_v50 }
 0x24a   : > { %1528 = vst [vmem:[%s2398_s17 + $0xc0] sm:$0xff] %v1496_v55  ;;  %v1499_v33 = vsel %vm1430_vm11, %v1384_v46, %v1467_v51 }
 0x24b   : > { %1531 = vst [vmem:[%s2398_s17 + $0xd8] sm:$0xff] %v1499_v33  ;;  %v1497_v31 = vsel %vm1428_vm12, %v1376_v50, %v1465_v57 }
 0x24c   : > { %1529 = vst [vmem:[%s2398_s17 + $0xc8] sm:$0xff] %v1497_v31 }
 0x253   : > { %v1933_v59 = vpop.f32.mrb[60].mxu1 }
 0x254   : > { %v1397_v11 = vadd.f32 %v1933_v59, %v2385_v4  ;;  %v1388_v61 = vpop.f32.mrb[61].mxu1 }
 0x255   : > { %v1389_v62 = vadd.f32 %v2385_v4, %v1388_v61  ;;  %v1934_v63 = vpop.f32.mrb[62].mxu1 }
 0x256   : > { %vm1433_vm13 = vcmp.ge.f32.partialorder %v1397_v11, 0.0  ;;  %v1470_v20 = vmul.f32 %v2391_v5, %v1397_v11  ;;  %v1400_v38 = vadd.f32 %v1934_v63, %v2385_v4  ;;  %v1391_v0 = vpop.f32.mrb[63].mxu1 }
 0x257   : > { %vm1431_vm14 = vcmp.ge.f32.partialorder %v1389_v62, 0.0  ;;  %v1468_v48 = vmul.f32 %v2391_v5, %v1389_v62  ;;  %v1392_v39 = vadd.f32 %v2385_v4, %v1391_v0 }
 0x258   : > { %v1502_v1 = vsel %vm1433_vm13, %v1397_v11, %v1470_v20  ;;  %vm1434_vm15 = vcmp.ge.f32.partialorder %v1400_v38, 0.0  ;;  %v1471_v2 = vmul.f32 %v2391_v5, %v1400_v38 }
 0x259   : > { %1534 = vst [vmem:[%s2398_s17 + $0xf0] sm:$0xff] %v1502_v1  ;;  %v1500_v18 = vsel %vm1431_vm14, %v1389_v62, %v1468_v48  ;;  %vm1432_vm0 = vcmp.ge.f32.partialorder %v1392_v39, 0.0  ;;  %v1469_v15 = vmul.f32 %v2391_v5, %v1392_v39 }
 0x25a   : > { %1532 = vst [vmem:[%s2398_s17 + $0xe0] sm:$0xff] %v1500_v18  ;;  %v1503_v26 = vsel %vm1434_vm15, %v1400_v38, %v1471_v2 }
 0x25b   : > { %1535 = vst [vmem:[%s2398_s17 + $0xf8] sm:$0xff] %v1503_v26  ;;  %v1501_v54 = vsel %vm1432_vm0, %v1392_v39, %v1469_v15 }
 0x25c   : > { %1533 = vst [vmem:[%s2398_s17 + $0xe8] sm:$0xff] %v1501_v54 }
 0x25d PF: > { %s15_s18 = sadd.s32 1, %s2040_s18  }
 0x25e   : > { %p12_p4 = scmp.ge.s32.totalorder %s15_s18, 4  }
 0x260   :  { %14 = sbr.rel (!%p12_p4) target bundleno = 1 (0x1), region = 70 }

</bundles_post_ra>
